<compile_context>
chip_gen: v6e
topology: v6e:2x2x1
jax: 0.10.0
libtpu: 0.0.40
codegen_flags: <defaults>
</compile_context>

<pallas_src>
import functools
import math

import jax
import jax.numpy as jnp
from jax import lax
from jax.experimental import pallas as pl
from jax.experimental.pallas import tpu as pltpu

_LN_EPS = 1e-5            # nn.LayerNorm default eps
_INV_SQRT2 = 0.7071067811865476


def _erf(x):
    # Abramowitz & Stegun 7.1.26 rational approximation (max abs err ~1.5e-7).
    # The divide goes through the EUP approximate reciprocal (free-ish slot).
    a1, a2, a3, a4, a5 = (0.254829592, -0.284496736, 1.421413741,
                          -1.453152027, 1.061405429)
    p = 0.3275911
    sgn = jnp.where(x >= 0.0, 1.0, -1.0)
    ax = jnp.abs(x)
    t = pl.reciprocal(1.0 + p * ax, approx=True)
    poly = ((((a5 * t + a4) * t + a3) * t + a2) * t + a1) * t
    return sgn * (1.0 - poly * jnp.exp(-ax * ax))


def _gelu_exact(x):
    # nn.GELU() default is the exact erf form.
    return 0.5 * x * (1.0 + _erf(x * _INV_SQRT2))


def _layer_norm(x, gamma, beta):
    mu = jnp.mean(x, axis=-1, keepdims=True)
    var = jnp.mean((x - mu) ** 2, axis=-1, keepdims=True)
    return (x - mu) * lax.rsqrt(var + _LN_EPS) * gamma + beta


def _encoder_layer_kernel(head_size, att_size,
                          x_ref, bias_ref,
                          ln1_g_ref, ln1_b_ref,
                          wqkv_ref, bqkv_ref, wo_ref, bo_ref,
                          ln2_g_ref, ln2_b_ref,
                          w1_ref, b1_ref, w2_ref, b2_ref,
                          out_ref):
    bf16 = jnp.bfloat16
    f32 = jnp.float32
    hdim = head_size * att_size

    x = x_ref[0]                                        # (S, H) f32

    # ---- self-attention block (pre-LN) ----
    y = _layer_norm(x, ln1_g_ref[...], ln1_b_ref[...])
    # Fused Q|K|V projection: bf16 operands, f32 MXU accumulation.
    qkv = jnp.dot(y.astype(bf16), wqkv_ref[...],
                  preferred_element_type=f32) + bqkv_ref[...]
    q = qkv[:, :hdim]            # 1/sqrt(dk) already folded into Wq/bq on host
    k = qkv[:, hdim:2 * hdim]
    v = qkv[:, 2 * hdim:]

    heads = []
    for h in range(head_size):                          # static, lane-aligned slices
        sl = slice(h * att_size, (h + 1) * att_size)
        sc = lax.dot_general(q[:, sl].astype(bf16), k[:, sl].astype(bf16),
                             (((1,), (1,)), ((), ())),
                             preferred_element_type=f32)           # (S, S)
        sc = sc + bias_ref[0, h]
        sc = sc - jnp.max(sc, axis=-1, keepdims=True)
        e = jnp.exp(sc)
        p = e * pl.reciprocal(jnp.sum(e, axis=-1, keepdims=True), approx=True)
        heads.append(jnp.dot(p.astype(bf16), v[:, sl].astype(bf16),
                             preferred_element_type=f32))
    attn_in = jnp.concatenate(heads, axis=1)            # stays in vregs, no scratch
    attn = jnp.dot(attn_in.astype(bf16), wo_ref[...],
                   preferred_element_type=f32) + bo_ref[...]
    x1 = x + attn                                       # residual (dropout = identity)

    # ---- feed-forward block (pre-LN) ----
    y2 = _layer_norm(x1, ln2_g_ref[...], ln2_b_ref[...])
    h1 = _gelu_exact(jnp.dot(y2.astype(bf16), w1_ref[...],
                             preferred_element_type=f32) + b1_ref[...])
    ffn = jnp.dot(h1.astype(bf16), w2_ref[...],
                  preferred_element_type=f32) + b2_ref[...]
    out_ref[0] = x1 + ffn                               # residual (dropout = identity)


def encoder_layer(x, attn_bias, params, *, head_size):
    """Pallas implementation of EncoderLayer.forward (inference)."""
    b, s, hdim = x.shape
    assert hdim % head_size == 0
    att_size = hdim // head_size
    ffn_size = params["w1"].shape[1]
    scale = att_size ** (-0.5)

    # One-time per-call packing (tiny host/XLA ops): fold the attention scale
    # into Wq/bq, fuse Q|K|V into one projection, ship big weights as bf16.
    wqkv = jnp.concatenate(
        [params["wq"] * scale, params["wk"], params["wv"]], axis=1
    ).astype(jnp.bfloat16)
    bqkv = jnp.concatenate(
        [params["bq"] * scale, params["bk"], params["bv"]], axis=1)
    wo = params["wo"].astype(jnp.bfloat16)
    w1 = params["w1"].astype(jnp.bfloat16)
    w2 = params["w2"].astype(jnp.bfloat16)

    def full(shape):
        nd = len(shape)
        return pl.BlockSpec(shape, lambda i: (0,) * nd)   # whole-array resident block

    in_specs = [
        pl.BlockSpec((1, s, hdim), lambda i: (i, 0, 0)),              # x
        pl.BlockSpec((1, head_size, s, s), lambda i: (i, 0, 0, 0)),   # attn_bias
        full((1, hdim)), full((1, hdim)),                             # LN1 gamma/beta
        full((hdim, 3 * hdim)), full((1, 3 * hdim)),                  # Wqkv, bqkv
        full((hdim, hdim)), full((1, hdim)),                          # Wo, bo
        full((1, hdim)), full((1, hdim)),                             # LN2 gamma/beta
        full((hdim, ffn_size)), full((1, ffn_size)),                  # W1, b1
        full((ffn_size, hdim)), full((1, hdim)),                      # W2, b2
    ]
    out_spec = pl.BlockSpec((1, s, hdim), lambda i: (i, 0, 0))

    kernel = functools.partial(_encoder_layer_kernel, head_size, att_size)
    return pl.pallas_call(
        kernel,
        out_shape=jax.ShapeDtypeStruct((b, s, hdim), jnp.float32),
        grid_spec=pltpu.PrefetchScalarGridSpec(
            num_scalar_prefetch=0,
            grid=(b,),
            in_specs=in_specs,
            out_specs=out_spec,
        ),
        compiler_params=pltpu.CompilerParams(
            dimension_semantics=("parallel",)),
    )(x, attn_bias,
      params["ln1_g"], params["ln1_b"],
      wqkv, bqkv, wo, params["bo"],
      params["ln2_g"], params["ln2_b"],
      w1, params["b1"], w2, params["b2"])


def encoder_layer_ref(x, attn_bias, params, *, head_size,
                      operand_dtype=jnp.float32):
    """Pure-JAX reference of PyTorch EncoderLayer.forward (eval mode).

    operand_dtype=float32  -> true f32 reference (HIGHEST precision dots).
    operand_dtype=bfloat16 -> matmul-precision-matched reference (bf16 operands,
                              f32 accumulation, same scheme as the kernel).
    """
    b, s, hdim = x.shape
    dk = hdim // head_size
    d = operand_dtype
    scale = dk ** (-0.5)
    mm = functools.partial(jnp.einsum, precision=lax.Precision.HIGHEST,
                           preferred_element_type=jnp.float32)

    def ln(z, g, bb):
        mu = jnp.mean(z, -1, keepdims=True)
        var = jnp.mean((z - mu) ** 2, -1, keepdims=True)
        return (z - mu) * lax.rsqrt(var + _LN_EPS) * g + bb

    y = ln(x, params["ln1_g"], params["ln1_b"])
    q = mm("bsh,hk->bsk", y.astype(d), (params["wq"] * scale).astype(d)) \
        + params["bq"] * scale
    k = mm("bsh,hk->bsk", y.astype(d), params["wk"].astype(d)) + params["bk"]
    v = mm("bsh,hk->bsk", y.astype(d), params["wv"].astype(d)) + params["bv"]

    def split(t):
        return t.reshape(b, s, head_size, dk).transpose(0, 2, 1, 3)

    qh, kh, vh = split(q), split(k), split(v)
    scores = mm("bhqd,bhkd->bhqk", qh.astype(d), kh.astype(d)) + attn_bias
    p = jax.nn.softmax(scores, axis=-1)
    o = mm("bhqk,bhkd->bhqd", p.astype(d), vh.astype(d))
    o = o.transpose(0, 2, 1, 3).reshape(b, s, hdim)
    attn = mm("bsh,hk->bsk", o.astype(d), params["wo"].astype(d)) + params["bo"]
    x1 = x + attn

    y2 = ln(x1, params["ln2_g"], params["ln2_b"])
    h1 = jax.nn.gelu(mm("bsh,hf->bsf", y2.astype(d), params["w1"].astype(d))
                     + params["b1"], approximate=False)
    ffn = mm("bsf,fh->bsh", h1.astype(d), params["w2"].astype(d)) + params["b2"]
    return x1 + ffn


if __name__ == "__main__":
    batch, seq = 2, 128
    hidden_size, ffn_size, head_size = 256, 512, 2

    keys = list(jax.random.split(jax.random.PRNGKey(0), 24))

    def nrm(shape, scale=1.0):
        return scale * jax.random.normal(keys.pop(), shape, dtype=jnp.float32)

    inv_h = 1.0 / math.sqrt(hidden_size)
    inv_f = 1.0 / math.sqrt(ffn_size)
    params = {
        "ln1_g": 1.0 + 0.1 * nrm((1, hidden_size)),
        "ln1_b": 0.1 * nrm((1, hidden_size)),
        "wq": nrm((hidden_size, hidden_size), inv_h),
        "bq": nrm((1, hidden_size), 0.02),
        "wk": nrm((hidden_size, hidden_size), inv_h),
        "bk": nrm((1, hidden_size), 0.02),
        "wv": nrm((hidden_size, hidden_size), inv_h),
        "bv": nrm((1, hidden_size), 0.02),
        "wo": nrm((hidden_size, hidden_size), inv_h),
        "bo": nrm((1, hidden_size), 0.02),
        "ln2_g": 1.0 + 0.1 * nrm((1, hidden_size)),
        "ln2_b": 0.1 * nrm((1, hidden_size)),
        "w1": nrm((hidden_size, ffn_size), inv_h),
        "b1": nrm((1, ffn_size), 0.02),
        "w2": nrm((ffn_size, hidden_size), inv_f),
        "b2": nrm((1, hidden_size), 0.02),
    }

    x = nrm((batch, seq, hidden_size))
    attn_bias = nrm((batch, head_size, seq, seq), 0.1)

    out = encoder_layer(x, attn_bias, params, head_size=head_size)
    out = jax.block_until_ready(out)

    # Precision-matched reference (bf16 operands / f32 accumulate, like kernel)
    ref_match = encoder_layer_ref(x, attn_bias, params, head_size=head_size,
                                  operand_dtype=jnp.bfloat16)
    # Full-precision f32 reference (sanity bound for the bf16-matmul scheme)
    ref_f32 = encoder_layer_ref(x, attn_bias, params, head_size=head_size,
                                operand_dtype=jnp.float32)

    err_match = float(jnp.max(jnp.abs(out - ref_match)))
    err_f32 = float(jnp.max(jnp.abs(out - ref_f32)))

    assert out.shape == x.shape
    assert err_match < 2e-2, f"mismatch vs bf16-matched reference: {err_match}"
    assert err_f32 < 1.5e-1, f"mismatch vs f32 reference: {err_f32}"
    print("KERNEL_OK")
</pallas_src>

<mosaic_0001>
module attributes {stable_mosaic.version = 11 : i64} {
  func.func @_encoder_layer_kernel(%arg0: i32, %arg1: memref<1x128x256xf32, #tpu.memory_space<vmem>>, %arg2: memref<1x2x128x128xf32, #tpu.memory_space<vmem>>, %arg3: memref<1x256xf32, #tpu.memory_space<vmem>>, %arg4: memref<1x256xf32, #tpu.memory_space<vmem>>, %arg5: memref<256x768xbf16, #tpu.memory_space<vmem>>, %arg6: memref<1x768xf32, #tpu.memory_space<vmem>>, %arg7: memref<256x256xbf16, #tpu.memory_space<vmem>>, %arg8: memref<1x256xf32, #tpu.memory_space<vmem>>, %arg9: memref<1x256xf32, #tpu.memory_space<vmem>>, %arg10: memref<1x256xf32, #tpu.memory_space<vmem>>, %arg11: memref<256x512xbf16, #tpu.memory_space<vmem>>, %arg12: memref<1x512xf32, #tpu.memory_space<vmem>>, %arg13: memref<512x256xbf16, #tpu.memory_space<vmem>>, %arg14: memref<1x256xf32, #tpu.memory_space<vmem>>, %arg15: memref<1x128x256xf32, #tpu.memory_space<vmem>>) attributes {dimension_semantics = [#tpu.dimension_semantics<parallel>], iteration_bounds = array<i64: 2>, scalar_prefetch = 0 : i64, scratch_operands = 0 : i64, tpu.core_type = #tpu.core_type<tc>, window_params = [{transform_indices = @transform_0, window_bounds = array<i64: 1, 128, 256>}, {transform_indices = @transform_1, window_bounds = array<i64: 1, 2, 128, 128>}, {pipeline_mode = #tpu.pipeline_mode<synchronous>, transform_indices = @transform_2, window_bounds = array<i64: 1, 256>}, {pipeline_mode = #tpu.pipeline_mode<synchronous>, transform_indices = @transform_3, window_bounds = array<i64: 1, 256>}, {pipeline_mode = #tpu.pipeline_mode<synchronous>, transform_indices = @transform_4, window_bounds = array<i64: 256, 768>}, {pipeline_mode = #tpu.pipeline_mode<synchronous>, transform_indices = @transform_5, window_bounds = array<i64: 1, 768>}, {pipeline_mode = #tpu.pipeline_mode<synchronous>, transform_indices = @transform_6, window_bounds = array<i64: 256, 256>}, {pipeline_mode = #tpu.pipeline_mode<synchronous>, transform_indices = @transform_7, window_bounds = array<i64: 1, 256>}, {pipeline_mode = #tpu.pipeline_mode<synchronous>, transform_indices = @transform_8, window_bounds = array<i64: 1, 256>}, {pipeline_mode = #tpu.pipeline_mode<synchronous>, transform_indices = @transform_9, window_bounds = array<i64: 1, 256>}, {pipeline_mode = #tpu.pipeline_mode<synchronous>, transform_indices = @transform_10, window_bounds = array<i64: 256, 512>}, {pipeline_mode = #tpu.pipeline_mode<synchronous>, transform_indices = @transform_11, window_bounds = array<i64: 1, 512>}, {pipeline_mode = #tpu.pipeline_mode<synchronous>, transform_indices = @transform_12, window_bounds = array<i64: 512, 256>}, {pipeline_mode = #tpu.pipeline_mode<synchronous>, transform_indices = @transform_13, window_bounds = array<i64: 1, 256>}, {transform_indices = @transform_14, window_bounds = array<i64: 1, 128, 256>}]} {
    %c0 = arith.constant 0 : index
    %c0_0 = arith.constant 0 : index
    %c0_1 = arith.constant 0 : index
    %0 = vector.load %arg1[%c0, %c0_0, %c0_1] : memref<1x128x256xf32, #tpu.memory_space<vmem>>, vector<1x128x256xf32>
    %1 = vector.shape_cast %0 : vector<1x128x256xf32> to vector<128x256xf32>
    %c0_2 = arith.constant 0 : index
    %c0_3 = arith.constant 0 : index
    %2 = vector.load %arg3[%c0_2, %c0_3] : memref<1x256xf32, #tpu.memory_space<vmem>>, vector<1x256xf32>
    %c0_4 = arith.constant 0 : index
    %c0_5 = arith.constant 0 : index
    %3 = vector.load %arg4[%c0_4, %c0_5] : memref<1x256xf32, #tpu.memory_space<vmem>>, vector<1x256xf32>
    %cst = arith.constant dense<0.000000e+00> : vector<128xf32>
    %4 = vector.multi_reduction <add>, %1, %cst [1] : vector<128x256xf32> to vector<128xf32>
    %5 = vector.shape_cast %4 : vector<128xf32> to vector<128x1xf32>
    %cst_6 = arith.constant 2.560000e+02 : f32
    %6 = vector.broadcast %cst_6 : f32 to vector<128x1xf32>
    %7 = arith.divf %5, %6 : vector<128x1xf32>
    %8 = vector.broadcast %7 : vector<128x1xf32> to vector<128x256xf32>
    %9 = arith.subf %1, %8 : vector<128x256xf32>
    %10 = arith.mulf %9, %9 : vector<128x256xf32>
    %cst_7 = arith.constant dense<0.000000e+00> : vector<128xf32>
    %11 = vector.multi_reduction <add>, %10, %cst_7 [1] : vector<128x256xf32> to vector<128xf32>
    %12 = vector.shape_cast %11 : vector<128xf32> to vector<128x1xf32>
    %cst_8 = arith.constant 2.560000e+02 : f32
    %13 = vector.broadcast %cst_8 : f32 to vector<128x1xf32>
    %14 = arith.divf %12, %13 : vector<128x1xf32>
    %15 = vector.broadcast %7 : vector<128x1xf32> to vector<128x256xf32>
    %16 = arith.subf %1, %15 : vector<128x256xf32>
    %cst_9 = arith.constant 9.99999974E-6 : f32
    %17 = vector.broadcast %cst_9 : f32 to vector<128x1xf32>
    %18 = arith.addf %14, %17 : vector<128x1xf32>
    %19 = math.rsqrt %18 : vector<128x1xf32>
    %20 = vector.broadcast %19 : vector<128x1xf32> to vector<128x256xf32>
    %21 = arith.mulf %16, %20 : vector<128x256xf32>
    %22 = vector.broadcast %2 : vector<1x256xf32> to vector<128x256xf32>
    %23 = arith.mulf %21, %22 : vector<128x256xf32>
    %24 = vector.broadcast %3 : vector<1x256xf32> to vector<128x256xf32>
    %25 = arith.addf %23, %24 : vector<128x256xf32>
    %26 = arith.truncf %25 : vector<128x256xf32> to vector<128x256xbf16>
    %c0_10 = arith.constant 0 : index
    %c0_11 = arith.constant 0 : index
    %27 = vector.load %arg5[%c0_10, %c0_11] : memref<256x768xbf16, #tpu.memory_space<vmem>>, vector<256x768xbf16>
    %cst_12 = arith.constant dense<0.000000e+00> : vector<128x768xf32>
    %28 = tpu.matmul %26, %27, %cst_12 {dimension_numbers = #tpu.dot_dimension_numbers<[1], [0], [0], [1], [0, 0, 1, 1], [], []>} : vector<128x256xbf16>, vector<256x768xbf16>, vector<128x768xf32> -> vector<128x768xf32>
    %c0_13 = arith.constant 0 : index
    %c0_14 = arith.constant 0 : index
    %29 = vector.load %arg6[%c0_13, %c0_14] : memref<1x768xf32, #tpu.memory_space<vmem>>, vector<1x768xf32>
    %30 = vector.broadcast %29 : vector<1x768xf32> to vector<128x768xf32>
    %31 = arith.addf %28, %30 : vector<128x768xf32>
    %32 = vector.extract_strided_slice %31 {offsets = [0, 0], sizes = [128, 256], strides = [1, 1]} : vector<128x768xf32> to vector<128x256xf32>
    %33 = vector.extract_strided_slice %31 {offsets = [0, 256], sizes = [128, 256], strides = [1, 1]} : vector<128x768xf32> to vector<128x256xf32>
    %34 = vector.extract_strided_slice %31 {offsets = [0, 512], sizes = [128, 256], strides = [1, 1]} : vector<128x768xf32> to vector<128x256xf32>
    %35 = vector.extract_strided_slice %32 {offsets = [0, 0], sizes = [128, 128], strides = [1, 1]} : vector<128x256xf32> to vector<128x128xf32>
    %36 = arith.truncf %35 : vector<128x128xf32> to vector<128x128xbf16>
    %37 = vector.extract_strided_slice %33 {offsets = [0, 0], sizes = [128, 128], strides = [1, 1]} : vector<128x256xf32> to vector<128x128xf32>
    %38 = arith.truncf %37 : vector<128x128xf32> to vector<128x128xbf16>
    %cst_15 = arith.constant dense<0.000000e+00> : vector<128x128xf32>
    %39 = tpu.matmul %36, %38, %cst_15 {dimension_numbers = #tpu.dot_dimension_numbers<[1], [1], [0], [0], [0, 0, 1, 0], [], []>} : vector<128x128xbf16>, vector<128x128xbf16>, vector<128x128xf32> -> vector<128x128xf32>
    %c0_16 = arith.constant 0 : index
    %c0_17 = arith.constant 0 : index
    %c0_18 = arith.constant 0 : index
    %c0_19 = arith.constant 0 : index
    %40 = vector.load %arg2[%c0_16, %c0_17, %c0_18, %c0_19] : memref<1x2x128x128xf32, #tpu.memory_space<vmem>>, vector<1x1x128x128xf32>
    %41 = vector.shape_cast %40 : vector<1x1x128x128xf32> to vector<128x128xf32>
    %42 = arith.addf %39, %41 : vector<128x128xf32>
    %cst_20 = arith.constant dense<0xFF800000> : vector<128xf32>
    %43 = vector.multi_reduction <maximumf>, %42, %cst_20 [1] : vector<128x128xf32> to vector<128xf32>
    %44 = vector.shape_cast %43 : vector<128xf32> to vector<128x1xf32>
    %45 = vector.broadcast %44 : vector<128x1xf32> to vector<128x128xf32>
    %46 = arith.subf %42, %45 : vector<128x128xf32>
    %47 = math.exp %46 : vector<128x128xf32>
    %cst_21 = arith.constant dense<0.000000e+00> : vector<128xf32>
    %48 = vector.multi_reduction <add>, %47, %cst_21 [1] : vector<128x128xf32> to vector<128xf32>
    %49 = vector.shape_cast %48 : vector<128xf32> to vector<128x1xf32>
    %50 = tpu.reciprocal %49 {approx = true} : vector<128x1xf32> -> vector<128x1xf32>
    %51 = vector.broadcast %50 : vector<128x1xf32> to vector<128x128xf32>
    %52 = arith.mulf %47, %51 : vector<128x128xf32>
    %53 = arith.truncf %52 : vector<128x128xf32> to vector<128x128xbf16>
    %54 = vector.extract_strided_slice %34 {offsets = [0, 0], sizes = [128, 128], strides = [1, 1]} : vector<128x256xf32> to vector<128x128xf32>
    %55 = arith.truncf %54 : vector<128x128xf32> to vector<128x128xbf16>
    %cst_22 = arith.constant dense<0.000000e+00> : vector<128x128xf32>
    %56 = tpu.matmul %53, %55, %cst_22 {dimension_numbers = #tpu.dot_dimension_numbers<[1], [0], [0], [1], [0, 0, 1, 1], [], []>} : vector<128x128xbf16>, vector<128x128xbf16>, vector<128x128xf32> -> vector<128x128xf32>
    %57 = vector.extract_strided_slice %32 {offsets = [0, 128], sizes = [128, 128], strides = [1, 1]} : vector<128x256xf32> to vector<128x128xf32>
    %58 = arith.truncf %57 : vector<128x128xf32> to vector<128x128xbf16>
    %59 = vector.extract_strided_slice %33 {offsets = [0, 128], sizes = [128, 128], strides = [1, 1]} : vector<128x256xf32> to vector<128x128xf32>
    %60 = arith.truncf %59 : vector<128x128xf32> to vector<128x128xbf16>
    %cst_23 = arith.constant dense<0.000000e+00> : vector<128x128xf32>
    %61 = tpu.matmul %58, %60, %cst_23 {dimension_numbers = #tpu.dot_dimension_numbers<[1], [1], [0], [0], [0, 0, 1, 0], [], []>} : vector<128x128xbf16>, vector<128x128xbf16>, vector<128x128xf32> -> vector<128x128xf32>
    %c0_24 = arith.constant 0 : index
    %c1 = arith.constant 1 : index
    %c0_25 = arith.constant 0 : index
    %c0_26 = arith.constant 0 : index
    %62 = vector.load %arg2[%c0_24, %c1, %c0_25, %c0_26] : memref<1x2x128x128xf32, #tpu.memory_space<vmem>>, vector<1x1x128x128xf32>
    %63 = vector.shape_cast %62 : vector<1x1x128x128xf32> to vector<128x128xf32>
    %64 = arith.addf %61, %63 : vector<128x128xf32>
    %cst_27 = arith.constant dense<0xFF800000> : vector<128xf32>
    %65 = vector.multi_reduction <maximumf>, %64, %cst_27 [1] : vector<128x128xf32> to vector<128xf32>
    %66 = vector.shape_cast %65 : vector<128xf32> to vector<128x1xf32>
    %67 = vector.broadcast %66 : vector<128x1xf32> to vector<128x128xf32>
    %68 = arith.subf %64, %67 : vector<128x128xf32>
    %69 = math.exp %68 : vector<128x128xf32>
    %cst_28 = arith.constant dense<0.000000e+00> : vector<128xf32>
    %70 = vector.multi_reduction <add>, %69, %cst_28 [1] : vector<128x128xf32> to vector<128xf32>
    %71 = vector.shape_cast %70 : vector<128xf32> to vector<128x1xf32>
    %72 = tpu.reciprocal %71 {approx = true} : vector<128x1xf32> -> vector<128x1xf32>
    %73 = vector.broadcast %72 : vector<128x1xf32> to vector<128x128xf32>
    %74 = arith.mulf %69, %73 : vector<128x128xf32>
    %75 = arith.truncf %74 : vector<128x128xf32> to vector<128x128xbf16>
    %76 = vector.extract_strided_slice %34 {offsets = [0, 128], sizes = [128, 128], strides = [1, 1]} : vector<128x256xf32> to vector<128x128xf32>
    %77 = arith.truncf %76 : vector<128x128xf32> to vector<128x128xbf16>
    %cst_29 = arith.constant dense<0.000000e+00> : vector<128x128xf32>
    %78 = tpu.matmul %75, %77, %cst_29 {dimension_numbers = #tpu.dot_dimension_numbers<[1], [0], [0], [1], [0, 0, 1, 1], [], []>} : vector<128x128xbf16>, vector<128x128xbf16>, vector<128x128xf32> -> vector<128x128xf32>
    %79 = tpu.concatenate %56, %78 in 1 : vector<128x128xf32>, vector<128x128xf32> -> vector<128x256xf32>
    %80 = arith.truncf %79 : vector<128x256xf32> to vector<128x256xbf16>
    %c0_30 = arith.constant 0 : index
    %c0_31 = arith.constant 0 : index
    %81 = vector.load %arg7[%c0_30, %c0_31] : memref<256x256xbf16, #tpu.memory_space<vmem>>, vector<256x256xbf16>
    %cst_32 = arith.constant dense<0.000000e+00> : vector<128x256xf32>
    %82 = tpu.matmul %80, %81, %cst_32 {dimension_numbers = #tpu.dot_dimension_numbers<[1], [0], [0], [1], [0, 0, 1, 1], [], []>} : vector<128x256xbf16>, vector<256x256xbf16>, vector<128x256xf32> -> vector<128x256xf32>
    %c0_33 = arith.constant 0 : index
    %c0_34 = arith.constant 0 : index
    %83 = vector.load %arg8[%c0_33, %c0_34] : memref<1x256xf32, #tpu.memory_space<vmem>>, vector<1x256xf32>
    %84 = vector.broadcast %83 : vector<1x256xf32> to vector<128x256xf32>
    %85 = arith.addf %82, %84 : vector<128x256xf32>
    %86 = arith.addf %1, %85 : vector<128x256xf32>
    %c0_35 = arith.constant 0 : index
    %c0_36 = arith.constant 0 : index
    %87 = vector.load %arg9[%c0_35, %c0_36] : memref<1x256xf32, #tpu.memory_space<vmem>>, vector<1x256xf32>
    %c0_37 = arith.constant 0 : index
    %c0_38 = arith.constant 0 : index
    %88 = vector.load %arg10[%c0_37, %c0_38] : memref<1x256xf32, #tpu.memory_space<vmem>>, vector<1x256xf32>
    %cst_39 = arith.constant dense<0.000000e+00> : vector<128xf32>
    %89 = vector.multi_reduction <add>, %86, %cst_39 [1] : vector<128x256xf32> to vector<128xf32>
    %90 = vector.shape_cast %89 : vector<128xf32> to vector<128x1xf32>
    %cst_40 = arith.constant 2.560000e+02 : f32
    %91 = vector.broadcast %cst_40 : f32 to vector<128x1xf32>
    %92 = arith.divf %90, %91 : vector<128x1xf32>
    %93 = vector.broadcast %92 : vector<128x1xf32> to vector<128x256xf32>
    %94 = arith.subf %86, %93 : vector<128x256xf32>
    %95 = arith.mulf %94, %94 : vector<128x256xf32>
    %cst_41 = arith.constant dense<0.000000e+00> : vector<128xf32>
    %96 = vector.multi_reduction <add>, %95, %cst_41 [1] : vector<128x256xf32> to vector<128xf32>
    %97 = vector.shape_cast %96 : vector<128xf32> to vector<128x1xf32>
    %cst_42 = arith.constant 2.560000e+02 : f32
    %98 = vector.broadcast %cst_42 : f32 to vector<128x1xf32>
    %99 = arith.divf %97, %98 : vector<128x1xf32>
    %100 = vector.broadcast %92 : vector<128x1xf32> to vector<128x256xf32>
    %101 = arith.subf %86, %100 : vector<128x256xf32>
    %cst_43 = arith.constant 9.99999974E-6 : f32
    %102 = vector.broadcast %cst_43 : f32 to vector<128x1xf32>
    %103 = arith.addf %99, %102 : vector<128x1xf32>
    %104 = math.rsqrt %103 : vector<128x1xf32>
    %105 = vector.broadcast %104 : vector<128x1xf32> to vector<128x256xf32>
    %106 = arith.mulf %101, %105 : vector<128x256xf32>
    %107 = vector.broadcast %87 : vector<1x256xf32> to vector<128x256xf32>
    %108 = arith.mulf %106, %107 : vector<128x256xf32>
    %109 = vector.broadcast %88 : vector<1x256xf32> to vector<128x256xf32>
    %110 = arith.addf %108, %109 : vector<128x256xf32>
    %111 = arith.truncf %110 : vector<128x256xf32> to vector<128x256xbf16>
    %c0_44 = arith.constant 0 : index
    %c0_45 = arith.constant 0 : index
    %112 = vector.load %arg11[%c0_44, %c0_45] : memref<256x512xbf16, #tpu.memory_space<vmem>>, vector<256x512xbf16>
    %cst_46 = arith.constant dense<0.000000e+00> : vector<128x512xf32>
    %113 = tpu.matmul %111, %112, %cst_46 {dimension_numbers = #tpu.dot_dimension_numbers<[1], [0], [0], [1], [0, 0, 1, 1], [], []>} : vector<128x256xbf16>, vector<256x512xbf16>, vector<128x512xf32> -> vector<128x512xf32>
    %c0_47 = arith.constant 0 : index
    %c0_48 = arith.constant 0 : index
    %114 = vector.load %arg12[%c0_47, %c0_48] : memref<1x512xf32, #tpu.memory_space<vmem>>, vector<1x512xf32>
    %115 = vector.broadcast %114 : vector<1x512xf32> to vector<128x512xf32>
    %116 = arith.addf %113, %115 : vector<128x512xf32>
    %cst_49 = arith.constant 5.000000e-01 : f32
    %117 = vector.broadcast %cst_49 : f32 to vector<128x512xf32>
    %118 = arith.mulf %117, %116 : vector<128x512xf32>
    %cst_50 = arith.constant 0.707106769 : f32
    %119 = vector.broadcast %cst_50 : f32 to vector<128x512xf32>
    %120 = arith.mulf %116, %119 : vector<128x512xf32>
    %cst_51 = arith.constant 0.000000e+00 : f32
    %121 = vector.broadcast %cst_51 : f32 to vector<128x512xf32>
    %122 = arith.cmpf oge, %120, %121 : vector<128x512xf32>
    %cst_52 = arith.constant 1.000000e+00 : f32
    %cst_53 = arith.constant -1.000000e+00 : f32
    %123 = vector.broadcast %cst_52 : f32 to vector<128x512xf32>
    %124 = vector.broadcast %cst_53 : f32 to vector<128x512xf32>
    %125 = arith.select %122, %123, %124 : vector<128x512xi1>, vector<128x512xf32>
    %126 = math.absf %120 : vector<128x512xf32>
    %cst_54 = arith.constant 0.327591091 : f32
    %127 = vector.broadcast %cst_54 : f32 to vector<128x512xf32>
    %128 = arith.mulf %127, %126 : vector<128x512xf32>
    %cst_55 = arith.constant 1.000000e+00 : f32
    %129 = vector.broadcast %cst_55 : f32 to vector<128x512xf32>
    %130 = arith.addf %129, %128 : vector<128x512xf32>
    %131 = tpu.reciprocal %130 {approx = true} : vector<128x512xf32> -> vector<128x512xf32>
    %cst_56 = arith.constant 1.06140542 : f32
    %132 = vector.broadcast %cst_56 : f32 to vector<128x512xf32>
    %133 = arith.mulf %132, %131 : vector<128x512xf32>
    %cst_57 = arith.constant -1.45315206 : f32
    %134 = vector.broadcast %cst_57 : f32 to vector<128x512xf32>
    %135 = arith.addf %133, %134 : vector<128x512xf32>
    %136 = arith.mulf %135, %131 : vector<128x512xf32>
    %cst_58 = arith.constant 1.42141378 : f32
    %137 = vector.broadcast %cst_58 : f32 to vector<128x512xf32>
    %138 = arith.addf %136, %137 : vector<128x512xf32>
    %139 = arith.mulf %138, %131 : vector<128x512xf32>
    %cst_59 = arith.constant -0.284496725 : f32
    %140 = vector.broadcast %cst_59 : f32 to vector<128x512xf32>
    %141 = arith.addf %139, %140 : vector<128x512xf32>
    %142 = arith.mulf %141, %131 : vector<128x512xf32>
    %cst_60 = arith.constant 0.254829586 : f32
    %143 = vector.broadcast %cst_60 : f32 to vector<128x512xf32>
    %144 = arith.addf %142, %143 : vector<128x512xf32>
    %145 = arith.mulf %144, %131 : vector<128x512xf32>
    %cst_61 = arith.constant 0.000000e+00 : f32
    %146 = vector.broadcast %cst_61 : f32 to vector<128x512xf32>
    %147 = arith.subf %146, %126 : vector<128x512xf32>
    %148 = arith.mulf %147, %126 : vector<128x512xf32>
    %149 = math.exp %148 : vector<128x512xf32>
    %150 = arith.mulf %145, %149 : vector<128x512xf32>
    %cst_62 = arith.constant 1.000000e+00 : f32
    %151 = vector.broadcast %cst_62 : f32 to vector<128x512xf32>
    %152 = arith.subf %151, %150 : vector<128x512xf32>
    %153 = arith.mulf %125, %152 : vector<128x512xf32>
    %cst_63 = arith.constant 1.000000e+00 : f32
    %154 = vector.broadcast %cst_63 : f32 to vector<128x512xf32>
    %155 = arith.addf %154, %153 : vector<128x512xf32>
    %156 = arith.mulf %118, %155 : vector<128x512xf32>
    %157 = arith.truncf %156 : vector<128x512xf32> to vector<128x512xbf16>
    %c0_64 = arith.constant 0 : index
    %c0_65 = arith.constant 0 : index
    %158 = vector.load %arg13[%c0_64, %c0_65] : memref<512x256xbf16, #tpu.memory_space<vmem>>, vector<512x256xbf16>
    %cst_66 = arith.constant dense<0.000000e+00> : vector<128x256xf32>
    %159 = tpu.matmul %157, %158, %cst_66 {dimension_numbers = #tpu.dot_dimension_numbers<[1], [0], [0], [1], [0, 0, 1, 1], [], []>} : vector<128x512xbf16>, vector<512x256xbf16>, vector<128x256xf32> -> vector<128x256xf32>
    %c0_67 = arith.constant 0 : index
    %c0_68 = arith.constant 0 : index
    %160 = vector.load %arg14[%c0_67, %c0_68] : memref<1x256xf32, #tpu.memory_space<vmem>>, vector<1x256xf32>
    %161 = vector.broadcast %160 : vector<1x256xf32> to vector<128x256xf32>
    %162 = arith.addf %159, %161 : vector<128x256xf32>
    %163 = arith.addf %86, %162 : vector<128x256xf32>
    %c0_69 = arith.constant 0 : index
    %c0_70 = arith.constant 0 : index
    %c0_71 = arith.constant 0 : index
    %164 = vector.load %arg15[%c0_69, %c0_70, %c0_71] : memref<1x128x256xf32, #tpu.memory_space<vmem>>, vector<1x128x256xf32>
    %165 = vector.shape_cast %164 : vector<1x128x256xf32> to vector<128x256xf32>
    %166 = vector.shape_cast %163 : vector<128x256xf32> to vector<1x128x256xf32>
    tpu.vector_store %arg15[%c0_69, %c0_70, %c0_71], %166 {strides = array<i32>} : memref<1x128x256xf32, #tpu.memory_space<vmem>>, vector<1x128x256xf32>,
    return
  }
  func.func @transform_0(%arg0: i32) -> (i32, i32, i32) {
    %c0_i32 = arith.constant 0 : i32
    %c0_i32_0 = arith.constant 0 : i32
    %c0_i32_1 = arith.constant 0 : i32
    return %arg0, %c0_i32, %c0_i32_0 : i32, i32, i32
  }
  func.func @transform_1(%arg0: i32) -> (i32, i32, i32, i32) {
    %c0_i32 = arith.constant 0 : i32
    %c0_i32_0 = arith.constant 0 : i32
    %c0_i32_1 = arith.constant 0 : i32
    %c0_i32_2 = arith.constant 0 : i32
    return %arg0, %c0_i32, %c0_i32_0, %c0_i32_1 : i32, i32, i32, i32
  }
  func.func @transform_2(%arg0: i32) -> (i32, i32) {
    %c0_i32 = arith.constant 0 : i32
    %c0_i32_0 = arith.constant 0 : i32
    %c0_i32_1 = arith.constant 0 : i32
    return %c0_i32, %c0_i32_0 : i32, i32
  }
  func.func @transform_3(%arg0: i32) -> (i32, i32) {
    %c0_i32 = arith.constant 0 : i32
    %c0_i32_0 = arith.constant 0 : i32
    %c0_i32_1 = arith.constant 0 : i32
    return %c0_i32, %c0_i32_0 : i32, i32
  }
  func.func @transform_4(%arg0: i32) -> (i32, i32) {
    %c0_i32 = arith.constant 0 : i32
    %c0_i32_0 = arith.constant 0 : i32
    %c0_i32_1 = arith.constant 0 : i32
    return %c0_i32, %c0_i32_0 : i32, i32
  }
  func.func @transform_5(%arg0: i32) -> (i32, i32) {
    %c0_i32 = arith.constant 0 : i32
    %c0_i32_0 = arith.constant 0 : i32
    %c0_i32_1 = arith.constant 0 : i32
    return %c0_i32, %c0_i32_0 : i32, i32
  }
  func.func @transform_6(%arg0: i32) -> (i32, i32) {
    %c0_i32 = arith.constant 0 : i32
    %c0_i32_0 = arith.constant 0 : i32
    %c0_i32_1 = arith.constant 0 : i32
    return %c0_i32, %c0_i32_0 : i32, i32
  }
  func.func @transform_7(%arg0: i32) -> (i32, i32) {
    %c0_i32 = arith.constant 0 : i32
    %c0_i32_0 = arith.constant 0 : i32
    %c0_i32_1 = arith.constant 0 : i32
    return %c0_i32, %c0_i32_0 : i32, i32
  }
  func.func @transform_8(%arg0: i32) -> (i32, i32) {
    %c0_i32 = arith.constant 0 : i32
    %c0_i32_0 = arith.constant 0 : i32
    %c0_i32_1 = arith.constant 0 : i32
    return %c0_i32, %c0_i32_0 : i32, i32
  }
  func.func @transform_9(%arg0: i32) -> (i32, i32) {
    %c0_i32 = arith.constant 0 : i32
    %c0_i32_0 = arith.constant 0 : i32
    %c0_i32_1 = arith.constant 0 : i32
    return %c0_i32, %c0_i32_0 : i32, i32
  }
  func.func @transform_10(%arg0: i32) -> (i32, i32) {
    %c0_i32 = arith.constant 0 : i32
    %c0_i32_0 = arith.constant 0 : i32
    %c0_i32_1 = arith.constant 0 : i32
    return %c0_i32, %c0_i32_0 : i32, i32
  }
  func.func @transform_11(%arg0: i32) -> (i32, i32) {
    %c0_i32 = arith.constant 0 : i32
    %c0_i32_0 = arith.constant 0 : i32
    %c0_i32_1 = arith.constant 0 : i32
    return %c0_i32, %c0_i32_0 : i32, i32
  }
  func.func @transform_12(%arg0: i32) -> (i32, i32) {
    %c0_i32 = arith.constant 0 : i32
    %c0_i32_0 = arith.constant 0 : i32
    %c0_i32_1 = arith.constant 0 : i32
    return %c0_i32, %c0_i32_0 : i32, i32
  }
  func.func @transform_13(%arg0: i32) -> (i32, i32) {
    %c0_i32 = arith.constant 0 : i32
    %c0_i32_0 = arith.constant 0 : i32
    %c0_i32_1 = arith.constant 0 : i32
    return %c0_i32, %c0_i32_0 : i32, i32
  }
  func.func @transform_14(%arg0: i32) -> (i32, i32, i32) {
    %c0_i32 = arith.constant 0 : i32
    %c0_i32_0 = arith.constant 0 : i32
    %c0_i32_1 = arith.constant 0 : i32
    return %arg0, %c0_i32, %c0_i32_0 : i32, i32, i32
  }
}

</mosaic_0001>

<bundles_post_ra>
// kernel: tpu_custom_call.1
= control target key start
LH: loop header
LB: loop body
LE: loop exit
PB: predicated region body
PF: predicated region fallthrough
CT: control target
= control target key end

     0   :  { %s12605_s0 = inlined_call_operand.hbm [shape: f32[2,128,256], index: 0, kind: input, shape index: {}]   ;;  %s12606_s1 = inlined_call_operand.hbm [shape: f32[2,2,128,128], index: 1, kind: input, shape index: {}]   ;;  %s12607_s2 = inlined_call_operand.hbm [shape: f32[1,256], index: 2, kind: input, shape index: {}]   ;;  %s12608_s3 = inlined_call_operand.hbm [shape: f32[1,256], index: 3, kind: input, shape index: {}]   ;;  %s12609_s4 = inlined_call_operand.hbm [shape: bf16[256,768], index: 4, kind: input, shape index: {}]   ;;  %s12610_s5 = inlined_call_operand.vmem [shape: f32[1,768], index: 5, kind: input, shape index: {}]   ;;  %s12611_s6 = inlined_call_operand.hbm [shape: bf16[256,256], index: 6, kind: input, shape index: {}]   ;;  %s12612_s7 = inlined_call_operand.vmem [shape: f32[1,256], index: 7, kind: input, shape index: {}]   ;;  %s12613_s8 = inlined_call_operand.vmem [shape: f32[1,256], index: 8, kind: input, shape index: {}]   ;;  %s12614_s9 = inlined_call_operand.vmem [shape: f32[1,256], index: 9, kind: input, shape index: {}]   ;;  %s12615_s10 = inlined_call_operand.hbm [shape: bf16[256,512], index: 10, kind: input, shape index: {}]   ;;  %s12616_s11 = inlined_call_operand.vmem [shape: f32[1,512], index: 11, kind: input, shape index: {}]   ;;  %s12617_s12 = inlined_call_operand.hbm [shape: bf16[512,256], index: 12, kind: input, shape index: {}]   ;;  %s12618_s13 = inlined_call_operand.vmem [shape: f32[1,256], index: 13, kind: input, shape index: {}]   ;;  %s12619_s14 = inlined_call_operand.hbm [shape: f32[2,128,256], index: 14, kind: output, shape index: {}]  }
   0x1   :  { %12739 = sst [smem:[#allocation124_spill]] %s12605_s0 }
   0x2   :  { %12740 = sst [smem:[#allocation125_spill]] %s12607_s2 }
   0x3   :  { %12741 = sst [smem:[#allocation126_spill]] %s12608_s3 }
   0x4   :  { %12742 = sst [smem:[#allocation127_spill]] %s12609_s4 }
   0x5   :  { %12743 = sst [smem:[#allocation128_spill]] %s12611_s6 }
   0x6   :  { %12744 = sst [smem:[#allocation129_spill]] %s12615_s10 }
   0x7   :  { %12745 = sst [smem:[#allocation130_spill]] %s12617_s12 }
   0x8   :  { %12746 = sst [smem:[#allocation131_spill]] %s12619_s14 }
   0x9   :  { %19 = vsyncpa [#allocation3], 0 }
   0xa   :  { %21 = vsyncpa [#allocation3 + $0x1], 0 }
   0xb   :  { %22 = vsyncpa [#allocation6], 0 }
   0xc   :  { %24 = vsyncpa [#allocation6 + $0x1], 0 }
   0xd   :  { %25 = vsyncpa [#allocation9], 0 }
   0xe   :  { %26 = vsyncpa [#allocation12], 0 }
   0xf   :  { %27 = vsyncpa [#allocation15], 0 }
  0x10   :  { %28 = vsyncpa [#allocation4], 0 }
  0x11   :  { %30 = vsyncpa [#allocation4 + $0x1], 0  ;;  %s8566_s29 = smov 0   ;;  %s8568_s30 = smov 0  }
  0x12   :  { %s8570_s15 = smov 0   ;;  %s8572_s16 = smov 0  }
  0x13 LB: > { %12747 = sst [smem:[#allocation24_spill]] %s8459_s29  ;;  %s8473_s17 = smov [#allocation7]   ;;  %s8471_s16 = sphi %s8572_s16, %s13108_s16   ;;  %s8467_s15 = sphi %s8570_s15, %s13110_s15   ;;  %s8463_s30 = sphi %s8568_s30, %s13112_s30   ;;  %s8459_s29 = sphi %s8566_s29, %s13111_s29  }
  0x14   : > { %12748 = sst [smem:[#allocation25_spill]] %s8467_s15  ;;  %s384_s18 = sshll.u32 %s8473_s17, 4  ;;  %s385_s18 = int_to_ptr.vmem [resolvable:$true] %s384_s18 }
  0x15   : > { %s8587_s19 = sadd.s32 4294967295, %s8471_s16   ;;  %p6630_p0 = scmp.ge.s32.totalorder %s8471_s16, 1 }
  0x16   : > { %p12620_p1 = scmp.eq.s32.totalorder %s8587_s19, 0  ;;  %p371_p2 = scmp.lt.s32.totalorder %s8471_s16, 3 }
  0x17   : > { %s8474_s21 = smov [#allocation8]   ;;  %s8475_s23 = smov [#allocation11]  }
  0x18   : > { %p8592_p3 = pnand %p6630_p0, %p371_p2  ;;  %s395_s22 = sshll.u32 %s8474_s21, 4  ;;  %s396_s22 = int_to_ptr.vmem [resolvable:$true] %s395_s22 }
  0x19   : > { %s421_s24 = sshll.u32 %s8475_s23, 4  ;;  %s8186_s27 = scalar_lea.vmem %s385_s18, 32  ;;  %s8605_s24 = int_to_ptr.vmem [resolvable:$true] %s421_s24 }
  0x1a   : > { %s12749_s20 = scalar_select %p8592_p3, 1, 0 }
  0x1b   : > { %p7188_p5 = pneg %p8592_p3  ;;  %p8187_p8 = scmp.ne.s32.totalorder %s385_s18, %s8186_s27 }
  0x1c   : > { %p8194_p11 = scmp.lt.s32.totalorder %s385_s18, %s385_s18  ;;  %p8195_p12 = scmp.lt.s32.totalorder %s8186_s27, %s8186_s27 }
  0x1d   : > { %p8601_p6 = pnand %p7188_p5, %p12620_p1 }
  0x1e   : > { %p8196_p13 = por %p8195_p12, %p8194_p11 }
  0x1f   : > { %p8609_p7 = pneg %p8601_p6 }
  0x21   : > { %p8189_p9 = pnand %p8187_p8, %p8609_p7 }
  0x23   : > { %p8190_p10 = pneg %p8189_p9 }
  0x25   : > { %p8197_p0 = pnand %p8196_p13, %p8190_p10 }
  0x27   : > { %8200 = shalt.err (!%p8197_p0)
}
  0x28   : > { %s12752_s2 = sld [smem:[#allocation125_spill]]  ;;  %s8212_s21 = scalar_lea.vmem %s396_s22, 32 }
  0x29   : > { %p8213_p2 = scmp.ne.s32.totalorder %s396_s22, %s8212_s21  ;;  %p8220_p1 = scmp.lt.s32.totalorder %s396_s22, %s396_s22 }
  0x2a   : > { %p8221_p8 = scmp.lt.s32.totalorder %s8212_s21, %s8212_s21 }
  0x2b   : > { %p8215_p5 = pnand %p8213_p2, %p8609_p7 }
  0x2c   : > { %p8222_p9 = por %p8221_p8, %p8220_p1 }
  0x2d   : > { %p8216_p4 = pneg %p8215_p5 }
  0x2e   : > { %7191 = dma.hbm_to_vmem [thread:$0]  (!%p8601_p6), %s12752_s2, 32, %s385_s18, [#allocation6]  }
  0x2f   : > { %p8223_p3 = pnand %p8222_p9, %p8216_p4 }
  0x31   : > { %8226 = shalt.err (!%p8223_p3)
}
  0x32   : > { %s12753_s3 = sld [smem:[#allocation126_spill]]  ;;  %s8238_s18 = scalar_lea.vmem %s8605_s24, 4096 }
  0x33   : > { %p8239_p10 = scmp.ne.s32.totalorder %s8605_s24, %s8238_s18  ;;  %p8246_p13 = scmp.lt.s32.totalorder %s8605_s24, %s8605_s24 }
  0x34   : > { %p8247_p1 = scmp.lt.s32.totalorder %s8238_s18, %s8238_s18 }
  0x35   : > { %p8241_p11 = pnand %p8239_p10, %p8609_p7 }
  0x36   : > { %p8248_p4 = por %p8247_p1, %p8246_p13 }
  0x37   : > { %p8242_p12 = pneg %p8241_p11 }
  0x38   : > { %7194 = dma.hbm_to_vmem [thread:$0]  (!%p8601_p6), %s12753_s3, 32, %s396_s22, [#allocation9]  }
  0x39   : > { %p8249_p3 = pnand %p8248_p4, %p8242_p12 }
  0x3b   : > { %8252 = shalt.err (!%p8249_p3)
}
  0x3c   : > { %s12622_s28 = smov 128   ;;  %s12624_s17 = smov 8  }
  0x3d   : > { %s12754_s6 = sld [smem:[#allocation128_spill]]  ;;  %s8478_s23 = smov [#allocation10]  }
  0x3e   : > { %s405_s27 = sshll.u32 %s8478_s23, 4  ;;  %s406_s27 = int_to_ptr.vmem [resolvable:$true] %s405_s27 }
  0x3f   : > { %s8264_s18 = scalar_lea.vmem %s406_s27, 12288  ;;  %p8272_p8 = scmp.lt.s32.totalorder %s406_s27, %s406_s27 }
  0x40   : > { %p8265_p0 = scmp.ne.s32.totalorder %s406_s27, %s8264_s18  ;;  %p8273_p9 = scmp.lt.s32.totalorder %s8264_s18, %s8264_s18 }
  0x42   : > { %p8267_p2 = pnand %p8265_p0, %p8609_p7  ;;  %p8274_p10 = por %p8273_p9, %p8272_p8 }
  0x43   : > { %7200 = dma.hbm_to_vmem [thread:$0]  (!%p8601_p6), %s12754_s6, 4096, %s8605_s24, [#allocation12], %s12622_s28, %s12622_s28, %s12624_s17  }
  0x44   : > { %p8268_p5 = pneg %p8267_p2 }
  0x46   : > { %p8275_p11 = pnand %p8274_p10, %p8268_p5 }
  0x48   : > { %8278 = shalt.err (!%p8275_p11)
}
  0x49   : > { %s8479_s2 = smov 384   ;;  %s8480_s3 = smov 24  }
  0x4a   : > { %s12755_s4 = sld [smem:[#allocation127_spill]]  ;;  %s8481_s21 = smov [#allocation13]  }
  0x4b   : > { %s443_s23 = sshll.u32 %s8481_s21, 4  ;;  %s444_s23 = int_to_ptr.vmem [resolvable:$true] %s443_s23 }
  0x4c   : > { %s8290_s28 = scalar_lea.vmem %s444_s23, 8192  ;;  %p8298_p4 = scmp.lt.s32.totalorder %s444_s23, %s444_s23 }
  0x4d   : > { %p8291_p12 = scmp.ne.s32.totalorder %s444_s23, %s8290_s28  ;;  %p8299_p3 = scmp.lt.s32.totalorder %s8290_s28, %s8290_s28 }
  0x4f   : > { %p8293_p13 = pnand %p8291_p12, %p8609_p7  ;;  %p8300_p0 = por %p8299_p3, %p8298_p4 }
  0x50   : > { %7197 = dma.hbm_to_vmem [thread:$0]  (!%p8601_p6), %s12755_s4, 12288, %s406_s27, [#allocation9], %s8479_s2, %s8479_s2, %s8480_s3  }
  0x51   : > { %p8294_p1 = pneg %p8293_p13 }
  0x53   : > { %p8301_p2 = pnand %p8300_p0, %p8294_p1 }
  0x55   : > { %8304 = shalt.err (!%p8301_p2)
}
  0x56   : > { %s12626_s18 = smov 256   ;;  %s12627_s17 = smov 16  }
  0x57   : > { %s12756_s10 = sld [smem:[#allocation129_spill]]  ;;  %s8484_s27 = smov [#allocation14]  }
  0x58   : > { %s459_s22 = sshll.u32 %s8484_s27, 4  ;;  %s460_s22 = int_to_ptr.vmem [resolvable:$true] %s459_s22 }
  0x59   : > { %s8316_s24 = scalar_lea.vmem %s460_s22, 8192  ;;  %p8324_p10 = scmp.lt.s32.totalorder %s460_s22, %s460_s22 }
  0x5a   : > { %p8317_p5 = scmp.ne.s32.totalorder %s460_s22, %s8316_s24  ;;  %p8325_p11 = scmp.lt.s32.totalorder %s8316_s24, %s8316_s24 }
  0x5c   : > { %p8319_p8 = pnand %p8317_p5, %p8609_p7  ;;  %p8326_p12 = por %p8325_p11, %p8324_p10 }
  0x5d   : > { %7203 = dma.hbm_to_vmem [thread:$0]  (!%p8601_p6), %s12756_s10, 8192, %s444_s23, [#allocation12], %s12626_s18, %s12626_s18, %s12627_s17  }
  0x5e   : > { %p8320_p9 = pneg %p8319_p8 }
  0x60   : > { %p8327_p13 = pnand %p8326_p12, %p8320_p9 }
  0x62   : > { %8330 = shalt.err (!%p8327_p13)
}
  0x63   : > { %s12757_s28 = smov 8   ;;  %s12758_s21 = smov 128  }
  0x64   : > { %s12759_s12 = sld [smem:[#allocation130_spill]]  ;;  %s6629_s25 = sadd.s32 4294967294, %s8471_s16  }
  0x65   : > { %s8671_s26 = sadd.s32 1, %s8471_s16   ;;  %s43_s27 = sadd.s32 1, %s8467_s15 }
  0x66   : > { %12760 = sst [smem:[#allocation26_spill]] %s8671_s26  ;;  %s40_s3 = ssub.s32 %s8471_s16, %s8671_s26 }
  0x67   : > { %p41_p7 = scmp.eq.s32.totalorder %s40_s3, 0  ;;  %p50_p1 = scmp.ne.s32.totalorder %s8467_s15, %s8463_s30 }
  0x68   : > { %p51_p4 = scmp.eq.s32.totalorder %s8471_s16, 0  ;;  %p56_p3 = scmp.ne.s32.totalorder %s8463_s30, %s8459_s29 }
  0x69   : > { %s8682_s24 = scalar_select %p41_p7, %s8467_s15, %s43_s27  }
  0x6a   : > { %7206 = dma.hbm_to_vmem [thread:$0]  (!%p8601_p6), %s12759_s12, 8192, %s460_s22, [#allocation15], %s12758_s21, %s12758_s21, %s12757_s28  }
  0x6b   : > { %12761 = sst [smem:[#allocation27_spill]] %s8682_s24  ;;  %p8684_p0 = por %p51_p4, %p50_p1 }
  0x6c   : > { %p12763_p2 = scmp.eq.s32.totalorder %s8587_s19, 0  ;;  %p358_p5 = scmp.eq.s32.totalorder %s8587_s19, 1 }
  0x6d   : > { %p364_p8 = scmp.eq.s32.totalorder %s6629_s25, 1  ;;  %p7224_p9 = scmp.lt.s32.totalorder %s8471_s16, 2 }
  0x6e   : > { %p8690_p6 = por %p12763_p2, %p56_p3  ;;  %s476_s23 = sand.u32 1, %s8467_s15  }
  0x6f   : > { %p8697_p10 = por %p358_p5, %p50_p1  ;;  %p8701_p11 = por %p364_p8, %p56_p3 }
  0x70   : > { %s6638_s18 = sshll.u32 %s476_s23, 8  ;;  %s6931_s17 = sshll.u32 %s8471_s16, 12 }
  0x71   : > { %s12765_s3 = scalar_select %p8697_p10, 1, 0 }
  0x72   : > { %s12766_s27 = scalar_select %p8701_p11, 1, 0 }
  0x73   : > { %s12768_s0 = sld [smem:[#allocation124_spill]]  ;;  %s480_s25 = scalar_lea.vmem [#allocation2], %s6638_s18 }
  0x74   : > { %12767 = sst [smem:[#allocation28_spill]] %s12766_s27  ;;  %s487_s12 = sshll.u32 %s480_s25, 4  ;;  %s8711_s12 = int_to_ptr.vmem [resolvable:$true] %s487_s12 }
  0x75   : > { %p8715_p12 = pnand %p7224_p9, %p8684_p0  ;;  %s8722_s4 = scalar_lea.hbm %s12606_s1, %s6931_s17 }
  0x76   : > { %s501_s6 = scalar_lea.vmem [#allocation5], %s6638_s18  ;;  %s8726_s29 = scalar_lea.sflag [#allocation3], %s476_s23 }
  0x77   : > { %s8724_s27 = sshll.u32 %s501_s6, 4  ;;  %p8333_p7 = pneg %p8715_p12  ;;  %s8757_s27 = int_to_ptr.vmem [resolvable:$true] %s8724_s27 }
  0x79   : > { %s8709_s10 = scalar_lea.hbm %s12768_s0, %s6931_s17  ;;  %s8336_s15 = scalar_lea.hbm %s12768_s0, 8192 }
  0x7a   : > { %s8331_s25 = scalar_lea.hbm %s8709_s10, 4096  ;;  %p8337_p3 = scmp.lt.s32.totalorder %s8709_s10, %s12768_s0 }
  0x7b   : > { %p8332_p13 = scmp.ne.s32.totalorder %s8709_s10, %s8331_s25  ;;  %p8338_p0 = scmp.lt.s32.totalorder %s8336_s15, %s8331_s25 }
  0x7d   : > { %p8334_p1 = pnand %p8333_p7, %p8332_p13  ;;  %p8339_p2 = por %p8338_p0, %p8337_p3 }
  0x7f   : > { %p8335_p4 = pneg %p8334_p1 }
  0x81   : > { %p8340_p5 = pnand %p8339_p2, %p8335_p4 }
  0x83   : > { %8343 = shalt.err (!%p8340_p5)
}
  0x84   : > { %s8344_s18 = scalar_lea.vmem %s8711_s12, 4096  ;;  %s8485_s14 = smov [#allocation2]  }
  0x85   : > { %p8345_p8 = scmp.ne.s32.totalorder %s8711_s12, %s8344_s18  ;;  %s8349_s23 = sshll.u32 %s8485_s14, 4  ;;  %s8350_s23 = int_to_ptr.vmem [resolvable:$false] %s8349_s23 }
  0x86   : > { %s8351_s6 = scalar_lea.vmem %s8350_s23, 8192  ;;  %p8352_p1 = scmp.lt.s32.totalorder %s8711_s12, %s8350_s23 }
  0x87   : > { %p8347_p9 = pnand %p8345_p8, %p8333_p7  ;;  %p8353_p11 = scmp.lt.s32.totalorder %s8351_s6, %s8344_s18 }
  0x89   : > { %p8348_p13 = pneg %p8347_p9  ;;  %p8354_p10 = por %p8353_p11, %p8352_p1 }
  0x8b   : > { %p8355_p3 = pnand %p8354_p10, %p8348_p13 }
  0x8d   : > { %8358 = shalt.err (!%p8355_p3)
}
  0x8e   : > { %s12770_s25 = smov 16   ;;  %s12771_s2 = smov 256  }
  0x8f   : > { %7210 = dma.hbm_to_vmem [thread:$0]  (!%p8715_p12), %s8709_s10, 4096, %s8711_s12, %s8726_s29, %s12771_s2, %s12771_s2, %s12770_s25  }
  0x90   : > { %s497_s15 = sand.u32 1, %s8471_s16   ;;  %s8359_s17 = scalar_lea.hbm %s8722_s4, 4096 }
  0x91   : > { %s498_s26 = scalar_lea.sflag [#allocation6], %s497_s15  ;;  %p8360_p10 = scmp.ne.s32.totalorder %s8722_s4, %s8359_s17 }
  0x92   : > { %s8364_s23 = scalar_lea.hbm %s12606_s1, 8192  ;;  %p8365_p0 = scmp.lt.s32.totalorder %s8722_s4, %s12606_s1 }
  0x93   : > { %p8362_p11 = pnand %p8360_p10, %p8333_p7  ;;  %p8366_p2 = scmp.lt.s32.totalorder %s8364_s23, %s8359_s17 }
  0x95   : > { %p8363_p4 = pneg %p8362_p11  ;;  %p8367_p5 = por %p8366_p2, %p8365_p0 }
  0x97   : > { %p8368_p8 = pnand %p8367_p5, %p8363_p4 }
  0x99   : > { %8371 = shalt.err (!%p8368_p8)
}
  0x9a   : > { %s8372_s10 = scalar_lea.vmem %s8757_s27, 4096  ;;  %s8486_s12 = smov [#allocation5]  }
  0x9b   : > { %p8373_p9 = scmp.ne.s32.totalorder %s8757_s27, %s8372_s10  ;;  %s8377_s29 = sshll.u32 %s8486_s12, 4  ;;  %s8378_s29 = int_to_ptr.vmem [resolvable:$false] %s8377_s29 }
  0x9c   : > { %s8379_s25 = scalar_lea.vmem %s8378_s29, 8192  ;;  %p8380_p3 = scmp.lt.s32.totalorder %s8757_s27, %s8378_s29 }
  0x9d   : > { %p8375_p13 = pnand %p8373_p9, %p8333_p7  ;;  %p8381_p10 = scmp.lt.s32.totalorder %s8379_s25, %s8372_s10 }
  0x9f   : > { %p8376_p1 = pneg %p8375_p13  ;;  %p8382_p11 = por %p8381_p10, %p8380_p3 }
  0xa1   : > { %p8383_p0 = pnand %p8382_p11, %p8376_p1 }
  0xa3   : > { %8386 = shalt.err (!%p8383_p0)
}
  0xa4   : > { %7213 = dma.hbm_to_vmem [thread:$0]  (!%p8715_p12), %s8722_s4, 4096, %s8757_s27, %s498_s26, %s12758_s21, %s12758_s21, %s12757_s28  }
  0xa5   : > { %p12772_p7 = scmp.ne.s32.totalorder %s12749_s20, 0 }
  0xa7   : > { %520 = sbr.rel (%p12772_p7) target bundleno = 2964 (0xb94), region = 76 }
  0xac   : > { %s8788_s0 = sand.u32 1, %s8463_s30  }
  0xad   : > { %s8791_s2 = sshll.u32 %s8788_s0, 8  ;;  %s523_s15 = scalar_lea.sflag [#allocation3], %s8788_s0 }
  0xae   : > { %s8795_s24 = scalar_lea.vmem [#allocation2], %s8791_s2 }
  0xaf   : > { %8430 = dma.done.wait (%p8690_p6), %s523_s15, 4096  }
  0xb0   : > { %8432 = vsyncadd (%p8690_p6), %s523_s15, 4294963200  ;;  %s531_s20 = sand.u32 1, %s8587_s19   ;;  %s8803_s21 = scalar_lea.vmem [#allocation5], %s8791_s2 }
  0xb1   : > { %s532_s28 = scalar_lea.sflag [#allocation6], %s531_s20 }
  0xb2   : > { %8434 = dma.done.wait (%p8690_p6), %s532_s28, 4096  }
  0xb3   : > { %8436 = vsyncadd (%p8690_p6), %s532_s28, 4294963200  ;;  %p12773_p12 = scmp.eq.s32.totalorder %s8587_s19, 0 }
  0xb5   : > { %8438 = dma.done.wait (%p12773_p12), [#allocation6], 32   ;;  %p12774_p4 = pmov %p12773_p12 }
  0xb7   : > { %8440 = vsyncadd (%p12774_p4), [#allocation6], 4294967264  ;;  %p12775_p2 = pmov %p12774_p4 }
  0xb9   : > { %8442 = dma.done.wait (%p12775_p2), [#allocation9], 12320   ;;  %p12776_p5 = pmov %p12775_p2 }
  0xba   : > { %p12777_p8 = pmov %p12775_p2 }
  0xbb   : > { %8444 = vsyncadd (%p12776_p5), [#allocation9], 4294954976 }
  0xbc   : > { %8446 = dma.done.wait (%p12777_p8), [#allocation12], 12288   ;;  %p12778_p9 = pmov %p12775_p2 }
  0xbd   : > { %p12779_p6 = pmov %p12775_p2 }
  0xbe   : > { %8448 = vsyncadd (%p12778_p9), [#allocation12], 4294955008 }
  0xbf   : > { %8450 = dma.done.wait (%p12779_p6), [#allocation15], 8192   ;;  %p12780_p13 = pmov %p12775_p2 }
  0xc0   : > { %v8826_v0 = vld [vmem:[%s8795_s24] sm:$0xff]  ;;  %v8829_v1 = vld [vmem:[%s8795_s24 + $0x8] sm:$0xff]  ;;  %v8840_v5 = vld [vmem:[%s8795_s24 + $0x10] sm:$0xff]  ;;  %s12456_s25 = scalar_lea.vmem [#allocation16], %s8791_s2  ;;  %s6933_s2 = sshll.u32 %s8587_s19, 12 }
  0xc1   : > { %8452 = vsyncadd (%p12780_p13), [#allocation15], 4294959104  ;;  %v8832_v2 = vld [vmem:[%s8795_s24 + $0x20] sm:$0xff]  ;;  %v644_v3 = vadd.f32 %v8829_v1, %v8826_v0  ;;  %v8837_v4 = vld [vmem:[%s8795_s24 + $0x28] sm:$0xff]  ;;  %s6476_s15 = sshll.u32 %s12456_s25, 4  ;;  %s13101_s28 = sld [smem:[#allocation131_spill]]  ;;  %s12559_s15 = int_to_ptr.vmem [resolvable:$true] %s6476_s15 }
  0xc2   : > { %v8843_v6 = vld [vmem:[%s8795_s24 + $0x18] sm:$0xff]  ;;  %v650_v7 = vadd.f32 %v8837_v4, %v8832_v2  ;;  %v8848_v8 = vld [vmem:[%s8795_s24 + $0x30] sm:$0xff]  ;;  %v8858_v12 = vld [vmem:[%s8795_s24 + $0x40] sm:$0xff]  ;;  %s6463_s19 = scalar_lea.sflag [#allocation4], %s8788_s0  ;;  %s8387_s22 = scalar_lea.vmem %s12559_s15, 4096 }
  0xc3   : > { %v8851_v9 = vld [vmem:[%s8795_s24 + $0x38] sm:$0xff]  ;;  %645 = vadd.xlane.f32.xlu0 %v644_v3  ;;  %v647_v10 = vadd.f32 %v8843_v6, %v8840_v5  ;;  %v8861_v13 = vld [vmem:[%s8795_s24 + $0x48] sm:$0xff]  ;;  %v8864_v14 = vld [vmem:[%s8795_s24 + $0x50] sm:$0xff]  ;;  %p8388_p1 = scmp.ne.s32.totalorder %s12559_s15, %s8387_s22  ;;  %p13103_p3 = scmp.ne.s32.totalorder %s12765_s3, 0 }
  0xc4   : > { %651 = vadd.xlane.f32.xlu1 %v650_v7  ;;  %v653_v11 = vadd.f32 %v8851_v9, %v8848_v8  ;;  %v8867_v15 = vld [vmem:[%s8795_s24 + $0x58] sm:$0xff]  ;;  %v656_v16 = vadd.f32 %v8861_v13, %v8858_v12  ;;  %v8874_v18 = vld [vmem:[%s8795_s24 + $0x60] sm:$0xff]  ;;  %v8877_v19 = vld [vmem:[%s8795_s24 + $0x68] sm:$0xff]  ;;  %s8488_s27 = smov [#allocation16]  }
  0xc5   : > { %v659_v17 = vadd.f32 %v8867_v15, %v8864_v14  ;;  %v8880_v20 = vld [vmem:[%s8795_s24 + $0x70] sm:$0xff]  ;;  %v8883_v21 = vld [vmem:[%s8795_s24 + $0x78] sm:$0xff]  ;;  %v8886_v22 = vld [vmem:[%s8795_s24 + $0x80] sm:$0xff]  ;;  %v662_v24 = vadd.f32 %v8877_v19, %v8874_v18  ;;  %p8389_p10 = pnand %p8388_p1, %p13103_p3  ;;  %s8391_s4 = sshll.u32 %s8488_s27, 4  ;;  %s8392_s4 = int_to_ptr.vmem [resolvable:$false] %s8391_s4 }
  0xc6   : > { %v8889_v23 = vld [vmem:[%s8795_s24 + $0x88] sm:$0xff]  ;;  %v8894_v25 = vld [vmem:[%s8795_s24 + $0x90] sm:$0xff]  ;;  %v8897_v26 = vld [vmem:[%s8795_s24 + $0x98] sm:$0xff]  ;;  %v665_v27 = vadd.f32 %v8883_v21, %v8880_v20  ;;  %s8393_s26 = scalar_lea.vmem %s8392_s4, 8192  ;;  %p8394_p0 = scmp.lt.s32.totalorder %s12559_s15, %s8392_s4 }
  0xc7   : > { %648 = vadd.xlane.f32.xlu0 %v647_v10  ;;  %v8902_v28 = vld [vmem:[%s8795_s24 + $0xa0] sm:$0xff]  ;;  %v8905_v29 = vld [vmem:[%s8795_s24 + $0xa8] sm:$0xff]  ;;  %v668_v30 = vadd.f32 %v8889_v23, %v8886_v22  ;;  %v8910_v31 = vld [vmem:[%s8795_s24 + $0xb0] sm:$0xff]  ;;  %v671_v33 = vadd.f32 %v8897_v26, %v8894_v25  ;;  %p8390_p11 = pneg %p8389_p10  ;;  %p8395_p7 = scmp.lt.s32.totalorder %s8393_s26, %s8387_s22 }
  0xc8   : > { %654 = vadd.xlane.f32.xlu1 %v653_v11  ;;  %v8913_v32 = vld [vmem:[%s8795_s24 + $0xb8] sm:$0xff]  ;;  %v8918_v34 = vld [vmem:[%s8795_s24 + $0xc0] sm:$0xff]  ;;  %v8921_v35 = vld [vmem:[%s8795_s24 + $0xc8] sm:$0xff]  ;;  %v674_v36 = vadd.f32 %v8905_v29, %v8902_v28 }
  0xc9   : > { %v8926_v37 = vld [vmem:[%s8795_s24 + $0xd0] sm:$0xff]  ;;  %v8929_v38 = vld [vmem:[%s8795_s24 + $0xd8] sm:$0xff]  ;;  %v677_v39 = vadd.f32 %v8913_v32, %v8910_v31  ;;  %v8934_v40 = vld [vmem:[%s8795_s24 + $0xe0] sm:$0xff]  ;;  %v680_v42 = vadd.f32 %v8921_v35, %v8918_v34  ;;  %p8396_p12 = por %p8395_p7, %p8394_p0 }
  0xca   : > { %v8937_v41 = vld [vmem:[%s8795_s24 + $0xe8] sm:$0xff]  ;;  %v8942_v43 = vld [vmem:[%s8795_s24 + $0xf0] sm:$0xff]  ;;  %v8945_v44 = vld [vmem:[%s8795_s24 + $0xf8] sm:$0xff]  ;;  %v683_v45 = vadd.f32 %v8929_v38, %v8926_v37 }
  0xcb   : > { %657 = vadd.xlane.f32.xlu0 %v656_v16  ;;  %v686_v46 = vadd.f32 %v8937_v41, %v8934_v40  ;;  %v689_v47 = vadd.f32 %v8945_v44, %v8942_v43  ;;  %v7279_v48 = vld [vmem:[#allocation10 + $0x154] ss:$24 sps:$4 sm:$0xff]   ;;  %v7283_v50 = vld [vmem:[#allocation10 + $0x150] ss:$24 sps:$4 sm:$0xff]   ;;  %v7285_v52 = vld [vmem:[#allocation10 + $0x124] ss:$24 sps:$4 sm:$0xff]   ;;  %p8397_p4 = pnand %p8396_p12, %p8390_p11 }
  0xcc   : > { %660 = vadd.xlane.f32.xlu1 %v659_v17  ;;  %v7281_v49 = vld [vmem:[#allocation10 + $0x15c] ss:$24 sps:$4 sm:$0xff]   ;;  %v7284_v51 = vld [vmem:[#allocation10 + $0x158] ss:$24 sps:$4 sm:$0xff]   ;;  %v7287_v53 = vld [vmem:[#allocation10 + $0x12c] ss:$24 sps:$4 sm:$0xff]   ;;  %1611 = vmatprep.subr.bf16.mxu0 %v7279_v48 }
  0xcd   : > { %1724 = vmatprep.subr.bf16.mxu1 %v7281_v49  ;;  %1612 = vmatpush1.bf16.msra.mxu0 %v7283_v50  ;;  %v7289_v54 = vld [vmem:[#allocation10 + $0x120] ss:$24 sps:$4 sm:$0xff]   ;;  %v7291_v56 = vld [vmem:[#allocation10 + $0xf4] ss:$24 sps:$4 sm:$0xff]   ;;  %v7295_v58 = vld [vmem:[#allocation10 + $0xf0] ss:$24 sps:$4 sm:$0xff]  }
  0xce   : > { %1725 = vmatpush1.bf16.msra.mxu1 %v7284_v51  ;;  %v7290_v55 = vld [vmem:[#allocation10 + $0x128] ss:$24 sps:$4 sm:$0xff]   ;;  %1613 = vmatprep.subr.bf16.mxu0 %v7285_v52  ;;  %v7293_v57 = vld [vmem:[#allocation10 + $0xfc] ss:$24 sps:$4 sm:$0xff]   ;;  %v7296_v59 = vld [vmem:[#allocation10 + $0xf8] ss:$24 sps:$4 sm:$0xff]  }
  0xcf   : > { %663 = vadd.xlane.f32.xlu0 %v662_v24  ;;  %1726 = vmatprep.subr.bf16.mxu1 %v7287_v53  ;;  %v7297_v60 = vld [vmem:[#allocation10 + $0xc4] ss:$24 sps:$4 sm:$0xff]   ;;  %v7301_v62 = vld [vmem:[#allocation10 + $0xc0] ss:$24 sps:$4 sm:$0xff]   ;;  %v7303_v3 = vld [vmem:[#allocation10 + $0x94] ss:$24 sps:$4 sm:$0xff]  }
  0xd0   : > { %666 = vadd.xlane.f32.xlu1 %v665_v27  ;;  %v7299_v61 = vld [vmem:[#allocation10 + $0xcc] ss:$24 sps:$4 sm:$0xff]   ;;  %v7302_v63 = vld [vmem:[#allocation10 + $0xc8] ss:$24 sps:$4 sm:$0xff]   ;;  %v7305_v7 = vld [vmem:[#allocation10 + $0x9c] ss:$24 sps:$4 sm:$0xff]  }
  0xd1   : > { %1614 = vmatpush1.bf16.msra.mxu0 %v7289_v54  ;;  %v7307_v10 = vld [vmem:[#allocation10 + $0x90] ss:$24 sps:$4 sm:$0xff]   ;;  %v7309_v16 = vld [vmem:[#allocation10 + $0x64] ss:$24 sps:$4 sm:$0xff]   ;;  %v7313_v24 = vld [vmem:[#allocation10 + $0x60] ss:$24 sps:$4 sm:$0xff]  }
  0xd2   : > { %1727 = vmatpush1.bf16.msra.mxu1 %v7290_v55  ;;  %1615 = vmatprep.subr.bf16.mxu0 %v7291_v56  ;;  %v7308_v11 = vld [vmem:[#allocation10 + $0x98] ss:$24 sps:$4 sm:$0xff]   ;;  %v7311_v17 = vld [vmem:[#allocation10 + $0x6c] ss:$24 sps:$4 sm:$0xff]   ;;  %v7314_v27 = vld [vmem:[#allocation10 + $0x68] ss:$24 sps:$4 sm:$0xff]  }
  0xd3   : > { %669 = vadd.xlane.f32.xlu0 %v668_v30  ;;  %1728 = vmatprep.subr.bf16.mxu1 %v7293_v57  ;;  %v7315_v30 = vld [vmem:[#allocation10 + $0x34] ss:$24 sps:$4 sm:$0xff]  }
  0xd4   : > { %672 = vadd.xlane.f32.xlu1 %v671_v33  ;;  %v7317_v33 = vld [vmem:[#allocation10 + $0x3c] ss:$24 sps:$4 sm:$0xff]  }
  0xd5   : > { %1616 = vmatpush1.bf16.msra.mxu0 %v7295_v58  ;;  %v7327_v48 = vld [vmem:[#allocation10 + $0x2d4] ss:$24 sps:$4 sm:$0xff]  }
  0xd6   : > { %1729 = vmatpush1.bf16.msra.mxu1 %v7296_v59  ;;  %1617 = vmatprep.subr.bf16.mxu0 %v7297_v60  ;;  %v7329_v49 = vld [vmem:[#allocation10 + $0x2dc] ss:$24 sps:$4 sm:$0xff]  }
  0xd7   : > { %675 = vadd.xlane.f32.xlu0 %v674_v36  ;;  %1730 = vmatprep.subr.bf16.mxu1 %v7299_v61  ;;  %v7319_v36 = vld [vmem:[#allocation10 + $0x30] ss:$24 sps:$4 sm:$0xff]  }
  0xd8   : > { %678 = vadd.xlane.f32.xlu1 %v677_v39  ;;  %v7320_v39 = vld [vmem:[#allocation10 + $0x38] ss:$24 sps:$4 sm:$0xff]  }
  0xd9   : > { %1618 = vmatpush1.bf16.msra.mxu0 %v7301_v62 }
  0xda   : > { %1731 = vmatpush1.bf16.msra.mxu1 %v7302_v63  ;;  %1619 = vmatprep.subr.bf16.mxu0 %v7303_v3 }
  0xdb   : > { %681 = vadd.xlane.f32.xlu0 %v680_v42  ;;  %1732 = vmatprep.subr.bf16.mxu1 %v7305_v7  ;;  %v7321_v42 = vld [vmem:[#allocation10 + $0x4] ss:$24 sps:$4 sm:$0xff]  }
  0xdc   : > { %684 = vadd.xlane.f32.xlu1 %v683_v45  ;;  %v7323_v45 = vld [vmem:[#allocation10 + $0xc] ss:$24 sps:$4 sm:$0xff]  }
  0xdd   : > { %1620 = vmatpush1.bf16.msra.mxu0 %v7307_v10 }
  0xde   : > { %1733 = vmatpush1.bf16.msra.mxu1 %v7308_v11  ;;  %1621 = vmatprep.subr.bf16.mxu0 %v7309_v16 }
  0xdf   : > { %687 = vadd.xlane.f32.xlu0 %v686_v46  ;;  %1734 = vmatprep.subr.bf16.mxu1 %v7311_v17  ;;  %v7325_v46 = vld [vmem:[#allocation10] ss:$24 sps:$4 sm:$0xff]  }
  0xe0   : > { %690 = vadd.xlane.f32.xlu1 %v689_v47  ;;  %v7326_v47 = vld [vmem:[#allocation10 + $0x8] ss:$24 sps:$4 sm:$0xff]  }
  0xe1   : > { %1622 = vmatpush1.bf16.msra.mxu0 %v7313_v24 }
  0xe2   : > { %1735 = vmatpush1.bf16.msra.mxu1 %v7314_v27  ;;  %1623 = vmatprep.subr.bf16.mxu0 %v7315_v30 }
  0xe3   : > { %1736 = vmatprep.subr.bf16.mxu1 %v7317_v33 }
  0xe5   : > { %1624 = vmatpush1.bf16.msra.mxu0 %v7319_v36 }
  0xe6   : > { %1737 = vmatpush1.bf16.msra.mxu1 %v7320_v39  ;;  %1625 = vmatprep.subr.bf16.mxu0 %v7321_v42 }
  0xe7   : > { %1738 = vmatprep.subr.bf16.mxu1 %v7323_v45 }
  0xe9   : > { %1626 = vmatpush1.bf16.msra.mxu0 %v7325_v46 }
  0xea   : > { %1739 = vmatpush1.bf16.msra.mxu1 %v7326_v47  ;;  %1627 = vmatprep.subr.bf16.mxu0 %v7327_v48 }
  0xeb   : > { %1740 = vmatprep.subr.bf16.mxu1 %v7329_v49 }
 0x14c   : > { %v646_v50 = vpop.xlane.xlu0 %645 }
 0x14d   : > { %v693_v51 = vmul.f32 0.00390625, %v646_v50  ;;  %v652_v52 = vpop.xlane.xlu1 %651 }
 0x14e   : > { %v695_v53 = vmul.f32 0.00390625, %v652_v52 }
 0x14f   : > { %v8954_v54 = vsub.f32 %v8826_v0, %v693_v51  ;;  %v8957_v55 = vsub.f32 %v8829_v1, %v693_v51 }
 0x150   : > { %v8960_v56 = vsub.f32 %v8832_v2, %v695_v53  ;;  %v8963_v57 = vsub.f32 %v8837_v4, %v695_v53  ;;  %v649_v58 = vpop.xlane.xlu0 %648 }
 0x151   : > { %v694_v59 = vmul.f32 0.00390625, %v649_v58  ;;  %v655_v60 = vpop.xlane.xlu1 %654  ;;  %v741_v61 = vmul.f32 %v8954_v54, %v8954_v54  ;;  %v742_v62 = vmul.f32 %v8957_v55, %v8957_v55 }
 0x152   : > { %v696_v0 = vmul.f32 0.00390625, %v655_v60  ;;  %v745_v1 = vmul.f32 %v8960_v56, %v8960_v56  ;;  %v746_v2 = vmul.f32 %v8963_v57, %v8963_v57 }
 0x153   : > { %v8974_v63 = vsub.f32 %v8840_v5, %v694_v59  ;;  %v8977_v4 = vsub.f32 %v8843_v6, %v694_v59  ;;  %v773_v3 = vadd.f32 %v742_v62, %v741_v61 }
 0x154   : > { %v8980_v7 = vsub.f32 %v8848_v8, %v696_v0  ;;  %v8983_v10 = vsub.f32 %v8851_v9, %v696_v0  ;;  %v658_v11 = vpop.xlane.xlu0 %657  ;;  %v779_v24 = vadd.f32 %v746_v2, %v745_v1  ;;  %v7331_v0 = vld [vmem:[#allocation10 + $0x2d0] ss:$24 sps:$4 sm:$0xff]  }
 0x155   : > { %v697_v16 = vmul.f32 0.00390625, %v658_v11  ;;  %774 = vadd.xlane.f32.xlu0 %v773_v3  ;;  %v661_v17 = vpop.xlane.xlu1 %660  ;;  %v743_v27 = vmul.f32 %v8974_v63, %v8974_v63  ;;  %v744_v5 = vmul.f32 %v8977_v4, %v8977_v4  ;;  %v7332_v1 = vld [vmem:[#allocation10 + $0x2d8] ss:$24 sps:$4 sm:$0xff]   ;;  %1628 = vmatpush2.bf16.msra.mxu0 %v7331_v0 }
 0x156   : > { %v698_v6 = vmul.f32 0.00390625, %v661_v17  ;;  %v747_v30 = vmul.f32 %v8980_v7, %v8980_v7  ;;  %v748_v8 = vmul.f32 %v8983_v10, %v8983_v10  ;;  %1741 = vmatpush2.bf16.msra.mxu1 %v7332_v1  ;;  %v7344_v0 = vld [vmem:[#allocation10 + $0x278] ss:$24 sps:$4 sm:$0xff]  }
 0x157   : > { %v8994_v9 = vsub.f32 %v8858_v12, %v697_v16  ;;  %v8997_v33 = vsub.f32 %v8861_v13, %v697_v16  ;;  %v776_v36 = vadd.f32 %v744_v5, %v743_v27  ;;  %v7333_v5 = vld [vmem:[#allocation10 + $0x2a4] ss:$24 sps:$4 sm:$0xff]  }
 0x158   : > { %v9000_v39 = vsub.f32 %v8864_v14, %v698_v6  ;;  %v9003_v42 = vsub.f32 %v8867_v15, %v698_v6  ;;  %v664_v45 = vpop.xlane.xlu0 %663  ;;  %v782_v48 = vadd.f32 %v748_v8, %v747_v30  ;;  %v7335_v6 = vld [vmem:[#allocation10 + $0x2ac] ss:$24 sps:$4 sm:$0xff]   ;;  %1629 = vmatprep.subr.bf16.mxu0 %v7333_v5 }
 0x159   : > { %v699_v46 = vmul.f32 0.00390625, %v664_v45  ;;  %780 = vadd.xlane.f32.xlu0 %v779_v24  ;;  %777 = vadd.xlane.f32.xlu1 %v776_v36  ;;  %v667_v47 = vpop.xlane.xlu1 %666  ;;  %v749_v12 = vmul.f32 %v8994_v9, %v8994_v9  ;;  %v750_v13 = vmul.f32 %v8997_v33, %v8997_v33 }
 0x15a   : > { %v700_v49 = vmul.f32 0.00390625, %v667_v47  ;;  %v751_v14 = vmul.f32 %v9000_v39, %v9000_v39  ;;  %v752_v15 = vmul.f32 %v9003_v42, %v9003_v42  ;;  %1742 = vmatprep.subr.bf16.mxu1 %v7335_v6  ;;  %v7338_v47 = vld [vmem:[#allocation10 + $0x2a8] ss:$24 sps:$4 sm:$0xff]  }
 0x15b   : > { %v9014_v50 = vsub.f32 %v8874_v18, %v699_v46  ;;  %v9017_v51 = vsub.f32 %v8877_v19, %v699_v46  ;;  %v785_v52 = vadd.f32 %v750_v13, %v749_v12  ;;  %v7337_v46 = vld [vmem:[#allocation10 + $0x2a0] ss:$24 sps:$4 sm:$0xff]   ;;  %1743 = vmatpush2.bf16.msra.mxu1 %v7338_v47 }
 0x15c   : > { %v9020_v53 = vsub.f32 %v8880_v20, %v700_v49  ;;  %v9023_v58 = vsub.f32 %v8883_v21, %v700_v49  ;;  %v670_v59 = vpop.xlane.xlu0 %669  ;;  %v788_v62 = vadd.f32 %v752_v15, %v751_v14  ;;  %1630 = vmatpush2.bf16.msra.mxu0 %v7337_v46 }
 0x15d   : > { %v701_v60 = vmul.f32 0.00390625, %v670_v59  ;;  %783 = vadd.xlane.f32.xlu1 %v782_v48  ;;  %786 = vadd.xlane.f32.xlu0 %v785_v52  ;;  %v673_v61 = vpop.xlane.xlu1 %672  ;;  %v753_v18 = vmul.f32 %v9014_v50, %v9014_v50  ;;  %v754_v19 = vmul.f32 %v9017_v51, %v9017_v51 }
 0x15e   : > { %v702_v2 = vmul.f32 0.00390625, %v673_v61  ;;  %v755_v20 = vmul.f32 %v9020_v53, %v9020_v53  ;;  %v756_v21 = vmul.f32 %v9023_v58, %v9023_v58  ;;  %v7339_v61 = vld [vmem:[#allocation10 + $0x274] ss:$24 sps:$4 sm:$0xff]  }
 0x15f   : > { %v9034_v3 = vsub.f32 %v8886_v22, %v701_v60  ;;  %v9037_v11 = vsub.f32 %v8889_v23, %v701_v60  ;;  %v791_v16 = vadd.f32 %v754_v19, %v753_v18  ;;  %v7343_v19 = vld [vmem:[#allocation10 + $0x270] ss:$24 sps:$4 sm:$0xff]   ;;  %1631 = vmatprep.subr.bf16.mxu0 %v7339_v61 }
 0x160   : > { %v9040_v17 = vsub.f32 %v8894_v25, %v702_v2  ;;  %v9043_v24 = vsub.f32 %v8897_v26, %v702_v2  ;;  %v676_v27 = vpop.xlane.xlu0 %675  ;;  %v794_v8 = vadd.f32 %v756_v21, %v755_v20  ;;  %1632 = vmatpush2.bf16.msra.mxu0 %v7343_v19  ;;  %v7363_v19 = vld [vmem:[#allocation10 + $0x1b4] ss:$24 sps:$4 sm:$0xff]  }
 0x161   : > { %v703_v30 = vmul.f32 0.00390625, %v676_v27  ;;  %789 = vadd.xlane.f32.xlu1 %v788_v62  ;;  %792 = vadd.xlane.f32.xlu0 %v791_v16  ;;  %v679_v22 = vpop.xlane.xlu1 %678  ;;  %v757_v23 = vmul.f32 %v9034_v3, %v9034_v3  ;;  %v758_v36 = vmul.f32 %v9037_v11, %v9037_v11 }
 0x162   : > { %v704_v45 = vmul.f32 0.00390625, %v679_v22  ;;  %v759_v25 = vmul.f32 %v9040_v17, %v9040_v17  ;;  %v760_v26 = vmul.f32 %v9043_v24, %v9043_v24  ;;  %v7345_v22 = vld [vmem:[#allocation10 + $0x244] ss:$24 sps:$4 sm:$0xff]  }
 0x163   : > { %v9054_v48 = vsub.f32 %v8902_v28, %v703_v30  ;;  %v9057_v12 = vsub.f32 %v8905_v29, %v703_v30  ;;  %v797_v13 = vadd.f32 %v758_v36, %v757_v23  ;;  %v7349_v36 = vld [vmem:[#allocation10 + $0x240] ss:$24 sps:$4 sm:$0xff]   ;;  %1633 = vmatprep.subr.bf16.mxu0 %v7345_v22 }
 0x164   : > { %v9060_v49 = vsub.f32 %v8910_v31, %v704_v45  ;;  %v9063_v14 = vsub.f32 %v8913_v32, %v704_v45  ;;  %v682_v15 = vpop.xlane.xlu0 %681  ;;  %v800_v60 = vadd.f32 %v760_v26, %v759_v25  ;;  %v7341_v31 = vld [vmem:[#allocation10 + $0x27c] ss:$24 sps:$4 sm:$0xff]   ;;  %v7350_v45 = vld [vmem:[#allocation10 + $0x248] ss:$24 sps:$4 sm:$0xff]   ;;  %1634 = vmatpush2.bf16.msra.mxu0 %v7349_v36 }
 0x165   : > { %v705_v52 = vmul.f32 0.00390625, %v682_v15  ;;  %795 = vadd.xlane.f32.xlu1 %v794_v8  ;;  %798 = vadd.xlane.f32.xlu0 %v797_v13  ;;  %v685_v59 = vpop.xlane.xlu1 %684  ;;  %v761_v28 = vmul.f32 %v9054_v48, %v9054_v48  ;;  %v762_v29 = vmul.f32 %v9057_v12, %v9057_v12 }
 0x166   : > { %v706_v62 = vmul.f32 0.00390625, %v685_v59  ;;  %v763_v32 = vmul.f32 %v9060_v49, %v9060_v49  ;;  %v764_v18 = vmul.f32 %v9063_v14, %v9063_v14  ;;  %1744 = vmatprep.subr.bf16.mxu1 %v7341_v31  ;;  %v7353_v59 = vld [vmem:[#allocation10 + $0x21c] ss:$24 sps:$4 sm:$0xff]  }
 0x167   : > { %v9074_v1 = vsub.f32 %v8918_v34, %v705_v52  ;;  %v9077_v2 = vsub.f32 %v8921_v35, %v705_v52  ;;  %v803_v20 = vadd.f32 %v762_v29, %v761_v28  ;;  %1745 = vmatpush2.bf16.msra.mxu1 %v7344_v0  ;;  %v7351_v52 = vld [vmem:[#allocation10 + $0x214] ss:$24 sps:$4 sm:$0xff]   ;;  %v7356_v28 = vld [vmem:[#allocation10 + $0x218] ss:$24 sps:$4 sm:$0xff]   ;;  %v7357_v31 = vld [vmem:[#allocation10 + $0x1e4] ss:$24 sps:$4 sm:$0xff]  }
 0x168   : > { %v9080_v21 = vsub.f32 %v8926_v37, %v706_v62  ;;  %v9083_v16 = vsub.f32 %v8929_v38, %v706_v62  ;;  %v688_v27 = vpop.xlane.xlu0 %687  ;;  %v806_v6 = vadd.f32 %v764_v18, %v763_v32  ;;  %v7347_v37 = vld [vmem:[#allocation10 + $0x24c] ss:$24 sps:$4 sm:$0xff]   ;;  %1635 = vmatprep.subr.bf16.mxu0 %v7351_v52  ;;  %v7361_v32 = vld [vmem:[#allocation10 + $0x1e0] ss:$24 sps:$4 sm:$0xff]   ;;  %v7365_v0 = vld [vmem:[#allocation10 + $0x1bc] ss:$24 sps:$4 sm:$0xff]  }
 0x169   : > { %v707_v5 = vmul.f32 0.00390625, %v688_v27  ;;  %801 = vadd.xlane.f32.xlu1 %v800_v60  ;;  %804 = vadd.xlane.f32.xlu0 %v803_v20  ;;  %v691_v34 = vpop.xlane.xlu1 %690  ;;  %v765_v35 = vmul.f32 %v9074_v1, %v9074_v1  ;;  %v766_v30 = vmul.f32 %v9077_v2, %v9077_v2  ;;  %v7355_v60 = vld [vmem:[#allocation10 + $0x210] ss:$24 sps:$4 sm:$0xff]   ;;  %v7359_v62 = vld [vmem:[#allocation10 + $0x1ec] ss:$24 sps:$4 sm:$0xff]  }
 0x16a   : > { %v708_v8 = vmul.f32 0.00390625, %v691_v34  ;;  %v767_v38 = vmul.f32 %v9080_v21, %v9080_v21  ;;  %v768_v23 = vmul.f32 %v9083_v16, %v9083_v16  ;;  %1746 = vmatprep.subr.bf16.mxu1 %v7347_v37  ;;  %1636 = vmatpush2.bf16.msra.mxu0 %v7355_v60  ;;  %v7362_v18 = vld [vmem:[#allocation10 + $0x1e8] ss:$24 sps:$4 sm:$0xff]   ;;  %v7368_v27 = vld [vmem:[#allocation10 + $0x1b8] ss:$24 sps:$4 sm:$0xff]  }
 0x16b   : > { %v9094_v25 = vsub.f32 %v8934_v40, %v707_v5  ;;  %v9097_v26 = vsub.f32 %v8937_v41, %v707_v5  ;;  %v809_v46 = vadd.f32 %v766_v30, %v765_v35  ;;  %1747 = vmatpush2.bf16.msra.mxu1 %v7350_v45  ;;  %1637 = vmatprep.subr.bf16.mxu0 %v7357_v31  ;;  %v7367_v20 = vld [vmem:[#allocation10 + $0x1b0] ss:$24 sps:$4 sm:$0xff]   ;;  %v7369_v5 = vld [vmem:[#allocation10 + $0x184] ss:$24 sps:$4 sm:$0xff]  }
 0x16c   : > { %v9100_v47 = vsub.f32 %v8942_v43, %v708_v8  ;;  %v9103_v13 = vsub.f32 %v8945_v44, %v708_v8  ;;  %v812_v15 = vadd.f32 %v768_v23, %v767_v38  ;;  %1748 = vmatprep.subr.bf16.mxu1 %v7353_v59  ;;  %v7371_v34 = vld [vmem:[#allocation10 + $0x18c] ss:$24 sps:$4 sm:$0xff]   ;;  %v7374_v35 = vld [vmem:[#allocation10 + $0x188] ss:$24 sps:$4 sm:$0xff]  }
 0x16d   : > { %807 = vadd.xlane.f32.xlu1 %v806_v6  ;;  %810 = vadd.xlane.f32.xlu0 %v809_v46  ;;  %v769_v40 = vmul.f32 %v9094_v25, %v9094_v25  ;;  %v770_v41 = vmul.f32 %v9097_v26, %v9097_v26  ;;  %v7373_v6 = vld [vmem:[#allocation10 + $0x180] ss:$24 sps:$4 sm:$0xff]   ;;  %v7377_v30 = vld [vmem:[#allocation10 + $0x164] ss:$24 sps:$4 sm:$0xff]   ;;  %v902_v46 = vlaneseq }
 0x16e   : > { %v771_v43 = vmul.f32 %v9100_v47, %v9100_v47  ;;  %v772_v44 = vmul.f32 %v9103_v13, %v9103_v13  ;;  %1638 = vmatpush2.bf16.msra.mxu0 %v7361_v32 }
 0x16f   : > { %v815_v29 = vadd.f32 %v770_v41, %v769_v40  ;;  %1749 = vmatpush2.bf16.msra.mxu1 %v7356_v28  ;;  %1639 = vmatprep.subr.bf16.mxu0 %v7363_v19 }
 0x170   : > { %v818_v61 = vadd.f32 %v772_v44, %v771_v43  ;;  %1750 = vmatprep.subr.bf16.mxu1 %v7359_v62  ;;  %v9113_v44 = vshrl.u32 %v902_v46, 7 }
 0x171   : > { %813 = vadd.xlane.f32.xlu1 %v812_v15  ;;  %816 = vadd.xlane.f32.xlu0 %v815_v29 }
 0x172   : > { %1640 = vmatpush2.bf16.msra.mxu0 %v7367_v20  ;;  %12781 = vst [vmem:[#allocation29_spill] sm:$0xff] %v9113_v44  ;;  %v9116_v32 = vsub.s32 1, %v9113_v44 }
 0x173   : > { %1751 = vmatpush2.bf16.msra.mxu1 %v7362_v18  ;;  %1641 = vmatprep.subr.bf16.mxu0 %v7369_v5  ;;  %v9119_v18 = vsub.s32 0, %v9113_v44 }
 0x174   : > { %1752 = vmatprep.subr.bf16.mxu1 %v7365_v0  ;;  %12782 = vst [vmem:[#allocation30_spill] sm:$0xff] %v9116_v32  ;;  %v642_v0 = vld [vmem:[#allocation7] sm:$0x3] }
 0x175   : > { %819 = vadd.xlane.f32.xlu1 %v818_v61  ;;  %12783 = vst [vmem:[#allocation31_spill] sm:$0xff] %v9119_v18 }
 0x176   : > { %1642 = vmatpush2.bf16.msra.mxu0 %v7373_v6 }
 0x177   : > { %1753 = vmatpush2.bf16.msra.mxu1 %v7368_v27  ;;  %1837 = vmatprep.subr.bf16.mxu0 %v7377_v30  ;;  %v9125_v30 = vrot.slane %v642_v0, %v9119_v18 }
 0x178   : > { %1754 = vmatprep.subr.bf16.mxu1 %v7371_v34 }
 0x17b   : > { %1755 = vmatpush2.bf16.msra.mxu1 %v7374_v35  ;;  %v9122_v35 = vrot.slane %v642_v0, %v9116_v32 }
 0x1de   : > { %v775_v22 = vpop.xlane.xlu0 %774 }
 0x1df   : > { %v821_v37 = vmul.f32 0.00390625, %v775_v22 }
 0x1e1   : > { %v837_v8 = vadd.f32 1e-05, %v821_v37  ;;  %v643_v37 = vld [vmem:[#allocation8] sm:$0x3] }
 0x1e2   : > { %v778_v38 = vpop.xlane.xlu1 %777  ;;  %v781_v23 = vpop.xlane.xlu0 %780 }
 0x1e3   : > { %7663 = vrsqrt.f32 %v837_v8  ;;  %v822_v36 = vmul.f32 0.00390625, %v778_v38  ;;  %v823_v45 = vmul.f32 0.00390625, %v781_v23 }
 0x1e5   : > { %v838_v15 = vadd.f32 1e-05, %v822_v36  ;;  %v839_v40 = vadd.f32 1e-05, %v823_v45 }
 0x1e6   : > { %v784_v41 = vpop.xlane.xlu1 %783  ;;  %v787_v52 = vpop.xlane.xlu0 %786 }
 0x1e7   : > { %7665 = vrsqrt.f32 %v838_v15  ;;  %v824_v59 = vmul.f32 0.00390625, %v784_v41  ;;  %v825_v43 = vmul.f32 0.00390625, %v787_v52  ;;  %v9135_v52 = vrot.slane %v643_v37, %v9119_v18 }
 0x1e8   : > { %7667 = vrsqrt.f32 %v839_v40  ;;  %v9131_v40 = vrot.slane %v643_v37, %v9116_v32 }
 0x1e9   : > { %v840_v60 = vadd.f32 1e-05, %v824_v59  ;;  %v841_v28 = vadd.f32 1e-05, %v825_v43 }
 0x1ea   : > { %v790_v29 = vpop.xlane.xlu1 %789  ;;  %v793_v61 = vpop.xlane.xlu0 %792 }
 0x1eb   : > { %7669 = vrsqrt.f32 %v840_v60  ;;  %v826_v31 = vmul.f32 0.00390625, %v790_v29  ;;  %v827_v62 = vmul.f32 0.00390625, %v793_v61 }
 0x1ec   : > { %7671 = vrsqrt.f32 %v841_v28 }
 0x1ed   : > { %v842_v19 = vadd.f32 1e-05, %v826_v31  ;;  %v843_v20 = vadd.f32 1e-05, %v827_v62 }
 0x1ee   : > { %v796_v27 = vpop.xlane.xlu1 %795  ;;  %v799_v6 = vpop.xlane.xlu0 %798 }
 0x1ef   : > { %7673 = vrsqrt.f32 %v842_v19  ;;  %v828_v5 = vmul.f32 0.00390625, %v796_v27  ;;  %v829_v36 = vmul.f32 0.00390625, %v799_v6 }
 0x1f0   : > { %v7664_v34 = vpop.eup %7663  ;;  %7675 = vrsqrt.f32 %v843_v20 }
 0x1f1   : > { %v844_v22 = vadd.f32 1e-05, %v828_v5  ;;  %v870_v8 = vmul.f32 %v7664_v34, %v8957_v55  ;;  %v869_v38 = vmul.f32 %v7664_v34, %v8954_v54  ;;  %v845_v29 = vadd.f32 1e-05, %v829_v36 }
 0x1f2   : > { %v802_v23 = vpop.xlane.xlu1 %801  ;;  %v805_v62 = vpop.xlane.xlu0 %804 }
 0x1f3   : > { %7677 = vrsqrt.f32 %v844_v22  ;;  %v830_v45 = vmul.f32 0.00390625, %v802_v23  ;;  %v913_v15 = vmul.f32 %v9122_v35, %v870_v8  ;;  %v912_v41 = vmul.f32 %v9125_v30, %v869_v38  ;;  %v7375_v38 = vld [vmem:[#allocation10 + $0x160] ss:$24 sps:$4 sm:$0xff]  }
 0x1f4   : > { %v7666_v46 = vpop.eup %7665  ;;  %v831_v37 = vmul.f32 0.00390625, %v805_v62 }
 0x1f5   : > { %v7668_v59 = vpop.eup %7667  ;;  %v846_v55 = vadd.f32 1e-05, %v830_v45  ;;  %v872_v54 = vmul.f32 %v7666_v46, %v8977_v4  ;;  %v871_v60 = vmul.f32 %v7666_v46, %v8974_v63  ;;  %v956_v19 = vadd.f32 %v9131_v40, %v913_v15 }
 0x1f6   : > { %v808_v43 = vpop.xlane.xlu1 %807  ;;  %v874_v28 = vmul.f32 %v7668_v59, %v8963_v57  ;;  %v955_v20 = vadd.f32 %v9135_v52, %v912_v41  ;;  %v873_v6 = vmul.f32 %v7668_v59, %v8960_v56 }
 0x1f7   : > { %v915_v61 = vmul.f32 %v9122_v35, %v872_v54  ;;  %v914_v0 = vmul.f32 %v9125_v30, %v871_v60  ;;  %7679 = vrsqrt.f32 %v846_v55  ;;  %v832_v27 = vmul.f32 0.00390625, %v808_v43 }
 0x1f8   : > { %v7670_v31 = vpop.eup %7669  ;;  %v917_v34 = vmul.f32 %v9122_v35, %v874_v28  ;;  %7681 = vrsqrt.f32 %v845_v29  ;;  %v916_v54 = vmul.f32 %v9125_v30, %v873_v6  ;;  %v847_v60 = vadd.f32 1e-05, %v831_v37  ;;  %v7378_v28 = vld [vmem:[#allocation10 + $0x130] ss:$24 sps:$4 sm:$0xff]   ;;  %v7381_v37 = vld [vmem:[#allocation10 + $0x100] ss:$24 sps:$4 sm:$0xff]  }
 0x1f9   : > { %v958_v4 = vadd.f32 %v9131_v40, %v915_v61  ;;  %v876_v5 = vmul.f32 %v7670_v31, %v8983_v10  ;;  %v7672_v63 = vpop.eup %7671  ;;  %v957_v57 = vadd.f32 %v9135_v52, %v914_v0  ;;  %v875_v22 = vmul.f32 %v7670_v31, %v8980_v7  ;;  %v7380_v10 = vld [vmem:[#allocation10 + $0x134] ss:$24 sps:$4 sm:$0xff]   ;;  %v811_v61 = vpop.xlane.xlu0 %810 }
 0x1fa   : > { %v848_v15 = vadd.f32 1e-05, %v832_v27  ;;  %v878_v56 = vmul.f32 %v7672_v63, %v8997_v33  ;;  %v814_v41 = vpop.xlane.xlu1 %813  ;;  %v960_v59 = vadd.f32 %v9131_v40, %v917_v34  ;;  %v833_v34 = vmul.f32 0.00390625, %v811_v61 }
 0x1fb   : > { %v9150_v8 = vpack.c.bf16 %v958_v4, %v956_v19  ;;  %v9152_v36 = vpack.c.bf16 %v957_v57, %v955_v20  ;;  %v919_v45 = vmul.f32 %v9122_v35, %v876_v5  ;;  %v918_v46 = vmul.f32 %v9125_v30, %v875_v22  ;;  %v7383_v19 = vld [vmem:[#allocation10 + $0x104] ss:$24 sps:$4 sm:$0xff]  }
 0x1fc   : > { %v7674_v23 = vpop.eup %7673  ;;  %v921_v29 = vmul.f32 %v9122_v35, %v878_v56  ;;  %7683 = vrsqrt.f32 %v848_v15  ;;  %v834_v20 = vmul.f32 0.00390625, %v814_v41  ;;  %v959_v4 = vadd.f32 %v9135_v52, %v916_v54  ;;  %v7384_v41 = vld [vmem:[#allocation10 + $0xd0] ss:$24 sps:$4 sm:$0xff]  }
 0x1fd   : > { %1643 = vmatprep.mubr.bf16.mxu0 %v9150_v8  ;;  %1756 = vmatprep.mubr.bf16.mxu1 %v9150_v8  ;;  %v880_v7 = vmul.f32 %v7674_v23, %v9003_v42  ;;  %v962_v55 = vadd.f32 %v9131_v40, %v919_v45  ;;  %v7676_v43 = vpop.eup %7675  ;;  %v961_v62 = vadd.f32 %v9135_v52, %v918_v46  ;;  %7685 = vrsqrt.f32 %v847_v60  ;;  %v7389_v60 = vld [vmem:[#allocation10 + $0xa4] ss:$24 sps:$4 sm:$0xff]  }
 0x1fe   : > { %1644 = vmatmul.mubr.bf16.vlgmr.msra.gmra.mxu0 %v9152_v36  ;;  %1757 = vmatmul.mubr.bf16.vlgmr.msra.gmra.mxu1 %v9152_v36  ;;  %v879_v0 = vmul.f32 %v7674_v23, %v9000_v39  ;;  %v877_v5 = vmul.f32 %v7672_v63, %v8994_v9  ;;  %v964_v6 = vadd.f32 %v9131_v40, %v921_v29  ;;  %v850_v23 = vadd.f32 1e-05, %v834_v20  ;;  %v820_v63 = vpop.xlane.xlu1 %819 }
 0x1ff   : > { %1838 = vmatpush1.bf16.msra.mxu0 %v7375_v38  ;;  %v923_v33 = vmul.f32 %v9122_v35, %v880_v7  ;;  %v9167_v31 = vpack.c.bf16 %v962_v55, %v960_v59  ;;  %v882_v39 = vmul.f32 %v7676_v43, %v9017_v51  ;;  %v9179_v22 = vpack.c.bf16 %v961_v62, %v959_v4  ;;  %v817_v7 = vpop.xlane.xlu0 %816 }
 0x200   : > { %v7678_v42 = vpop.eup %7677  ;;  %1839 = vmatprep.subr.bf16.mxu0 %v7380_v10  ;;  %v922_v38 = vmul.f32 %v9125_v30, %v879_v0  ;;  %v7386_v10 = vld [vmem:[#allocation10 + $0xd4] ss:$24 sps:$4 sm:$0xff]   ;;  %v920_v51 = vmul.f32 %v9125_v30, %v877_v5  ;;  %v849_v46 = vadd.f32 1e-05, %v833_v34  ;;  %7687 = vrsqrt.f32 %v850_v23 }
 0x201   : > { %v966_v27 = vadd.f32 %v9131_v40, %v923_v33  ;;  %1653 = vmatprep.mubr.bf16.mxu0 %v9167_v31  ;;  %1766 = vmatprep.mubr.bf16.mxu1 %v9167_v31  ;;  %v884_v57 = vmul.f32 %v7678_v42, %v9023_v58  ;;  %v925_v15 = vmul.f32 %v9122_v35, %v882_v39  ;;  %v836_v54 = vmul.f32 0.00390625, %v820_v63 }
 0x202   : > { %v965_v59 = vadd.f32 %v9135_v52, %v922_v38  ;;  %v883_v55 = vmul.f32 %v7678_v42, %v9020_v53  ;;  %v963_v33 = vadd.f32 %v9135_v52, %v920_v51  ;;  %v881_v61 = vmul.f32 %v7676_v43, %v9014_v50  ;;  %v7387_v42 = vld [vmem:[#allocation10 + $0xa0] ss:$24 sps:$4 sm:$0xff]   ;;  %v7395_v38 = vld [vmem:[#allocation10 + $0x44] ss:$24 sps:$4 sm:$0xff]  }
 0x203   : > { %1840 = vmatpush1.bf16.msra.mxu0 %v7378_v28  ;;  %v9182_v45 = vpack.c.bf16 %v966_v27, %v964_v6  ;;  %v927_v9 = vmul.f32 %v9122_v35, %v884_v57  ;;  %7689 = vrsqrt.f32 %v849_v46  ;;  %v835_v62 = vmul.f32 0.00390625, %v817_v7  ;;  %v7390_v6 = vld [vmem:[#allocation10 + $0x70] ss:$24 sps:$4 sm:$0xff]  }
 0x204   : > { %1841 = vmatprep.subr.bf16.mxu0 %v7383_v19  ;;  %v7680_v58 = vpop.eup %7679  ;;  %v968_v19 = vadd.f32 %v9131_v40, %v925_v15  ;;  %v9199_v53 = vpack.c.bf16 %v965_v59, %v963_v33  ;;  %v926_v20 = vmul.f32 %v9125_v30, %v883_v55  ;;  %v852_v27 = vadd.f32 1e-05, %v836_v54  ;;  %v7396_v55 = vld [vmem:[#allocation10 + $0x10] ss:$24 sps:$4 sm:$0xff]  }
 0x205   : > { %v7682_v56 = vpop.eup %7681  ;;  %v970_v28 = vadd.f32 %v9131_v40, %v927_v9  ;;  %v888_v29 = vmul.f32 %v7680_v58, %v9043_v24  ;;  %v7392_v24 = vld [vmem:[#allocation10 + $0x74] ss:$24 sps:$4 sm:$0xff]   ;;  %v851_v43 = vadd.f32 1e-05, %v835_v62 }
 0x206   : > { %1654 = vmatmul.mubr.bf16.gmra.mxu0 %v9179_v22  ;;  %1767 = vmatmul.mubr.bf16.gmra.mxu1 %v9179_v22  ;;  %v886_v0 = vmul.f32 %v7682_v56, %v9037_v11  ;;  %v924_v11 = vmul.f32 %v9125_v30, %v881_v61  ;;  %v969_v39 = vadd.f32 %v9135_v52, %v926_v20  ;;  %7691 = vrsqrt.f32 %v852_v27  ;;  %v7399_v20 = vld [vmem:[#allocation10 + $0x2e0] ss:$24 sps:$4 sm:$0xff]  }
 0x207   : > { %1663 = vmatprep.mubr.bf16.mxu0 %v9182_v45  ;;  %1776 = vmatprep.mubr.bf16.mxu1 %v9182_v45  ;;  %v9202_v4 = vpack.c.bf16 %v970_v28, %v968_v19  ;;  %v931_v5 = vmul.f32 %v9122_v35, %v888_v29  ;;  %v885_v63 = vmul.f32 %v7682_v56, %v9034_v3  ;;  %7693 = vrsqrt.f32 %v851_v43  ;;  %v7401_v28 = vld [vmem:[#allocation10 + $0x2e4] ss:$24 sps:$4 sm:$0xff]  }
 0x208   : > { %1842 = vmatpush1.bf16.msra.mxu0 %v7381_v37  ;;  %v929_v57 = vmul.f32 %v9122_v35, %v886_v0  ;;  %v887_v37 = vmul.f32 %v7680_v58, %v9040_v17  ;;  %v967_v9 = vadd.f32 %v9135_v52, %v924_v11  ;;  %v7393_v17 = vld [vmem:[#allocation10 + $0x40] ss:$24 sps:$4 sm:$0xff]   ;;  %v7402_v11 = vld [vmem:[#allocation10 + $0x2b0] ss:$24 sps:$4 sm:$0xff]  }
 0x209   : > { %1843 = vmatprep.subr.bf16.mxu0 %v7386_v10  ;;  %v7684_v50 = vpop.eup %7683  ;;  %v974_v23 = vadd.f32 %v9131_v40, %v931_v5  ;;  %v928_v3 = vmul.f32 %v9125_v30, %v885_v63  ;;  %v7405_v63 = vld [vmem:[#allocation10 + $0x280] ss:$24 sps:$4 sm:$0xff]  }
 0x20a   : > { %v7686_v34 = vpop.eup %7685  ;;  %v892_v10 = vmul.f32 %v7684_v50, %v9063_v14  ;;  %v972_v51 = vadd.f32 %v9131_v40, %v929_v57  ;;  %v9219_v15 = vpack.c.bf16 %v969_v39, %v967_v9  ;;  %v930_v58 = vmul.f32 %v9125_v30, %v887_v37 }
 0x20b   : > { %v890_v46 = vmul.f32 %v7686_v34, %v9057_v12  ;;  %v971_v61 = vadd.f32 %v9135_v52, %v928_v3  ;;  %v889_v62 = vmul.f32 %v7686_v34, %v9054_v48  ;;  %v7407_v34 = vld [vmem:[#allocation10 + $0x284] ss:$24 sps:$4 sm:$0xff]  }
 0x20c   : > { %1844 = vmatpush1.bf16.msra.mxu0 %v7384_v41  ;;  %v9222_v7 = vpack.c.bf16 %v974_v23, %v972_v51  ;;  %v7398_v41 = vld [vmem:[#allocation10 + $0x14] ss:$24 sps:$4 sm:$0xff]   ;;  %v935_v14 = vmul.f32 %v9122_v35, %v892_v10  ;;  %v973_v54 = vadd.f32 %v9135_v52, %v930_v58 }
 0x20d   : > { %1845 = vmatprep.subr.bf16.mxu0 %v7389_v60  ;;  %v7688_v59 = vpop.eup %7687  ;;  %v933_v12 = vmul.f32 %v9122_v35, %v890_v46  ;;  %v891_v60 = vmul.f32 %v7684_v50, %v9060_v49  ;;  %v932_v48 = vmul.f32 %v9125_v30, %v889_v62  ;;  %v7410_v46 = vld [vmem:[#allocation10 + $0x254] ss:$24 sps:$4 sm:$0xff]   ;;  %v7417_v62 = vld [vmem:[#allocation10 + $0x1c0] ss:$24 sps:$4 sm:$0xff]  }
 0x20e   : > { %1664 = vmatmul.mubr.bf16.gmra.mxu0 %v9199_v53  ;;  %1777 = vmatmul.mubr.bf16.gmra.mxu1 %v9199_v53  ;;  %v978_v29 = vadd.f32 %v9131_v40, %v935_v14  ;;  %v896_v33 = vmul.f32 %v7688_v59, %v9083_v16  ;;  %v895_v57 = vmul.f32 %v7688_v59, %v9080_v21  ;;  %v7413_v14 = vld [vmem:[#allocation10 + $0x224] ss:$24 sps:$4 sm:$0xff]  }
 0x20f   : > { %1673 = vmatprep.mubr.bf16.mxu0 %v9202_v4  ;;  %1786 = vmatprep.mubr.bf16.mxu1 %v9202_v4  ;;  %v976_v19 = vadd.f32 %v9131_v40, %v933_v12  ;;  %v934_v49 = vmul.f32 %v9125_v30, %v891_v60  ;;  %v975_v37 = vadd.f32 %v9135_v52, %v932_v48 }
 0x210   : > { %1846 = vmatpush1.bf16.msra.mxu0 %v7387_v42  ;;  %v7690_v56 = vpop.eup %7689  ;;  %v9239_v42 = vpack.c.bf16 %v973_v54, %v971_v61  ;;  %v939_v16 = vmul.f32 %v9122_v35, %v896_v33  ;;  %v938_v51 = vmul.f32 %v9125_v30, %v895_v57  ;;  %v7411_v54 = vld [vmem:[#allocation10 + $0x220] ss:$24 sps:$4 sm:$0xff]  }
 0x211   : > { %1847 = vmatprep.subr.bf16.mxu0 %v7392_v24  ;;  %v894_v0 = vmul.f32 %v7690_v56, %v9077_v2  ;;  %v9242_v27 = vpack.c.bf16 %v978_v29, %v976_v19  ;;  %v7404_v24 = vld [vmem:[#allocation10 + $0x2b4] ss:$24 sps:$4 sm:$0xff]   ;;  %v977_v43 = vadd.f32 %v9135_v52, %v934_v49  ;;  %v7414_v29 = vld [vmem:[#allocation10 + $0x1f0] ss:$24 sps:$4 sm:$0xff]  }
 0x212   : > { %v981_v58 = vadd.f32 %v9135_v52, %v938_v51  ;;  %v7422_v19 = vld [vmem:[#allocation10 + $0x194] ss:$24 sps:$4 sm:$0xff]  }
 0x213   : > { %v7692_v5 = vpop.eup %7691  ;;  %v937_v2 = vmul.f32 %v9122_v35, %v894_v0  ;;  %v997_v9 = vpack.c.bf16 %v977_v43, %v975_v37 }
 0x214   : > { %1848 = vmatpush1.bf16.msra.mxu0 %v7390_v6  ;;  %v7694_v50 = vpop.eup %7693  ;;  %v982_v6 = vadd.f32 %v9131_v40, %v939_v16  ;;  %v900_v39 = vmul.f32 %v7692_v5, %v9103_v13 }
 0x215   : > { %1849 = vmatprep.subr.bf16.mxu0 %v7395_v38  ;;  %v893_v38 = vmul.f32 %v7690_v56, %v9074_v1  ;;  %v980_v23 = vadd.f32 %v9131_v40, %v937_v2  ;;  %v898_v10 = vmul.f32 %v7694_v50, %v9097_v26  ;;  %v7408_v26 = vld [vmem:[#allocation10 + $0x250] ss:$24 sps:$4 sm:$0xff]   ;;  %v897_v12 = vmul.f32 %v7694_v50, %v9094_v25 }
 0x216   : > { %1674 = vmatmul.mubr.bf16.gmra.mxu0 %v9219_v15  ;;  %1787 = vmatmul.mubr.bf16.gmra.mxu1 %v9219_v15 }
 0x217   : > { %1683 = vmatprep.mubr.bf16.mxu0 %v9222_v7  ;;  %1796 = vmatprep.mubr.bf16.mxu1 %v9222_v7  ;;  %v1000_v21 = vpack.c.bf16 %v982_v6, %v980_v23  ;;  %v936_v13 = vmul.f32 %v9125_v30, %v893_v38  ;;  %v941_v1 = vmul.f32 %v9122_v35, %v898_v10 }
 0x218   : > { %1850 = vmatpush1.bf16.msra.mxu0 %v7393_v17  ;;  %v943_v17 = vmul.f32 %v9122_v35, %v900_v39 }
 0x219   : > { %1851 = vmatprep.subr.bf16.mxu0 %v7398_v41  ;;  %v899_v41 = vmul.f32 %v7692_v5, %v9100_v47  ;;  %v979_v3 = vadd.f32 %v9135_v52, %v936_v13  ;;  %v984_v56 = vadd.f32 %v9131_v40, %v941_v1  ;;  %v940_v47 = vmul.f32 %v9125_v30, %v897_v12 }
 0x21a   : > { %v986_v59 = vadd.f32 %v9131_v40, %v943_v17  ;;  %v7419_v40 = vld [vmem:[#allocation10 + $0x1c4] ss:$24 sps:$4 sm:$0xff]  }
 0x21b   : > { %v942_v35 = vmul.f32 %v9125_v30, %v899_v41  ;;  %v983_v33 = vadd.f32 %v9135_v52, %v940_v47  ;;  %v7420_v30 = vld [vmem:[#allocation10 + $0x190] ss:$24 sps:$4 sm:$0xff]  }
 0x21c   : > { %1852 = vmatpush1.bf16.msra.mxu0 %v7396_v55  ;;  %v999_v55 = vpack.c.bf16 %v981_v58, %v979_v3  ;;  %v1002_v60 = vpack.c.bf16 %v986_v59, %v984_v56 }
 0x21d   : > { %1853 = vmatprep.subr.bf16.mxu0 %v7401_v28  ;;  %v7416_v28 = vld [vmem:[#allocation10 + $0x1f4] ss:$24 sps:$4 sm:$0xff]   ;;  %v985_v25 = vadd.f32 %v9135_v52, %v942_v35  ;;  %v12635_v52 = vsub.s32 2, %v9113_v44 }
 0x21e   : > { %1684 = vmatmul.mubr.bf16.gmra.mxu0 %v9239_v42  ;;  %1797 = vmatmul.mubr.bf16.gmra.mxu1 %v9239_v42 }
 0x21f   : > { %1693 = vmatprep.mubr.bf16.mxu0 %v9242_v27  ;;  %1806 = vmatprep.mubr.bf16.mxu1 %v9242_v27  ;;  %v1001_v61 = vpack.c.bf16 %v985_v25, %v983_v33 }
 0x220   : > { %1854 = vmatpush2.bf16.msra.mxu0 %v7399_v20 }
 0x221   : > { %1855 = vmatprep.subr.bf16.mxu0 %v7404_v24 }
 0x224   : > { %1856 = vmatpush2.bf16.msra.mxu0 %v7402_v11 }
 0x225   : > { %1857 = vmatprep.subr.bf16.mxu0 %v7407_v34 }
 0x226   : > { %1694 = vmatmul.mubr.bf16.gmra.mxu0 %v997_v9  ;;  %1807 = vmatmul.mubr.bf16.gmra.mxu1 %v997_v9 }
 0x227   : > { %1703 = vmatprep.mubr.bf16.mxu0 %v1000_v21  ;;  %1816 = vmatprep.mubr.bf16.mxu1 %v1000_v21 }
 0x228   : > { %1858 = vmatpush2.bf16.msra.mxu0 %v7405_v63 }
 0x229   : > { %1859 = vmatprep.subr.bf16.mxu0 %v7410_v46 }
 0x22c   : > { %1860 = vmatpush2.bf16.msra.mxu0 %v7408_v26 }
 0x22d   : > { %1861 = vmatprep.subr.bf16.mxu0 %v7413_v14 }
 0x22e   : > { %1704 = vmatmul.mubr.bf16.gmra.mxu0 %v999_v55  ;;  %1817 = vmatmul.mubr.bf16.gmra.mxu1 %v999_v55 }
 0x22f   : > { %1713 = vmatprep.mubr.bf16.mxu0 %v1002_v60  ;;  %1826 = vmatprep.mubr.bf16.mxu1 %v1002_v60 }
 0x230   : > { %1862 = vmatpush2.bf16.msra.mxu0 %v7411_v54 }
 0x231   : > { %1863 = vmatprep.subr.bf16.mxu0 %v7416_v28 }
 0x234   : > { %1864 = vmatpush2.bf16.msra.mxu0 %v7414_v29 }
 0x235   : > { %1865 = vmatprep.subr.bf16.mxu0 %v7419_v40 }
 0x236   : > { %1714 = vmatmul.mubr.bf16.gmra.mxu0 %v1001_v61  ;;  %1827 = vmatmul.mubr.bf16.gmra.mxu1 %v1001_v61 }
 0x237   : > { %1869 = vmatprep.mubr.bf16.mxu0 %v9150_v8  ;;  %v9288_v8 = vld [vmem:[%s12610_s5] sm:$0x3f] }
 0x238   : > { %1866 = vmatpush2.bf16.msra.mxu0 %v7417_v62 }
 0x239   : > { %1867 = vmatprep.subr.bf16.mxu0 %v7422_v19 }
 0x23c   : > { %1868 = vmatpush2.bf16.msra.mxu0 %v7420_v30 }
 0x23f   : > { %1870 = vmatmul.mubr.bf16.vlgmr.msra.gmra.mxu0 %v9152_v36 }
 0x240   : > { %1879 = vmatprep.mubr.bf16.mxu0 %v9167_v31 }
 0x247   : > { %1880 = vmatmul.mubr.bf16.gmra.mxu0 %v9179_v22  ;;  %v9292_v22 = vrot.slane %v9288_v8, %v9119_v18 }
 0x248   : > { %1889 = vmatprep.mubr.bf16.mxu0 %v9182_v45  ;;  %v9297_v45 = vrot.slane %v9288_v8, %v12635_v52 }
 0x24f   : > { %1890 = vmatmul.mubr.bf16.gmra.mxu0 %v9199_v53 }
 0x250   : > { %1899 = vmatprep.mubr.bf16.mxu0 %v9202_v4 }
 0x257   : > { %1900 = vmatmul.mubr.bf16.gmra.mxu0 %v9219_v15  ;;  %v9303_v15 = vrot.slane %v9288_v8, %v9116_v32 }
 0x258   : > { %1909 = vmatprep.mubr.bf16.mxu0 %v9222_v7 }
 0x25f   : > { %1910 = vmatmul.mubr.bf16.gmra.mxu0 %v9239_v42 }
 0x260   : > { %1919 = vmatprep.mubr.bf16.mxu0 %v9242_v27 }
 0x267   : > { %1920 = vmatmul.mubr.bf16.gmra.mxu0 %v997_v9 }
 0x268   : > { %1929 = vmatprep.mubr.bf16.mxu0 %v1000_v21 }
 0x26f   : > { %1930 = vmatmul.mubr.bf16.gmra.mxu0 %v999_v55 }
 0x270   : > { %1939 = vmatprep.mubr.bf16.mxu0 %v1002_v60 }
 0x277   : > { %1940 = vmatmul.mubr.bf16.gmra.mxu0 %v1001_v61 }
 0x2be   : > { %v1645_v36 = vpop.f32.mrf.mxu0  ;;  %v1758_v31 = vpop.f32.mrf.mxu1 }
 0x2bf   : > { %v1646_v42 = vadd.f32 %v1645_v36, %v9292_v22  ;;  %v1759_v20 = vadd.f32 %v1758_v31, %v9297_v45 }
 0x2c0   : > { %v1647_v53 = vpop.f32.mrf.mxu0  ;;  %v9299_v4 = vpop.f32.mrf.mxu1 }
 0x2c1   : > { %v1648_v5 = vadd.f32 %v1647_v53, %v9303_v15 }
 0x2c2   : > { %v1649_v7 = vpop.f32.mrf.mxu0  ;;  %v1762_v0 = vpop.f32.mrf.mxu1 }
 0x2c3   : > { %v1650_v49 = vadd.f32 %v1649_v7, %v9292_v22  ;;  %v1763_v27 = vadd.f32 %v1762_v0, %v9297_v45 }
 0x2c4   : > { %v1651_v24 = vpop.f32.mrf.mxu0  ;;  %v9309_v16 = vpop.f32.mrf.mxu1 }
 0x2c5   : > { %v1950_v48 = vpack.c.bf16 %v1650_v49, %v1646_v42  ;;  %v9312_v2 = vpack.c.bf16 %v1763_v27, %v1759_v20  ;;  %v1652_v50 = vadd.f32 %v1651_v24, %v9303_v15 }
 0x2c6   : > { %v1655_v11 = vpop.f32.mrf.mxu0  ;;  %v1768_v43 = vpop.f32.mrf.mxu1 }
 0x2c7   : > { %v2336_v57 = vpack.c.bf16 %v1652_v50, %v1648_v5  ;;  %v9316_v34 = vadd.f32 %v1655_v11, %v9292_v22  ;;  %7014 = vmatprep.mubr.bf16.mxu1 %v1950_v48  ;;  %v1769_v10 = vadd.f32 %v1768_v43, %v9297_v45 }
 0x2c8   : > { %v1657_v6 = vpop.f32.mrf.mxu0  ;;  %v9318_v39 = vpop.f32.mrf.mxu1 }
 0x2c9   : > { %v9321_v37 = vadd.f32 %v1657_v6, %v9303_v15  ;;  %7078 = vmatprep.mubr.bf16.mxu0 %v2336_v57 }
 0x2ca   : > { %v1659_v38 = vpop.f32.mrf.mxu0  ;;  %v1772_v23 = vpop.f32.mrf.mxu1 }
 0x2cb   : > { %v9325_v9 = vadd.f32 %v1659_v38, %v9292_v22  ;;  %v1773_v63 = vadd.f32 %v1772_v23, %v9297_v45 }
 0x2cc   : > { %v1661_v51 = vpop.f32.mrf.mxu0  ;;  %v9328_v21 = vpop.f32.mrf.mxu1 }
 0x2cd   : > { %v9332_v17 = vpack.c.bf16 %v1773_v63, %v1769_v10  ;;  %v9335_v13 = vadd.f32 %v1661_v51, %v9303_v15 }
 0x2ce   : > { %v1665_v1 = vpop.f32.mrf.mxu0  ;;  %v1778_v26 = vpop.f32.mrf.mxu1 }
 0x2cf   : > { %v9340_v41 = vadd.f32 %v1665_v1, %v9292_v22  ;;  %v1779_v55 = vadd.f32 %v1778_v26, %v9297_v45 }
 0x2d0   : > { %v1667_v14 = vpop.f32.mrf.mxu0  ;;  %v9342_v59 = vpop.f32.mrf.mxu1 }
 0x2d1   : > { %v9345_v3 = vadd.f32 %v1667_v14, %v9303_v15 }
 0x2d2   : > { %v1669_v12 = vpop.f32.mrf.mxu0  ;;  %v1782_v56 = vpop.f32.mrf.mxu1 }
 0x2d3   : > { %v9349_v54 = vadd.f32 %v1669_v12, %v9292_v22  ;;  %v1783_v35 = vadd.f32 %v1782_v56, %v9297_v45 }
 0x2d4   : > { %v1671_v60 = vpop.f32.mrf.mxu0  ;;  %v9352_v28 = vpop.f32.mrf.mxu1 }
 0x2d5   : > { %v9356_v29 = vpack.c.bf16 %v1783_v35, %v1779_v55  ;;  %v9359_v25 = vadd.f32 %v1671_v60, %v9303_v15 }
 0x2d6   : > { %v1675_v40 = vpop.f32.mrf.mxu0  ;;  %v9361_v33 = vpop.f32.mrf.mxu1 }
 0x2d7   : > { %v9366_v62 = vadd.f32 %v1675_v40, %v9292_v22 }
 0x2d8   : > { %v1677_v19 = vpop.f32.mrf.mxu0  ;;  %v9368_v30 = vpop.f32.mrf.mxu1 }
 0x2d9   : > { %v9371_v36 = vadd.f32 %v1677_v19, %v9303_v15 }
 0x2da   : > { %v1679_v31 = vpop.f32.mrf.mxu0  ;;  %v9373_v53 = vpop.f32.mrf.mxu1 }
 0x2db   : > { %v9376_v7 = vadd.f32 %v1679_v31, %v9292_v22 }
 0x2dc   : > { %v1681_v0 = vpop.f32.mrf.mxu0  ;;  %v9378_v42 = vpop.f32.mrf.mxu1 }
 0x2dd   : > { %v9383_v49 = vadd.f32 %v1681_v0, %v9303_v15 }
 0x2de   : > { %v1685_v27 = vpop.f32.mrf.mxu0  ;;  %v9385_v24 = vpop.f32.mrf.mxu1 }
 0x2df   : > { %v9390_v48 = vadd.f32 %v1685_v27, %v9292_v22 }
 0x2e0   : > { %v1687_v50 = vpop.f32.mrf.mxu0  ;;  %v9392_v11 = vpop.f32.mrf.mxu1 }
 0x2e1   : > { %v9395_v43 = vadd.f32 %v1687_v50, %v9303_v15 }
 0x2e2   : > { %v1689_v57 = vpop.f32.mrf.mxu0  ;;  %v9397_v6 = vpop.f32.mrf.mxu1 }
 0x2e3   : > { %12784 = vst [vmem:[#allocation32_spill] sm:$0xff] %v9395_v43  ;;  %v9400_v38 = vadd.f32 %v1689_v57, %v9292_v22 }
 0x2e4   : > { %v1691_v23 = vpop.f32.mrf.mxu0  ;;  %v9402_v10 = vpop.f32.mrf.mxu1 }
 0x2e5   : > { %v9407_v51 = vadd.f32 %v1691_v23, %v9303_v15 }
 0x2e6   : > { %v1695_v1 = vpop.f32.mrf.mxu0  ;;  %v9409_v26 = vpop.f32.mrf.mxu1 }
 0x2e7   : > { %v9414_v12 = vadd.f32 %v1695_v1, %v9292_v22 }
 0x2e8   : > { %v1697_v56 = vpop.f32.mrf.mxu0  ;;  %v9416_v55 = vpop.f32.mrf.mxu1 }
 0x2e9   : > { %12785 = vst [vmem:[#allocation33_spill] sm:$0xff] %v9414_v12  ;;  %v9419_v35 = vadd.f32 %v1697_v56, %v9303_v15 }
 0x2ea   : > { %v1699_v60 = vpop.f32.mrf.mxu0  ;;  %v1812_v40 = vpop.f32.mrf.mxu1 }
 0x2eb   : > { %12786 = vst [vmem:[#allocation34_spill] sm:$0xff] %v9419_v35  ;;  %v9422_v19 = vadd.f32 %v1699_v60, %v9292_v22 }
 0x2ec   : > { %v1701_v31 = vpop.f32.mrf.mxu0  ;;  %v9424_v0 = vpop.f32.mrf.mxu1 }
 0x2ed   : > { %12787 = vst [vmem:[#allocation35_spill] sm:$0xff] %v9422_v19  ;;  %v9429_v50 = vadd.f32 %v1701_v31, %v9303_v15  ;;  %v1119_v19 = vsub.s32 4, %v9113_v44 }
 0x2ee   : > { %v1705_v57 = vpop.f32.mrf.mxu0  ;;  %v1818_v23 = vpop.f32.mrf.mxu1 }
 0x2ef   : > { %12788 = vst [vmem:[#allocation36_spill] sm:$0xff] %v9429_v50  ;;  %v9434_v56 = vadd.f32 %v1705_v57, %v9292_v22  ;;  %v12645_v57 = vsub.s32 3, %v9113_v44  ;;  %v1123_v50 = vsub.s32 5, %v9113_v44 }
 0x2f0   : > { %v1707_v52 = vpop.f32.mrf.mxu0  ;;  %v1820_v60 = vpop.f32.mrf.mxu1 }
 0x2f1   : > { %12789 = vst [vmem:[#allocation37_spill] sm:$0xff] %v9434_v56  ;;  %v9437_v14 = vadd.f32 %v1707_v52, %v9303_v15 }
 0x2f2   : > { %v1709_v5 = vpop.f32.mrf.mxu0  ;;  %v1822_v63 = vpop.f32.mrf.mxu1 }
 0x2f3   : > { %12790 = vst [vmem:[#allocation38_spill] sm:$0xff] %v9437_v14  ;;  %v9440_v27 = vadd.f32 %v1709_v5, %v9292_v22  ;;  %v1823_v56 = vadd.f32 %v1822_v63, %v9297_v45  ;;  %v9485_v63 = vrot.slane %v9288_v8, %v1119_v19 }
 0x2f4   : > { %v1711_v31 = vpop.f32.mrf.mxu0  ;;  %v1824_v20 = vpop.f32.mrf.mxu1 }
 0x2f5   : > { %12791 = vst [vmem:[#allocation39_spill] sm:$0xff] %v9440_v27  ;;  %v9445_v1 = vadd.f32 %v1711_v31, %v9303_v15  ;;  %v9459_v31 = vrot.slane %v9288_v8, %v12645_v57 }
 0x2f6   : > { %v1715_v58 = vpop.f32.mrf.mxu0  ;;  %v1828_v47 = vpop.f32.mrf.mxu1 }
 0x2f7   : > { %12792 = vst [vmem:[#allocation40_spill] sm:$0xff] %v9445_v1  ;;  %v9451_v46 = vadd.f32 %v1715_v58, %v9292_v22  ;;  %v1829_v52 = vadd.f32 %v1828_v47, %v9297_v45  ;;  %v1825_v1 = vadd.f32 %v1824_v20, %v9459_v31  ;;  %v1821_v20 = vadd.f32 %v1820_v60, %v9459_v31 }
 0x2f8   : > { %v1717_v5 = vpop.f32.mrf.mxu0  ;;  %v1830_v32 = vpop.f32.mrf.mxu1 }
 0x2f9   : > { %v9454_v18 = vadd.f32 %v1717_v5, %v9303_v15  ;;  %v1819_v5 = vadd.f32 %v1818_v23, %v9297_v45  ;;  %v1831_v57 = vadd.f32 %v1830_v32, %v9459_v31 }
 0x2fa   : > { %v1719_v61 = vpop.f32.mrf.mxu0  ;;  %v1832_v35 = vpop.f32.mrf.mxu1 }
 0x2fb   : > { %v9465_v58 = vadd.f32 %v1719_v61, %v9292_v22  ;;  %v1833_v14 = vadd.f32 %v1832_v35, %v9297_v45  ;;  %v9479_v61 = vrot.slane %v9288_v8, %v1123_v50  ;;  %v1964_v35 = vpack.c.bf16 %v1823_v56, %v1819_v5 }
 0x2fc   : > { %v1721_v27 = vpop.f32.mrf.mxu0  ;;  %v1834_v12 = vpop.f32.mrf.mxu1  ;;  %v1809_v8 = vadd.f32 %v9409_v26, %v9297_v45 }
 0x2fd   : > { %v1965_v43 = vpack.c.bf16 %v1833_v14, %v1829_v52  ;;  %v9475_v47 = vadd.f32 %v1721_v27, %v9303_v15  ;;  %v1835_v22 = vadd.f32 %v1834_v12, %v9459_v31  ;;  %v2350_v15 = vpack.c.bf16 %v1825_v1, %v1821_v20 }
 0x2fe   : > { %v1813_v27 = vadd.f32 %v1812_v40, %v9297_v45  ;;  %v1811_v40 = vadd.f32 %v9416_v55, %v9459_v31 }
 0x2ff   : > { %v2343_v32 = vpack.c.bf16 %v9475_v47, %v9454_v18  ;;  %v2351_v23 = vpack.c.bf16 %v1835_v22, %v1831_v57  ;;  %v1871_v44 = vpop.f32.mrf.mxu0  ;;  %6998 = vmatprep.subr.bf16.mxu1 %v1965_v43  ;;  %v1968_v18 = vld [vmem:[%s8803_s21 + $0x10] sm:$0xff] }
 0x300   : > { %6999 = vmatpush3.bf16.xpose.msra.mxu1 %v1965_v43  ;;  %v1872_v56 = vadd.f32 %v1871_v44, %v9485_v63  ;;  %v1815_v43 = vadd.f32 %v9424_v0, %v9459_v31  ;;  %v1963_v52 = vpack.c.bf16 %v1813_v27, %v1809_v8  ;;  %v1803_v0 = vadd.f32 %v9397_v6, %v9297_v45 }
 0x301   : > { %v1873_v14 = vpop.f32.mrf.mxu0  ;;  %7000 = vmatprep.subr.bf16.mxu1 %v1964_v35  ;;  %7062 = vmatprep.subr.bf16.mxu0 %v2351_v23  ;;  %v1801_v6 = vadd.f32 %v9392_v11, %v9459_v31  ;;  %v1789_v11 = vadd.f32 %v9361_v33, %v9297_v45 }
 0x302   : > { %v1874_v12 = vadd.f32 %v1873_v14, %v9479_v61  ;;  %7063 = vmatpush3.bf16.xpose.msra.mxu0 %v2351_v23  ;;  %v2349_v44 = vpack.c.bf16 %v1815_v43, %v1811_v40  ;;  %v1795_v40 = vadd.f32 %v9378_v42, %v9459_v31  ;;  %v1785_v42 = vadd.f32 %v9352_v28, %v9459_v31 }
 0x303   : > { %v1875_v50 = vpop.f32.mrf.mxu0  ;;  %7064 = vmatprep.subr.bf16.mxu0 %v2350_v15  ;;  %v1775_v28 = vadd.f32 %v9328_v21, %v9459_v31  ;;  %v1765_v21 = vadd.f32 %v9309_v16, %v9459_v31 }
 0x304   : > { %v1876_v60 = vadd.f32 %v1875_v50, %v9485_v63 }
 0x305   : > { %v1877_v19 = vpop.f32.mrf.mxu0 }
 0x306   : > { %v9495_v1 = vpack.c.bf16 %v1876_v60, %v1872_v56  ;;  %v1878_v57 = vadd.f32 %v1877_v19, %v9479_v61 }
 0x307   : > { %v1881_v5 = vpop.f32.mrf.mxu0 }
 0x308   : > { %v9500_v22 = vpack.c.bf16 %v1878_v57, %v1874_v12  ;;  %7001 = vmatpush3.bf16.xpose.msra.mxu1 %v1964_v35  ;;  %v1882_v14 = vadd.f32 %v1881_v5, %v9485_v63  ;;  %v1799_v12 = vadd.f32 %v9385_v24, %v9297_v45  ;;  %v1805_v35 = vadd.f32 %v9402_v10, %v9459_v31 }
 0x309   : > { %v1883_v20 = vpop.f32.mrf.mxu0  ;;  %7002 = vmatprep.subr.bf16.mxu1 %v1963_v52  ;;  %v1793_v10 = vadd.f32 %v9373_v53, %v9297_v45 }
 0x30a   : > { %v1884_v26 = vadd.f32 %v1883_v20, %v9479_v61  ;;  %7065 = vmatpush3.bf16.xpose.msra.mxu0 %v2350_v15  ;;  %v1962_v56 = vpack.c.bf16 %v1803_v0, %v1799_v12  ;;  %v2348_v43 = vpack.c.bf16 %v1805_v35, %v1801_v6  ;;  %v1791_v20 = vadd.f32 %v9368_v30, %v9459_v31 }
 0x30b   : > { %v1885_v23 = vpop.f32.mrf.mxu0  ;;  %7066 = vmatprep.subr.bf16.mxu0 %v2349_v44 }
 0x30c   : > { %v1886_v55 = vadd.f32 %v1885_v23, %v9485_v63  ;;  %v2347_v53 = vpack.c.bf16 %v1795_v40, %v1791_v20 }
 0x30d   : > { %v1887_v27 = vpop.f32.mrf.mxu0 }
 0x30e   : > { %v9511_v50 = vpack.c.bf16 %v1886_v55, %v1882_v14  ;;  %v1888_v15 = vadd.f32 %v1887_v27, %v9479_v61  ;;  %v1781_v55 = vadd.f32 %v9342_v59, %v9459_v31 }
 0x30f   : > { %v9516_v60 = vpop.f32.mrf.mxu0 }
 0x310   : > { %v9518_v8 = vpack.c.bf16 %v1888_v15, %v1884_v26  ;;  %7003 = vmatpush3.bf16.xpose.msra.mxu1 %v1963_v52  ;;  %v1961_v26 = vpack.c.bf16 %v1793_v10, %v1789_v11  ;;  %v2346_v27 = vpack.c.bf16 %v1785_v42, %v1781_v55 }
 0x311   : > { %v1893_v19 = vpop.f32.mrf.mxu0  ;;  %7004 = vmatprep.subr.bf16.mxu1 %v1962_v56 }
 0x312   : > { %v1894_v24 = vadd.f32 %v1893_v19, %v9479_v61  ;;  %7067 = vmatpush3.bf16.xpose.msra.mxu0 %v2349_v44  ;;  %v1771_v19 = vadd.f32 %v9318_v39, %v9459_v31 }
 0x313   : > { %v9523_v57 = vpop.f32.mrf.mxu0  ;;  %7068 = vmatprep.subr.bf16.mxu0 %v2348_v43 }
 0x314   : > { %v2345_v11 = vpack.c.bf16 %v1775_v28, %v1771_v19 }
 0x315   : > { %v1897_v5 = vpop.f32.mrf.mxu0 }
 0x316   : > { %v1898_v52 = vadd.f32 %v1897_v5, %v9479_v61 }
 0x317   : > { %v9532_v44 = vpop.f32.mrf.mxu0 }
 0x318   : > { %v9534_v0 = vpack.c.bf16 %v1898_v52, %v1894_v24  ;;  %7005 = vmatpush3.bf16.xpose.msra.mxu1 %v1962_v56 }
 0x319   : > { %v1903_v23 = vpop.f32.mrf.mxu0  ;;  %7006 = vmatprep.subr.bf16.mxu1 %v1961_v26 }
 0x31a   : > { %v1904_v45 = vadd.f32 %v1903_v23, %v9479_v61  ;;  %7069 = vmatpush3.bf16.xpose.msra.mxu0 %v2348_v43 }
 0x31b   : > { %v9537_v33 = vpop.f32.mrf.mxu0  ;;  %7070 = vmatprep.subr.bf16.mxu0 %v2347_v53 }
 0x31d   : > { %v1907_v14 = vpop.f32.mrf.mxu0 }
 0x31e   : > { %v1908_v30 = vadd.f32 %v1907_v14, %v9479_v61 }
 0x31f   : > { %v9544_v12 = vpop.f32.mrf.mxu0 }
 0x320   : > { %v9546_v35 = vpack.c.bf16 %v1908_v30, %v1904_v45  ;;  %7007 = vmatpush3.bf16.xpose.msra.mxu1 %v1961_v26  ;;  %v1761_v26 = vadd.f32 %v9299_v4, %v9459_v31 }
 0x321   : > { %v1913_v15 = vpop.f32.mrf.mxu0  ;;  %7008 = vmatprep.subr.bf16.mxu1 %v9356_v29 }
 0x322   : > { %v1914_v6 = vadd.f32 %v1913_v15, %v9479_v61  ;;  %7071 = vmatpush3.bf16.xpose.msra.mxu0 %v2347_v53  ;;  %v2344_v23 = vpack.c.bf16 %v1765_v21, %v1761_v26  ;;  %v12806_v21 = vld [vmem:[#allocation37_spill] sm:$0xff] }
 0x323   : > { %v1915_v56 = vpop.f32.mrf.mxu0  ;;  %7072 = vmatprep.subr.bf16.mxu0 %v2346_v27 }
 0x325   : > { %v1917_v43 = vpop.f32.mrf.mxu0 }
 0x326   : > { %v1918_v59 = vadd.f32 %v1917_v43, %v9479_v61 }
 0x327   : > { %v1921_v24 = vpop.f32.mrf.mxu0 }
 0x328   : > { %v9555_v10 = vpack.c.bf16 %v1918_v59, %v1914_v6  ;;  %7009 = vmatpush3.bf16.xpose.msra.mxu1 %v9356_v29  ;;  %v12793_v59 = vpack.c.bf16 %v9325_v9, %v9316_v34  ;;  %v12796_v34 = vpack.c.bf16 %v9359_v25, %v9345_v3  ;;  %v1916_v9 = vadd.f32 %v1915_v56, %v9485_v63 }
 0x329   : > { %v1923_v40 = vpop.f32.mrf.mxu0  ;;  %7010 = vmatprep.subr.bf16.mxu1 %v9332_v17  ;;  %v12798_v3 = vpack.c.bf16 %v9400_v38, %v9390_v48  ;;  %v12799_v25 = vpack.c.bf16 %v9383_v49, %v9371_v36  ;;  %v1892_v48 = vadd.f32 %v9516_v60, %v9485_v63  ;;  %v12802_v38 = vld [vmem:[#allocation35_spill] sm:$0xff]  ;;  %v12803_v36 = vld [vmem:[#allocation33_spill] sm:$0xff] }
 0x32a   : > { %v1924_v5 = vadd.f32 %v1923_v40, %v9479_v61  ;;  %7073 = vmatpush3.bf16.xpose.msra.mxu0 %v2346_v27  ;;  %v12795_v40 = vpack.c.bf16 %v9335_v13, %v9321_v37  ;;  %v1906_v37 = vadd.f32 %v9537_v33, %v9485_v63  ;;  %v1896_v33 = vadd.f32 %v9523_v57, %v9485_v63  ;;  %v12811_v57 = vld [vmem:[#allocation40_spill] sm:$0xff] }
 0x32b   : > { %v1925_v52 = vpop.f32.mrf.mxu0  ;;  %7074 = vmatprep.subr.bf16.mxu0 %v2345_v11  ;;  %v12804_v49 = vpack.c.bf16 %v12802_v38, %v12803_v36 }
 0x32c   : > { %v1926_v19 = vadd.f32 %v1925_v52, %v9485_v63 }
 0x32d   : > { %v1927_v20 = vpop.f32.mrf.mxu0 }
 0x32e   : > { %v1928_v39 = vadd.f32 %v1927_v20, %v9479_v61 }
 0x32f   : > { %v1931_v53 = vpop.f32.mrf.mxu0 }
 0x330   : > { %v9565_v29 = vpack.c.bf16 %v1928_v39, %v1924_v5  ;;  %7011 = vmatpush3.bf16.xpose.msra.mxu1 %v9332_v17  ;;  %v1932_v28 = vadd.f32 %v1931_v53, %v9485_v63  ;;  %v1922_v5 = vadd.f32 %v1921_v24, %v9485_v63  ;;  %v2233_v24 = vpack.c.bf16 %v1896_v33, %v1892_v48  ;;  %v12809_v39 = vld [vmem:[#allocation34_spill] sm:$0xff] }
 0x331   : > { %v1933_v45 = vpop.f32.mrf.mxu0  ;;  %7012 = vmatprep.subr.bf16.mxu1 %v9312_v2  ;;  %v12812_v53 = vld [vmem:[#allocation38_spill] sm:$0xff] }
 0x332   : > { %v1934_v42 = vadd.f32 %v1933_v45, %v9479_v61  ;;  %7075 = vmatpush3.bf16.xpose.msra.mxu0 %v2345_v11  ;;  %v2236_v52 = vpack.c.bf16 %v1926_v19, %v1922_v5  ;;  %v1972_v19 = vld [vmem:[%s8803_s21 + $0x30] sm:$0xff]  ;;  %v1975_v33 = vld [vmem:[%s8803_s21 + $0x48] sm:$0xff] }
 0x333   : > { %v1935_v14 = vpop.f32.mrf.mxu0  ;;  %7076 = vmatprep.subr.bf16.mxu0 %v2344_v23 }
 0x334   : > { %v1936_v31 = vadd.f32 %v1935_v14, %v9485_v63 }
 0x335   : > { %v1937_v16 = vpop.f32.mrf.mxu0 }
 0x336   : > { %v1938_v30 = vadd.f32 %v1937_v16, %v9479_v61  ;;  %v2237_v11 = vpack.c.bf16 %v1936_v31, %v1932_v28 }
 0x337   : > { %v1941_v55 = vpop.f32.mrf.mxu0 }
 0x338   : > { %v9571_v27 = vpack.c.bf16 %v1938_v30, %v1934_v42  ;;  %7013 = vmatpush3.bf16.xpose.msra.mxu1 %v9312_v2  ;;  %v1942_v15 = vadd.f32 %v1941_v55, %v9485_v63  ;;  %v12794_v2 = vpack.c.bf16 %v9349_v54, %v9340_v41  ;;  %v1912_v41 = vadd.f32 %v9544_v12, %v9485_v63 }
 0x339   : > { %v1943_v4 = vpop.f32.mrf.mxu0  ;;  %v12797_v54 = vpack.c.bf16 %v9376_v7, %v9366_v62  ;;  %v1902_v12 = vadd.f32 %v9532_v44, %v9485_v63  ;;  %v12800_v62 = vld [vmem:[#allocation32_spill] sm:$0xff]  ;;  %v12805_v44 = vld [vmem:[#allocation39_spill] sm:$0xff] }
 0x33a   : > { %7077 = vmatpush3.bf16.xpose.msra.mxu0 %v2344_v23  ;;  %v2235_v13 = vpack.c.bf16 %v1916_v9, %v1912_v41  ;;  %v12801_v7 = vpack.c.bf16 %v9407_v51, %v12800_v62  ;;  %v12807_v20 = vpack.c.bf16 %v12805_v44, %v12806_v21  ;;  %v12808_v51 = vld [vmem:[#allocation36_spill] sm:$0xff]  ;;  %v12814_v23 = vpack.c.bf16 %v9465_v58, %v9451_v46  ;;  %v1976_v62 = vld [vmem:[%s8803_s21 + $0x50] sm:$0xff] }
 0x33b   : > { %v1945_v17 = vpop.f32.mrf.mxu0  ;;  %v2234_v56 = vpack.c.bf16 %v1906_v37, %v1902_v12  ;;  %v12810_v26 = vpack.c.bf16 %v12808_v51, %v12809_v39  ;;  %v1944_v42 = vadd.f32 %v1943_v4, %v9479_v61  ;;  %v1966_v58 = vld [vmem:[%s8803_s21] sm:$0xff]  ;;  %v1973_v41 = vld [vmem:[%s8803_s21 + $0x38] sm:$0xff] }
 0x33c   : > { %v1946_v6 = vadd.f32 %v1945_v17, %v9485_v63  ;;  %v12813_v63 = vpack.c.bf16 %v12811_v57, %v12812_v53  ;;  %v1969_v17 = vld [vmem:[%s8803_s21 + $0x18] sm:$0xff]  ;;  %v1974_v37 = vld [vmem:[%s8803_s21 + $0x40] sm:$0xff]  ;;  %v1979_v53 = vld [vmem:[%s8803_s21 + $0x68] sm:$0xff] }
 0x33d   : > { %v1947_v60 = vpop.f32.mrf.mxu0  ;;  %v1978_v44 = vld [vmem:[%s8803_s21 + $0x60] sm:$0xff] }
 0x33e   : > { %v2238_v43 = vpack.c.bf16 %v1946_v6, %v1942_v15  ;;  %v1948_v45 = vadd.f32 %v1947_v60, %v9479_v61  ;;  %v1970_v6 = vld [vmem:[%s8803_s21 + $0x20] sm:$0xff] }
 0x33f   : > { %7015 = vmatmul.mubr.bf16.vlgmr.msra.gmra.mxu1 %v12793_v59 }
 0x340   : > { %7030 = vmatprep.subr.bf16.mxu1 %v2238_v43  ;;  %7018 = vmatprep.mubr.bf16.mxu1 %v12794_v2  ;;  %v9638_v14 = vpack.c.bf16 %v1948_v45, %v1944_v42  ;;  %v6750_v45 = vld [vmem:[%s8803_s21 + $0x80] sm:$0xff] }
 0x341   : > { %7031 = vmatpush3.bf16.msra.mxu1 %v2238_v43  ;;  %7079 = vmatmul.mubr.bf16.vlgmr.msra.gmra.mxu0 %v12795_v40  ;;  %v1971_v40 = vld [vmem:[%s8803_s21 + $0x28] sm:$0xff] }
 0x342   : > { %7032 = vmatprep.subr.bf16.mxu1 %v2237_v11  ;;  %7082 = vmatprep.mubr.bf16.mxu0 %v12796_v34 }
 0x345   : > { %7033 = vmatpush3.bf16.msra.mxu1 %v2237_v11 }
 0x346   : > { %7034 = vmatprep.subr.bf16.mxu1 %v2236_v52 }
 0x347   : > { %7019 = vmatmul.mubr.bf16.gmra.mxu1 %v12797_v54 }
 0x348   : > { %7022 = vmatprep.mubr.bf16.mxu1 %v12798_v3 }
 0x349   : > { %7035 = vmatpush3.bf16.msra.mxu1 %v2236_v52  ;;  %7083 = vmatmul.mubr.bf16.gmra.mxu0 %v12799_v25 }
 0x34a   : > { %7036 = vmatprep.subr.bf16.mxu1 %v2235_v13  ;;  %7086 = vmatprep.mubr.bf16.mxu0 %v12801_v7 }
 0x34d   : > { %7037 = vmatpush3.bf16.msra.mxu1 %v2235_v13 }
 0x34e   : > { %7038 = vmatprep.subr.bf16.mxu1 %v2234_v56 }
 0x34f   : > { %7023 = vmatmul.mubr.bf16.gmra.mxu1 %v12804_v49  ;;  %v1977_v49 = vld [vmem:[%s8803_s21 + $0x58] sm:$0xff] }
 0x350   : > { %7026 = vmatprep.mubr.bf16.mxu1 %v12807_v20 }
 0x351   : > { %7039 = vmatpush3.bf16.msra.mxu1 %v2234_v56  ;;  %7087 = vmatmul.mubr.bf16.gmra.mxu0 %v12810_v26  ;;  %v1980_v26 = vld [vmem:[%s8803_s21 + $0x70] sm:$0xff] }
 0x352   : > { %7040 = vmatprep.subr.bf16.mxu1 %v2233_v24  ;;  %7090 = vmatprep.mubr.bf16.mxu0 %v12813_v63 }
 0x355   : > { %7041 = vmatpush3.bf16.msra.mxu1 %v2233_v24 }
 0x356   : > { %7042 = vmatprep.subr.bf16.mxu1 %v9511_v50 }
 0x357   : > { %7027 = vmatmul.mubr.bf16.gmra.mxu1 %v12814_v23 }
 0x359   : > { %7043 = vmatpush3.bf16.msra.mxu1 %v9511_v50  ;;  %7091 = vmatmul.mubr.bf16.gmra.mxu0 %v2343_v32  ;;  %v1967_v32 = vld [vmem:[%s8803_s21 + $0x8] sm:$0xff] }
 0x35a   : > { %7044 = vmatprep.subr.bf16.mxu1 %v9495_v1 }
 0x35d   : > { %7045 = vmatpush3.bf16.msra.mxu1 %v9495_v1 }
 0x35e   : > { %7094 = vmatprep.subr.bf16.mxu1 %v9638_v14 }
 0x3ff   : > { %v7016_v46 = vpop.f32.mrf.mxu1 }
 0x400   : > { %v9652_v55 = vadd.f32 %v7016_v46, %v1968_v18  ;;  %v1981_v46 = vld [vmem:[%s8803_s21 + $0x78] sm:$0xff]  ;;  %v6752_v18 = vld [vmem:[%s8803_s21 + $0x90] sm:$0xff] }
 0x401   : > { %v2016_v16 = vpop.f32.mrf.mxu1  ;;  %v9643_v50 = vpop.f32.mrf.mxu0 }
 0x402   : > { %v9645_v30 = vadd.f32 %v2016_v16, %v1966_v58 }
 0x403   : > { %v7017_v47 = vpop.f32.mrf.mxu1  ;;  %v9648_v61 = vpop.f32.mrf.mxu0 }
 0x404   : > { %2079 = vmax.xlane.f32.xlu0 %v9645_v30  ;;  %v9662_v43 = vadd.f32 %v7017_v47, %v1969_v17  ;;  %v9711_v58 = vadd.f32 %v6750_v45, %v9648_v61  ;;  %v6751_v47 = vld [vmem:[%s8803_s21 + $0x88] sm:$0xff]  ;;  %v6753_v61 = vld [vmem:[%s8803_s21 + $0x98] sm:$0xff] }
 0x405   : > { %v2019_v1 = vpop.f32.mrf.mxu1  ;;  %v9657_v31 = vpop.f32.mrf.mxu0 }
 0x406   : > { %v9654_v4 = vadd.f32 %v2019_v1, %v1967_v32  ;;  %v9720_v1 = vadd.f32 %v9643_v50, %v6752_v18  ;;  %v6756_v50 = vld [vmem:[%s8803_s21 + $0xb0] sm:$0xff] }
 0x407   : > { %v7020_v15 = vpop.f32.mrf.mxu1  ;;  %v2406_v11 = vpop.f32.mrf.mxu0 }
 0x408   : > { %2081 = vmax.xlane.f32.xlu1 %v9654_v4  ;;  %2083 = vmax.xlane.f32.xlu0 %v9652_v55  ;;  %v9670_v34 = vadd.f32 %v7020_v15, %v1972_v19  ;;  %v9722_v17 = vadd.f32 %v6751_v47, %v2406_v11  ;;  %v6754_v15 = vld [vmem:[%s8803_s21 + $0xa0] sm:$0xff] }
 0x409   : > { %v2032_v28 = vpop.f32.mrf.mxu1  ;;  %v7084_v52 = vpop.f32.mrf.mxu0 }
 0x40a   : > { %v9664_v59 = vadd.f32 %v2032_v28, %v1970_v6  ;;  %v9729_v28 = vadd.f32 %v9657_v31, %v6753_v61  ;;  %v9737_v11 = vadd.f32 %v7084_v52, %v6756_v50  ;;  %v6758_v31 = vld [vmem:[%s8803_s21 + $0xc0] sm:$0xff]  ;;  %v6759_v52 = vld [vmem:[%s8803_s21 + $0xc8] sm:$0xff] }
 0x40b   : > { %v7021_v2 = vpop.f32.mrf.mxu1  ;;  %v2419_v12 = vpop.f32.mrf.mxu0 }
 0x40c   : > { %2085 = vmax.xlane.f32.xlu1 %v9662_v43  ;;  %2087 = vmax.xlane.f32.xlu0 %v9664_v59  ;;  %v9678_v3 = vadd.f32 %v7021_v2, %v1973_v41  ;;  %v9731_v19 = vadd.f32 %v6754_v15, %v2419_v12  ;;  %v6755_v2 = vld [vmem:[%s8803_s21 + $0xa8] sm:$0xff]  ;;  %v6757_v41 = vld [vmem:[%s8803_s21 + $0xb8] sm:$0xff]  ;;  %v6760_v12 = vld [vmem:[%s8803_s21 + $0xd0] sm:$0xff] }
 0x40d   : > { %v2035_v5 = vpop.f32.mrf.mxu1  ;;  %v7085_v36 = vpop.f32.mrf.mxu0 }
 0x40e   : > { %v9672_v9 = vadd.f32 %v2035_v5, %v1971_v40 }
 0x40f   : > { %v7024_v54 = vpop.f32.mrf.mxu1  ;;  %v2422_v39 = vpop.f32.mrf.mxu0 }
 0x410   : > { %2089 = vmax.xlane.f32.xlu1 %v9672_v9  ;;  %2091 = vmax.xlane.f32.xlu0 %v9670_v34  ;;  %v9686_v48 = vadd.f32 %v7024_v54, %v1976_v62  ;;  %v9739_v5 = vadd.f32 %v6755_v2, %v2422_v39 }
 0x411   : > { %v2048_v13 = vpop.f32.mrf.mxu1  ;;  %v7088_v42 = vpop.f32.mrf.mxu0 }
 0x412   : > { %v9680_v25 = vadd.f32 %v2048_v13, %v1974_v37  ;;  %v9745_v37 = vadd.f32 %v7085_v36, %v6757_v41 }
 0x413   : > { %v7025_v7 = vpop.f32.mrf.mxu1  ;;  %v2435_v32 = vpop.f32.mrf.mxu0 }
 0x414   : > { %2093 = vmax.xlane.f32.xlu1 %v9678_v3  ;;  %2095 = vmax.xlane.f32.xlu0 %v9680_v25  ;;  %v9694_v20 = vadd.f32 %v7025_v7, %v1977_v49  ;;  %v9747_v13 = vadd.f32 %v6758_v31, %v2435_v32  ;;  %v9753_v7 = vadd.f32 %v7088_v42, %v6760_v12  ;;  %v6762_v49 = vld [vmem:[%s8803_s21 + $0xe0] sm:$0xff] }
 0x415   : > { %v2051_v56 = vpop.f32.mrf.mxu1  ;;  %v7089_v6 = vpop.f32.mrf.mxu0 }
 0x416   : > { %v9688_v38 = vadd.f32 %v2051_v56, %v1975_v33  ;;  %v6761_v56 = vld [vmem:[%s8803_s21 + $0xd8] sm:$0xff] }
 0x417   : > { %v7028_v24 = vpop.f32.mrf.mxu1  ;;  %v2438_v40 = vpop.f32.mrf.mxu0 }
 0x418   : > { %2097 = vmax.xlane.f32.xlu1 %v9688_v38  ;;  %2099 = vmax.xlane.f32.xlu0 %v9686_v48  ;;  %v9702_v60 = vadd.f32 %v7028_v24, %v1980_v26  ;;  %v9755_v33 = vadd.f32 %v6759_v52, %v2438_v40  ;;  %v9761_v24 = vadd.f32 %v7089_v6, %v6761_v56  ;;  %v6763_v26 = vld [vmem:[%s8803_s21 + $0xe8] sm:$0xff] }
 0x419   : > { %v2064_v21 = vpop.f32.mrf.mxu1  ;;  %v7092_v54 = vpop.f32.mrf.mxu0 }
 0x41a   : > { %v9696_v51 = vadd.f32 %v2064_v21, %v1978_v44  ;;  %v6764_v21 = vld [vmem:[%s8803_s21 + $0xf0] sm:$0xff] }
 0x41b   : > { %v7029_v57 = vpop.f32.mrf.mxu1  ;;  %v2451_v62 = vpop.f32.mrf.mxu0 }
 0x41c   : > { %2101 = vmax.xlane.f32.xlu1 %v9694_v20  ;;  %2103 = vmax.xlane.f32.xlu0 %v9696_v51  ;;  %v9713_v16 = vadd.f32 %v7029_v57, %v1981_v46  ;;  %v9763_v44 = vadd.f32 %v6762_v49, %v2451_v62  ;;  %v9769_v57 = vadd.f32 %v7092_v54, %v6764_v21 }
 0x41d   : > { %v2067_v63 = vpop.f32.mrf.mxu1  ;;  %v7093_v36 = vpop.f32.mrf.mxu0 }
 0x41e   : > { %v9704_v23 = vadd.f32 %v2067_v63, %v1979_v53  ;;  %v6765_v63 = vld [vmem:[%s8803_s21 + $0xf8] sm:$0xff]  ;;  %s12557_s21 = scalar_lea.hbm %s13101_s28, %s6933_s2 }
 0x41f   : > { %v2454_v39 = vpop.f32.mrf.mxu0  ;;  %v9776_v45 = vadd.f32 %v7093_v36, %v6765_v63 }
 0x420   : > { %2105 = vmax.xlane.f32.xlu1 %v9704_v23  ;;  %2107 = vmax.xlane.f32.xlu0 %v9702_v60  ;;  %v9771_v53 = vadd.f32 %v6763_v26, %v2454_v39 }
 0x424   : > { %2109 = vmax.xlane.f32.xlu1 %v9713_v16  ;;  %2466 = vmax.xlane.f32.xlu0 %v9711_v58 }
 0x428   : > { %2468 = vmax.xlane.f32.xlu1 %v9722_v17  ;;  %2470 = vmax.xlane.f32.xlu0 %v9720_v1 }
 0x42c   : > { %2472 = vmax.xlane.f32.xlu1 %v9729_v28  ;;  %2474 = vmax.xlane.f32.xlu0 %v9731_v19 }
 0x430   : > { %2476 = vmax.xlane.f32.xlu1 %v9739_v5  ;;  %2478 = vmax.xlane.f32.xlu0 %v9737_v11 }
 0x434   : > { %2480 = vmax.xlane.f32.xlu1 %v9745_v37  ;;  %2482 = vmax.xlane.f32.xlu0 %v9747_v13 }
 0x438   : > { %2484 = vmax.xlane.f32.xlu1 %v9755_v33  ;;  %2486 = vmax.xlane.f32.xlu0 %v9753_v7 }
 0x43c   : > { %2488 = vmax.xlane.f32.xlu1 %v9761_v24  ;;  %2490 = vmax.xlane.f32.xlu0 %v9763_v44 }
 0x440   : > { %2492 = vmax.xlane.f32.xlu1 %v9771_v53  ;;  %2494 = vmax.xlane.f32.xlu0 %v9769_v57 }
 0x444   : > { %2496 = vmax.xlane.f32.xlu1 %v9776_v45 }
 0x48d   : > { %v2080_v42 = vpop.xlane.xlu0 %2079 }
 0x48e   : > { %v2111_v46 = vsub.f32 %v9645_v30, %v2080_v42 }
 0x490   : > { %v2127_v18 = vmul.f32 1.442695, %v2111_v46 }
 0x491   : > { %v2082_v47 = vpop.xlane.xlu1 %2081  ;;  %v2084_v32 = vpop.xlane.xlu0 %2083 }
 0x492   : > { %7695 = vpow2.f32 %v2127_v18  ;;  %v2112_v61 = vsub.f32 %v9654_v4, %v2082_v47  ;;  %v2113_v15 = vsub.f32 %v9652_v55, %v2084_v32 }
 0x494   : > { %v2129_v6 = vmul.f32 1.442695, %v2112_v61  ;;  %v2131_v50 = vmul.f32 1.442695, %v2113_v15 }
 0x495   : > { %v2086_v2 = vpop.xlane.xlu1 %2085  ;;  %v2088_v40 = vpop.xlane.xlu0 %2087 }
 0x496   : > { %7697 = vpow2.f32 %v2129_v6  ;;  %v2114_v41 = vsub.f32 %v9662_v43, %v2086_v2  ;;  %v2115_v31 = vsub.f32 %v9664_v59, %v2088_v40 }
 0x497   : > { %7699 = vpow2.f32 %v2131_v50 }
 0x498   : > { %v2133_v54 = vmul.f32 1.442695, %v2114_v41  ;;  %v2135_v30 = vmul.f32 1.442695, %v2115_v31 }
 0x499   : > { %v2090_v12 = vpop.xlane.xlu1 %2089  ;;  %v2092_v52 = vpop.xlane.xlu0 %2091 }
 0x49a   : > { %7701 = vpow2.f32 %v2133_v54  ;;  %v2116_v62 = vsub.f32 %v9672_v9, %v2090_v12  ;;  %v2117_v4 = vsub.f32 %v9670_v34, %v2092_v52 }
 0x49b   : > { %7703 = vpow2.f32 %v2135_v30 }
 0x49c   : > { %v2137_v55 = vmul.f32 1.442695, %v2116_v62  ;;  %v2139_v56 = vmul.f32 1.442695, %v2117_v4 }
 0x49d   : > { %v2094_v49 = vpop.xlane.xlu1 %2093  ;;  %v2096_v36 = vpop.xlane.xlu0 %2095 }
 0x49e   : > { %7705 = vpow2.f32 %v2137_v55  ;;  %v2118_v43 = vsub.f32 %v9678_v3, %v2094_v49  ;;  %v2119_v59 = vsub.f32 %v9680_v25, %v2096_v36 }
 0x49f   : > { %v9788_v21 = vpop.eup %7695  ;;  %7707 = vpow2.f32 %v2139_v56 }
 0x4a0   : > { %v2141_v39 = vmul.f32 1.442695, %v2118_v43  ;;  %v2143_v26 = vmul.f32 1.442695, %v2119_v59  ;;  %2159 = vadd.xlane.f32.xlu0 %v9788_v21 }
 0x4a1   : > { %v2098_v9 = vpop.xlane.xlu1 %2097  ;;  %v2100_v63 = vpop.xlane.xlu0 %2099 }
 0x4a2   : > { %7709 = vpow2.f32 %v2141_v39  ;;  %v2120_v34 = vsub.f32 %v9688_v38, %v2098_v9  ;;  %v2121_v42 = vsub.f32 %v9686_v48, %v2100_v63 }
 0x4a3   : > { %v9793_v46 = vpop.eup %7697  ;;  %7711 = vpow2.f32 %v2143_v26 }
 0x4a4   : > { %v9795_v3 = vpop.eup %7699  ;;  %v2145_v25 = vmul.f32 1.442695, %v2120_v34  ;;  %v2147_v18 = vmul.f32 1.442695, %v2121_v42  ;;  %2161 = vadd.xlane.f32.xlu1 %v9793_v46 }
 0x4a5   : > { %2163 = vadd.xlane.f32.xlu0 %v9795_v3  ;;  %v2102_v47 = vpop.xlane.xlu1 %2101  ;;  %v2104_v32 = vpop.xlane.xlu0 %2103 }
 0x4a6   : > { %7713 = vpow2.f32 %v2145_v25  ;;  %v2122_v61 = vsub.f32 %v9694_v20, %v2102_v47  ;;  %v2123_v38 = vsub.f32 %v9696_v51, %v2104_v32 }
 0x4a7   : > { %v9801_v15 = vpop.eup %7701  ;;  %7715 = vpow2.f32 %v2147_v18 }
 0x4a8   : > { %v9803_v48 = vpop.eup %7703  ;;  %v2149_v6 = vmul.f32 1.442695, %v2122_v61  ;;  %v2151_v50 = vmul.f32 1.442695, %v2123_v38  ;;  %2165 = vadd.xlane.f32.xlu1 %v9801_v15 }
 0x4a9   : > { %2167 = vadd.xlane.f32.xlu0 %v9803_v48  ;;  %v2106_v2 = vpop.xlane.xlu1 %2105  ;;  %v2108_v40 = vpop.xlane.xlu0 %2107 }
 0x4aa   : > { %7717 = vpow2.f32 %v2149_v6  ;;  %v2124_v41 = vsub.f32 %v9704_v23, %v2106_v2  ;;  %v2125_v20 = vsub.f32 %v9702_v60, %v2108_v40 }
 0x4ab   : > { %v9809_v31 = vpop.eup %7705  ;;  %7719 = vpow2.f32 %v2151_v50 }
 0x4ac   : > { %v9811_v51 = vpop.eup %7707  ;;  %v2153_v54 = vmul.f32 1.442695, %v2124_v41  ;;  %v2155_v30 = vmul.f32 1.442695, %v2125_v20  ;;  %2169 = vadd.xlane.f32.xlu1 %v9809_v31 }
 0x4ad   : > { %2171 = vadd.xlane.f32.xlu0 %v9811_v51  ;;  %v2110_v12 = vpop.xlane.xlu1 %2109  ;;  %v2467_v52 = vpop.xlane.xlu0 %2466 }
 0x4ae   : > { %7721 = vpow2.f32 %v2153_v54  ;;  %v2126_v62 = vsub.f32 %v9713_v16, %v2110_v12  ;;  %v2498_v23 = vsub.f32 %v9711_v58, %v2467_v52 }
 0x4af   : > { %v9817_v4 = vpop.eup %7709  ;;  %7723 = vpow2.f32 %v2155_v30 }
 0x4b0   : > { %v9819_v60 = vpop.eup %7711  ;;  %v2157_v55 = vmul.f32 1.442695, %v2126_v62  ;;  %v2514_v56 = vmul.f32 1.442695, %v2498_v23  ;;  %2173 = vadd.xlane.f32.xlu1 %v9817_v4 }
 0x4b1   : > { %2175 = vadd.xlane.f32.xlu0 %v9819_v60  ;;  %v2469_v49 = vpop.xlane.xlu1 %2468  ;;  %v2471_v36 = vpop.xlane.xlu0 %2470 }
 0x4b2   : > { %7725 = vpow2.f32 %v2157_v55  ;;  %v2499_v43 = vsub.f32 %v9722_v17, %v2469_v49  ;;  %v2500_v16 = vsub.f32 %v9720_v1, %v2471_v36 }
 0x4b3   : > { %v9825_v59 = vpop.eup %7713  ;;  %7727 = vpow2.f32 %v2514_v56 }
 0x4b4   : > { %v9827_v58 = vpop.eup %7715  ;;  %v2516_v39 = vmul.f32 1.442695, %v2499_v43  ;;  %v2518_v26 = vmul.f32 1.442695, %v2500_v16  ;;  %2177 = vadd.xlane.f32.xlu1 %v9825_v59 }
 0x4b5   : > { %2179 = vadd.xlane.f32.xlu0 %v9827_v58  ;;  %v2473_v9 = vpop.xlane.xlu1 %2472  ;;  %v2475_v63 = vpop.xlane.xlu0 %2474 }
 0x4b6   : > { %7729 = vpow2.f32 %v2516_v39  ;;  %v2501_v34 = vsub.f32 %v9729_v28, %v2473_v9  ;;  %v2502_v17 = vsub.f32 %v9731_v19, %v2475_v63 }
 0x4b7   : > { %v9833_v42 = vpop.eup %7717  ;;  %7731 = vpow2.f32 %v2518_v26 }
 0x4b8   : > { %v9835_v1 = vpop.eup %7719  ;;  %v2520_v25 = vmul.f32 1.442695, %v2501_v34  ;;  %v2522_v18 = vmul.f32 1.442695, %v2502_v17  ;;  %2181 = vadd.xlane.f32.xlu1 %v9833_v42 }
 0x4b9   : > { %2183 = vadd.xlane.f32.xlu0 %v9835_v1  ;;  %v2477_v47 = vpop.xlane.xlu1 %2476  ;;  %v2479_v32 = vpop.xlane.xlu0 %2478 }
 0x4ba   : > { %7733 = vpow2.f32 %v2520_v25  ;;  %v2503_v61 = vsub.f32 %v9739_v5, %v2477_v47  ;;  %v2504_v28 = vsub.f32 %v9737_v11, %v2479_v32 }
 0x4bb   : > { %v9841_v38 = vpop.eup %7721  ;;  %7735 = vpow2.f32 %v2522_v18 }
 0x4bc   : > { %v9843_v19 = vpop.eup %7723  ;;  %v2524_v6 = vmul.f32 1.442695, %v2503_v61  ;;  %v2526_v50 = vmul.f32 1.442695, %v2504_v28  ;;  %2185 = vadd.xlane.f32.xlu1 %v9841_v38 }
 0x4bd   : > { %2187 = vadd.xlane.f32.xlu0 %v9843_v19  ;;  %v2481_v2 = vpop.xlane.xlu1 %2480  ;;  %v2483_v40 = vpop.xlane.xlu0 %2482 }
 0x4be   : > { %7737 = vpow2.f32 %v2524_v6  ;;  %v2505_v41 = vsub.f32 %v9745_v37, %v2481_v2  ;;  %v2506_v5 = vsub.f32 %v9747_v13, %v2483_v40 }
 0x4bf   : > { %v9849_v20 = vpop.eup %7725  ;;  %7739 = vpow2.f32 %v2526_v50 }
 0x4c0   : > { %v9851_v11 = vpop.eup %7727  ;;  %v2528_v54 = vmul.f32 1.442695, %v2505_v41  ;;  %v2530_v30 = vmul.f32 1.442695, %v2506_v5  ;;  %2189 = vadd.xlane.f32.xlu1 %v9849_v20  ;;  %v7423_v5 = vld [vmem:[#allocation11 + $0x70] ss:$8 sps:$4 sm:$0xff]  }
 0x4c1   : > { %2546 = vadd.xlane.f32.xlu0 %v9851_v11  ;;  %v2485_v12 = vpop.xlane.xlu1 %2484  ;;  %v2487_v52 = vpop.xlane.xlu0 %2486 }
 0x4c2   : > { %7741 = vpow2.f32 %v2528_v54  ;;  %v2507_v62 = vsub.f32 %v9755_v33, %v2485_v12  ;;  %v2508_v37 = vsub.f32 %v9753_v7, %v2487_v52  ;;  %v7425_v54 = vld [vmem:[#allocation11 + $0x74] ss:$8 sps:$4 sm:$0xff]   ;;  %v7426_v12 = vld [vmem:[#allocation11 + $0x60] ss:$8 sps:$4 sm:$0xff]  }
 0x4c3   : > { %v9857_v23 = vpop.eup %7729  ;;  %7743 = vpow2.f32 %v2530_v30  ;;  %v7428_v30 = vld [vmem:[#allocation11 + $0x64] ss:$8 sps:$4 sm:$0xff]   ;;  %2943 = vmatprep.subr.bf16.mxu0 %v7425_v54  ;;  %v7431_v52 = vld [vmem:[#allocation11 + $0x54] ss:$8 sps:$4 sm:$0xff]  }
 0x4c4   : > { %v9859_v13 = vpop.eup %7731  ;;  %v2532_v55 = vmul.f32 1.442695, %v2507_v62  ;;  %v2534_v56 = vmul.f32 1.442695, %v2508_v37  ;;  %2548 = vadd.xlane.f32.xlu1 %v9857_v23  ;;  %2944 = vmatpush1.bf16.msra.mxu0 %v7423_v5  ;;  %v7429_v62 = vld [vmem:[#allocation11 + $0x50] ss:$8 sps:$4 sm:$0xff]  }
 0x4c5   : > { %2550 = vadd.xlane.f32.xlu0 %v9859_v13  ;;  %v2489_v49 = vpop.xlane.xlu1 %2488  ;;  %v2491_v36 = vpop.xlane.xlu0 %2490  ;;  %2945 = vmatprep.subr.bf16.mxu0 %v7428_v30  ;;  %v7434_v37 = vld [vmem:[#allocation11 + $0x44] ss:$8 sps:$4 sm:$0xff]  }
 0x4c6   : > { %7745 = vpow2.f32 %v2532_v55  ;;  %v2509_v43 = vsub.f32 %v9761_v24, %v2489_v49  ;;  %v2510_v33 = vsub.f32 %v9763_v44, %v2491_v36  ;;  %v7432_v55 = vld [vmem:[#allocation11 + $0x40] ss:$8 sps:$4 sm:$0xff]   ;;  %v7435_v49 = vld [vmem:[#allocation11 + $0x30] ss:$8 sps:$4 sm:$0xff]   ;;  %v7440_v36 = vld [vmem:[#allocation11 + $0x24] ss:$8 sps:$4 sm:$0xff]  }
 0x4c7   : > { %v9865_v16 = vpop.eup %7733  ;;  %7747 = vpow2.f32 %v2534_v56  ;;  %v7437_v56 = vld [vmem:[#allocation11 + $0x34] ss:$8 sps:$4 sm:$0xff]  }
 0x4c8   : > { %v9867_v7 = vpop.eup %7735  ;;  %v2536_v39 = vmul.f32 1.442695, %v2509_v43  ;;  %v2538_v26 = vmul.f32 1.442695, %v2510_v33  ;;  %2552 = vadd.xlane.f32.xlu1 %v9865_v16  ;;  %2946 = vmatpush1.bf16.msra.mxu0 %v7426_v12  ;;  %v7438_v43 = vld [vmem:[#allocation11 + $0x20] ss:$8 sps:$4 sm:$0xff]  }
 0x4c9   : > { %2554 = vadd.xlane.f32.xlu0 %v9867_v7  ;;  %v2493_v9 = vpop.xlane.xlu1 %2492  ;;  %v2495_v63 = vpop.xlane.xlu0 %2494  ;;  %2947 = vmatprep.subr.bf16.mxu0 %v7431_v52 }
 0x4ca   : > { %7749 = vpow2.f32 %v2536_v39  ;;  %v2511_v34 = vsub.f32 %v9771_v53, %v2493_v9  ;;  %v2512_v24 = vsub.f32 %v9769_v57, %v2495_v63 }
 0x4cb   : > { %v9873_v17 = vpop.eup %7737  ;;  %7751 = vpow2.f32 %v2538_v26 }
 0x4cc   : > { %v9875_v44 = vpop.eup %7739  ;;  %v2540_v25 = vmul.f32 1.442695, %v2511_v34  ;;  %v2542_v18 = vmul.f32 1.442695, %v2512_v24  ;;  %2556 = vadd.xlane.f32.xlu1 %v9873_v17  ;;  %2948 = vmatpush1.bf16.msra.mxu0 %v7429_v62 }
 0x4cd   : > { %2558 = vadd.xlane.f32.xlu0 %v9875_v44  ;;  %v2497_v47 = vpop.xlane.xlu1 %2496  ;;  %2949 = vmatprep.subr.bf16.mxu0 %v7434_v37 }
 0x4ce   : > { %7753 = vpow2.f32 %v2540_v25  ;;  %v2513_v32 = vsub.f32 %v9776_v45, %v2497_v47 }
 0x4cf   : > { %v9880_v61 = vpop.eup %7741  ;;  %7755 = vpow2.f32 %v2542_v18 }
 0x4d0   : > { %v9882_v53 = vpop.eup %7743  ;;  %v2544_v57 = vmul.f32 1.442695, %v2513_v32  ;;  %2560 = vadd.xlane.f32.xlu1 %v9880_v61  ;;  %2950 = vmatpush1.bf16.msra.mxu0 %v7432_v55 }
 0x4d1   : > { %2562 = vadd.xlane.f32.xlu0 %v9882_v53  ;;  %2951 = vmatprep.subr.bf16.mxu0 %v7437_v56 }
 0x4d2   : > { %7757 = vpow2.f32 %v2544_v57 }
 0x4d3   : > { %v9886_v28 = vpop.eup %7745 }
 0x4d4   : > { %v9888_v6 = vpop.eup %7747  ;;  %2564 = vadd.xlane.f32.xlu1 %v9886_v28  ;;  %2952 = vmatpush1.bf16.msra.mxu0 %v7435_v49 }
 0x4d5   : > { %2566 = vadd.xlane.f32.xlu0 %v9888_v6  ;;  %2953 = vmatprep.subr.bf16.mxu0 %v7440_v36 }
 0x4d7   : > { %v9892_v45 = vpop.eup %7749 }
 0x4d8   : > { %v9894_v50 = vpop.eup %7751  ;;  %2568 = vadd.xlane.f32.xlu1 %v9892_v45  ;;  %2954 = vmatpush1.bf16.msra.mxu0 %v7438_v43 }
 0x4d9   : > { %2570 = vadd.xlane.f32.xlu0 %v9894_v50 }
 0x4db   : > { %v9898_v2 = vpop.eup %7753 }
 0x4dc   : > { %v9900_v40 = vpop.eup %7755  ;;  %2572 = vadd.xlane.f32.xlu1 %v9898_v2 }
 0x4dd   : > { %2574 = vadd.xlane.f32.xlu0 %v9900_v40 }
 0x4df   : > { %v9904_v41 = vpop.eup %7757 }
 0x4e0   : > { %2576 = vadd.xlane.f32.xlu1 %v9904_v41 }
 0x529   : > { %v2160_v33 = vpop.xlane.xlu0 %2159 }
 0x52a   : > { %7759 = vrcp.f32 %v2160_v33 }
 0x52d   : > { %v2162_v39 = vpop.xlane.xlu1 %2161 }
 0x52e   : > { %7761 = vrcp.f32 %v2162_v39  ;;  %v2164_v26 = vpop.xlane.xlu0 %2163 }
 0x52f   : > { %7763 = vrcp.f32 %v2164_v26 }
 0x531   : > { %v2166_v9 = vpop.xlane.xlu1 %2165 }
 0x532   : > { %7765 = vrcp.f32 %v2166_v9  ;;  %v2168_v63 = vpop.xlane.xlu0 %2167 }
 0x533   : > { %7767 = vrcp.f32 %v2168_v63 }
 0x535   : > { %v2170_v34 = vpop.xlane.xlu1 %2169 }
 0x536   : > { %7769 = vrcp.f32 %v2170_v34  ;;  %v2172_v24 = vpop.xlane.xlu0 %2171 }
 0x537   : > { %7771 = vrcp.f32 %v2172_v24  ;;  %v7760_v25 = vpop.eup %7759 }
 0x538   : > { %v2207_v57 = vmul.f32 %v7760_v25, %v9788_v21 }
 0x539   : > { %v2174_v18 = vpop.xlane.xlu1 %2173 }
 0x53a   : > { %7773 = vrcp.f32 %v2174_v18  ;;  %v2176_v47 = vpop.xlane.xlu0 %2175 }
 0x53b   : > { %v7762_v32 = vpop.eup %7761  ;;  %7775 = vrcp.f32 %v2176_v47 }
 0x53c   : > { %v2208_v5 = vmul.f32 %v7762_v32, %v9793_v46  ;;  %v7764_v54 = vpop.eup %7763 }
 0x53d   : > { %v2178_v30 = vpop.xlane.xlu1 %2177  ;;  %v2209_v37 = vmul.f32 %v7764_v54, %v9795_v3 }
 0x53e   : > { %7777 = vrcp.f32 %v2178_v30  ;;  %v2180_v12 = vpop.xlane.xlu0 %2179  ;;  %v2223_v52 = vpack.c.bf16 %v2208_v5, %v2207_v57 }
 0x53f   : > { %v7766_v62 = vpop.eup %7765  ;;  %7779 = vrcp.f32 %v2180_v12 }
 0x540   : > { %7046 = vmatprep.mubr.bf16.mxu1 %v2223_v52  ;;  %v2210_v55 = vmul.f32 %v7766_v62, %v9801_v15  ;;  %v7768_v56 = vpop.eup %7767 }
 0x541   : > { %v2182_v49 = vpop.xlane.xlu1 %2181  ;;  %v2211_v46 = vmul.f32 %v7768_v56, %v9803_v48 }
 0x542   : > { %7781 = vrcp.f32 %v2182_v49  ;;  %v2184_v36 = vpop.xlane.xlu0 %2183  ;;  %v2224_v43 = vpack.c.bf16 %v2210_v55, %v2209_v37 }
 0x543   : > { %v7770_v21 = vpop.eup %7769  ;;  %7783 = vrcp.f32 %v2184_v36 }
 0x544   : > { %7047 = vmatmul.mubr.bf16.vlgmr.msra.gmra.mxu1 %v2224_v43  ;;  %v2212_v33 = vmul.f32 %v7770_v21, %v9809_v31  ;;  %v7772_v39 = vpop.eup %7771 }
 0x545   : > { %7095 = vmatpush3.bf16.msra.mxu1 %v9638_v14  ;;  %v2186_v26 = vpop.xlane.xlu1 %2185  ;;  %v2213_v63 = vmul.f32 %v7772_v39, %v9811_v51 }
 0x546   : > { %7785 = vrcp.f32 %v2186_v26  ;;  %7096 = vmatprep.subr.bf16.mxu1 %v9571_v27  ;;  %v2188_v3 = vpop.xlane.xlu0 %2187  ;;  %v2225_v15 = vpack.c.bf16 %v2212_v33, %v2211_v46 }
 0x547   : > { %v7774_v9 = vpop.eup %7773  ;;  %7787 = vrcp.f32 %v2188_v3 }
 0x548   : > { %7050 = vmatprep.mubr.bf16.mxu1 %v2225_v15  ;;  %v2214_v34 = vmul.f32 %v7774_v9, %v9817_v4  ;;  %v7776_v24 = vpop.eup %7775 }
 0x549   : > { %7097 = vmatpush3.bf16.msra.mxu1 %v9571_v27  ;;  %v2190_v48 = vpop.xlane.xlu1 %2189  ;;  %v2215_v18 = vmul.f32 %v7776_v24, %v9819_v60 }
 0x54a   : > { %7789 = vrcp.f32 %v2190_v48  ;;  %7098 = vmatprep.subr.bf16.mxu1 %v9565_v29  ;;  %v2547_v14 = vpop.xlane.xlu0 %2546  ;;  %v2226_v31 = vpack.c.bf16 %v2214_v34, %v2213_v63 }
 0x54b   : > { %v7778_v25 = vpop.eup %7777  ;;  %7791 = vrcp.f32 %v2547_v14 }
 0x54c   : > { %7051 = vmatmul.mubr.bf16.gmra.mxu1 %v2226_v31  ;;  %v2216_v47 = vmul.f32 %v7778_v25, %v9825_v59  ;;  %v7780_v32 = vpop.eup %7779 }
 0x54d   : > { %7099 = vmatpush3.bf16.msra.mxu1 %v9565_v29  ;;  %v2549_v51 = vpop.xlane.xlu1 %2548  ;;  %v2217_v5 = vmul.f32 %v7780_v32, %v9827_v58 }
 0x54e   : > { %7793 = vrcp.f32 %v2549_v51  ;;  %7100 = vmatprep.subr.bf16.mxu1 %v9555_v10  ;;  %v2551_v27 = vpop.xlane.xlu0 %2550  ;;  %v2227_v4 = vpack.c.bf16 %v2216_v47, %v2215_v18 }
 0x54f   : > { %v7782_v57 = vpop.eup %7781  ;;  %7795 = vrcp.f32 %v2551_v27 }
 0x550   : > { %7054 = vmatprep.mubr.bf16.mxu1 %v2227_v4  ;;  %v2218_v54 = vmul.f32 %v7782_v57, %v9833_v42  ;;  %v7784_v30 = vpop.eup %7783 }
 0x551   : > { %7101 = vmatpush3.bf16.msra.mxu1 %v9555_v10  ;;  %v2553_v60 = vpop.xlane.xlu1 %2552  ;;  %v2219_v52 = vmul.f32 %v7784_v30, %v9835_v1 }
 0x552   : > { %7797 = vrcp.f32 %v2553_v60  ;;  %7102 = vmatprep.subr.bf16.mxu1 %v9546_v35  ;;  %v2555_v29 = vpop.xlane.xlu0 %2554  ;;  %v2228_v59 = vpack.c.bf16 %v2218_v54, %v2217_v5 }
 0x553   : > { %v7786_v12 = vpop.eup %7785  ;;  %7799 = vrcp.f32 %v2555_v29 }
 0x554   : > { %7055 = vmatmul.mubr.bf16.gmra.mxu1 %v2228_v59  ;;  %v2220_v62 = vmul.f32 %v7786_v12, %v9841_v38  ;;  %v7788_v37 = vpop.eup %7787 }
 0x555   : > { %7103 = vmatpush3.bf16.msra.mxu1 %v9546_v35  ;;  %v2557_v58 = vpop.xlane.xlu1 %2556  ;;  %v2221_v56 = vmul.f32 %v7788_v37, %v9843_v19  ;;  %v7446_v37 = vld [vmem:[#allocation11 + $0x4] ss:$8 sps:$4 sm:$0xff]  }
 0x556   : > { %7801 = vrcp.f32 %v2557_v58  ;;  %7104 = vmatprep.subr.bf16.mxu1 %v9534_v0  ;;  %v2559_v10 = vpop.xlane.xlu0 %2558  ;;  %v2229_v42 = vpack.c.bf16 %v2220_v62, %v2219_v52  ;;  %v7444_v62 = vld [vmem:[#allocation11] ss:$8 sps:$4 sm:$0xff]  }
 0x557   : > { %v7790_v55 = vpop.eup %7789  ;;  %7803 = vrcp.f32 %v2559_v10  ;;  %v7450_v58 = vld [vmem:[#allocation11 + $0xe0] ss:$8 sps:$4 sm:$0xff]   ;;  %v7452_v10 = vld [vmem:[#allocation11 + $0xe4] ss:$8 sps:$4 sm:$0xff]  }
 0x558   : > { %7058 = vmatprep.mubr.bf16.mxu1 %v2229_v42  ;;  %v2222_v49 = vmul.f32 %v7790_v55, %v9849_v20  ;;  %v7792_v36 = vpop.eup %7791  ;;  %v7456_v42 = vld [vmem:[#allocation11 + $0xc0] ss:$8 sps:$4 sm:$0xff]   ;;  %v7458_v55 = vld [vmem:[#allocation11 + $0xc4] ss:$8 sps:$4 sm:$0xff]  }
 0x559   : > { %7105 = vmatpush3.bf16.msra.mxu1 %v9534_v0  ;;  %v2561_v1 = vpop.xlane.xlu1 %2560  ;;  %v2594_v21 = vmul.f32 %v7792_v36, %v9851_v11  ;;  %v7462_v36 = vld [vmem:[#allocation11 + $0xa0] ss:$8 sps:$4 sm:$0xff]  }
 0x55a   : > { %7805 = vrcp.f32 %v2561_v1  ;;  %7106 = vmatprep.subr.bf16.mxu1 %v9518_v8  ;;  %v2563_v35 = vpop.xlane.xlu0 %2562  ;;  %v2230_v38 = vpack.c.bf16 %v2222_v49, %v2221_v56  ;;  %v7459_v56 = vld [vmem:[#allocation11 + $0xb0] ss:$8 sps:$4 sm:$0xff]   ;;  %v7461_v49 = vld [vmem:[#allocation11 + $0xb4] ss:$8 sps:$4 sm:$0xff]   ;;  %v7464_v1 = vld [vmem:[#allocation11 + $0xa4] ss:$8 sps:$4 sm:$0xff]  }
 0x55b   : > { %v7794_v43 = vpop.eup %7793  ;;  %7807 = vrcp.f32 %v2563_v35  ;;  %v7465_v35 = vld [vmem:[#allocation11 + $0x90] ss:$8 sps:$4 sm:$0xff]  }
 0x55c   : > { %7059 = vmatmul.mubr.bf16.gmra.mxu1 %v2230_v38  ;;  %v2595_v46 = vmul.f32 %v7794_v43, %v9857_v23  ;;  %v7796_v33 = vpop.eup %7795  ;;  %v7467_v38 = vld [vmem:[#allocation11 + $0x94] ss:$8 sps:$4 sm:$0xff]   ;;  %v7468_v43 = vld [vmem:[#allocation11 + $0x80] ss:$8 sps:$4 sm:$0xff]  }
 0x55d   : > { %7107 = vmatpush3.bf16.msra.mxu1 %v9518_v8  ;;  %v2565_v19 = vpop.xlane.xlu1 %2564  ;;  %v2596_v26 = vmul.f32 %v7796_v33, %v9859_v13 }
 0x55e   : > { %7809 = vrcp.f32 %v2565_v19  ;;  %7108 = vmatprep.subr.bf16.mxu1 %v9500_v22  ;;  %v2567_v0 = vpop.xlane.xlu0 %2566  ;;  %v2610_v20 = vpack.c.bf16 %v2595_v46, %v2594_v21  ;;  %v7470_v21 = vld [vmem:[#allocation11 + $0x84] ss:$8 sps:$4 sm:$0xff]  }
 0x55f   : > { %v7798_v39 = vpop.eup %7797  ;;  %7811 = vrcp.f32 %v2567_v0 }
 0x560   : > { %7110 = vmatprep.mubr.bf16.mxu1 %v2610_v20  ;;  %v2597_v3 = vmul.f32 %v7798_v39, %v9865_v16  ;;  %v7800_v15 = vpop.eup %7799 }
 0x561   : > { %7109 = vmatpush3.bf16.msra.mxu1 %v9500_v22  ;;  %v2569_v11 = vpop.xlane.xlu1 %2568  ;;  %v2598_v63 = vmul.f32 %v7800_v15, %v9867_v7 }
 0x562   : > { %7813 = vrcp.f32 %v2569_v11  ;;  %v2571_v23 = vpop.xlane.xlu0 %2570  ;;  %v2611_v8 = vpack.c.bf16 %v2597_v3, %v2596_v26 }
 0x563   : > { %v7802_v9 = vpop.eup %7801  ;;  %7815 = vrcp.f32 %v2571_v23 }
 0x564   : > { %7111 = vmatmul.mubr.bf16.vlgmr.msra.gmra.mxu1 %v2611_v8  ;;  %v2599_v34 = vmul.f32 %v7802_v9, %v9873_v17  ;;  %v7804_v24 = vpop.eup %7803 }
 0x565   : > { %v2573_v48 = vpop.xlane.xlu1 %2572  ;;  %v2600_v22 = vmul.f32 %v7804_v24, %v9875_v44 }
 0x566   : > { %7817 = vrcp.f32 %v2573_v48  ;;  %v2575_v13 = vpop.xlane.xlu0 %2574  ;;  %v2612_v14 = vpack.c.bf16 %v2599_v34, %v2598_v63 }
 0x567   : > { %v7806_v16 = vpop.eup %7805  ;;  %7819 = vrcp.f32 %v2575_v13 }
 0x568   : > { %7114 = vmatprep.mubr.bf16.mxu1 %v2612_v14  ;;  %v2601_v31 = vmul.f32 %v7806_v16, %v9880_v61  ;;  %v7808_v25 = vpop.eup %7807 }
 0x569   : > { %v2577_v18 = vpop.xlane.xlu1 %2576  ;;  %v2602_v7 = vmul.f32 %v7808_v25, %v9882_v53 }
 0x56a   : > { %7821 = vrcp.f32 %v2577_v18  ;;  %v2613_v47 = vpack.c.bf16 %v2601_v31, %v2600_v22 }
 0x56b   : > { %v7810_v32 = vpop.eup %7809 }
 0x56c   : > { %7115 = vmatmul.mubr.bf16.gmra.mxu1 %v2613_v47  ;;  %v2603_v17 = vmul.f32 %v7810_v32, %v9886_v28  ;;  %v7812_v51 = vpop.eup %7811 }
 0x56d   : > { %v2604_v57 = vmul.f32 %v7812_v51, %v9888_v6  ;;  %v7441_v6 = vld [vmem:[#allocation11 + $0x10] ss:$8 sps:$4 sm:$0xff]  }
 0x56e   : > { %v2614_v27 = vpack.c.bf16 %v2603_v17, %v2602_v7 }
 0x56f   : > { %v7814_v4 = vpop.eup %7813 }
 0x570   : > { %7118 = vmatprep.mubr.bf16.mxu1 %v2614_v27  ;;  %v2605_v44 = vmul.f32 %v7814_v4, %v9892_v45  ;;  %v7816_v5 = vpop.eup %7815  ;;  %v7443_v45 = vld [vmem:[#allocation11 + $0x14] ss:$8 sps:$4 sm:$0xff]  }
 0x571   : > { %v2606_v30 = vmul.f32 %v7816_v5, %v9894_v50  ;;  %2955 = vmatprep.subr.bf16.mxu0 %v7443_v45  ;;  %v7447_v50 = vld [vmem:[#allocation11 + $0xf0] ss:$8 sps:$4 sm:$0xff]  }
 0x572   : > { %v2615_v61 = vpack.c.bf16 %v2605_v44, %v2604_v57  ;;  %2956 = vmatpush1.bf16.msra.mxu0 %v7441_v6 }
 0x573   : > { %v7818_v54 = vpop.eup %7817  ;;  %2957 = vmatprep.subr.bf16.mxu0 %v7446_v37 }
 0x574   : > { %7119 = vmatmul.mubr.bf16.gmra.mxu1 %v2615_v61  ;;  %v2607_v60 = vmul.f32 %v7818_v54, %v9898_v2  ;;  %v7820_v29 = vpop.eup %7819  ;;  %v7449_v2 = vld [vmem:[#allocation11 + $0xf4] ss:$8 sps:$4 sm:$0xff]  }
 0x575   : > { %v2608_v28 = vmul.f32 %v7820_v29, %v9900_v40  ;;  %v7453_v40 = vld [vmem:[#allocation11 + $0xd0] ss:$8 sps:$4 sm:$0xff]  }
 0x576   : > { %v2616_v53 = vpack.c.bf16 %v2607_v60, %v2606_v30  ;;  %2958 = vmatpush1.bf16.msra.mxu0 %v7444_v62 }
 0x577   : > { %v7822_v59 = vpop.eup %7821  ;;  %2959 = vmatprep.subr.bf16.mxu0 %v7449_v2  ;;  %v12815_v2 = vld [vmem:[#allocation31_spill] sm:$0xff] }
 0x578   : > { %7122 = vmatprep.mubr.bf16.mxu1 %v2616_v53  ;;  %v2609_v12 = vmul.f32 %v7822_v59, %v9904_v41  ;;  %v7455_v41 = vld [vmem:[#allocation11 + $0xd4] ss:$8 sps:$4 sm:$0xff]  }
 0x57a   : > { %v2617_v52 = vpack.c.bf16 %v2609_v12, %v2608_v28  ;;  %2960 = vmatpush2.bf16.msra.mxu0 %v7447_v50  ;;  %v2771_v50 = vld [vmem:[%s12612_s7] sm:$0x3] }
 0x57b   : > { %2961 = vmatprep.subr.bf16.mxu0 %v7452_v10  ;;  %v12816_v10 = vld [vmem:[#allocation30_spill] sm:$0xff] }
 0x57c   : > { %7123 = vmatmul.mubr.bf16.gmra.mxu1 %v2617_v52 }
 0x57e   : > { %2962 = vmatpush2.bf16.msra.mxu0 %v7450_v58  ;;  %v9958_v58 = vrot.slane %v2771_v50, %v12815_v2 }
 0x57f   : > { %2963 = vmatprep.subr.bf16.mxu0 %v7455_v41 }
 0x582   : > { %2964 = vmatpush2.bf16.msra.mxu0 %v7453_v40  ;;  %v9961_v40 = vrot.slane %v2771_v50, %v12816_v10  ;;  %v8123_v50 = vld [vmem:[%s8795_s24 + $0x60] sm:$0xff] }
 0x583   : > { %2965 = vmatprep.subr.bf16.mxu0 %v7458_v55 }
 0x586   : > { %2966 = vmatpush2.bf16.msra.mxu0 %v7456_v42 }
 0x587   : > { %2967 = vmatprep.subr.bf16.mxu0 %v7461_v49 }
 0x58a   : > { %2968 = vmatpush2.bf16.msra.mxu0 %v7459_v56 }
 0x58b   : > { %2969 = vmatprep.subr.bf16.mxu0 %v7464_v1 }
 0x58e   : > { %2970 = vmatpush2.bf16.msra.mxu0 %v7462_v36  ;;  %v8111_v36 = vld [vmem:[%s8795_s24] sm:$0xff] }
 0x58f   : > { %2971 = vmatprep.subr.bf16.mxu0 %v7467_v38 }
 0x592   : > { %2972 = vmatpush2.bf16.msra.mxu0 %v7465_v35  ;;  %v8112_v35 = vld [vmem:[%s8795_s24 + $0x8] sm:$0xff] }
 0x593   : > { %2973 = vmatprep.subr.bf16.mxu0 %v7470_v21 }
 0x596   : > { %2974 = vmatpush2.bf16.msra.mxu0 %v7468_v43 }
 0x604   : > { %v7048_v46 = vpop.f32.mrf.mxu1 }
 0x606   : > { %v2273_v33 = vpop.f32.mrf.mxu1 }
 0x608   : > { %v7049_v19 = vpop.f32.mrf.mxu1 }
 0x609   : > { %v2725_v51 = vpack.c.bf16 %v7049_v19, %v7048_v46 }
 0x60a   : > { %v2276_v0 = vpop.f32.mrf.mxu1 }
 0x60b   : > { %v2723_v25 = vpack.c.bf16 %v2276_v0, %v2273_v33  ;;  %v8113_v0 = vld [vmem:[%s8795_s24 + $0x10] sm:$0xff] }
 0x60c   : > { %v7052_v20 = vpop.f32.mrf.mxu1 }
 0x60e   : > { %v2289_v39 = vpop.f32.mrf.mxu1 }
 0x610   : > { %v7053_v26 = vpop.f32.mrf.mxu1 }
 0x611   : > { %v2729_v30 = vpack.c.bf16 %v7053_v26, %v7052_v20 }
 0x612   : > { %v2292_v3 = vpop.f32.mrf.mxu1 }
 0x613   : > { %v2727_v44 = vpack.c.bf16 %v2292_v3, %v2289_v39  ;;  %v8114_v39 = vld [vmem:[%s8795_s24 + $0x18] sm:$0xff] }
 0x614   : > { %v7056_v15 = vpop.f32.mrf.mxu1 }
 0x616   : > { %v2305_v11 = vpop.f32.mrf.mxu1 }
 0x618   : > { %v7057_v23 = vpop.f32.mrf.mxu1 }
 0x619   : > { %v2733_v6 = vpack.c.bf16 %v7057_v23, %v7056_v15 }
 0x61a   : > { %v2308_v8 = vpop.f32.mrf.mxu1 }
 0x61b   : > { %v2731_v59 = vpack.c.bf16 %v2308_v8, %v2305_v11 }
 0x61c   : > { %v7060_v9 = vpop.f32.mrf.mxu1 }
 0x61e   : > { %v2321_v63 = vpop.f32.mrf.mxu1 }
 0x620   : > { %v7061_v34 = vpop.f32.mrf.mxu1 }
 0x621   : > { %v2737_v24 = vpack.c.bf16 %v7061_v34, %v7060_v9  ;;  %v8115_v9 = vld [vmem:[%s8795_s24 + $0x20] sm:$0xff]  ;;  %v8116_v34 = vld [vmem:[%s8795_s24 + $0x28] sm:$0xff] }
 0x622   : > { %v2324_v48 = vpop.f32.mrf.mxu1 }
 0x623   : > { %v2735_v62 = vpack.c.bf16 %v2324_v48, %v2321_v63 }
 0x624   : > { %v7112_v13 = vpop.f32.mrf.mxu1 }
 0x626   : > { %v2660_v14 = vpop.f32.mrf.mxu1 }
 0x628   : > { %v7113_v16 = vpop.f32.mrf.mxu1 }
 0x629   : > { %v2726_v47 = vpack.c.bf16 %v7113_v16, %v7112_v13 }
 0x62a   : > { %v2663_v22 = vpop.f32.mrf.mxu1 }
 0x62b   : > { %v2724_v31 = vpack.c.bf16 %v2663_v22, %v2660_v14 }
 0x62c   : > { %v7116_v18 = vpop.f32.mrf.mxu1 }
 0x62d   : > { %2975 = vmatprep.mubr.bf16.mxu0 %v2724_v31  ;;  %v8117_v31 = vld [vmem:[%s8795_s24 + $0x30] sm:$0xff] }
 0x62e   : > { %v2676_v32 = vpop.f32.mrf.mxu1  ;;  %2976 = vmatmul.mubr.bf16.vlgmr.msra.gmra.mxu0 %v2723_v25 }
 0x62f   : > { %2985 = vmatprep.mubr.bf16.mxu0 %v2726_v47 }
 0x630   : > { %v7117_v7 = vpop.f32.mrf.mxu1 }
 0x631   : > { %v2730_v5 = vpack.c.bf16 %v7117_v7, %v7116_v18  ;;  %v8118_v18 = vld [vmem:[%s8795_s24 + $0x38] sm:$0xff] }
 0x632   : > { %v2679_v17 = vpop.f32.mrf.mxu1 }
 0x633   : > { %v2728_v27 = vpack.c.bf16 %v2679_v17, %v2676_v32 }
 0x634   : > { %v7120_v4 = vpop.f32.mrf.mxu1 }
 0x636   : > { %2986 = vmatmul.mubr.bf16.gmra.mxu0 %v2725_v51  ;;  %v2692_v57 = vpop.f32.mrf.mxu1 }
 0x637   : > { %2995 = vmatprep.mubr.bf16.mxu0 %v2728_v27 }
 0x638   : > { %v7121_v61 = vpop.f32.mrf.mxu1 }
 0x639   : > { %v2734_v28 = vpack.c.bf16 %v7121_v61, %v7120_v4  ;;  %v8119_v4 = vld [vmem:[%s8795_s24 + $0x40] sm:$0xff] }
 0x63a   : > { %v2695_v54 = vpop.f32.mrf.mxu1 }
 0x63b   : > { %v2732_v60 = vpack.c.bf16 %v2695_v54, %v2692_v57 }
 0x63c   : > { %v7124_v29 = vpop.f32.mrf.mxu1 }
 0x63e   : > { %2996 = vmatmul.mubr.bf16.gmra.mxu0 %v2727_v44  ;;  %v2708_v53 = vpop.f32.mrf.mxu1  ;;  %v8120_v44 = vld [vmem:[%s8795_s24 + $0x48] sm:$0xff] }
 0x63f   : > { %3005 = vmatprep.mubr.bf16.mxu0 %v2730_v5 }
 0x640   : > { %v7125_v12 = vpop.f32.mrf.mxu1 }
 0x641   : > { %v2738_v37 = vpack.c.bf16 %v7125_v12, %v7124_v29 }
 0x642   : > { %v2711_v52 = vpop.f32.mrf.mxu1 }
 0x643   : > { %v2736_v45 = vpack.c.bf16 %v2711_v52, %v2708_v53  ;;  %v8121_v53 = vld [vmem:[%s8795_s24 + $0x50] sm:$0xff] }
 0x646   : > { %3006 = vmatmul.mubr.bf16.gmra.mxu0 %v2729_v30 }
 0x647   : > { %3015 = vmatprep.mubr.bf16.mxu0 %v2732_v60 }
 0x64e   : > { %3016 = vmatmul.mubr.bf16.gmra.mxu0 %v2731_v59 }
 0x64f   : > { %3025 = vmatprep.mubr.bf16.mxu0 %v2734_v28  ;;  %v8122_v28 = vld [vmem:[%s8795_s24 + $0x58] sm:$0xff] }
 0x656   : > { %3026 = vmatmul.mubr.bf16.gmra.mxu0 %v2733_v6 }
 0x657   : > { %3035 = vmatprep.mubr.bf16.mxu0 %v2736_v45 }
 0x65e   : > { %3036 = vmatmul.mubr.bf16.gmra.mxu0 %v2735_v62 }
 0x65f   : > { %3045 = vmatprep.mubr.bf16.mxu0 %v2738_v37 }
 0x666   : > { %3046 = vmatmul.mubr.bf16.gmra.mxu0 %v2737_v24 }
 0x6ee   : > { %v2977_v41 = vpop.f32.mrf.mxu0 }
 0x6ef   : > { %v2978_v42 = vadd.f32 %v2977_v41, %v9958_v58 }
 0x6f0   : > { %v2979_v55 = vpop.f32.mrf.mxu0 }
 0x6f1   : > { %v2980_v56 = vadd.f32 %v2979_v55, %v9961_v40  ;;  %v9966_v1 = vadd.f32 %v8111_v36, %v2978_v42  ;;  %v8124_v42 = vld [vmem:[%s8795_s24 + $0x68] sm:$0xff] }
 0x6f2   : > { %v2981_v49 = vpop.f32.mrf.mxu0 }
 0x6f3   : > { %12817 = vst [vmem:[#allocation32_spill] sm:$0xff] %v9966_v1  ;;  %v9969_v38 = vadd.f32 %v8112_v35, %v2980_v56  ;;  %v2982_v43 = vadd.f32 %v2981_v49, %v9958_v58 }
 0x6f4   : > { %v2983_v21 = vpop.f32.mrf.mxu0 }
 0x6f5   : > { %12818 = vst [vmem:[#allocation35_spill] sm:$0xff] %v9969_v38  ;;  %v2984_v46 = vadd.f32 %v2983_v21, %v9961_v40  ;;  %v3090_v33 = vadd.f32 %v9969_v38, %v9966_v1  ;;  %v9976_v20 = vadd.f32 %v8113_v0, %v2982_v43  ;;  %v8125_v21 = vld [vmem:[%s8795_s24 + $0x70] sm:$0xff] }
 0x6f6   : > { %v2987_v19 = vpop.f32.mrf.mxu0 }
 0x6f7   : > { %12819 = vst [vmem:[#allocation33_spill] sm:$0xff] %v9976_v20  ;;  %v9979_v26 = vadd.f32 %v8114_v39, %v2984_v46  ;;  %v2988_v3 = vadd.f32 %v2987_v19, %v9958_v58  ;;  %3091 = vadd.xlane.f32.xlu0 %v3090_v33  ;;  %v8126_v33 = vld [vmem:[%s8795_s24 + $0x78] sm:$0xff] }
 0x6f8   : > { %v2989_v15 = vpop.f32.mrf.mxu0 }
 0x6f9   : > { %12820 = vst [vmem:[#allocation39_spill] sm:$0xff] %v9979_v26  ;;  %v2990_v11 = vadd.f32 %v2989_v15, %v9961_v40  ;;  %v3093_v23 = vadd.f32 %v9979_v26, %v9976_v20  ;;  %v9986_v63 = vadd.f32 %v8115_v9, %v2988_v3  ;;  %v8128_v9 = vld [vmem:[%s8795_s24 + $0x88] sm:$0xff] }
 0x6fa   : > { %v2991_v8 = vpop.f32.mrf.mxu0 }
 0x6fb   : > { %12821 = vst [vmem:[#allocation37_spill] sm:$0xff] %v9986_v63  ;;  %v9989_v24 = vadd.f32 %v8116_v34, %v2990_v11  ;;  %v2992_v48 = vadd.f32 %v2991_v8, %v9958_v58  ;;  %3094 = vadd.xlane.f32.xlu1 %v3093_v23  ;;  %v8127_v23 = vld [vmem:[%s8795_s24 + $0x80] sm:$0xff] }
 0x6fc   : > { %v2993_v13 = vpop.f32.mrf.mxu0 }
 0x6fd   : > { %12822 = vst [vmem:[#allocation36_spill] sm:$0xff] %v9989_v24  ;;  %v2994_v14 = vadd.f32 %v2993_v13, %v9961_v40  ;;  %v3096_v16 = vadd.f32 %v9989_v24, %v9986_v63  ;;  %v9996_v25 = vadd.f32 %v8117_v31, %v2992_v48  ;;  %v8129_v31 = vld [vmem:[%s8795_s24 + $0x90] sm:$0xff] }
 0x6fe   : > { %v2997_v22 = vpop.f32.mrf.mxu0 }
 0x6ff   : > { %12823 = vst [vmem:[#allocation34_spill] sm:$0xff] %v9996_v25  ;;  %v9999_v47 = vadd.f32 %v8118_v18, %v2994_v14  ;;  %v2998_v32 = vadd.f32 %v2997_v22, %v9958_v58  ;;  %3097 = vadd.xlane.f32.xlu0 %v3096_v16 }
 0x700   : > { %v2999_v7 = vpop.f32.mrf.mxu0 }
 0x701   : > { %12824 = vst [vmem:[#allocation40_spill] sm:$0xff] %v9999_v47  ;;  %v3000_v17 = vadd.f32 %v2999_v7, %v9961_v40  ;;  %v3099_v51 = vadd.f32 %v9999_v47, %v9996_v25  ;;  %v10006_v57 = vadd.f32 %v8119_v4, %v2998_v32  ;;  %v8130_v32 = vld [vmem:[%s8795_s24 + $0x98] sm:$0xff] }
 0x702   : > { %v3001_v27 = vpop.f32.mrf.mxu0 }
 0x703   : > { %12825 = vst [vmem:[#allocation38_spill] sm:$0xff] %v10006_v57  ;;  %v10009_v5 = vadd.f32 %v8120_v44, %v3000_v17  ;;  %v3002_v61 = vadd.f32 %v3001_v27, %v9958_v58  ;;  %3100 = vadd.xlane.f32.xlu1 %v3099_v51 }
 0x704   : > { %v3003_v54 = vpop.f32.mrf.mxu0 }
 0x705   : > { %12826 = vst [vmem:[#allocation41_spill] sm:$0xff] %v10009_v5  ;;  %v3004_v30 = vadd.f32 %v3003_v54, %v9961_v40  ;;  %v3102_v60 = vadd.f32 %v10009_v5, %v10006_v57  ;;  %v10016_v59 = vadd.f32 %v8121_v53, %v3002_v61  ;;  %v8131_v61 = vld [vmem:[%s8795_s24 + $0xa0] sm:$0xff] }
 0x706   : > { %v3007_v29 = vpop.f32.mrf.mxu0 }
 0x707   : > { %12827 = vst [vmem:[#allocation42_spill] sm:$0xff] %v10016_v59  ;;  %v10019_v12 = vadd.f32 %v8122_v28, %v3004_v30  ;;  %v3008_v52 = vadd.f32 %v3007_v29, %v9958_v58  ;;  %3103 = vadd.xlane.f32.xlu0 %v3102_v60  ;;  %v8132_v30 = vld [vmem:[%s8795_s24 + $0xa8] sm:$0xff] }
 0x708   : > { %v3009_v6 = vpop.f32.mrf.mxu0 }
 0x709   : > { %12828 = vst [vmem:[#allocation43_spill] sm:$0xff] %v10019_v12  ;;  %v3010_v45 = vadd.f32 %v3009_v6, %v9961_v40  ;;  %v3105_v62 = vadd.f32 %v10019_v12, %v10016_v59  ;;  %v10026_v41 = vadd.f32 %v8123_v50, %v3008_v52 }
 0x70a   : > { %v3011_v37 = vpop.f32.mrf.mxu0 }
 0x70b   : > { %12829 = vst [vmem:[#allocation44_spill] sm:$0xff] %v10026_v41  ;;  %v10029_v55 = vadd.f32 %v8124_v42, %v3010_v45  ;;  %v3012_v56 = vadd.f32 %v3011_v37, %v9958_v58  ;;  %3106 = vadd.xlane.f32.xlu1 %v3105_v62  ;;  %v8133_v45 = vld [vmem:[%s8795_s24 + $0xb0] sm:$0xff]  ;;  %v8134_v37 = vld [vmem:[%s8795_s24 + $0xb8] sm:$0xff] }
 0x70c   : > { %v3013_v49 = vpop.f32.mrf.mxu0 }
 0x70d   : > { %12830 = vst [vmem:[#allocation45_spill] sm:$0xff] %v10029_v55  ;;  %v3014_v36 = vadd.f32 %v3013_v49, %v9961_v40  ;;  %v3108_v35 = vadd.f32 %v10029_v55, %v10026_v41  ;;  %v10036_v46 = vadd.f32 %v8125_v21, %v3012_v56 }
 0x70e   : > { %v3017_v43 = vpop.f32.mrf.mxu0 }
 0x70f   : > { %12831 = vst [vmem:[#allocation46_spill] sm:$0xff] %v10036_v46  ;;  %v10039_v19 = vadd.f32 %v8126_v33, %v3014_v36  ;;  %v3018_v0 = vadd.f32 %v3017_v43, %v9958_v58  ;;  %3109 = vadd.xlane.f32.xlu0 %v3108_v35  ;;  %v8135_v43 = vld [vmem:[%s8795_s24 + $0xc0] sm:$0xff]  ;;  %v8136_v33 = vld [vmem:[%s8795_s24 + $0xc8] sm:$0xff] }
 0x710   : > { %v3019_v39 = vpop.f32.mrf.mxu0 }
 0x711   : > { %12832 = vst [vmem:[#allocation47_spill] sm:$0xff] %v10039_v19  ;;  %v3020_v3 = vadd.f32 %v3019_v39, %v9961_v40  ;;  %v3111_v15 = vadd.f32 %v10039_v19, %v10036_v46  ;;  %v10046_v8 = vadd.f32 %v8127_v23, %v3018_v0 }
 0x712   : > { %v3021_v11 = vpop.f32.mrf.mxu0 }
 0x713   : > { %12833 = vst [vmem:[#allocation48_spill] sm:$0xff] %v10046_v8  ;;  %v10049_v34 = vadd.f32 %v8128_v9, %v3020_v3  ;;  %v3022_v48 = vadd.f32 %v3021_v11, %v9958_v58  ;;  %3112 = vadd.xlane.f32.xlu1 %v3111_v15  ;;  %v8137_v9 = vld [vmem:[%s8795_s24 + $0xd0] sm:$0xff] }
 0x714   : > { %v3023_v13 = vpop.f32.mrf.mxu0 }
 0x715   : > { %12834 = vst [vmem:[#allocation49_spill] sm:$0xff] %v10049_v34  ;;  %v3024_v14 = vadd.f32 %v3023_v13, %v9961_v40  ;;  %v3114_v16 = vadd.f32 %v10049_v34, %v10046_v8  ;;  %v10056_v18 = vadd.f32 %v8129_v31, %v3022_v48  ;;  %v8138_v13 = vld [vmem:[%s8795_s24 + $0xd8] sm:$0xff] }
 0x716   : > { %v3027_v22 = vpop.f32.mrf.mxu0 }
 0x717   : > { %12835 = vst [vmem:[#allocation50_spill] sm:$0xff] %v10056_v18  ;;  %v10059_v7 = vadd.f32 %v8130_v32, %v3024_v14  ;;  %v3028_v17 = vadd.f32 %v3027_v22, %v9958_v58  ;;  %3115 = vadd.xlane.f32.xlu0 %v3114_v16 }
 0x718   : > { %v3029_v51 = vpop.f32.mrf.mxu0 }
 0x719   : > { %12836 = vst [vmem:[#allocation51_spill] sm:$0xff] %v10059_v7  ;;  %v3030_v27 = vadd.f32 %v3029_v51, %v9961_v40  ;;  %v3117_v4 = vadd.f32 %v10059_v7, %v10056_v18  ;;  %v10066_v54 = vadd.f32 %v8131_v61, %v3028_v17  ;;  %v8139_v51 = vld [vmem:[%s8795_s24 + $0xe0] sm:$0xff] }
 0x71a   : > { %v3031_v44 = vpop.f32.mrf.mxu0 }
 0x71b   : > { %12837 = vst [vmem:[#allocation52_spill] sm:$0xff] %v10066_v54  ;;  %v10069_v60 = vadd.f32 %v8132_v30, %v3030_v27  ;;  %v3032_v29 = vadd.f32 %v3031_v44, %v9958_v58  ;;  %3118 = vadd.xlane.f32.xlu1 %v3117_v4  ;;  %v8140_v4 = vld [vmem:[%s8795_s24 + $0xe8] sm:$0xff] }
 0x71c   : > { %v3033_v53 = vpop.f32.mrf.mxu0 }
 0x71d   : > { %12838 = vst [vmem:[#allocation53_spill] sm:$0xff] %v10069_v60  ;;  %v3034_v28 = vadd.f32 %v3033_v53, %v9961_v40  ;;  %v3120_v52 = vadd.f32 %v10069_v60, %v10066_v54  ;;  %v10076_v62 = vadd.f32 %v8133_v45, %v3032_v29 }
 0x71e   : > { %v3037_v6 = vpop.f32.mrf.mxu0 }
 0x71f   : > { %12839 = vst [vmem:[#allocation54_spill] sm:$0xff] %v10076_v62  ;;  %v10079_v50 = vadd.f32 %v8134_v37, %v3034_v28  ;;  %v3038_v42 = vadd.f32 %v3037_v6, %v9958_v58  ;;  %3121 = vadd.xlane.f32.xlu0 %v3120_v52  ;;  %v8141_v28 = vld [vmem:[%s8795_s24 + $0xf0] sm:$0xff]  ;;  %v8142_v6 = vld [vmem:[%s8795_s24 + $0xf8] sm:$0xff] }
 0x720   : > { %v3039_v56 = vpop.f32.mrf.mxu0 }
 0x721   : > { %12840 = vst [vmem:[#allocation55_spill] sm:$0xff] %v10079_v50  ;;  %v3040_v49 = vadd.f32 %v3039_v56, %v9961_v40  ;;  %v3123_v36 = vadd.f32 %v10079_v50, %v10076_v62  ;;  %v10086_v21 = vadd.f32 %v8135_v43, %v3038_v42  ;;  %v7471_v42 = vld [vmem:[#allocation13 + $0xe0] ss:$16 sps:$4 sm:$0xff]   ;;  %v7474_v56 = vld [vmem:[#allocation13 + $0xe8] ss:$16 sps:$4 sm:$0xff]  }
 0x722   : > { %v3041_v35 = vpop.f32.mrf.mxu0  ;;  %v7480_v43 = vld [vmem:[#allocation13 + $0xc8] ss:$16 sps:$4 sm:$0xff]  }
 0x723   : > { %12841 = vst [vmem:[#allocation56_spill] sm:$0xff] %v10086_v21  ;;  %v10089_v0 = vadd.f32 %v8136_v33, %v3040_v49  ;;  %v3042_v39 = vadd.f32 %v3041_v35, %v9958_v58  ;;  %3124 = vadd.xlane.f32.xlu1 %v3123_v36  ;;  %v7476_v49 = vld [vmem:[#allocation13 + $0xec] ss:$16 sps:$4 sm:$0xff]   ;;  %v7479_v36 = vld [vmem:[#allocation13 + $0xc4] ss:$16 sps:$4 sm:$0xff]  }
 0x724   : > { %v3043_v3 = vpop.f32.mrf.mxu0  ;;  %3967 = vmatprep.subr.bf16.mxu0 %v7476_v49  ;;  %v7477_v35 = vld [vmem:[#allocation13 + $0xc0] ss:$16 sps:$4 sm:$0xff]   ;;  %v7485_v33 = vld [vmem:[#allocation13 + $0xa4] ss:$16 sps:$4 sm:$0xff]   ;;  %v7524_v49 = vld [vmem:[#allocation13 + $0x1ec] ss:$16 sps:$4 sm:$0xff]  }
 0x725   : > { %12842 = vst [vmem:[#allocation57_spill] sm:$0xff] %v10089_v0  ;;  %v3044_v15 = vadd.f32 %v3043_v3, %v9961_v40  ;;  %v3126_v11 = vadd.f32 %v10089_v0, %v10086_v21  ;;  %v10096_v48 = vadd.f32 %v8137_v9, %v3042_v39  ;;  %3968 = vmatpush1.bf16.msra.mxu0 %v7474_v56  ;;  %v7488_v39 = vld [vmem:[#allocation13 + $0xac] ss:$16 sps:$4 sm:$0xff]   ;;  %v7483_v3 = vld [vmem:[#allocation13 + $0xa0] ss:$16 sps:$4 sm:$0xff]  }
 0x726   : > { %v3047_v23 = vpop.f32.mrf.mxu0  ;;  %v7489_v9 = vld [vmem:[#allocation13 + $0x80] ss:$16 sps:$4 sm:$0xff]   ;;  %v7521_v56 = vld [vmem:[#allocation13 + $0x1e4] ss:$16 sps:$4 sm:$0xff]  }
 0x727   : > { %12843 = vst [vmem:[#allocation58_spill] sm:$0xff] %v10096_v48  ;;  %v10099_v14 = vadd.f32 %v8138_v13, %v3044_v15  ;;  %v3048_v16 = vadd.f32 %v3047_v23, %v9958_v58  ;;  %3127 = vadd.xlane.f32.xlu0 %v3126_v11  ;;  %v7486_v15 = vld [vmem:[#allocation13 + $0xa8] ss:$16 sps:$4 sm:$0xff]   ;;  %v7491_v11 = vld [vmem:[#allocation13 + $0x84] ss:$16 sps:$4 sm:$0xff]  }
 0x728   : > { %v3049_v22 = vpop.f32.mrf.mxu0  ;;  %v7494_v23 = vld [vmem:[#allocation13 + $0x8c] ss:$16 sps:$4 sm:$0xff]   ;;  %v7492_v13 = vld [vmem:[#allocation13 + $0x88] ss:$16 sps:$4 sm:$0xff]  }
 0x729   : > { %12844 = vst [vmem:[#allocation59_spill] sm:$0xff] %v10099_v14  ;;  %v3050_v31 = vadd.f32 %v3049_v22, %v9961_v40  ;;  %v3129_v32 = vadd.f32 %v10099_v14, %v10096_v48  ;;  %v10106_v27 = vadd.f32 %v8139_v51, %v3048_v16  ;;  %v7497_v16 = vld [vmem:[#allocation13 + $0x64] ss:$16 sps:$4 sm:$0xff]   ;;  %v7500_v22 = vld [vmem:[#allocation13 + $0x6c] ss:$16 sps:$4 sm:$0xff]  }
 0x72a   : > { %v3051_v17 = vpop.f32.mrf.mxu0  ;;  %v7506_v51 = vld [vmem:[#allocation13 + $0x4c] ss:$16 sps:$4 sm:$0xff]  }
 0x72b   : > { %12845 = vst [vmem:[#allocation60_spill] sm:$0xff] %v10106_v27  ;;  %v10109_v44 = vadd.f32 %v8140_v4, %v3050_v31  ;;  %v3052_v61 = vadd.f32 %v3051_v17, %v9958_v58  ;;  %3130 = vadd.xlane.f32.xlu1 %v3129_v32  ;;  %v7473_v58 = vld [vmem:[#allocation13 + $0xe4] ss:$16 sps:$4 sm:$0xff]   ;;  %v7495_v31 = vld [vmem:[#allocation13 + $0x60] ss:$16 sps:$4 sm:$0xff]  }
 0x72c   : > { %v3053_v30 = vpop.f32.mrf.mxu0  ;;  %3854 = vmatprep.subr.bf16.mxu1 %v7473_v58  ;;  %v7498_v32 = vld [vmem:[#allocation13 + $0x68] ss:$16 sps:$4 sm:$0xff]   ;;  %v7503_v17 = vld [vmem:[#allocation13 + $0x44] ss:$16 sps:$4 sm:$0xff]   ;;  %v7501_v4 = vld [vmem:[#allocation13 + $0x40] ss:$16 sps:$4 sm:$0xff]  }
 0x72d   : > { %12846 = vst [vmem:[#allocation61_spill] sm:$0xff] %v10109_v44  ;;  %v3054_v29 = vadd.f32 %v3053_v30, %v9961_v40  ;;  %v3132_v53 = vadd.f32 %v10109_v44, %v10106_v27  ;;  %v10116_v52 = vadd.f32 %v8141_v28, %v3052_v61  ;;  %v7482_v40 = vld [vmem:[#allocation13 + $0xcc] ss:$16 sps:$4 sm:$0xff]   ;;  %3855 = vmatpush1.bf16.msra.mxu1 %v7471_v42  ;;  %v7504_v61 = vld [vmem:[#allocation13 + $0x48] ss:$16 sps:$4 sm:$0xff]  }
 0x72e   : > { %3856 = vmatprep.subr.bf16.mxu1 %v7479_v36  ;;  %3969 = vmatprep.subr.bf16.mxu0 %v7482_v40  ;;  %v7509_v30 = vld [vmem:[#allocation13 + $0x24] ss:$16 sps:$4 sm:$0xff]   ;;  %v7510_v28 = vld [vmem:[#allocation13 + $0x28] ss:$16 sps:$4 sm:$0xff]   ;;  %v7513_v42 = vld [vmem:[#allocation13] ss:$16 sps:$4 sm:$0xff]  }
 0x72f   : > { %12847 = vst [vmem:[#allocation62_spill] sm:$0xff] %v10116_v52  ;;  %v10119_v45 = vadd.f32 %v8142_v6, %v3054_v29  ;;  %3133 = vadd.xlane.f32.xlu0 %v3132_v53  ;;  %3970 = vmatpush1.bf16.msra.mxu0 %v7480_v43  ;;  %v7512_v29 = vld [vmem:[#allocation13 + $0x2c] ss:$16 sps:$4 sm:$0xff]   ;;  %v7507_v53 = vld [vmem:[#allocation13 + $0x20] ss:$16 sps:$4 sm:$0xff]  }
 0x730   : > { %3971 = vmatprep.subr.bf16.mxu0 %v7488_v39  ;;  %v7515_v6 = vld [vmem:[#allocation13 + $0x4] ss:$16 sps:$4 sm:$0xff]   ;;  %v7516_v58 = vld [vmem:[#allocation13 + $0x8] ss:$16 sps:$4 sm:$0xff]   ;;  %v7519_v36 = vld [vmem:[#allocation13 + $0x1e0] ss:$16 sps:$4 sm:$0xff]  }
 0x731   : > { %12848 = vst [vmem:[#allocation63_spill] sm:$0xff] %v10119_v45  ;;  %v3135_v37 = vadd.f32 %v10119_v45, %v10116_v52  ;;  %3857 = vmatpush1.bf16.msra.mxu1 %v7477_v35  ;;  %v7522_v40 = vld [vmem:[#allocation13 + $0x1e8] ss:$16 sps:$4 sm:$0xff]  }
 0x732   : > { %3858 = vmatprep.subr.bf16.mxu1 %v7485_v33 }
 0x733   : > { %3136 = vadd.xlane.f32.xlu1 %v3135_v37  ;;  %3972 = vmatpush1.bf16.msra.mxu0 %v7486_v15  ;;  %v7518_v37 = vld [vmem:[#allocation13 + $0xc] ss:$16 sps:$4 sm:$0xff]  }
 0x734   : > { %3973 = vmatprep.subr.bf16.mxu0 %v7494_v23 }
 0x735   : > { %3859 = vmatpush1.bf16.msra.mxu1 %v7483_v3 }
 0x736   : > { %3860 = vmatprep.subr.bf16.mxu1 %v7491_v11 }
 0x737   : > { %3974 = vmatpush1.bf16.msra.mxu0 %v7492_v13 }
 0x738   : > { %3975 = vmatprep.subr.bf16.mxu0 %v7500_v22 }
 0x739   : > { %3861 = vmatpush1.bf16.msra.mxu1 %v7489_v9 }
 0x73a   : > { %3862 = vmatprep.subr.bf16.mxu1 %v7497_v16 }
 0x73b   : > { %3976 = vmatpush1.bf16.msra.mxu0 %v7498_v32 }
 0x73c   : > { %3977 = vmatprep.subr.bf16.mxu0 %v7506_v51 }
 0x73d   : > { %3863 = vmatpush1.bf16.msra.mxu1 %v7495_v31 }
 0x73e   : > { %3864 = vmatprep.subr.bf16.mxu1 %v7503_v17 }
 0x73f   : > { %3978 = vmatpush1.bf16.msra.mxu0 %v7504_v61 }
 0x740   : > { %3979 = vmatprep.subr.bf16.mxu0 %v7512_v29 }
 0x741   : > { %3865 = vmatpush1.bf16.msra.mxu1 %v7501_v4 }
 0x742   : > { %3866 = vmatprep.subr.bf16.mxu1 %v7509_v30 }
 0x743   : > { %3980 = vmatpush1.bf16.msra.mxu0 %v7510_v28 }
 0x744   : > { %3981 = vmatprep.subr.bf16.mxu0 %v7518_v37 }
 0x745   : > { %3867 = vmatpush1.bf16.msra.mxu1 %v7507_v53 }
 0x746   : > { %3868 = vmatprep.subr.bf16.mxu1 %v7515_v6 }
 0x747   : > { %3982 = vmatpush1.bf16.msra.mxu0 %v7516_v58 }
 0x748   : > { %3983 = vmatprep.subr.bf16.mxu0 %v7524_v49 }
 0x749   : > { %3869 = vmatpush1.bf16.msra.mxu1 %v7513_v42 }
 0x74a   : > { %3870 = vmatprep.subr.bf16.mxu1 %v7521_v56 }
 0x74b   : > { %3984 = vmatpush2.bf16.msra.mxu0 %v7522_v40 }
 0x74d   : > { %3871 = vmatpush2.bf16.msra.mxu1 %v7519_v36 }
 0x780   : > { %v3092_v35 = vpop.xlane.xlu0 %3091 }
 0x781   : > { %v3138_v43 = vmul.f32 0.00390625, %v3092_v35 }
 0x783   : > { %v10124_v33 = vsub.f32 %v9966_v1, %v3138_v43  ;;  %v10127_v39 = vsub.f32 %v9969_v38, %v3138_v43 }
 0x784   : > { %v3095_v3 = vpop.xlane.xlu1 %3094 }
 0x785   : > { %v3186_v15 = vmul.f32 %v10124_v33, %v10124_v33  ;;  %v3187_v11 = vmul.f32 %v10127_v39, %v10127_v39  ;;  %v3139_v23 = vmul.f32 0.00390625, %v3095_v3 }
 0x787   : > { %v10134_v9 = vsub.f32 %v9976_v20, %v3139_v23  ;;  %v10137_v13 = vsub.f32 %v9979_v26, %v3139_v23  ;;  %v3218_v16 = vadd.f32 %v3187_v11, %v3186_v15 }
 0x788   : > { %v3098_v22 = vpop.xlane.xlu0 %3097 }
 0x789   : > { %v3188_v31 = vmul.f32 %v10134_v9, %v10134_v9  ;;  %v3189_v32 = vmul.f32 %v10137_v13, %v10137_v13  ;;  %v3140_v17 = vmul.f32 0.00390625, %v3098_v22  ;;  %3219 = vadd.xlane.f32.xlu0 %v3218_v16 }
 0x78b   : > { %v10144_v51 = vsub.f32 %v9986_v63, %v3140_v17  ;;  %v10147_v4 = vsub.f32 %v9989_v24, %v3140_v17  ;;  %v3221_v61 = vadd.f32 %v3189_v32, %v3188_v31 }
 0x78c   : > { %v3101_v30 = vpop.xlane.xlu1 %3100 }
 0x78d   : > { %v3190_v29 = vmul.f32 %v10144_v51, %v10144_v51  ;;  %v3191_v53 = vmul.f32 %v10147_v4, %v10147_v4  ;;  %v3141_v28 = vmul.f32 0.00390625, %v3101_v30  ;;  %3222 = vadd.xlane.f32.xlu1 %v3221_v61 }
 0x78f   : > { %v10154_v6 = vsub.f32 %v9996_v25, %v3141_v28  ;;  %v10157_v37 = vsub.f32 %v9999_v47, %v3141_v28  ;;  %v3224_v42 = vadd.f32 %v3191_v53, %v3190_v29  ;;  %v7615_v47 = vld [vmem:[#allocation14 + $0xf0] ss:$8 sps:$4 sm:$0xff]  }
 0x790   : > { %v3104_v58 = vpop.xlane.xlu0 %3103 }
 0x791   : > { %v3192_v56 = vmul.f32 %v10154_v6, %v10154_v6  ;;  %v3193_v49 = vmul.f32 %v10157_v37, %v10157_v37  ;;  %v3142_v36 = vmul.f32 0.00390625, %v3104_v58  ;;  %3225 = vadd.xlane.f32.xlu0 %v3224_v42  ;;  %v7527_v42 = vld [vmem:[#allocation13 + $0x1c4] ss:$16 sps:$4 sm:$0xff]   ;;  %v7530_v58 = vld [vmem:[#allocation13 + $0x1cc] ss:$16 sps:$4 sm:$0xff]  }
 0x792   : > { %3872 = vmatprep.subr.bf16.mxu1 %v7527_v42  ;;  %3985 = vmatprep.subr.bf16.mxu0 %v7530_v58 }
 0x793   : > { %v10164_v40 = vsub.f32 %v10006_v57, %v3142_v36  ;;  %v10167_v35 = vsub.f32 %v10009_v5, %v3142_v36  ;;  %v3227_v43 = vadd.f32 %v3193_v49, %v3192_v56  ;;  %v7525_v49 = vld [vmem:[#allocation13 + $0x1c0] ss:$16 sps:$4 sm:$0xff]   ;;  %v7528_v36 = vld [vmem:[#allocation13 + $0x1c8] ss:$16 sps:$4 sm:$0xff]  }
 0x794   : > { %v3107_v3 = vpop.xlane.xlu1 %3106  ;;  %3873 = vmatpush2.bf16.msra.mxu1 %v7525_v49  ;;  %3986 = vmatpush2.bf16.msra.mxu0 %v7528_v36 }
 0x795   : > { %v3194_v15 = vmul.f32 %v10164_v40, %v10164_v40  ;;  %v3195_v11 = vmul.f32 %v10167_v35, %v10167_v35  ;;  %v3143_v23 = vmul.f32 0.00390625, %v3107_v3  ;;  %3228 = vadd.xlane.f32.xlu1 %v3227_v43 }
 0x797   : > { %v10174_v16 = vsub.f32 %v10016_v59, %v3143_v23  ;;  %v10177_v22 = vsub.f32 %v10019_v12, %v3143_v23  ;;  %v3230_v31 = vadd.f32 %v3195_v11, %v3194_v15  ;;  %v7570_v12 = vld [vmem:[#allocation14 + $0x170] ss:$8 sps:$4 sm:$0xff]  }
 0x798   : > { %v3110_v32 = vpop.xlane.xlu0 %3109 }
 0x799   : > { %v3196_v17 = vmul.f32 %v10174_v16, %v10174_v16  ;;  %v3197_v61 = vmul.f32 %v10177_v22, %v10177_v22  ;;  %v3144_v30 = vmul.f32 0.00390625, %v3110_v32  ;;  %3231 = vadd.xlane.f32.xlu0 %v3230_v31  ;;  %v7533_v32 = vld [vmem:[#allocation13 + $0x1a4] ss:$16 sps:$4 sm:$0xff]  }
 0x79a   : > { %3874 = vmatprep.subr.bf16.mxu1 %v7533_v32 }
 0x79b   : > { %v10184_v29 = vsub.f32 %v10026_v41, %v3144_v30  ;;  %v10187_v53 = vsub.f32 %v10029_v55, %v3144_v30  ;;  %v3233_v28 = vadd.f32 %v3197_v61, %v3196_v17  ;;  %v7536_v17 = vld [vmem:[#allocation13 + $0x1ac] ss:$16 sps:$4 sm:$0xff]   ;;  %v7531_v30 = vld [vmem:[#allocation13 + $0x1a0] ss:$16 sps:$4 sm:$0xff]   ;;  %v7534_v55 = vld [vmem:[#allocation13 + $0x1a8] ss:$16 sps:$4 sm:$0xff]  }
 0x79c   : > { %v3113_v56 = vpop.xlane.xlu1 %3112  ;;  %3987 = vmatprep.subr.bf16.mxu0 %v7536_v17  ;;  %3875 = vmatpush2.bf16.msra.mxu1 %v7531_v30 }
 0x79d   : > { %v3198_v43 = vmul.f32 %v10184_v29, %v10184_v29  ;;  %v3199_v3 = vmul.f32 %v10187_v53, %v10187_v53  ;;  %v3145_v15 = vmul.f32 0.00390625, %v3113_v56  ;;  %3234 = vadd.xlane.f32.xlu1 %v3233_v28  ;;  %3988 = vmatpush2.bf16.msra.mxu0 %v7534_v55 }
 0x79f   : > { %v10194_v11 = vsub.f32 %v10036_v46, %v3145_v15  ;;  %v10197_v23 = vsub.f32 %v10039_v19, %v3145_v15  ;;  %v3236_v31 = vadd.f32 %v3199_v3, %v3198_v43  ;;  %v7539_v43 = vld [vmem:[#allocation13 + $0x184] ss:$16 sps:$4 sm:$0xff]   ;;  %v7542_v3 = vld [vmem:[#allocation13 + $0x18c] ss:$16 sps:$4 sm:$0xff]   ;;  %v7537_v19 = vld [vmem:[#allocation13 + $0x180] ss:$16 sps:$4 sm:$0xff]  }
 0x7a0   : > { %v3116_v61 = vpop.xlane.xlu0 %3115  ;;  %v7540_v46 = vld [vmem:[#allocation13 + $0x188] ss:$16 sps:$4 sm:$0xff]   ;;  %3876 = vmatprep.subr.bf16.mxu1 %v7539_v43  ;;  %3989 = vmatprep.subr.bf16.mxu0 %v7542_v3  ;;  %v7551_v43 = vld [vmem:[#allocation13 + $0x144] ss:$16 sps:$4 sm:$0xff]   ;;  %v7549_v3 = vld [vmem:[#allocation13 + $0x140] ss:$16 sps:$4 sm:$0xff]  }
 0x7a1   : > { %v3200_v56 = vmul.f32 %v10194_v11, %v10194_v11  ;;  %v3201_v28 = vmul.f32 %v10197_v23, %v10197_v23  ;;  %v3146_v42 = vmul.f32 0.00390625, %v3116_v61  ;;  %3237 = vadd.xlane.f32.xlu0 %v3236_v31  ;;  %3877 = vmatpush2.bf16.msra.mxu1 %v7537_v19 }
 0x7a2   : > { %3990 = vmatpush2.bf16.msra.mxu0 %v7540_v46 }
 0x7a3   : > { %v10204_v58 = vsub.f32 %v10046_v8, %v3146_v42  ;;  %v10207_v49 = vsub.f32 %v10049_v34, %v3146_v42  ;;  %v3239_v36 = vadd.f32 %v3201_v28, %v3200_v56  ;;  %v7545_v56 = vld [vmem:[#allocation13 + $0x164] ss:$16 sps:$4 sm:$0xff]   ;;  %v7548_v28 = vld [vmem:[#allocation13 + $0x16c] ss:$16 sps:$4 sm:$0xff]   ;;  %v7543_v34 = vld [vmem:[#allocation13 + $0x160] ss:$16 sps:$4 sm:$0xff]  }
 0x7a4   : > { %v3119_v15 = vpop.xlane.xlu1 %3118  ;;  %v7546_v8 = vld [vmem:[#allocation13 + $0x168] ss:$16 sps:$4 sm:$0xff]   ;;  %3878 = vmatprep.subr.bf16.mxu1 %v7545_v56  ;;  %3991 = vmatprep.subr.bf16.mxu0 %v7548_v28 }
 0x7a5   : > { %v3202_v61 = vmul.f32 %v10204_v58, %v10204_v58  ;;  %v3203_v31 = vmul.f32 %v10207_v49, %v10207_v49  ;;  %v3147_v32 = vmul.f32 0.00390625, %v3119_v15  ;;  %3240 = vadd.xlane.f32.xlu1 %v3239_v36  ;;  %3879 = vmatpush2.bf16.msra.mxu1 %v7543_v34 }
 0x7a6   : > { %3992 = vmatpush2.bf16.msra.mxu0 %v7546_v8  ;;  %3880 = vmatprep.subr.bf16.mxu1 %v7551_v43  ;;  %v7563_v43 = vld [vmem:[#allocation13 + $0x104] ss:$16 sps:$4 sm:$0xff]  }
 0x7a7   : > { %v10214_v17 = vsub.f32 %v10056_v18, %v3147_v32  ;;  %v10217_v55 = vsub.f32 %v10059_v7, %v3147_v32  ;;  %v3242_v30 = vadd.f32 %v3203_v31, %v3202_v61  ;;  %v7554_v61 = vld [vmem:[#allocation13 + $0x14c] ss:$16 sps:$4 sm:$0xff]   ;;  %v7552_v7 = vld [vmem:[#allocation13 + $0x148] ss:$16 sps:$4 sm:$0xff]   ;;  %v7557_v18 = vld [vmem:[#allocation13 + $0x124] ss:$16 sps:$4 sm:$0xff]  }
 0x7a8   : > { %v3122_v42 = vpop.xlane.xlu0 %3121  ;;  %3993 = vmatprep.subr.bf16.mxu0 %v7554_v61 }
 0x7a9   : > { %v3204_v15 = vmul.f32 %v10214_v17, %v10214_v17  ;;  %v3205_v36 = vmul.f32 %v10217_v55, %v10217_v55  ;;  %v3148_v19 = vmul.f32 0.00390625, %v3122_v42  ;;  %3243 = vadd.xlane.f32.xlu0 %v3242_v30  ;;  %v7560_v30 = vld [vmem:[#allocation13 + $0x12c] ss:$16 sps:$4 sm:$0xff]   ;;  %3881 = vmatpush2.bf16.msra.mxu1 %v7549_v3  ;;  %v7555_v42 = vld [vmem:[#allocation13 + $0x120] ss:$16 sps:$4 sm:$0xff]  }
 0x7aa   : > { %3994 = vmatpush2.bf16.msra.mxu0 %v7552_v7  ;;  %3882 = vmatprep.subr.bf16.mxu1 %v7557_v18 }
 0x7ab   : > { %v10224_v46 = vsub.f32 %v10066_v54, %v3148_v19  ;;  %v10227_v31 = vsub.f32 %v10069_v60, %v3148_v19  ;;  %v3245_v32 = vadd.f32 %v3205_v36, %v3204_v15  ;;  %v7558_v36 = vld [vmem:[#allocation13 + $0x128] ss:$16 sps:$4 sm:$0xff]   ;;  %3995 = vmatprep.subr.bf16.mxu0 %v7560_v30  ;;  %v7566_v60 = vld [vmem:[#allocation13 + $0x10c] ss:$16 sps:$4 sm:$0xff]  }
 0x7ac   : > { %v3125_v41 = vpop.xlane.xlu1 %3124  ;;  %v7564_v30 = vld [vmem:[#allocation13 + $0x108] ss:$16 sps:$4 sm:$0xff]  }
 0x7ad   : > { %v3206_v56 = vmul.f32 %v10224_v46, %v10224_v46  ;;  %v3207_v34 = vmul.f32 %v10227_v31, %v10227_v31  ;;  %v3149_v28 = vmul.f32 0.00390625, %v3125_v41  ;;  %3246 = vadd.xlane.f32.xlu1 %v3245_v32  ;;  %3883 = vmatpush2.bf16.msra.mxu1 %v7555_v42 }
 0x7ae   : > { %3996 = vmatpush2.bf16.msra.mxu0 %v7558_v36  ;;  %3884 = vmatprep.subr.bf16.mxu1 %v7563_v43 }
 0x7af   : > { %v10234_v19 = vsub.f32 %v10076_v62, %v3149_v28  ;;  %v10237_v8 = vsub.f32 %v10079_v50, %v3149_v28  ;;  %v3248_v15 = vadd.f32 %v3207_v34, %v3206_v56  ;;  %v7561_v62 = vld [vmem:[#allocation13 + $0x100] ss:$16 sps:$4 sm:$0xff]   ;;  %3997 = vmatprep.subr.bf16.mxu0 %v7566_v60 }
 0x7b0   : > { %v3128_v61 = vpop.xlane.xlu0 %3127 }
 0x7b1   : > { %v3208_v41 = vmul.f32 %v10234_v19, %v10234_v19  ;;  %v3209_v3 = vmul.f32 %v10237_v8, %v10237_v8  ;;  %v3150_v32 = vmul.f32 0.00390625, %v3128_v61  ;;  %3249 = vadd.xlane.f32.xlu0 %v3248_v15  ;;  %3885 = vmatpush2.bf16.msra.mxu1 %v7561_v62 }
 0x7b2   : > { %3998 = vmatpush2.bf16.msra.mxu0 %v7564_v30 }
 0x7b3   : > { %v10244_v28 = vsub.f32 %v10086_v21, %v3150_v32  ;;  %v10247_v18 = vsub.f32 %v10089_v0, %v3150_v32  ;;  %v3251_v7 = vadd.f32 %v3209_v3, %v3208_v41 }
 0x7b4   : > { %v3131_v56 = vpop.xlane.xlu1 %3130 }
 0x7b5   : > { %v3210_v34 = vmul.f32 %v10244_v28, %v10244_v28  ;;  %v3211_v15 = vmul.f32 %v10247_v18, %v10247_v18  ;;  %v3151_v42 = vmul.f32 0.00390625, %v3131_v56  ;;  %3252 = vadd.xlane.f32.xlu1 %v3251_v7 }
 0x7b7   : > { %v10254_v61 = vsub.f32 %v10096_v48, %v3151_v42  ;;  %v10257_v32 = vsub.f32 %v10099_v14, %v3151_v42  ;;  %v3254_v36 = vadd.f32 %v3211_v15, %v3210_v34 }
 0x7b8   : > { %v3134_v43 = vpop.xlane.xlu0 %3133 }
 0x7b9   : > { %v3212_v60 = vmul.f32 %v10254_v61, %v10254_v61  ;;  %v3213_v41 = vmul.f32 %v10257_v32, %v10257_v32  ;;  %v3152_v3 = vmul.f32 0.00390625, %v3134_v43  ;;  %3255 = vadd.xlane.f32.xlu0 %v3254_v36 }
 0x7bb   : > { %v10264_v7 = vsub.f32 %v10106_v27, %v3152_v3  ;;  %v10267_v62 = vsub.f32 %v10109_v44, %v3152_v3  ;;  %v3257_v56 = vadd.f32 %v3213_v41, %v3212_v60  ;;  %v7569_v44 = vld [vmem:[#allocation14 + $0x74] ss:$8 sps:$4 sm:$0xff]  }
 0x7bc   : > { %v3137_v42 = vpop.xlane.xlu1 %3136  ;;  %v7572_v27 = vld [vmem:[#allocation14 + $0x174] ss:$8 sps:$4 sm:$0xff]   ;;  %6172 = vmatprep.subr.bf16.mxu1 %v7569_v44 }
 0x7bd   : > { %v3214_v30 = vmul.f32 %v10264_v7, %v10264_v7  ;;  %v3215_v34 = vmul.f32 %v10267_v62, %v10267_v62  ;;  %v3153_v15 = vmul.f32 0.00390625, %v3137_v42  ;;  %3258 = vadd.xlane.f32.xlu1 %v3257_v56  ;;  %6285 = vmatprep.subr.bf16.mxu0 %v7572_v27  ;;  %v3088_v44 = vld [vmem:[%s12613_s8] sm:$0x3] }
 0x7bf   : > { %v10274_v14 = vsub.f32 %v10116_v52, %v3153_v15  ;;  %v10277_v36 = vsub.f32 %v10119_v45, %v3153_v15  ;;  %v3260_v43 = vadd.f32 %v3215_v34, %v3214_v30 }
 0x7c1   : > { %v3216_v3 = vmul.f32 %v10274_v14, %v10274_v14  ;;  %v3217_v60 = vmul.f32 %v10277_v36, %v10277_v36  ;;  %3261 = vadd.xlane.f32.xlu0 %v3260_v43 }
 0x7c3   : > { %v3263_v41 = vadd.f32 %v3217_v60, %v3216_v3 }
 0x7c5   : > { %3264 = vadd.xlane.f32.xlu1 %v3263_v41 }
 0x812   : > { %v3220_v56 = vpop.xlane.xlu0 %3219 }
 0x813   : > { %v3266_v42 = vmul.f32 0.00390625, %v3220_v56 }
 0x815   : > { %v3282_v52 = vadd.f32 1e-05, %v3266_v42 }
 0x816   : > { %v3223_v48 = vpop.xlane.xlu1 %3222 }
 0x817   : > { %7823 = vrsqrt.f32 %v3282_v52  ;;  %v3267_v15 = vmul.f32 0.00390625, %v3223_v48  ;;  %v10287_v52 = vrot.slane %v3088_v44, %v12815_v2  ;;  %v10290_v48 = vrot.slane %v3088_v44, %v12816_v10 }
 0x819   : > { %v3283_v30 = vadd.f32 1e-05, %v3267_v15 }
 0x81a   : > { %v3226_v34 = vpop.xlane.xlu0 %3225 }
 0x81b   : > { %7825 = vrsqrt.f32 %v3283_v30  ;;  %v3268_v45 = vmul.f32 0.00390625, %v3226_v34 }
 0x81d   : > { %v3284_v0 = vadd.f32 1e-05, %v3268_v45 }
 0x81e   : > { %v3229_v21 = vpop.xlane.xlu1 %3228 }
 0x81f   : > { %7827 = vrsqrt.f32 %v3284_v0  ;;  %v3269_v43 = vmul.f32 0.00390625, %v3229_v21  ;;  %v3089_v21 = vld [vmem:[%s12614_s9] sm:$0x3] }
 0x821   : > { %v3285_v3 = vadd.f32 1e-05, %v3269_v43  ;;  %v10299_v43 = vrot.slane %v3089_v21, %v12815_v2 }
 0x822   : > { %v3232_v27 = vpop.xlane.xlu0 %3231 }
 0x823   : > { %7829 = vrsqrt.f32 %v3285_v3  ;;  %v3270_v60 = vmul.f32 0.00390625, %v3232_v27  ;;  %v10302_v3 = vrot.slane %v3089_v21, %v12816_v10 }
 0x824   : > { %v7824_v41 = vpop.eup %7823 }
 0x825   : > { %v3314_v45 = vmul.f32 %v7824_v41, %v10124_v33  ;;  %v3286_v56 = vadd.f32 1e-05, %v3270_v60  ;;  %v3315_v0 = vmul.f32 %v7824_v41, %v10127_v39 }
 0x826   : > { %v3235_v42 = vpop.xlane.xlu1 %3234 }
 0x827   : > { %7831 = vrsqrt.f32 %v3286_v56  ;;  %v3271_v15 = vmul.f32 0.00390625, %v3235_v42  ;;  %v3358_v34 = vmul.f32 %v10290_v48, %v3315_v0  ;;  %v3357_v33 = vmul.f32 %v10287_v52, %v3314_v45 }
 0x828   : > { %v7826_v30 = vpop.eup %7825 }
 0x829   : > { %v3316_v44 = vmul.f32 %v7826_v30, %v10134_v9  ;;  %v3287_v27 = vadd.f32 1e-05, %v3271_v15  ;;  %v3317_v60 = vmul.f32 %v7826_v30, %v10137_v13  ;;  %v3401_v50 = vadd.f32 %v10302_v3, %v3358_v34 }
 0x82a   : > { %v3238_v39 = vpop.xlane.xlu0 %3237  ;;  %v3400_v21 = vadd.f32 %v10299_v43, %v3357_v33 }
 0x82b   : > { %7833 = vrsqrt.f32 %v3287_v27  ;;  %v3272_v41 = vmul.f32 0.00390625, %v3238_v39  ;;  %v3360_v56 = vmul.f32 %v10290_v48, %v3317_v60  ;;  %v3359_v0 = vmul.f32 %v10287_v52, %v3316_v44  ;;  %v7567_v44 = vld [vmem:[#allocation14 + $0x70] ss:$8 sps:$4 sm:$0xff]  }
 0x82c   : > { %v7828_v42 = vpop.eup %7827 }
 0x82d   : > { %v3288_v54 = vadd.f32 1e-05, %v3272_v41  ;;  %v3403_v45 = vadd.f32 %v10302_v3, %v3360_v56  ;;  %v3402_v9 = vadd.f32 %v10299_v43, %v3359_v0  ;;  %v3319_v15 = vmul.f32 %v7828_v42, %v10147_v4 }
 0x82e   : > { %v3241_v13 = vpop.xlane.xlu1 %3240  ;;  %v3318_v30 = vmul.f32 %v7828_v42, %v10144_v51 }
 0x82f   : > { %7835 = vrsqrt.f32 %v3288_v54  ;;  %v3273_v27 = vmul.f32 0.00390625, %v3241_v13  ;;  %v3433_v60 = vpack.c.bf16 %v3403_v45, %v3401_v50  ;;  %v3432_v39 = vpack.c.bf16 %v3402_v9, %v3400_v21 }
 0x830   : > { %v7830_v59 = vpop.eup %7829  ;;  %v3362_v34 = vmul.f32 %v10290_v48, %v3319_v15  ;;  %v3361_v33 = vmul.f32 %v10287_v52, %v3318_v30 }
 0x831   : > { %v3289_v41 = vadd.f32 1e-05, %v3273_v27  ;;  %3886 = vmatprep.mubr.bf16.mxu1 %v3433_v60  ;;  %3999 = vmatprep.mubr.bf16.mxu0 %v3433_v60  ;;  %v3321_v56 = vmul.f32 %v7830_v59, %v10157_v37  ;;  %v3320_v4 = vmul.f32 %v7830_v59, %v10154_v6 }
 0x832   : > { %3887 = vmatmul.mubr.bf16.vlgmr.msra.gmra.mxu1 %v3432_v39  ;;  %4000 = vmatmul.mubr.bf16.vlgmr.msra.gmra.mxu0 %v3432_v39  ;;  %v3244_v54 = vpop.xlane.xlu0 %3243  ;;  %v3405_v21 = vadd.f32 %v10302_v3, %v3362_v34  ;;  %v3404_v45 = vadd.f32 %v10299_v43, %v3361_v33 }
 0x833   : > { %7837 = vrsqrt.f32 %v3289_v41  ;;  %v3274_v50 = vmul.f32 0.00390625, %v3244_v54  ;;  %v3364_v51 = vmul.f32 %v10290_v48, %v3321_v56  ;;  %v3363_v0 = vmul.f32 %v10287_v52, %v3320_v4  ;;  %6173 = vmatpush1.bf16.msra.mxu1 %v7567_v44  ;;  %6286 = vmatpush1.bf16.msra.mxu0 %v7570_v12 }
 0x834   : > { %v7832_v42 = vpop.eup %7831 }
 0x835   : > { %v3290_v9 = vadd.f32 1e-05, %v3274_v50  ;;  %v3407_v37 = vadd.f32 %v10302_v3, %v3364_v51  ;;  %v3406_v59 = vadd.f32 %v10299_v43, %v3363_v0  ;;  %v3323_v6 = vmul.f32 %v7832_v42, %v10167_v35 }
 0x836   : > { %v3247_v15 = vpop.xlane.xlu1 %3246  ;;  %v3322_v13 = vmul.f32 %v7832_v42, %v10164_v40 }
 0x837   : > { %7839 = vrsqrt.f32 %v3290_v9  ;;  %v3275_v30 = vmul.f32 0.00390625, %v3247_v15  ;;  %v3435_v27 = vpack.c.bf16 %v3407_v37, %v3405_v21  ;;  %v3434_v60 = vpack.c.bf16 %v3406_v59, %v3404_v45 }
 0x838   : > { %v7834_v12 = vpop.eup %7833  ;;  %v3366_v39 = vmul.f32 %v10290_v48, %v3323_v6  ;;  %v3365_v44 = vmul.f32 %v10287_v52, %v3322_v13 }
 0x839   : > { %v3291_v34 = vadd.f32 1e-05, %v3275_v30  ;;  %3896 = vmatprep.mubr.bf16.mxu1 %v3435_v27  ;;  %4009 = vmatprep.mubr.bf16.mxu0 %v3435_v27  ;;  %v3325_v33 = vmul.f32 %v7834_v12, %v10177_v22  ;;  %v3324_v41 = vmul.f32 %v7834_v12, %v10174_v16 }
 0x83a   : > { %3897 = vmatmul.mubr.bf16.gmra.mxu1 %v3434_v60  ;;  %4010 = vmatmul.mubr.bf16.gmra.mxu0 %v3434_v60  ;;  %v3250_v35 = vpop.xlane.xlu0 %3249  ;;  %v3409_v50 = vadd.f32 %v10302_v3, %v3366_v39  ;;  %v3408_v51 = vadd.f32 %v10299_v43, %v3365_v44 }
 0x83b   : > { %7841 = vrsqrt.f32 %v3291_v34  ;;  %v3276_v40 = vmul.f32 0.00390625, %v3250_v35  ;;  %v3368_v56 = vmul.f32 %v10290_v48, %v3325_v33  ;;  %v3367_v4 = vmul.f32 %v10287_v52, %v3324_v41 }
 0x83c   : > { %v7836_v54 = vpop.eup %7835 }
 0x83d   : > { %v3292_v0 = vadd.f32 1e-05, %v3276_v40  ;;  %v3411_v42 = vadd.f32 %v10302_v3, %v3368_v56  ;;  %v3410_v22 = vadd.f32 %v10299_v43, %v3367_v4  ;;  %v3327_v16 = vmul.f32 %v7836_v54, %v10187_v53 }
 0x83e   : > { %v3253_v21 = vpop.xlane.xlu1 %3252  ;;  %v3326_v45 = vmul.f32 %v7836_v54, %v10184_v29 }
 0x83f   : > { %7843 = vrsqrt.f32 %v3292_v0  ;;  %v3277_v9 = vmul.f32 0.00390625, %v3253_v21  ;;  %v3437_v37 = vpack.c.bf16 %v3411_v42, %v3409_v50  ;;  %v3436_v59 = vpack.c.bf16 %v3410_v22, %v3408_v51 }
 0x840   : > { %v7838_v6 = vpop.eup %7837  ;;  %v3370_v15 = vmul.f32 %v10290_v48, %v3327_v16  ;;  %v3369_v13 = vmul.f32 %v10287_v52, %v3326_v45 }
 0x841   : > { %v3293_v30 = vadd.f32 1e-05, %v3277_v9  ;;  %3906 = vmatprep.mubr.bf16.mxu1 %v3437_v37  ;;  %4019 = vmatprep.mubr.bf16.mxu0 %v3437_v37  ;;  %v3329_v27 = vmul.f32 %v7838_v6, %v10197_v23  ;;  %v3328_v60 = vmul.f32 %v7838_v6, %v10194_v11 }
 0x842   : > { %3907 = vmatmul.mubr.bf16.gmra.mxu1 %v3436_v59  ;;  %4020 = vmatmul.mubr.bf16.gmra.mxu0 %v3436_v59  ;;  %v3256_v53 = vpop.xlane.xlu0 %3255  ;;  %v3413_v34 = vadd.f32 %v10302_v3, %v3370_v15  ;;  %v3412_v33 = vadd.f32 %v10299_v43, %v3369_v13 }
 0x843   : > { %7845 = vrsqrt.f32 %v3293_v30  ;;  %v3278_v29 = vmul.f32 0.00390625, %v3256_v53  ;;  %v3372_v12 = vmul.f32 %v10290_v48, %v3329_v27  ;;  %v3371_v39 = vmul.f32 %v10287_v52, %v3328_v60 }
 0x844   : > { %v7840_v44 = vpop.eup %7839 }
 0x845   : > { %v3294_v41 = vadd.f32 1e-05, %v3278_v29  ;;  %v3415_v35 = vadd.f32 %v10302_v3, %v3372_v12  ;;  %v3414_v23 = vadd.f32 %v10299_v43, %v3371_v39  ;;  %v3331_v11 = vmul.f32 %v7840_v44, %v10207_v49 }
 0x846   : > { %v3259_v40 = vpop.xlane.xlu1 %3258  ;;  %v3330_v56 = vmul.f32 %v7840_v44, %v10204_v58 }
 0x847   : > { %7847 = vrsqrt.f32 %v3294_v41  ;;  %v3279_v4 = vmul.f32 0.00390625, %v3259_v40  ;;  %v3439_v54 = vpack.c.bf16 %v3415_v35, %v3413_v34  ;;  %v3438_v50 = vpack.c.bf16 %v3414_v23, %v3412_v33 }
 0x848   : > { %v7842_v51 = vpop.eup %7841  ;;  %v3374_v0 = vmul.f32 %v10290_v48, %v3331_v11  ;;  %v3373_v42 = vmul.f32 %v10287_v52, %v3330_v56 }
 0x849   : > { %v3295_v22 = vadd.f32 1e-05, %v3279_v4  ;;  %3916 = vmatprep.mubr.bf16.mxu1 %v3439_v54  ;;  %4029 = vmatprep.mubr.bf16.mxu0 %v3439_v54  ;;  %v3333_v16 = vmul.f32 %v7842_v51, %v10217_v55  ;;  %v3332_v21 = vmul.f32 %v7842_v51, %v10214_v17 }
 0x84a   : > { %3917 = vmatmul.mubr.bf16.gmra.mxu1 %v3438_v50  ;;  %4030 = vmatmul.mubr.bf16.gmra.mxu0 %v3438_v50  ;;  %v3262_v49 = vpop.xlane.xlu0 %3261  ;;  %v3417_v59 = vadd.f32 %v10302_v3, %v3374_v0  ;;  %v3416_v6 = vadd.f32 %v10299_v43, %v3373_v42 }
 0x84b   : > { %7849 = vrsqrt.f32 %v3295_v22  ;;  %v3280_v58 = vmul.f32 0.00390625, %v3262_v49  ;;  %v3376_v45 = vmul.f32 %v10290_v48, %v3333_v16  ;;  %v3375_v9 = vmul.f32 %v10287_v52, %v3332_v21 }
 0x84c   : > { %v7844_v37 = vpop.eup %7843 }
 0x84d   : > { %v3296_v15 = vadd.f32 1e-05, %v3280_v58  ;;  %v3419_v13 = vadd.f32 %v10302_v3, %v3376_v45  ;;  %v3418_v55 = vadd.f32 %v10299_v43, %v3375_v9  ;;  %v3335_v17 = vmul.f32 %v7844_v37, %v10227_v31 }
 0x84e   : > { %v3265_v30 = vpop.xlane.xlu1 %3264  ;;  %v3334_v27 = vmul.f32 %v7844_v37, %v10224_v46 }
 0x84f   : > { %7851 = vrsqrt.f32 %v3296_v15  ;;  %v3281_v60 = vmul.f32 0.00390625, %v3265_v30  ;;  %v3441_v53 = vpack.c.bf16 %v3419_v13, %v3417_v59  ;;  %v3440_v29 = vpack.c.bf16 %v3418_v55, %v3416_v6 }
 0x850   : > { %v7846_v12 = vpop.eup %7845  ;;  %v3378_v39 = vmul.f32 %v10290_v48, %v3335_v17  ;;  %v3377_v44 = vmul.f32 %v10287_v52, %v3334_v27 }
 0x851   : > { %v3297_v34 = vadd.f32 1e-05, %v3281_v60  ;;  %3926 = vmatprep.mubr.bf16.mxu1 %v3441_v53  ;;  %4039 = vmatprep.mubr.bf16.mxu0 %v3441_v53  ;;  %v3337_v33 = vmul.f32 %v7846_v12, %v10237_v8  ;;  %v3336_v41 = vmul.f32 %v7846_v12, %v10234_v19  ;;  %v7573_v12 = vld [vmem:[#allocation14 + $0x60] ss:$8 sps:$4 sm:$0xff]  }
 0x852   : > { %3927 = vmatmul.mubr.bf16.gmra.mxu1 %v3440_v29  ;;  %4040 = vmatmul.mubr.bf16.gmra.mxu0 %v3440_v29  ;;  %v3421_v23 = vadd.f32 %v10302_v3, %v3378_v39  ;;  %v3420_v11 = vadd.f32 %v10299_v43, %v3377_v44  ;;  %v7578_v29 = vld [vmem:[#allocation14 + $0x164] ss:$8 sps:$4 sm:$0xff]   ;;  %v7579_v39 = vld [vmem:[#allocation14 + $0x50] ss:$8 sps:$4 sm:$0xff]  }
 0x853   : > { %7853 = vrsqrt.f32 %v3297_v34  ;;  %v3380_v46 = vmul.f32 %v10290_v48, %v3337_v33  ;;  %v3379_v31 = vmul.f32 %v10287_v52, %v3336_v41  ;;  %6287 = vmatprep.subr.bf16.mxu0 %v7578_v29  ;;  %v7582_v44 = vld [vmem:[#allocation14 + $0x150] ss:$8 sps:$4 sm:$0xff]   ;;  %v7590_v34 = vld [vmem:[#allocation14 + $0x144] ss:$8 sps:$4 sm:$0xff]   ;;  %v7585_v33 = vld [vmem:[#allocation14 + $0x40] ss:$8 sps:$4 sm:$0xff]  }
 0x854   : > { %v7848_v35 = vpop.eup %7847  ;;  %v7588_v41 = vld [vmem:[#allocation14 + $0x140] ss:$8 sps:$4 sm:$0xff]  }
 0x855   : > { %v3423_v40 = vadd.f32 %v10302_v3, %v3380_v46  ;;  %v3422_v56 = vadd.f32 %v10299_v43, %v3379_v31  ;;  %v3339_v8 = vmul.f32 %v7848_v35, %v10247_v18  ;;  %v3338_v19 = vmul.f32 %v7848_v35, %v10244_v28  ;;  %v7593_v46 = vld [vmem:[#allocation14 + $0x34] ss:$8 sps:$4 sm:$0xff]   ;;  %v7591_v35 = vld [vmem:[#allocation14 + $0x30] ss:$8 sps:$4 sm:$0xff]  }
 0x856   : > { %v7596_v31 = vld [vmem:[#allocation14 + $0x134] ss:$8 sps:$4 sm:$0xff]  }
 0x857   : > { %v3443_v4 = vpack.c.bf16 %v3423_v40, %v3421_v23  ;;  %v3442_v54 = vpack.c.bf16 %v3422_v56, %v3420_v11  ;;  %v3382_v51 = vmul.f32 %v10290_v48, %v3339_v8  ;;  %v3381_v0 = vmul.f32 %v10287_v52, %v3338_v19  ;;  %v7594_v23 = vld [vmem:[#allocation14 + $0x130] ss:$8 sps:$4 sm:$0xff]   ;;  %v7599_v11 = vld [vmem:[#allocation14 + $0x24] ss:$8 sps:$4 sm:$0xff]   ;;  %v7597_v56 = vld [vmem:[#allocation14 + $0x20] ss:$8 sps:$4 sm:$0xff]  }
 0x858   : > { %v7850_v50 = vpop.eup %7849  ;;  %v7602_v40 = vld [vmem:[#allocation14 + $0x124] ss:$8 sps:$4 sm:$0xff]   ;;  %v7600_v8 = vld [vmem:[#allocation14 + $0x120] ss:$8 sps:$4 sm:$0xff]   ;;  %v7605_v19 = vld [vmem:[#allocation14 + $0x14] ss:$8 sps:$4 sm:$0xff]  }
 0x859   : > { %3936 = vmatprep.mubr.bf16.mxu1 %v3443_v4  ;;  %4049 = vmatprep.mubr.bf16.mxu0 %v3443_v4  ;;  %v3341_v42 = vmul.f32 %v7850_v50, %v10257_v32  ;;  %v3340_v22 = vmul.f32 %v7850_v50, %v10254_v61  ;;  %v3425_v21 = vadd.f32 %v10302_v3, %v3382_v51  ;;  %v7608_v4 = vld [vmem:[#allocation14 + $0x114] ss:$8 sps:$4 sm:$0xff]   ;;  %v7606_v50 = vld [vmem:[#allocation14 + $0x110] ss:$8 sps:$4 sm:$0xff]  }
 0x85a   : > { %3937 = vmatmul.mubr.bf16.gmra.mxu1 %v3442_v54  ;;  %4050 = vmatmul.mubr.bf16.gmra.mxu0 %v3442_v54  ;;  %v3424_v49 = vadd.f32 %v10299_v43, %v3381_v0  ;;  %v7603_v54 = vld [vmem:[#allocation14 + $0x10] ss:$8 sps:$4 sm:$0xff]   ;;  %v3512_v51 = vld [vmem:[%s12616_s11] sm:$0xf] }
 0x85b   : > { %v3384_v16 = vmul.f32 %v10290_v48, %v3341_v42  ;;  %v3383_v18 = vmul.f32 %v10287_v52, %v3340_v22  ;;  %v10401_v42 = vrot.slane %v3512_v51, %v12815_v2  ;;  %v12849_v22 = vld [vmem:[#allocation29_spill] sm:$0xff] }
 0x85c   : > { %v7852_v28 = vpop.eup %7851 }
 0x85d   : > { %v3427_v58 = vadd.f32 %v10302_v3, %v3384_v16  ;;  %v3426_v45 = vadd.f32 %v10299_v43, %v3383_v18  ;;  %v3343_v9 = vmul.f32 %v7852_v28, %v10267_v62  ;;  %v3342_v32 = vmul.f32 %v7852_v28, %v10264_v7 }
 0x85e   : > { %v12850_v16 = vsub.s32 2, %v12849_v22 }
 0x85f   : > { %v3445_v61 = vpack.c.bf16 %v3427_v58, %v3425_v21  ;;  %v3444_v37 = vpack.c.bf16 %v3426_v45, %v3424_v49  ;;  %v3386_v6 = vmul.f32 %v10290_v48, %v3343_v9  ;;  %v3385_v55 = vmul.f32 %v10287_v52, %v3342_v32 }
 0x860   : > { %v7854_v59 = vpop.eup %7853  ;;  %v10405_v18 = vrot.slane %v3512_v51, %v12850_v16  ;;  %v10408_v21 = vrot.slane %v3512_v51, %v12816_v10  ;;  %v12851_v9 = vsub.s32 3, %v12849_v22 }
 0x861   : > { %3946 = vmatprep.mubr.bf16.mxu1 %v3445_v61  ;;  %4059 = vmatprep.mubr.bf16.mxu0 %v3445_v61  ;;  %v3345_v15 = vmul.f32 %v7854_v59, %v10277_v36  ;;  %v3344_v13 = vmul.f32 %v7854_v59, %v10274_v14  ;;  %v3429_v7 = vadd.f32 %v10302_v3, %v3386_v6  ;;  %v7575_v14 = vld [vmem:[#allocation14 + $0x64] ss:$8 sps:$4 sm:$0xff]  }
 0x862   : > { %3947 = vmatmul.mubr.bf16.gmra.mxu1 %v3444_v37  ;;  %4060 = vmatmul.mubr.bf16.gmra.mxu0 %v3444_v37  ;;  %v3428_v27 = vadd.f32 %v10299_v43, %v3385_v55  ;;  %v10418_v32 = vrot.slane %v3512_v51, %v12851_v9 }
 0x863   : > { %v3388_v17 = vmul.f32 %v10290_v48, %v3345_v15  ;;  %v3387_v62 = vmul.f32 %v10287_v52, %v3344_v13  ;;  %v7576_v48 = vld [vmem:[#allocation14 + $0x160] ss:$8 sps:$4 sm:$0xff]   ;;  %6174 = vmatprep.subr.bf16.mxu1 %v7575_v14  ;;  %v7581_v52 = vld [vmem:[#allocation14 + $0x54] ss:$8 sps:$4 sm:$0xff]  }
 0x864   : > { %6175 = vmatpush1.bf16.msra.mxu1 %v7573_v12  ;;  %6288 = vmatpush1.bf16.msra.mxu0 %v7576_v48 }
 0x865   : > { %v3431_v30 = vadd.f32 %v10302_v3, %v3388_v17  ;;  %v3430_v60 = vadd.f32 %v10299_v43, %v3387_v62  ;;  %v7584_v3 = vld [vmem:[#allocation14 + $0x154] ss:$8 sps:$4 sm:$0xff]   ;;  %6176 = vmatprep.subr.bf16.mxu1 %v7581_v52  ;;  %v7587_v43 = vld [vmem:[#allocation14 + $0x44] ss:$8 sps:$4 sm:$0xff]  }
 0x866   : > { %6289 = vmatprep.subr.bf16.mxu0 %v7584_v3 }
 0x867   : > { %v3447_v53 = vpack.c.bf16 %v3431_v30, %v3429_v7  ;;  %v3446_v36 = vpack.c.bf16 %v3430_v60, %v3428_v27 }
 0x868   : > { %6177 = vmatpush1.bf16.msra.mxu1 %v7579_v39  ;;  %6290 = vmatpush1.bf16.msra.mxu0 %v7582_v44 }
 0x869   : > { %3956 = vmatprep.mubr.bf16.mxu1 %v3447_v53  ;;  %4069 = vmatprep.mubr.bf16.mxu0 %v3447_v53 }
 0x86a   : > { %3957 = vmatmul.mubr.bf16.gmra.mxu1 %v3446_v36  ;;  %4070 = vmatmul.mubr.bf16.gmra.mxu0 %v3446_v36 }
 0x86b   : > { %6178 = vmatprep.subr.bf16.mxu1 %v7587_v43  ;;  %6291 = vmatprep.subr.bf16.mxu0 %v7590_v34  ;;  %v7609_v43 = vld [vmem:[#allocation14] ss:$8 sps:$4 sm:$0xff]  }
 0x86c   : > { %6179 = vmatpush1.bf16.msra.mxu1 %v7585_v33  ;;  %6292 = vmatpush1.bf16.msra.mxu0 %v7588_v41  ;;  %v7611_v41 = vld [vmem:[#allocation14 + $0x4] ss:$8 sps:$4 sm:$0xff]  }
 0x86d   : > { %6180 = vmatprep.subr.bf16.mxu1 %v7593_v46  ;;  %6293 = vmatprep.subr.bf16.mxu0 %v7596_v31 }
 0x870   : > { %6181 = vmatpush1.bf16.msra.mxu1 %v7591_v35  ;;  %6294 = vmatpush1.bf16.msra.mxu0 %v7594_v23 }
 0x871   : > { %6182 = vmatprep.subr.bf16.mxu1 %v7599_v11  ;;  %6295 = vmatprep.subr.bf16.mxu0 %v7602_v40  ;;  %v7612_v40 = vld [vmem:[#allocation14 + $0x100] ss:$8 sps:$4 sm:$0xff]  }
 0x874   : > { %6183 = vmatpush1.bf16.msra.mxu1 %v7597_v56  ;;  %6296 = vmatpush1.bf16.msra.mxu0 %v7600_v8  ;;  %v7614_v8 = vld [vmem:[#allocation14 + $0x104] ss:$8 sps:$4 sm:$0xff]  }
 0x875   : > { %6184 = vmatprep.subr.bf16.mxu1 %v7605_v19  ;;  %6297 = vmatprep.subr.bf16.mxu0 %v7608_v4 }
 0x878   : > { %6185 = vmatpush1.bf16.msra.mxu1 %v7603_v54  ;;  %6298 = vmatpush1.bf16.msra.mxu0 %v7606_v50 }
 0x879   : > { %6186 = vmatprep.subr.bf16.mxu1 %v7611_v41  ;;  %6299 = vmatprep.subr.bf16.mxu0 %v7614_v8 }
 0x87c   : > { %6187 = vmatpush1.bf16.msra.mxu1 %v7609_v43  ;;  %6300 = vmatpush1.bf16.msra.mxu0 %v7612_v40 }
 0x8f2   : > { %v3888_v0 = vpop.f32.mrf.mxu1  ;;  %v4001_v28 = vpop.f32.mrf.mxu0 }
 0x8f3   : > { %v10411_v58 = vadd.f32 %v3888_v0, %v10401_v42  ;;  %v10414_v45 = vadd.f32 %v4001_v28, %v10405_v18 }
 0x8f4   : > { %v3890_v49 = vpop.f32.mrf.mxu1  ;;  %v4003_v37 = vpop.f32.mrf.mxu0 }
 0x8f5   : > { %v10421_v61 = vadd.f32 %v3890_v49, %v10408_v21  ;;  %v10424_v6 = vmul.f32 0.70710677, %v10411_v58  ;;  %v10427_v15 = vmul.f32 0.70710677, %v10414_v45  ;;  %v10430_v13 = vadd.f32 %v4003_v37, %v10418_v32 }
 0x8f6   : > { %v3892_v59 = vpop.f32.mrf.mxu1  ;;  %v4005_v62 = vpop.f32.mrf.mxu0 }
 0x8f7   : > { %v10433_v55 = vmul.f32 0.70710677, %v10421_v61  ;;  %v10436_v17 = vadd.f32 %v3892_v59, %v10401_v42  ;;  %v4336_v7 = vand.u32 2147483647, %v10424_v6  ;;  %v10440_v30 = vand.u32 2147483647, %v10427_v15 }
 0x8f8   : > { %v10443_v27 = vmul.f32 0.70710677, %v10430_v13  ;;  %v10446_v60 = vadd.f32 %v4005_v62, %v10405_v18  ;;  %v3894_v14 = vpop.f32.mrf.mxu1  ;;  %v4007_v56 = vpop.f32.mrf.mxu0  ;;  %vm4208_vm0 = vcmp.ge.f32.partialorder %v10424_v6, 0.0  ;;  %vm4210_vm1 = vcmp.ge.f32.partialorder %v10427_v15, 0.0 }
 0x8f9   : > { %v10449_v53 = vand.u32 2147483647, %v10433_v55  ;;  %v10452_v36 = vmul.f32 0.70710677, %v10436_v17  ;;  %v4400_v29 = vmul.f32 0.3275911, %v4336_v7  ;;  %v10462_v3 = vadd.f32 %v3894_v14, %v10408_v21 }
 0x8fa   : > { %v4402_v12 = vmul.f32 0.3275911, %v10440_v30  ;;  %v10456_v48 = vand.u32 2147483647, %v10443_v27  ;;  %v10459_v52 = vmul.f32 0.70710677, %v10446_v60  ;;  %v3898_v19 = vpop.f32.mrf.mxu1  ;;  %v10481_v0 = vadd.f32 %v4007_v56, %v10418_v32 }
 0x8fb   : > { %v4401_v39 = vmul.f32 0.3275911, %v10449_v53  ;;  %v10466_v44 = vand.u32 2147483647, %v10452_v36  ;;  %v4464_v34 = vadd.f32 1.0, %v4400_v29  ;;  %v10484_v22 = vadd.f32 %v3898_v19, %v10401_v42 }
 0x8fc   : > { %v4466_v33 = vadd.f32 1.0, %v4402_v12  ;;  %v4403_v46 = vmul.f32 0.3275911, %v10456_v48  ;;  %v10470_v31 = vand.u32 2147483647, %v10459_v52  ;;  %v5168_v37 = vsub.f32 0.0, %v4336_v7 }
 0x8fd   : > { %v10473_v35 = vmul.f32 0.70710677, %v10462_v3  ;;  %v4465_v23 = vadd.f32 1.0, %v4401_v39  ;;  %v4404_v11 = vmul.f32 0.3275911, %v10466_v44  ;;  %7855 = vrcp.f32 %v4464_v34 }
 0x8fe   : > { %7857 = vrcp.f32 %v4466_v33  ;;  %v4467_v4 = vadd.f32 1.0, %v4403_v46  ;;  %v4406_v54 = vmul.f32 0.3275911, %v10470_v31  ;;  %v10488_v49 = vmul.f32 0.70710677, %v10481_v0 }
 0x8ff   : > { %v10478_v50 = vand.u32 2147483647, %v10473_v35  ;;  %7859 = vrcp.f32 %v4465_v23  ;;  %v4468_v51 = vadd.f32 1.0, %v4404_v11  ;;  %v10491_v9 = vmul.f32 0.70710677, %v10484_v22 }
 0x900   : > { %7861 = vrcp.f32 %v4467_v4  ;;  %v4470_v16 = vadd.f32 1.0, %v4406_v54  ;;  %v10494_v62 = vand.u32 2147483647, %v10488_v49  ;;  %v5232_v12 = vmul.f32 %v5168_v37, %v4336_v7 }
 0x901   : > { %v4405_v28 = vmul.f32 0.3275911, %v10478_v50  ;;  %7863 = vrcp.f32 %v4468_v51  ;;  %v10497_v14 = vand.u32 2147483647, %v10491_v9  ;;  %v5170_v39 = vsub.f32 0.0, %v10440_v30 }
 0x902   : > { %7865 = vrcp.f32 %v4470_v16  ;;  %v4407_v34 = vmul.f32 0.3275911, %v10494_v62  ;;  %v5169_v41 = vsub.f32 0.0, %v10449_v53  ;;  %v10513_v7 = vmul.f32 0.5, %v10411_v58 }
 0x903   : > { %v4469_v59 = vadd.f32 1.0, %v4405_v28  ;;  %v4408_v46 = vmul.f32 0.3275911, %v10497_v14  ;;  %v5296_v11 = vmul.f32 1.442695, %v5232_v12  ;;  %v5234_v56 = vmul.f32 %v5170_v39, %v10440_v30 }
 0x904   : > { %v12674_v19 = vmov -1.0   ;;  %v10523_v4 = vmul.f32 0.5, %v10414_v45  ;;  %v4471_v15 = vadd.f32 1.0, %v4407_v34  ;;  %vm4209_vm2 = vcmp.ge.f32.partialorder %v10433_v55, 0.0 }
 0x905   : > { %7867 = vrcp.f32 %v4469_v59  ;;  %v10520_v6 = vsel %vm4208_vm0, 1.0, %v12674_v19  ;;  %v10529_v58 = vsel %vm4210_vm1, 1.0, %v12674_v19  ;;  %v5233_v30 = vmul.f32 %v5169_v41, %v10449_v53 }
 0x906   : > { %v4472_v16 = vadd.f32 1.0, %v4408_v46  ;;  %v10534_v37 = vmul.f32 0.5, %v10421_v61  ;;  %v10537_v45 = vmul.f32 0.5, %v10430_v13  ;;  %vm4211_vm3 = vcmp.ge.f32.partialorder %v10443_v27, 0.0  ;;  %v4011_v46 = vpop.f32.mrf.mxu0 }
 0x907   : > { %7869 = vpow2.f32 %v5296_v11  ;;  %v5300_v12 = vmul.f32 1.442695, %v5234_v56  ;;  %v10544_v55 = vsel %vm4209_vm2, 1.0, %v12674_v19  ;;  %v5298_v61 = vmul.f32 1.442695, %v5233_v30 }
 0x908   : > { %12852 = vst [vmem:[#allocation29_spill] sm:$0xff] %v10537_v45  ;;  %7871 = vrcp.f32 %v4471_v15  ;;  %v10548_v13 = vsel %vm4211_vm3, 1.0, %v12674_v19  ;;  %v5171_v27 = vsub.f32 0.0, %v10456_v48  ;;  %v10553_v11 = vmul.f32 0.5, %v10436_v17  ;;  %v7617_v19 = vld [vmem:[#allocation14 + $0xf4] ss:$8 sps:$4 sm:$0xff]  }
 0x909   : > { %7873 = vrcp.f32 %v4472_v16  ;;  %v10557_v56 = vmul.f32 0.5, %v10446_v60  ;;  %v5174_v17 = vsub.f32 0.0, %v10470_v31  ;;  %v10566_v57 = vadd.f32 %v4011_v46, %v10405_v18  ;;  %6188 = vmatprep.subr.bf16.mxu1 %v7617_v19 }
 0x90a   : > { %v10499_v29 = vpop.eup %7855  ;;  %7875 = vpow2.f32 %v5300_v12  ;;  %v5235_v60 = vmul.f32 %v5171_v27, %v10456_v48  ;;  %v7620_v12 = vld [vmem:[#allocation14 + $0x1f4] ss:$8 sps:$4 sm:$0xff]   ;;  %vm4212_vm4 = vcmp.ge.f32.partialorder %v10452_v36, 0.0  ;;  %6189 = vmatpush2.bf16.msra.mxu1 %v7615_v47  ;;  %v12854_v27 = vmov -1.0  }
 0x90b   : > { %v10502_v43 = vpop.eup %7857  ;;  %v4592_v23 = vmul.f32 1.0614054, %v10499_v29  ;;  %7877 = vpow2.f32 %v5298_v61  ;;  %6301 = vmatprep.subr.bf16.mxu0 %v7620_v12  ;;  %v5238_v19 = vmul.f32 %v5174_v17, %v10470_v31  ;;  %v10576_v61 = vmul.f32 0.5, %v10462_v3 }
 0x90c   : > { %v10505_v33 = vpop.eup %7859  ;;  %v4594_v40 = vmul.f32 1.0614054, %v10502_v43  ;;  %v10579_v36 = vmul.f32 0.70710677, %v10566_v57  ;;  %vm4214_vm5 = vcmp.ge.f32.partialorder %v10459_v52, 0.0  ;;  %vm4213_vm6 = vcmp.ge.f32.partialorder %v10473_v35, 0.0  ;;  %v3900_v35 = vpop.f32.mrf.mxu1 }
 0x90d   : > { %v10517_v8 = vpop.eup %7861  ;;  %v4593_v54 = vmul.f32 1.0614054, %v10505_v33  ;;  %v4656_v28 = vadd.f32 -1.4531521, %v4592_v23  ;;  %12853 = vst [vmem:[#allocation64_spill] sm:$0xff] %v10576_v61  ;;  %vm4215_vm7 = vcmp.ge.f32.partialorder %v10488_v49, 0.0 }
 0x90e   : > { %v10526_v51 = vpop.eup %7863  ;;  %v4658_v59 = vadd.f32 -1.4531521, %v4594_v40  ;;  %v4595_v39 = vmul.f32 1.0614054, %v10517_v8  ;;  %v5172_v40 = vsub.f32 0.0, %v10466_v44  ;;  %vm4216_vm8 = vcmp.ge.f32.partialorder %v10491_v9, 0.0 }
 0x90f   : > { %v10541_v34 = vpop.eup %7865  ;;  %v4657_v53 = vadd.f32 -1.4531521, %v4593_v54  ;;  %v4596_v41 = vmul.f32 1.0614054, %v10526_v51  ;;  %v4720_v23 = vmul.f32 %v10499_v29, %v4656_v28  ;;  %v5308_v52 = vmul.f32 1.442695, %v5238_v19 }
 0x910   : > { %v4722_v54 = vmul.f32 %v10502_v43, %v4658_v59  ;;  %v4659_v15 = vadd.f32 -1.4531521, %v4595_v39  ;;  %v4598_v30 = vmul.f32 1.0614054, %v10541_v34  ;;  %v7618_v59 = vld [vmem:[#allocation14 + $0x1f0] ss:$8 sps:$4 sm:$0xff]   ;;  %v5236_v25 = vmul.f32 %v5172_v40, %v10466_v44 }
 0x911   : > { %v4721_v16 = vmul.f32 %v10505_v33, %v4657_v53  ;;  %v4660_v28 = vadd.f32 -1.4531521, %v4596_v41  ;;  %v4784_v39 = vadd.f32 1.4214138, %v4720_v23  ;;  %v5173_v53 = vsub.f32 0.0, %v10478_v50  ;;  %6302 = vmatpush2.bf16.msra.mxu0 %v7618_v59 }
 0x912   : > { %v10561_v5 = vpop.eup %7867  ;;  %v4786_v41 = vadd.f32 1.4214138, %v4722_v54  ;;  %v4723_v24 = vmul.f32 %v10517_v8, %v4659_v15  ;;  %v4662_v63 = vadd.f32 -1.4531521, %v4598_v30  ;;  %v5302_v44 = vmul.f32 1.442695, %v5235_v60 }
 0x913   : > { %v4597_v46 = vmul.f32 1.0614054, %v10561_v5  ;;  %v4785_v48 = vadd.f32 1.4214138, %v4721_v16  ;;  %v10582_v23 = vsel %vm4212_vm4, 1.0, %v12854_v27  ;;  %v4724_v40 = vmul.f32 %v10526_v51, %v4660_v28 }
 0x914   : > { %v4848_v47 = vmul.f32 %v10499_v29, %v4784_v39  ;;  %v5304_v54 = vmul.f32 1.442695, %v5236_v25  ;;  %v5237_v3 = vmul.f32 %v5173_v53, %v10478_v50  ;;  %v4850_v31 = vmul.f32 %v10502_v43, %v4786_v41  ;;  %v10591_v17 = vpop.eup %7869 }
 0x915   : > { %v4787_v15 = vadd.f32 1.4214138, %v4723_v24  ;;  %v4726_v30 = vmul.f32 %v10541_v34, %v4662_v63  ;;  %v4661_v16 = vadd.f32 -1.4531521, %v4597_v46  ;;  %v4849_v60 = vmul.f32 %v10505_v33, %v4785_v48  ;;  %v10600_v59 = vpop.eup %7871 }
 0x916   : > { %v10595_v28 = vsel %vm4214_vm5, 1.0, %v12854_v27  ;;  %v10598_v25 = vand.u32 2147483647, %v10579_v36  ;;  %7879 = vpow2.f32 %v5302_v44  ;;  %v4788_v50 = vadd.f32 1.4214138, %v4724_v40  ;;  %v10608_v12 = vpop.eup %7873 }
 0x917   : > { %v10603_v24 = vsel %vm4213_vm6, 1.0, %v12854_v27  ;;  %v10606_v63 = vmul.f32 0.5, %v10481_v0  ;;  %v4912_v39 = vadd.f32 -0.28449672, %v4848_v47  ;;  %7881 = vpow2.f32 %v5304_v54  ;;  %v10615_v44 = vpop.eup %7875  ;;  %v3902_v47 = vpop.f32.mrf.mxu1 }
 0x918   : > { %v10610_v53 = vmul.f32 1.442695, %v5237_v3  ;;  %v4914_v41 = vadd.f32 -0.28449672, %v4850_v31  ;;  %v4851_v46 = vmul.f32 %v10517_v8, %v4787_v15  ;;  %v4790_v48 = vadd.f32 1.4214138, %v4726_v30  ;;  %v10625_v30 = vpop.eup %7877 }
 0x919   : > { %12855 = vst [vmem:[#allocation65_spill] sm:$0xff] %v10606_v63  ;;  %v4725_v19 = vmul.f32 %v10561_v5, %v4661_v16  ;;  %v4913_v40 = vadd.f32 -0.28449672, %v4849_v60  ;;  %7883 = vpow2.f32 %v5308_v52  ;;  %v4599_v0 = vmul.f32 1.0614054, %v10600_v59 }
 0x91a   : > { %v4410_v26 = vmul.f32 0.3275911, %v10598_v25  ;;  %v4852_v54 = vmul.f32 %v10526_v51, %v4788_v50  ;;  %v5175_v3 = vsub.f32 0.0, %v10494_v62  ;;  %v4600_v31 = vmul.f32 1.0614054, %v10608_v12 }
 0x91b   : > { %v10623_v15 = vadd.f32 %v3900_v35, %v10408_v21  ;;  %v4976_v16 = vmul.f32 %v10499_v29, %v4912_v39  ;;  %v10631_v60 = vsel %vm4215_vm7, 1.0, %v12854_v27  ;;  %v10634_v52 = vmul.f32 0.5, %v10484_v22  ;;  %v4013_v35 = vpop.f32.mrf.mxu0 }
 0x91c   : > { %12856 = vst [vmem:[#allocation66_spill] sm:$0xff] %v10631_v60  ;;  %v4915_v50 = vadd.f32 -0.28449672, %v4851_v46  ;;  %v4854_v20 = vmul.f32 %v10541_v34, %v4790_v48  ;;  %v4789_v38 = vadd.f32 1.4214138, %v4725_v19  ;;  %v10639_v1 = vadd.f32 %v3902_v47, %v10401_v42 }
 0x91d   : > { %12857 = vst [vmem:[#allocation67_spill] sm:$0xff] %v10634_v52  ;;  %v4978_v39 = vmul.f32 %v10502_v43, %v4914_v41  ;;  %v4977_v10 = vmul.f32 %v10505_v33, %v4913_v40  ;;  %v4663_v49 = vadd.f32 -1.4531521, %v4599_v0  ;;  %v4474_v2 = vadd.f32 1.0, %v4410_v26  ;;  %v4015_v0 = vpop.f32.mrf.mxu0 }
 0x91e   : > { %12858 = vst [vmem:[#allocation68_spill] sm:$0xff] %v10639_v1  ;;  %v4916_v63 = vadd.f32 -0.28449672, %v4852_v54  ;;  %v5239_v22 = vmul.f32 %v5175_v3, %v10494_v62  ;;  %v4664_v52 = vadd.f32 -1.4531521, %v4600_v31  ;;  %v10648_v48 = vsel %vm4216_vm8, 1.0, %v12854_v27 }
 0x91f   : > { %v10645_v9 = vmul.f32 0.70710677, %v10623_v15  ;;  %v5040_v46 = vadd.f32 0.2548296, %v4976_v16  ;;  %12859 = vst [vmem:[#allocation69_spill] sm:$0xff] %v10648_v48  ;;  %v5176_v19 = vsub.f32 0.0, %v10497_v14  ;;  %v10652_v47 = vadd.f32 %v4013_v35, %v10418_v32 }
 0x920   : > { %v4979_v41 = vmul.f32 %v10517_v8, %v4915_v50  ;;  %v4918_v40 = vadd.f32 -0.28449672, %v4854_v20  ;;  %v4853_v26 = vmul.f32 %v10561_v5, %v4789_v38  ;;  %v10657_v62 = vmul.f32 0.70710677, %v10639_v1 }
 0x921   : > { %12860 = vst [vmem:[#allocation70_spill] sm:$0xff] %v10652_v47  ;;  %v5042_v54 = vadd.f32 0.2548296, %v4978_v39  ;;  %v5041_v3 = vadd.f32 0.2548296, %v4977_v10  ;;  %v4727_v31 = vmul.f32 %v10600_v59, %v4663_v49  ;;  %7885 = vrcp.f32 %v4474_v2 }
 0x922   : > { %v4980_v16 = vmul.f32 %v10526_v51, %v4916_v63  ;;  %v5310_v48 = vmul.f32 1.442695, %v5239_v22  ;;  %v4728_v35 = vmul.f32 %v10608_v12, %v4664_v52  ;;  %v10663_v61 = vand.u32 2147483647, %v10645_v9 }
 0x923   : > { %v7880_v20 = vpop.eup %7879  ;;  %v5104_v38 = vmul.f32 %v10499_v29, %v5040_v46  ;;  %v5240_v50 = vmul.f32 %v5176_v19, %v10497_v14  ;;  %v10668_v1 = vmul.f32 0.70710677, %v10652_v47  ;;  %v10671_v10 = vadd.f32 %v4015_v0, %v10405_v18  ;;  %v7623_v14 = vld [vmem:[#allocation14 + $0xe4] ss:$8 sps:$4 sm:$0xff]  }
 0x924   : > { %v7882_v2 = vpop.eup %7881  ;;  %v5043_v39 = vadd.f32 0.2548296, %v4979_v41  ;;  %v4982_v63 = vmul.f32 %v10541_v34, %v4918_v40  ;;  %v4917_v49 = vadd.f32 -0.28449672, %v4853_v26  ;;  %v10675_v52 = vand.u32 2147483647, %v10657_v62  ;;  %6190 = vmatprep.subr.bf16.mxu1 %v7623_v14 }
 0x925   : > { %12861 = vst [vmem:[#allocation71_spill] sm:$0xff] %v10671_v10  ;;  %v5106_v22 = vmul.f32 %v10502_v43, %v5042_v54  ;;  %v5105_v29 = vmul.f32 %v10505_v33, %v5041_v3  ;;  %v4791_v46 = vadd.f32 1.4214138, %v4727_v31  ;;  %v7626_v19 = vld [vmem:[#allocation14 + $0x1e4] ss:$8 sps:$4 sm:$0xff]   ;;  %7887 = vpow2.f32 %v10610_v53  ;;  %v3904_v3 = vpop.f32.mrf.mxu1 }
 0x926   : > { %v7884_v60 = vpop.eup %7883  ;;  %v5044_v45 = vadd.f32 0.2548296, %v4980_v16  ;;  %v4792_v47 = vadd.f32 1.4214138, %v4728_v35  ;;  %v4409_v0 = vmul.f32 0.3275911, %v10663_v61  ;;  %6303 = vmatprep.subr.bf16.mxu0 %v7626_v19  ;;  %v5424_v43 = vmul.f32 %v10591_v17, %v5104_v38 }
 0x927   : > { %v5312_v41 = vmul.f32 1.442695, %v5240_v50  ;;  %v10682_v40 = vand.u32 2147483647, %v10668_v1  ;;  %v10685_v26 = vmul.f32 0.70710677, %v10671_v10  ;;  %v5426_v16 = vmul.f32 %v10615_v44, %v5106_v22 }
 0x928   : > { %v5046_v33 = vadd.f32 0.2548296, %v4982_v63  ;;  %v4412_v54 = vmul.f32 0.3275911, %v10675_v52  ;;  %v7621_v31 = vld [vmem:[#allocation14 + $0xe0] ss:$8 sps:$4 sm:$0xff]   ;;  %v5425_v53 = vmul.f32 %v10625_v30, %v5105_v29  ;;  %v4981_v35 = vmul.f32 %v10561_v5, %v4917_v49  ;;  %v4017_v29 = vpop.f32.mrf.mxu0 }
 0x929   : > { %12862 = vst [vmem:[#allocation72_spill] sm:$0xff] %v10685_v26  ;;  %v4855_v50 = vmul.f32 %v10600_v59, %v4791_v46  ;;  %v5107_v10 = vmul.f32 %v10517_v8, %v5043_v39  ;;  %v5108_v14 = vmul.f32 %v10526_v51, %v5044_v45  ;;  %v4856_v19 = vmul.f32 %v10608_v12, %v4792_v47  ;;  %v7624_v30 = vld [vmem:[#allocation14 + $0x1e0] ss:$8 sps:$4 sm:$0xff]  }
 0x92a   : > { %v4473_v17 = vadd.f32 1.0, %v4409_v0  ;;  %6191 = vmatpush2.bf16.msra.mxu1 %v7621_v31  ;;  %v4411_v38 = vmul.f32 0.3275911, %v10682_v40  ;;  %v10698_v63 = vand.u32 2147483647, %v10685_v26  ;;  %v10701_v44 = vadd.f32 %v3904_v3, %v10408_v21  ;;  %6304 = vmatpush2.bf16.msra.mxu0 %v7624_v30 }
 0x92b   : > { %v5488_v49 = vsub.f32 1.0, %v5424_v43  ;;  %v5110_v22 = vmul.f32 %v10541_v34, %v5046_v33  ;;  %7889 = vpow2.f32 %v5310_v48  ;;  %v4476_v8 = vadd.f32 1.0, %v4412_v54 }
 0x92c   : > { %v5490_v39 = vsub.f32 1.0, %v5426_v16  ;;  %v5489_v51 = vsub.f32 1.0, %v5425_v53  ;;  %v5045_v45 = vadd.f32 0.2548296, %v4981_v35  ;;  %v4919_v47 = vadd.f32 -0.28449672, %v4855_v50 }
 0x92d   : > { %v5427_v0 = vmul.f32 %v7880_v20, %v5107_v10  ;;  %v5428_v31 = vmul.f32 %v7882_v2, %v5108_v14  ;;  %v4920_v26 = vadd.f32 -0.28449672, %v4856_v19  ;;  %7891 = vrcp.f32 %v4473_v17 }
 0x92e   : > { %v10704_v46 = vpop.eup %7885  ;;  %7893 = vpow2.f32 %v5312_v41  ;;  %v4475_v3 = vadd.f32 1.0, %v4411_v38  ;;  %v4414_v43 = vmul.f32 0.3275911, %v10698_v63  ;;  %v10708_v34 = vmul.f32 0.70710677, %v10701_v44 }
 0x92f   : > { %v5552_v48 = vmul.f32 %v5488_v49, %v10520_v6  ;;  %v5430_v33 = vmul.f32 %v7884_v60, %v5110_v22  ;;  %7895 = vrcp.f32 %v4476_v8  ;;  %v10712_v54 = vadd.f32 %v4017_v29, %v10418_v32  ;;  %v4021_v22 = vpop.f32.mrf.mxu0 }
 0x930   : > { %v5554_v16 = vmul.f32 %v5490_v39, %v10529_v58  ;;  %v5109_v20 = vmul.f32 %v10561_v5, %v5045_v45  ;;  %v4983_v10 = vmul.f32 %v10600_v59, %v4919_v47  ;;  %v4602_v2 = vmul.f32 1.0614054, %v10704_v46  ;;  %v3908_v58 = vpop.f32.mrf.mxu1 }
 0x931   : > { %v5553_v41 = vmul.f32 %v5489_v51, %v10544_v55  ;;  %v5491_v53 = vsub.f32 1.0, %v5427_v0  ;;  %v5492_v35 = vsub.f32 1.0, %v5428_v31  ;;  %v10720_v50 = vmul.f32 0.5, %v10566_v57 }
 0x932   : > { %v4984_v6 = vmul.f32 %v10608_v12, %v4920_v26  ;;  %7897 = vrcp.f32 %v4475_v3  ;;  %v4478_v60 = vadd.f32 1.0, %v4414_v43  ;;  %v10724_v14 = vand.u32 2147483647, %v10708_v34  ;;  %v7888_v5 = vpop.eup %7887 }
 0x933   : > { %v5616_v19 = vadd.f32 1.0, %v5552_v48  ;;  %v5494_v17 = vsub.f32 1.0, %v5430_v33  ;;  %vm4218_vm9 = vcmp.ge.f32.partialorder %v10579_v36, 0.0  ;;  %v10728_v55 = vmul.f32 0.70710677, %v10712_v54 }
 0x934   : > { %v5618_v38 = vadd.f32 1.0, %v5554_v16  ;;  %v5429_v30 = vmul.f32 %v7888_v5, %v5109_v20  ;;  %v5047_v57 = vadd.f32 0.2548296, %v4983_v10  ;;  %v4666_v49 = vadd.f32 -1.4531521, %v4602_v2 }
 0x935   : > { %v5617_v26 = vadd.f32 1.0, %v5553_v41  ;;  %v5556_v8 = vmul.f32 %v5492_v35, %v10582_v23  ;;  %v5178_v39 = vsub.f32 0.0, %v10598_v25  ;;  %v10733_v51 = vadd.f32 %v3908_v58, %v10401_v42 }
 0x936   : > { %v5555_v45 = vmul.f32 %v5491_v53, %v10548_v13  ;;  %v5048_v47 = vadd.f32 0.2548296, %v4984_v6  ;;  %7899 = vrcp.f32 %v4478_v60  ;;  %v4413_v29 = vmul.f32 0.3275911, %v10724_v14 }
 0x937   : > { %v5558_v0 = vmul.f32 %v5494_v17, %v10595_v28  ;;  %v10741_v31 = vsel %vm4218_vm9, 1.0, %v12854_v27  ;;  %v10744_v23 = vand.u32 2147483647, %v10728_v55  ;;  %v10747_v3 = vadd.f32 %v4021_v22, %v10405_v18 }
 0x938   : > { %v7890_v43 = vpop.eup %7889  ;;  %v10750_v13 = vmul.f32 %v5616_v19, %v10513_v7  ;;  %v5493_v48 = vsub.f32 1.0, %v5429_v30  ;;  %v5111_v33 = vmul.f32 %v10600_v59, %v5047_v57  ;;  %v4730_v28 = vmul.f32 %v10704_v46, %v4666_v49 }
 0x939   : > { %v10755_v16 = vmul.f32 %v5618_v38, %v10523_v4  ;;  %v5620_v36 = vadd.f32 1.0, %v5556_v8  ;;  %v5242_v20 = vmul.f32 %v5178_v39, %v10598_v25  ;;  %v10759_v10 = vmul.f32 0.70710677, %v10733_v51 }
 0x93a   : > { %12863 = vst [vmem:[#allocation73_spill] sm:$0xff] %v10750_v13  ;;  %v10761_v2 = vpop.eup %7891  ;;  %v10764_v41 = vmul.f32 %v5617_v26, %v10534_v37  ;;  %v5619_v7 = vadd.f32 1.0, %v5555_v45  ;;  %v5112_v53 = vmul.f32 %v10608_v12, %v5048_v47  ;;  %v4477_v59 = vadd.f32 1.0, %v4413_v29  ;;  %v12868_v47 = vld [vmem:[#allocation70_spill] sm:$0xff] }
 0x93b   : > { %12864 = vst [vmem:[#allocation74_spill] sm:$0xff] %v10755_v16  ;;  %v7894_v35 = vpop.eup %7893  ;;  %v5622_v6 = vadd.f32 1.0, %v5558_v0  ;;  %vm4217_vm10 = vcmp.ge.f32.partialorder %v10645_v9, 0.0  ;;  %v4415_v4 = vmul.f32 0.3275911, %v10744_v23  ;;  %v5557_v58 = vmul.f32 %v5493_v48, %v10603_v24  ;;  %v12869_v0 = vld [vmem:[#allocation29_spill] sm:$0xff] }
 0x93c   : > { %12865 = vst [vmem:[#allocation75_spill] sm:$0xff] %v10764_v41  ;;  %v10770_v25 = vmul.f32 0.70710677, %v10747_v3  ;;  %v10772_v60 = vpop.eup %7895  ;;  %v5431_v5 = vmul.f32 %v7890_v43, %v5111_v33  ;;  %v4794_v37 = vadd.f32 1.4214138, %v4730_v28  ;;  %v10776_v19 = vmul.f32 0.5, %v10623_v15  ;;  %v3910_v33 = vpop.f32.mrf.mxu1 }
 0x93d   : > { %v10779_v12 = vmul.f32 %v5620_v36, %v10553_v11  ;;  %v5316_v17 = vmul.f32 1.442695, %v5242_v20  ;;  %v4601_v9 = vmul.f32 1.0614054, %v10761_v2  ;;  %v10783_v38 = vand.u32 2147483647, %v10759_v10 }
 0x93e   : > { %v5432_v30 = vmul.f32 %v7894_v35, %v5112_v53  ;;  %v10786_v57 = vsel %vm4217_vm10, 1.0, %v12854_v27  ;;  %v5177_v24 = vsub.f32 0.0, %v10663_v61  ;;  %7901 = vrcp.f32 %v4477_v59  ;;  %v7629_v28 = vld [vmem:[#allocation14 + $0xd4] ss:$8 sps:$4 sm:$0xff]   ;;  %v7627_v35 = vld [vmem:[#allocation14 + $0xd0] ss:$8 sps:$4 sm:$0xff]  }
 0x93f   : > { %12866 = vst [vmem:[#allocation76_spill] sm:$0xff] %v10779_v12  ;;  %v10789_v49 = vpop.eup %7897  ;;  %v10792_v15 = vmul.f32 %v5622_v6, %v10557_v56  ;;  %v4604_v11 = vmul.f32 1.0614054, %v10772_v60  ;;  %v4479_v22 = vadd.f32 1.0, %v4415_v4  ;;  %v10796_v26 = vand.u32 2147483647, %v10770_v25  ;;  %6192 = vmatprep.subr.bf16.mxu1 %v7629_v28 }
 0x940   : > { %v5621_v8 = vadd.f32 1.0, %v5557_v58  ;;  %v5495_v39 = vsub.f32 1.0, %v5431_v5  ;;  %v4858_v45 = vmul.f32 %v10704_v46, %v4794_v37  ;;  %v10800_v29 = vmul.f32 0.5, %v12868_v47  ;;  %v7630_v5 = vld [vmem:[#allocation14 + $0x1d0] ss:$8 sps:$4 sm:$0xff]   ;;  %6193 = vmatpush2.bf16.msra.mxu1 %v7627_v35 }
 0x941   : > { %12867 = vst [vmem:[#allocation77_spill] sm:$0xff] %v10792_v15  ;;  %v10803_v43 = vmul.f32 %v5619_v7, %v12869_v0  ;;  %7903 = vpow2.f32 %v5316_v17  ;;  %v4665_v48 = vadd.f32 -1.4531521, %v4601_v9  ;;  %v4416_v56 = vmul.f32 0.3275911, %v10783_v38  ;;  %v12872_v0 = vld [vmem:[#allocation64_spill] sm:$0xff] }
 0x942   : > { %v5496_v36 = vsub.f32 1.0, %v5432_v30  ;;  %v5241_v20 = vmul.f32 %v5177_v24, %v10663_v61  ;;  %v4603_v53 = vmul.f32 1.0614054, %v10789_v49  ;;  %v5179_v59 = vsub.f32 0.0, %v10682_v40  ;;  %v12871_v61 = vld [vmem:[#allocation66_spill] sm:$0xff] }
 0x943   : > { %12870 = vst [vmem:[#allocation70_spill] sm:$0xff] %v10803_v43  ;;  %v10809_v6 = vpop.eup %7899  ;;  %v4668_v4 = vadd.f32 -1.4531521, %v4604_v11  ;;  %7905 = vrcp.f32 %v4479_v22  ;;  %v4418_v58 = vmul.f32 0.3275911, %v10796_v26  ;;  %v5559_v17 = vmul.f32 %v5495_v39, %v12871_v61 }
 0x944   : > { %v4922_v9 = vadd.f32 -0.28449672, %v4858_v45  ;;  %v10818_v30 = vadd.f32 %v3910_v33, %v10408_v21  ;;  %v7632_v24 = vld [vmem:[#allocation14 + $0x1d4] ss:$8 sps:$4 sm:$0xff]   ;;  %v4729_v47 = vmul.f32 %v10761_v2, %v4665_v48  ;;  %vm4219_vm11 = vcmp.ge.f32.partialorder %v10668_v1, 0.0  ;;  %v12874_v45 = vld [vmem:[#allocation69_spill] sm:$0xff] }
 0x945   : > { %v5180_v11 = vsub.f32 0.0, %v10675_v52  ;;  %v4480_v22 = vadd.f32 1.0, %v4416_v56  ;;  %v10824_v28 = vmul.f32 %v5621_v8, %v12872_v0  ;;  %v5314_v7 = vmul.f32 1.442695, %v5241_v20  ;;  %6305 = vmatprep.subr.bf16.mxu0 %v7632_v24  ;;  %v12875_v20 = vld [vmem:[#allocation68_spill] sm:$0xff]  ;;  %v12876_v24 = vld [vmem:[#allocation65_spill] sm:$0xff] }
 0x946   : > { %v5243_v37 = vmul.f32 %v5179_v59, %v10682_v40  ;;  %v4606_v39 = vmul.f32 1.0614054, %v10809_v6  ;;  %v5560_v33 = vmul.f32 %v5496_v36, %v12874_v45  ;;  %v4667_v61 = vadd.f32 -1.4531521, %v4603_v53  ;;  %6306 = vmatpush2.bf16.msra.mxu0 %v7630_v5  ;;  %v12878_v45 = vld [vmem:[#allocation72_spill] sm:$0xff] }
 0x947   : > { %12873 = vst [vmem:[#allocation29_spill] sm:$0xff] %v10824_v28  ;;  %v4732_v35 = vmul.f32 %v10772_v60, %v4668_v4  ;;  %v4482_v48 = vadd.f32 1.0, %v4418_v58  ;;  %v5623_v1 = vadd.f32 1.0, %v5559_v17  ;;  %v4986_v16 = vmul.f32 %v10704_v46, %v4922_v9 }
 0x948   : > { %v10832_v56 = vsel %vm4219_vm11, 1.0, %v12854_v27  ;;  %v10835_v8 = vmul.f32 0.70710677, %v10818_v30  ;;  %v4793_v40 = vadd.f32 1.4214138, %v4729_v47  ;;  %v10838_v59 = vmul.f32 0.5, %v12875_v20 }
 0x949   : > { %v5244_v36 = vmul.f32 %v5180_v11, %v10675_v52  ;;  %7907 = vrcp.f32 %v4480_v22  ;;  %v5318_v53 = vmul.f32 1.442695, %v5243_v37  ;;  %vm4220_vm12 = vcmp.ge.f32.partialorder %v10657_v62, 0.0 }
 0x94a   : > { %7909 = vpow2.f32 %v5314_v7  ;;  %v4670_v4 = vadd.f32 -1.4531521, %v4606_v39  ;;  %v5624_v5 = vadd.f32 1.0, %v5560_v33  ;;  %v4731_v17 = vmul.f32 %v10789_v49, %v4667_v61  ;;  %v12879_v39 = vld [vmem:[#allocation71_spill] sm:$0xff] }
 0x94b   : > { %v10842_v58 = vpop.eup %7901  ;;  %v4796_v9 = vadd.f32 1.4214138, %v4732_v35  ;;  %7911 = vrcp.f32 %v4482_v48  ;;  %v10846_v47 = vmul.f32 %v5623_v1, %v12876_v24  ;;  %v5050_v0 = vadd.f32 0.2548296, %v4986_v16  ;;  %v12880_v35 = vld [vmem:[#allocation67_spill] sm:$0xff] }
 0x94c   : > { %vm4222_vm13 = vcmp.ge.f32.partialorder %v12878_v45, 0.0  ;;  %v10850_v52 = vand.u32 2147483647, %v10835_v8  ;;  %v4857_v7 = vmul.f32 %v10761_v2, %v4793_v40  ;;  %v10854_v62 = vsel %vm4220_vm12, 1.0, %v12854_v27 }
 0x94d   : > { %12877 = vst [vmem:[#allocation66_spill] sm:$0xff] %v10846_v47  ;;  %v5320_v37 = vmul.f32 1.442695, %v5244_v36  ;;  %v5182_v11 = vsub.f32 0.0, %v10698_v63  ;;  %7913 = vpow2.f32 %v5318_v53  ;;  %v10858_v33 = vmul.f32 0.5, %v12879_v39  ;;  %v4023_v36 = vpop.f32.mrf.mxu0 }
 0x94e   : > { %v7904_v22 = vpop.eup %7903  ;;  %v4734_v16 = vmul.f32 %v10809_v6, %v4670_v4  ;;  %v4605_v61 = vmul.f32 1.0614054, %v10842_v58  ;;  %v10863_v48 = vmul.f32 %v5624_v5, %v12880_v35  ;;  %v4795_v1 = vadd.f32 1.4214138, %v4731_v17 }
 0x94f   : > { %v4860_v40 = vmul.f32 %v10772_v60, %v4796_v9  ;;  %v10867_v20 = vsel %vm4222_vm13, 1.0, %v12854_v27  ;;  %v5114_v53 = vmul.f32 %v10704_v46, %v5050_v0  ;;  %v10873_v45 = vmul.f32 0.5, %v10701_v44  ;;  %v3912_v9 = vpop.f32.mrf.mxu1  ;;  %v4025_v28 = vpop.f32.mrf.mxu0 }
 0x950   : > { %12881 = vst [vmem:[#allocation64_spill] sm:$0xff] %v10863_v48  ;;  %v10869_v24 = vpop.eup %7905  ;;  %v5181_v4 = vsub.f32 0.0, %v10724_v14  ;;  %v4417_v39 = vmul.f32 0.3275911, %v10850_v52  ;;  %v4921_v5 = vadd.f32 -0.28449672, %v4857_v7  ;;  %7915 = vpow2.f32 %v5320_v37 }
 0x951   : > { %12882 = vst [vmem:[#allocation69_spill] sm:$0xff] %v10873_v45  ;;  %v5246_v17 = vmul.f32 %v5182_v11, %v10698_v63  ;;  %vm4221_vm14 = vcmp.ge.f32.partialorder %v10708_v34, 0.0  ;;  %v4798_v35 = vadd.f32 1.4214138, %v4734_v16  ;;  %v4669_v15 = vadd.f32 -1.4531521, %v4605_v61 }
 0x952   : > { %v10880_v13 = vmul.f32 0.5, %v10712_v54  ;;  %v10883_v46 = vadd.f32 %v4023_v36, %v10418_v32  ;;  %v4859_v44 = vmul.f32 %v10789_v49, %v4795_v1  ;;  %v4924_v0 = vadd.f32 -0.28449672, %v4860_v40 }
 0x953   : > { %vm4223_vm15 = vcmp.ge.f32.partialorder %v10728_v55, 0.0  ;;  %v4607_v7 = vmul.f32 1.0614054, %v10869_v24  ;;  %v5434_v37 = vmul.f32 %v7904_v22, %v5114_v53  ;;  %v5245_v63 = vmul.f32 %v5181_v4, %v10724_v14 }
 0x954   : > { %12883 = vst [vmem:[#allocation68_spill] sm:$0xff] %v10880_v13  ;;  %v4481_v11 = vadd.f32 1.0, %v4417_v39  ;;  %v10890_v16 = vadd.f32 %v3912_v9, %v10401_v42  ;;  %v4985_v54 = vmul.f32 %v10761_v2, %v4921_v5  ;;  %v5324_v61 = vmul.f32 1.442695, %v5246_v17 }
 0x955   : > { %v10896_v36 = vsel %vm4221_vm14, 1.0, %v12854_v27  ;;  %v5183_v1 = vsub.f32 0.0, %v10744_v23  ;;  %v4862_v22 = vmul.f32 %v10809_v6, %v4798_v35  ;;  %v4733_v14 = vmul.f32 %v10842_v58, %v4669_v15 }
 0x956   : > { %12884 = vst [vmem:[#allocation65_spill] sm:$0xff] %v10890_v16  ;;  %v10899_v55 = vpop.eup %7907  ;;  %v10904_v40 = vsel %vm4223_vm15, 1.0, %v12854_v27  ;;  %v10907_v53 = vmul.f32 0.70710677, %v10883_v46  ;;  %v4923_v39 = vadd.f32 -0.28449672, %v4859_v44  ;;  %v4988_v34 = vmul.f32 %v10772_v60, %v4924_v0 }
 0x957   : > { %12885 = vst [vmem:[#allocation72_spill] sm:$0xff] %v10904_v40  ;;  %v7910_v4 = vpop.eup %7909  ;;  %v4671_v5 = vadd.f32 -1.4531521, %v4607_v7  ;;  %v10911_v17 = vmul.f32 0.5, %v10733_v51  ;;  %v5498_v12 = vsub.f32 1.0, %v5434_v37  ;;  %7917 = vrcp.f32 %v4481_v11 }
 0x958   : > { %v10913_v9 = vpop.eup %7911  ;;  %v5322_v35 = vmul.f32 1.442695, %v5245_v63  ;;  %v10916_v15 = vmul.f32 0.70710677, %v10890_v16  ;;  %v5049_v47 = vadd.f32 0.2548296, %v4985_v54  ;;  %v5247_v43 = vmul.f32 %v5183_v1, %v10744_v23 }
 0x959   : > { %12886 = vst [vmem:[#allocation71_spill] sm:$0xff] %v10911_v17  ;;  %vm4224_vm0 = vcmp.ge.f32.partialorder %v10759_v10, 0.0  ;;  %v4608_v44 = vmul.f32 1.0614054, %v10899_v55  ;;  %v4926_v0 = vadd.f32 -0.28449672, %v4862_v22  ;;  %7919 = vpow2.f32 %v5324_v61  ;;  %v3914_v10 = vpop.f32.mrf.mxu1 }
 0x95a   : > { %12887 = vst [vmem:[#allocation67_spill] sm:$0xff] %v10916_v15  ;;  %v4797_v7 = vadd.f32 1.4214138, %v4733_v14  ;;  %v10922_v51 = vand.u32 2147483647, %v10907_v53  ;;  %v7914_v37 = vpop.eup %7913  ;;  %v4987_v63 = vmul.f32 %v10789_v49, %v4923_v39  ;;  %v4735_v41 = vmul.f32 %v10869_v24, %v4671_v5 }
 0x95b   : > { %v5052_v11 = vadd.f32 0.2548296, %v4988_v34  ;;  %v4610_v54 = vmul.f32 1.0614054, %v10913_v9  ;;  %v5562_v23 = vmul.f32 %v5498_v12, %v10741_v31  ;;  %7921 = vpow2.f32 %v5322_v35  ;;  %v7633_v22 = vld [vmem:[#allocation14 + $0xc0] ss:$8 sps:$4 sm:$0xff]  }
 0x95c   : > { %v5184_v1 = vsub.f32 0.0, %v10783_v38  ;;  %v10930_v61 = vand.u32 2147483647, %v10916_v15  ;;  %v5113_v14 = vmul.f32 %v10761_v2, %v5049_v47  ;;  %v5326_v17 = vmul.f32 1.442695, %v5247_v43 }
 0x95d   : > { %v4672_v13 = vadd.f32 -1.4531521, %v4608_v44  ;;  %v10934_v39 = vadd.f32 %v4025_v28, %v10405_v18  ;;  %v7635_v34 = vld [vmem:[#allocation14 + $0xc4] ss:$8 sps:$4 sm:$0xff]   ;;  %v7916_v5 = vpop.eup %7915  ;;  %v4990_v45 = vmul.f32 %v10809_v6, %v4926_v0  ;;  %v4861_v31 = vmul.f32 %v10842_v58, %v4797_v7  ;;  %v7636_v0 = vld [vmem:[#allocation14 + $0x1c0] ss:$8 sps:$4 sm:$0xff]  }
 0x95e   : > { %v5186_v12 = vsub.f32 0.0, %v10796_v26  ;;  %v4419_v35 = vmul.f32 0.3275911, %v10922_v51  ;;  %v5051_v40 = vadd.f32 0.2548296, %v4987_v63  ;;  %v5116_v15 = vmul.f32 %v10772_v60, %v5052_v11  ;;  %6194 = vmatprep.subr.bf16.mxu1 %v7635_v34 }
 0x95f   : > { %v4799_v16 = vadd.f32 1.4214138, %v4735_v41  ;;  %v4674_v2 = vadd.f32 -1.4531521, %v4610_v54  ;;  %v10944_v43 = vsel %vm4224_vm0, 1.0, %v12854_v27  ;;  %v5248_v28 = vmul.f32 %v5184_v1, %v10783_v38  ;;  %6195 = vmatpush2.bf16.msra.mxu1 %v7633_v22 }
 0x960   : > { %v10948_v47 = vmul.f32 0.5, %v10747_v3  ;;  %v4420_v44 = vmul.f32 0.3275911, %v10930_v61  ;;  %v10951_v7 = vadd.f32 1.0, %v5562_v23  ;;  %v5433_v60 = vmul.f32 %v7910_v4, %v5113_v14  ;;  %v7638_v11 = vld [vmem:[#allocation14 + $0x1c4] ss:$8 sps:$4 sm:$0xff]  }
 0x961   : > { %v4736_v41 = vmul.f32 %v10899_v55, %v4672_v13  ;;  %v10955_v63 = vmul.f32 0.70710677, %v10934_v39  ;;  %v5054_v54 = vadd.f32 0.2548296, %v4990_v45  ;;  %v4925_v34 = vadd.f32 -0.28449672, %v4861_v31  ;;  %6307 = vmatprep.subr.bf16.mxu0 %v7638_v11 }
 0x962   : > { %12888 = vst [vmem:[#allocation78_spill] sm:$0xff] %v10948_v47  ;;  %v5250_v38 = vmul.f32 %v5186_v12, %v10796_v26  ;;  %v4483_v3 = vadd.f32 1.0, %v4419_v35  ;;  %v5115_v1 = vmul.f32 %v10789_v49, %v5051_v40  ;;  %v5436_v47 = vmul.f32 %v7916_v5, %v5116_v15  ;;  %6308 = vmatpush2.bf16.msra.mxu0 %v7636_v0 }
 0x963   : > { %v4863_v22 = vmul.f32 %v10869_v24, %v4799_v16  ;;  %v4738_v23 = vmul.f32 %v10913_v9, %v4674_v2  ;;  %7923 = vpow2.f32 %v5326_v17  ;;  %v5328_v13 = vmul.f32 1.442695, %v5248_v28  ;;  %v4027_v16 = vpop.f32.mrf.mxu0 }
 0x964   : > { %v4484_v4 = vadd.f32 1.0, %v4420_v44  ;;  %v10962_v14 = vadd.f32 %v3914_v10, %v10408_v21  ;;  %v10964_v45 = vpop.eup %7917  ;;  %v5497_v31 = vsub.f32 1.0, %v5433_v60  ;;  %v4800_v26 = vadd.f32 1.4214138, %v4736_v41 }
 0x965   : > { %vm4226_vm1 = vcmp.ge.f32.partialorder %v10770_v25, 0.0  ;;  %v10968_v49 = vand.u32 2147483647, %v10955_v63  ;;  %v5118_v40 = vmul.f32 %v10809_v6, %v5054_v54  ;;  %v4989_v17 = vmul.f32 %v10842_v58, %v4925_v34  ;;  %v3918_v34 = vpop.f32.mrf.mxu1 }
 0x966   : > { %v5332_v15 = vmul.f32 1.442695, %v5250_v38  ;;  %7925 = vrcp.f32 %v4483_v3  ;;  %v7920_v5 = vpop.eup %7919  ;;  %v5435_v12 = vmul.f32 %v7914_v37, %v5115_v1  ;;  %v5500_v35 = vsub.f32 1.0, %v5436_v47 }
 0x967   : > { %v4927_v2 = vadd.f32 -0.28449672, %v4863_v22  ;;  %v4802_v28 = vadd.f32 1.4214138, %v4738_v23  ;;  %v4609_v44 = vmul.f32 1.0614054, %v10964_v45  ;;  %7927 = vrcp.f32 %v4484_v4 }
 0x968   : > { %v10974_v0 = vmul.f32 0.70710677, %v10962_v14  ;;  %v10977_v60 = vadd.f32 %v4027_v16, %v10418_v32  ;;  %v7922_v41 = vpop.eup %7921  ;;  %v4864_v6 = vmul.f32 %v10899_v55, %v4800_v26  ;;  %7929 = vpow2.f32 %v5328_v13 }
 0x969   : > { %v10983_v37 = vsel %vm4226_vm1, 1.0, %v12854_v27  ;;  %v4422_v47 = vmul.f32 0.3275911, %v10968_v49  ;;  %v5561_v10 = vmul.f32 %v5497_v31, %v10786_v57  ;;  %v5438_v11 = vmul.f32 %v7920_v5, %v5118_v40 }
 0x96a   : > { %v5053_v54 = vadd.f32 0.2548296, %v4989_v17  ;;  %7931 = vpow2.f32 %v5332_v15  ;;  %v5499_v38 = vsub.f32 1.0, %v5435_v12  ;;  %v4991_v3 = vmul.f32 %v10869_v24, %v4927_v2 }
 0x96b   : > { %v4866_v1 = vmul.f32 %v10913_v9, %v4802_v28  ;;  %v5185_v22 = vsub.f32 0.0, %v10850_v52  ;;  %v5564_v23 = vmul.f32 %v5500_v35, %v10854_v62  ;;  %v4673_v25 = vadd.f32 -1.4531521, %v4609_v44 }
 0x96c   : > { %v10992_v13 = vand.u32 2147483647, %v10974_v0  ;;  %v10995_v4 = vmul.f32 0.70710677, %v10977_v60  ;;  %v4928_v57 = vadd.f32 -0.28449672, %v4864_v6  ;;  %v11001_v16 = vadd.f32 %v3918_v34, %v10401_v42  ;;  %v4031_v6 = vpop.f32.mrf.mxu0 }
 0x96d   : > { %v10998_v31 = vmul.f32 0.5, %v10818_v30  ;;  %v4486_v26 = vadd.f32 1.0, %v4422_v47  ;;  %v5625_v40 = vadd.f32 1.0, %v5561_v10  ;;  %v5502_v17 = vsub.f32 1.0, %v5438_v11 }
 0x96e   : > { %v5117_v15 = vmul.f32 %v10842_v58, %v5053_v54  ;;  %vm4225_vm2 = vcmp.ge.f32.partialorder %v10835_v8, 0.0  ;;  %v5563_v62 = vmul.f32 %v5499_v38, %v10832_v56  ;;  %v5055_v5 = vadd.f32 0.2548296, %v4991_v3 }
 0x96f   : > { %v4930_v12 = vadd.f32 -0.28449672, %v4866_v1  ;;  %v5249_v35 = vmul.f32 %v5185_v22, %v10850_v52  ;;  %v5628_v2 = vadd.f32 1.0, %v5564_v23  ;;  %v4737_v30 = vmul.f32 %v10964_v45, %v4673_v25 }
 0x970   : > { %v4421_v28 = vmul.f32 0.3275911, %v10992_v13  ;;  %v11010_v44 = vand.u32 2147483647, %v10995_v4  ;;  %v7924_v47 = vpop.eup %7923  ;;  %v4992_v58 = vmul.f32 %v10899_v55, %v4928_v57  ;;  %vm4227_vm3 = vcmp.ge.f32.partialorder %v10907_v53, 0.0 }
 0x971   : > { %7933 = vrcp.f32 %v4486_v26  ;;  %v11015_v56 = vmul.f32 0.70710677, %v11001_v16  ;;  %v5566_v52 = vmul.f32 %v5502_v17, %v10867_v20  ;;  %v5437_v10 = vmul.f32 %v7922_v41, %v5117_v15  ;;  %v3920_v20 = vpop.f32.mrf.mxu1 }
 0x972   : > { %v11021_v11 = vsel %vm4225_vm2, 1.0, %v12854_v27  ;;  %v11024_v54 = vmul.f32 0.5, %v10883_v46  ;;  %v5627_v38 = vadd.f32 1.0, %v5563_v62  ;;  %v5119_v53 = vmul.f32 %v10869_v24, %v5055_v5 }
 0x973   : > { %v11026_v34 = vpop.eup %7925  ;;  %v4994_v3 = vmul.f32 %v10913_v9, %v4930_v12  ;;  %v11031_v1 = vadd.f32 %v4031_v6, %v10405_v18  ;;  %v4801_v41 = vadd.f32 1.4214138, %v4737_v30  ;;  %v11034_v22 = vsel %vm4227_vm3, 1.0, %v12854_v27 }
 0x974   : > { %12889 = vst [vmem:[#allocation79_spill] sm:$0xff] %v11024_v54  ;;  %12890 = vst [vmem:[#allocation80_spill] sm:$0xff] %v11034_v22  ;;  %v4485_v8 = vadd.f32 1.0, %v4421_v28  ;;  %v4423_v23 = vmul.f32 0.3275911, %v11010_v44  ;;  %v11037_v46 = vpop.eup %7927  ;;  %v11040_v25 = vmul.f32 %v5628_v2, %v10838_v59  ;;  %v5630_v15 = vadd.f32 1.0, %v5566_v52 }
 0x975   : > { %v5056_v57 = vadd.f32 0.2548296, %v4992_v58  ;;  %v5330_v24 = vmul.f32 1.442695, %v5249_v35  ;;  %v11043_v26 = vand.u32 2147483647, %v11015_v56  ;;  %v7930_v17 = vpop.eup %7929  ;;  %v11047_v12 = vadd.f32 %v3920_v20, %v10408_v21 }
 0x976   : > { %12891 = vst [vmem:[#allocation81_spill] sm:$0xff] %v11040_v25  ;;  %v5501_v62 = vsub.f32 1.0, %v5437_v10  ;;  %v4611_v5 = vmul.f32 1.0614054, %v11026_v34  ;;  %v5439_v28 = vmul.f32 %v7924_v47, %v5119_v53  ;;  %v5058_v6 = vadd.f32 0.2548296, %v4994_v3 }
 0x977   : > { %v7932_v30 = vpop.eup %7931  ;;  %v5187_v54 = vsub.f32 0.0, %v10922_v51  ;;  %v11051_v59 = vmul.f32 0.70710677, %v11031_v1  ;;  %v4865_v35 = vmul.f32 %v10964_v45, %v4801_v41  ;;  %v4612_v2 = vmul.f32 1.0614054, %v11037_v46 }
 0x978   : > { %7935 = vrcp.f32 %v4485_v8  ;;  %v4487_v58 = vadd.f32 1.0, %v4423_v23  ;;  %v11057_v52 = vmul.f32 %v10951_v7, %v10720_v50  ;;  %v11060_v10 = vmul.f32 %v5625_v40, %v10776_v19  ;;  %v7641_v3 = vld [vmem:[#allocation14 + $0xb4] ss:$8 sps:$4 sm:$0xff]   ;;  %v7639_v50 = vld [vmem:[#allocation14 + $0xb0] ss:$8 sps:$4 sm:$0xff]  }
 0x979   : > { %v5120_v47 = vmul.f32 %v10899_v55, %v5056_v57  ;;  %v4424_v53 = vmul.f32 0.3275911, %v11043_v26  ;;  %v7644_v20 = vld [vmem:[#allocation14 + $0x1b4] ss:$8 sps:$4 sm:$0xff]   ;;  %v11065_v22 = vmul.f32 %v5627_v38, %v10800_v29  ;;  %v11068_v41 = vmul.f32 %v5630_v15, %v10858_v33  ;;  %6196 = vmatprep.subr.bf16.mxu1 %v7641_v3  ;;  %v7642_v57 = vld [vmem:[#allocation14 + $0x1b0] ss:$8 sps:$4 sm:$0xff]  }
 0x97a   : > { %12892 = vst [vmem:[#allocation82_spill] sm:$0xff] %v11057_v52  ;;  %12893 = vst [vmem:[#allocation83_spill] sm:$0xff] %v11060_v10  ;;  %v4675_v8 = vadd.f32 -1.4531521, %v4611_v5  ;;  %v11071_v23 = vmul.f32 0.70710677, %v11047_v12  ;;  %v5565_v55 = vmul.f32 %v5501_v62, %v10896_v36  ;;  %6309 = vmatprep.subr.bf16.mxu0 %v7644_v20  ;;  %7937 = vpow2.f32 %v5330_v24  ;;  %6197 = vmatpush2.bf16.msra.mxu1 %v7639_v50 }
 0x97b   : > { %12894 = vst [vmem:[#allocation84_spill] sm:$0xff] %v11065_v22  ;;  %12895 = vst [vmem:[#allocation85_spill] sm:$0xff] %v11068_v41  ;;  %v5503_v7 = vsub.f32 1.0, %v5439_v28  ;;  %v11077_v40 = vand.u32 2147483647, %v11051_v59  ;;  %v5251_v33 = vmul.f32 %v5187_v54, %v10922_v51  ;;  %v5440_v15 = vmul.f32 %v7930_v17, %v5120_v47  ;;  %v12896_v5 = vld [vmem:[#allocation65_spill] sm:$0xff]  ;;  %v4033_v54 = vpop.f32.mrf.mxu0  ;;  %6310 = vmatpush2.bf16.msra.mxu0 %v7642_v57 }
 0x97c   : > { %v4929_v29 = vadd.f32 -0.28449672, %v4865_v35  ;;  %v4676_v38 = vadd.f32 -1.4531521, %v4612_v2  ;;  %v11081_v22 = vmul.f32 0.5, %v12896_v5  ;;  %7939 = vrcp.f32 %v4487_v58  ;;  %v12897_v35 = vld [vmem:[#allocation67_spill] sm:$0xff] }
 0x97d   : > { %v4488_v19 = vadd.f32 1.0, %v4424_v53  ;;  %v5122_v28 = vmul.f32 %v10913_v9, %v5058_v6  ;;  %v4739_v24 = vmul.f32 %v11026_v34, %v4675_v8  ;;  %v11090_v51 = vand.u32 2147483647, %v11071_v23  ;;  %v12898_v47 = vld [vmem:[#allocation72_spill] sm:$0xff] }
 0x97e   : > { %v11083_v36 = vpop.eup %7933  ;;  %v5629_v17 = vadd.f32 1.0, %v5565_v55  ;;  %vm4228_vm4 = vcmp.ge.f32.partialorder %v12897_v35, 0.0  ;;  %v5188_v2 = vsub.f32 0.0, %v10930_v61  ;;  %v4426_v58 = vmul.f32 0.3275911, %v11077_v40 }
 0x97f   : > { %v5567_v53 = vmul.f32 %v5503_v7, %v12898_v47  ;;  %v4993_v3 = vmul.f32 %v10964_v45, %v4929_v29  ;;  %v5334_v20 = vmul.f32 1.442695, %v5251_v33  ;;  %v4740_v9 = vmul.f32 %v11037_v46, %v4676_v38  ;;  %v12899_v7 = vld [vmem:[#allocation69_spill] sm:$0xff] }
 0x980   : > { %v5504_v6 = vsub.f32 1.0, %v5440_v15  ;;  %v4614_v8 = vmul.f32 1.0614054, %v11083_v36  ;;  %7941 = vrcp.f32 %v4488_v19  ;;  %v11100_v50 = vadd.f32 %v4033_v54, %v10418_v32 }
 0x981   : > { %v5442_v55 = vmul.f32 %v7932_v30, %v5122_v28  ;;  %v4803_v57 = vadd.f32 1.4214138, %v4739_v24  ;;  %v11103_v5 = vsel %vm4228_vm4, 1.0, %v12854_v27  ;;  %v4425_v35 = vmul.f32 0.3275911, %v11090_v51  ;;  %v3922_v30 = vpop.f32.mrf.mxu1 }
 0x982   : > { %v11107_v47 = vmul.f32 %v5629_v17, %v12899_v7  ;;  %v5252_v29 = vmul.f32 %v5188_v2, %v10930_v61  ;;  %v5190_v33 = vsub.f32 0.0, %v10968_v49  ;;  %v4490_v38 = vadd.f32 1.0, %v4426_v58 }
 0x983   : > { %v11111_v15 = vadd.f32 1.0, %v5567_v53  ;;  %v5057_v19 = vadd.f32 0.2548296, %v4993_v3  ;;  %7943 = vpow2.f32 %v5334_v20  ;;  %v4804_v54 = vadd.f32 1.4214138, %v4740_v9 }
 0x984   : > { %12900 = vst [vmem:[#allocation65_spill] sm:$0xff] %v11107_v47  ;;  %v5568_v24 = vmul.f32 %v5504_v6, %v10944_v43  ;;  %v11117_v62 = vmul.f32 0.5, %v10934_v39  ;;  %v4678_v17 = vadd.f32 -1.4531521, %v4614_v8  ;;  %v11120_v7 = vmul.f32 0.70710677, %v11100_v50 }
 0x985   : > { %v11113_v28 = vpop.eup %7935  ;;  %v5506_v61 = vsub.f32 1.0, %v5442_v55  ;;  %v4867_v2 = vmul.f32 %v11026_v34, %v4803_v57  ;;  %vm4230_vm5 = vcmp.ge.f32.partialorder %v10955_v63, 0.0  ;;  %v4489_v58 = vadd.f32 1.0, %v4425_v35 }
 0x986   : > { %v5336_v53 = vmul.f32 1.442695, %v5252_v29  ;;  %v5254_v3 = vmul.f32 %v5190_v33, %v10968_v49  ;;  %7945 = vrcp.f32 %v4490_v38  ;;  %v11126_v20 = vadd.f32 %v3922_v30, %v10401_v42 }
 0x987   : > { %v5121_v39 = vmul.f32 %v10964_v45, %v5057_v19  ;;  %v4868_v43 = vmul.f32 %v11037_v46, %v4804_v54  ;;  %v4613_v9 = vmul.f32 1.0614054, %v11113_v28  ;;  %v5189_v6 = vsub.f32 0.0, %v10992_v13  ;;  %v7938_v8 = vpop.eup %7937 }
 0x988   : > { %v5632_v55 = vadd.f32 1.0, %v5568_v24  ;;  %v11133_v63 = vsel %vm4230_vm5, 1.0, %v12854_v27  ;;  %v4742_v57 = vmul.f32 %v11083_v36, %v4678_v17  ;;  %v11137_v49 = vand.u32 2147483647, %v11120_v7 }
 0x989   : > { %v11139_v35 = vpop.eup %7939  ;;  %v5570_v45 = vmul.f32 %v5506_v61, %v10983_v37  ;;  %v4931_v29 = vadd.f32 -0.28449672, %v4867_v2  ;;  %v11143_v33 = vmul.f32 0.5, %v10962_v14  ;;  %7947 = vrcp.f32 %v4489_v58 }
 0x98a   : > { %v5340_v38 = vmul.f32 1.442695, %v5254_v3  ;;  %vm4229_vm6 = vcmp.ge.f32.partialorder %v10974_v0, 0.0  ;;  %vm4231_vm7 = vcmp.ge.f32.partialorder %v10995_v4, 0.0  ;;  %v11148_v19 = vmul.f32 0.70710677, %v11126_v20 }
 0x98b   : > { %12901 = vst [vmem:[#allocation67_spill] sm:$0xff] %v11143_v33  ;;  %v5441_v54 = vmul.f32 %v7938_v8, %v5121_v39  ;;  %v4932_v30 = vadd.f32 -0.28449672, %v4868_v43  ;;  %v4677_v24 = vadd.f32 -1.4531521, %v4613_v9  ;;  %v5253_v17 = vmul.f32 %v5189_v6, %v10992_v13 }
 0x98c   : > { %7949 = vpow2.f32 %v5336_v53  ;;  %v4806_v37 = vadd.f32 1.4214138, %v4742_v57  ;;  %v4615_v61 = vmul.f32 1.0614054, %v11139_v35  ;;  %v4427_v14 = vmul.f32 0.3275911, %v11137_v49 }
 0x98d   : > { %v11153_v2 = vpop.eup %7941  ;;  %v5634_v58 = vadd.f32 1.0, %v5570_v45  ;;  %v4995_v3 = vmul.f32 %v11026_v34, %v4931_v29  ;;  %v11157_v52 = vmul.f32 0.5, %v10977_v60  ;;  %v5191_v39 = vsub.f32 0.0, %v11010_v44  ;;  %v4035_v60 = vpop.f32.mrf.mxu0 }
 0x98e   : > { %v11163_v13 = vsel %vm4229_vm6, 1.0, %v12854_v27  ;;  %v11168_v53 = vsel %vm4231_vm7, 1.0, %v12854_v27  ;;  %v11171_v43 = vmul.f32 0.5, %v11001_v16  ;;  %v11174_v9 = vand.u32 2147483647, %v11148_v19 }
 0x98f   : > { %12902 = vst [vmem:[#allocation72_spill] sm:$0xff] %v11157_v52  ;;  %v5505_v6 = vsub.f32 1.0, %v5441_v54  ;;  %v4996_v8 = vmul.f32 %v11037_v46, %v4932_v30  ;;  %v4741_v57 = vmul.f32 %v11113_v28, %v4677_v24  ;;  %v5338_v0 = vmul.f32 1.442695, %v5253_v17  ;;  %v12904_v54 = vld [vmem:[#allocation68_spill] sm:$0xff]  ;;  %v12906_v24 = vld [vmem:[#allocation71_spill] sm:$0xff] }
 0x990   : > { %12903 = vst [vmem:[#allocation69_spill] sm:$0xff] %v11171_v43  ;;  %v7944_v45 = vpop.eup %7943  ;;  %v4870_v29 = vmul.f32 %v11083_v36, %v4806_v37  ;;  %v4679_v41 = vadd.f32 -1.4531521, %v4615_v61  ;;  %v4616_v4 = vmul.f32 1.0614054, %v11153_v2  ;;  %v4491_v48 = vadd.f32 1.0, %v4427_v14  ;;  %v3924_v61 = vpop.f32.mrf.mxu1 }
 0x991   : > { %v5059_v25 = vadd.f32 0.2548296, %v4995_v3  ;;  %v5255_v16 = vmul.f32 %v5191_v39, %v11010_v44  ;;  %vm4232_vm8 = vcmp.ge.f32.partialorder %v11015_v56, 0.0  ;;  %v11183_v47 = vadd.f32 %v4035_v60, %v10405_v18  ;;  %v7645_v14 = vld [vmem:[#allocation14 + $0xa0] ss:$8 sps:$4 sm:$0xff]  }
 0x992   : > { %v11187_v30 = vmul.f32 %v11111_v15, %v12904_v54  ;;  %v11190_v17 = vmul.f32 %v5632_v55, %v12906_v24  ;;  %7951 = vpow2.f32 %v5340_v38  ;;  %v4428_v37 = vmul.f32 0.3275911, %v11174_v9  ;;  %v7647_v3 = vld [vmem:[#allocation14 + $0xa4] ss:$8 sps:$4 sm:$0xff]   ;;  %v7648_v55 = vld [vmem:[#allocation14 + $0x1a0] ss:$8 sps:$4 sm:$0xff]  }
 0x993   : > { %v11193_v10 = vpop.eup %7945  ;;  %v5569_v44 = vmul.f32 %v5505_v6, %v11021_v11  ;;  %v5060_v39 = vadd.f32 0.2548296, %v4996_v8  ;;  %v4805_v60 = vadd.f32 1.4214138, %v4741_v57  ;;  %v5192_v43 = vsub.f32 0.0, %v11043_v26  ;;  %6198 = vmatprep.subr.bf16.mxu1 %v7647_v3  ;;  %v12908_v38 = vld [vmem:[#allocation78_spill] sm:$0xff] }
 0x994   : > { %12905 = vst [vmem:[#allocation68_spill] sm:$0xff] %v11187_v30  ;;  %12907 = vst [vmem:[#allocation71_spill] sm:$0xff] %v11190_v17  ;;  %v4934_v52 = vadd.f32 -0.28449672, %v4870_v29  ;;  %v4743_v15 = vmul.f32 %v11139_v35, %v4679_v41  ;;  %v4680_v54 = vadd.f32 -1.4531521, %v4616_v4  ;;  %7953 = vrcp.f32 %v4491_v48  ;;  %6199 = vmatpush2.bf16.msra.mxu1 %v7645_v14 }
 0x995   : > { %v11199_v24 = vmul.f32 %v5634_v58, %v12908_v38  ;;  %v5342_v30 = vmul.f32 1.442695, %v5255_v16  ;;  %v11202_v33 = vmul.f32 0.70710677, %v11183_v47  ;;  %v11205_v11 = vadd.f32 %v3924_v61, %v10408_v21  ;;  %v7650_v6 = vld [vmem:[#allocation14 + $0x1a4] ss:$8 sps:$4 sm:$0xff]   ;;  %v4037_v38 = vpop.f32.mrf.mxu0 }
 0x996   : > { %v11207_v8 = vpop.eup %7947  ;;  %v5123_v41 = vmul.f32 %v11026_v34, %v5059_v25  ;;  %7955 = vpow2.f32 %v5338_v0  ;;  %v4618_v48 = vmul.f32 1.0614054, %v11193_v10  ;;  %v4492_v57 = vadd.f32 1.0, %v4428_v37  ;;  %6311 = vmatprep.subr.bf16.mxu0 %v7650_v6 }
 0x997   : > { %12909 = vst [vmem:[#allocation78_spill] sm:$0xff] %v11199_v24  ;;  %v5124_v58 = vmul.f32 %v11037_v46, %v5060_v39  ;;  %v4869_v29 = vmul.f32 %v11113_v28, %v4805_v60  ;;  %v11216_v4 = vsel %vm4232_vm8, 1.0, %v12854_v27  ;;  %v5256_v16 = vmul.f32 %v5192_v43, %v11043_v26  ;;  %6312 = vmatpush2.bf16.msra.mxu0 %v7648_v55 }
 0x998   : > { %v5633_v61 = vadd.f32 1.0, %v5569_v44  ;;  %v4998_v14 = vmul.f32 %v11083_v36, %v4934_v52  ;;  %v4807_v34 = vadd.f32 1.4214138, %v4743_v15  ;;  %v4744_v25 = vmul.f32 %v11153_v2, %v4680_v54 }
 0x999   : > { %v7950_v0 = vpop.eup %7949  ;;  %7957 = vpow2.f32 %v5342_v30  ;;  %v4617_v46 = vmul.f32 1.0614054, %v11207_v8  ;;  %v11223_v37 = vand.u32 2147483647, %v11202_v33  ;;  %v11226_v56 = vmul.f32 0.70710677, %v11205_v11 }
 0x99a   : > { %v5443_v3 = vmul.f32 %v7944_v45, %v5123_v41  ;;  %v4682_v26 = vadd.f32 -1.4531521, %v4618_v48  ;;  %v5194_v43 = vsub.f32 0.0, %v11077_v40  ;;  %7959 = vrcp.f32 %v4492_v57 }
 0x99b   : > { %v5444_v52 = vmul.f32 %v7950_v0, %v5124_v58  ;;  %v4933_v44 = vadd.f32 -0.28449672, %v4869_v29  ;;  %v5344_v39 = vmul.f32 1.442695, %v5256_v16  ;;  %v11230_v60 = vmul.f32 0.5, %v11031_v1 }
 0x99c   : > { %v5062_v30 = vadd.f32 0.2548296, %v4998_v14  ;;  %v4871_v15 = vmul.f32 %v11139_v35, %v4807_v34  ;;  %v4808_v54 = vadd.f32 1.4214138, %v4744_v25  ;;  %v11234_v55 = vmul.f32 0.5, %v11047_v12 }
 0x99d   : > { %v11237_v45 = vmul.f32 %v5633_v61, %v10998_v31  ;;  %v4681_v6 = vadd.f32 -1.4531521, %v4617_v46  ;;  %v4430_v41 = vmul.f32 0.3275911, %v11223_v37  ;;  %v11241_v48 = vand.u32 2147483647, %v11226_v56 }
 0x99e   : > { %12910 = vst [vmem:[#allocation86_spill] sm:$0xff] %v11234_v55  ;;  %v5507_v57 = vsub.f32 1.0, %v5443_v3  ;;  %v4746_v1 = vmul.f32 %v11193_v10, %v4682_v26  ;;  %v5258_v58 = vmul.f32 %v5194_v43, %v11077_v40  ;;  %v5193_v29 = vsub.f32 0.0, %v11090_v51  ;;  %v12912_v26 = vld [vmem:[#allocation80_spill] sm:$0xff] }
 0x99f   : > { %12911 = vst [vmem:[#allocation87_spill] sm:$0xff] %v11237_v45  ;;  %v7952_v16 = vpop.eup %7951  ;;  %v5508_v12 = vsub.f32 1.0, %v5444_v52  ;;  %v4997_v14 = vmul.f32 %v11113_v28, %v4933_v44  ;;  %7961 = vpow2.f32 %v5344_v39  ;;  %v11248_v31 = vadd.f32 %v4037_v38, %v10418_v32 }
 0x9a0   : > { %v5126_v61 = vmul.f32 %v11083_v36, %v5062_v30  ;;  %v4935_v34 = vadd.f32 -0.28449672, %v4871_v15  ;;  %vm4234_vm9 = vcmp.ge.f32.partialorder %v11051_v59, 0.0  ;;  %vm4233_vm10 = vcmp.ge.f32.partialorder %v11071_v23, 0.0 }
 0x9a1   : > { %v11253_v25 = vpop.eup %7953  ;;  %v4872_v40 = vmul.f32 %v11153_v2, %v4808_v54  ;;  %v4745_v0 = vmul.f32 %v11207_v8, %v4681_v6  ;;  %v4494_v46 = vadd.f32 1.0, %v4430_v41  ;;  %v4429_v3 = vmul.f32 0.3275911, %v11241_v48 }
 0x9a2   : > { %v5571_v43 = vmul.f32 %v5507_v57, %v12912_v26  ;;  %v4810_v52 = vadd.f32 1.4214138, %v4746_v1  ;;  %v5348_v44 = vmul.f32 1.442695, %v5258_v58  ;;  %v5257_v36 = vmul.f32 %v5193_v29, %v11090_v51  ;;  %v3928_v58 = vpop.f32.mrf.mxu1 }
 0x9a3   : > { %v7956_v39 = vpop.eup %7955  ;;  %v5572_v59 = vmul.f32 %v5508_v12, %v11103_v5  ;;  %v5061_v30 = vadd.f32 0.2548296, %v4997_v14  ;;  %v11262_v15 = vsel %vm4234_vm9, 1.0, %v12854_v27  ;;  %v11265_v54 = vmul.f32 0.70710677, %v11248_v31 }
 0x9a4   : > { %v5446_v38 = vmul.f32 %v7952_v16, %v5126_v61  ;;  %v4999_v6 = vmul.f32 %v11139_v35, %v4935_v34  ;;  %v11271_v41 = vsel %vm4233_vm10, 1.0, %v12854_v27  ;;  %v4619_v51 = vmul.f32 1.0614054, %v11253_v25 }
 0x9a5   : > { %v4936_v57 = vadd.f32 -0.28449672, %v4872_v40  ;;  %v4809_v1 = vadd.f32 1.4214138, %v4745_v0  ;;  %7963 = vrcp.f32 %v4494_v46  ;;  %v4493_v5 = vadd.f32 1.0, %v4429_v3  ;;  %v4041_v40 = vpop.f32.mrf.mxu0 }
 0x9a6   : > { %v7958_v29 = vpop.eup %7957  ;;  %v5635_v12 = vadd.f32 1.0, %v5571_v43  ;;  %v4874_v14 = vmul.f32 %v11193_v10, %v4810_v52  ;;  %7965 = vpow2.f32 %v5348_v44  ;;  %v5346_v16 = vmul.f32 1.442695, %v5257_v36 }
 0x9a7   : > { %v11275_v61 = vpop.eup %7959  ;;  %v5636_v34 = vadd.f32 1.0, %v5572_v59  ;;  %v5125_v23 = vmul.f32 %v11113_v28, %v5061_v30  ;;  %vm4235_vm11 = vcmp.ge.f32.partialorder %v11120_v7, 0.0  ;;  %v11280_v26 = vand.u32 2147483647, %v11265_v54 }
 0x9a8   : > { %v5063_v0 = vadd.f32 0.2548296, %v4999_v6  ;;  %v4683_v46 = vadd.f32 -1.4531521, %v4619_v51  ;;  %v5195_v3 = vsub.f32 0.0, %v11137_v49  ;;  %v11284_v43 = vadd.f32 %v3928_v58, %v10401_v42 }
 0x9a9   : > { %v5510_v52 = vsub.f32 1.0, %v5446_v38  ;;  %v5000_v44 = vmul.f32 %v11153_v2, %v4936_v57  ;;  %v4873_v36 = vmul.f32 %v11207_v8, %v4809_v1  ;;  %7967 = vrcp.f32 %v4493_v5 }
 0x9aa   : > { %v4938_v28 = vadd.f32 -0.28449672, %v4874_v14  ;;  %v11289_v59 = vmul.f32 0.5, %v11100_v50  ;;  %v4620_v30 = vmul.f32 1.0614054, %v11275_v61  ;;  %v11293_v6 = vadd.f32 %v4041_v40, %v10405_v18 }
 0x9ab   : > { %v5445_v51 = vmul.f32 %v7956_v39, %v5125_v23  ;;  %v11298_v58 = vsel %vm4235_vm11, 1.0, %v12854_v27  ;;  %v11301_v38 = vmul.f32 0.5, %v11126_v20  ;;  %v4431_v57 = vmul.f32 0.3275911, %v11280_v26  ;;  %v3930_v39 = vpop.f32.mrf.mxu1 }
 0x9ac   : > { %12913 = vst [vmem:[#allocation80_spill] sm:$0xff] %v11289_v59  ;;  %12914 = vst [vmem:[#allocation88_spill] sm:$0xff] %v11298_v58  ;;  %v7962_v1 = vpop.eup %7961  ;;  %v5127_v50 = vmul.f32 %v11139_v35, %v5063_v0  ;;  %v4747_v5 = vmul.f32 %v11253_v25, %v4683_v46  ;;  %v5259_v14 = vmul.f32 %v5195_v3, %v11137_v49  ;;  %v11308_v40 = vmul.f32 0.70710677, %v11284_v43  ;;  %v12917_v59 = vld [vmem:[#allocation79_spill] sm:$0xff] }
 0x9ad   : > { %12915 = vst [vmem:[#allocation89_spill] sm:$0xff] %v11301_v38  ;;  %v11311_v7 = vmul.f32 %v5636_v34, %v11081_v22  ;;  %v5574_v23 = vmul.f32 %v5510_v52, %v11133_v63  ;;  %v5064_v20 = vadd.f32 0.2548296, %v5000_v44  ;;  %v4937_v45 = vadd.f32 -0.28449672, %v4873_v36 }
 0x9ae   : > { %v7651_v38 = vld [vmem:[#allocation14 + $0x90] ss:$8 sps:$4 sm:$0xff]   ;;  %v11315_v58 = vmul.f32 %v5635_v12, %v12917_v59  ;;  %v5002_v35 = vmul.f32 %v11193_v10, %v4938_v28  ;;  %v4684_v0 = vadd.f32 -1.4531521, %v4620_v30  ;;  %v11319_v49 = vmul.f32 0.70710677, %v11293_v6 }
 0x9af   : > { %12916 = vst [vmem:[#allocation90_spill] sm:$0xff] %v11311_v7  ;;  %v7653_v46 = vld [vmem:[#allocation14 + $0x94] ss:$8 sps:$4 sm:$0xff]   ;;  %v5509_v3 = vsub.f32 1.0, %v5445_v51  ;;  %7969 = vpow2.f32 %v5346_v16  ;;  %v4495_v55 = vadd.f32 1.0, %v4431_v57  ;;  %v11322_v22 = vadd.f32 %v3930_v39, %v10408_v21 }
 0x9b0   : > { %12918 = vst [vmem:[#allocation79_spill] sm:$0xff] %v11315_v58  ;;  %v7654_v63 = vld [vmem:[#allocation14 + $0x190] ss:$8 sps:$4 sm:$0xff]   ;;  %v7656_v34 = vld [vmem:[#allocation14 + $0x194] ss:$8 sps:$4 sm:$0xff]   ;;  %v5447_v52 = vmul.f32 %v7958_v29, %v5127_v50  ;;  %6200 = vmatprep.subr.bf16.mxu1 %v7653_v46  ;;  %v5638_v59 = vadd.f32 1.0, %v5574_v23  ;;  %v5128_v29 = vmul.f32 %v11153_v2, %v5064_v20  ;;  %v5001_v57 = vmul.f32 %v11207_v8, %v4937_v45 }
 0x9b1   : > { %v4811_v44 = vadd.f32 1.4214138, %v4747_v5  ;;  %v5350_v36 = vmul.f32 1.442695, %v5259_v14  ;;  %v11325_v12 = vand.u32 2147483647, %v11308_v40  ;;  %6313 = vmatprep.subr.bf16.mxu0 %v7656_v34  ;;  %6201 = vmatpush2.bf16.msra.mxu1 %v7651_v38  ;;  %v4043_v5 = vpop.f32.mrf.mxu0  ;;  %v5573_v39 = vmul.f32 %v5509_v3, %v11163_v13 }
 0x9b2   : > { %vm4236_vm12 = vcmp.ge.f32.partialorder %v11148_v19, 0.0  ;;  %v5196_v16 = vsub.f32 0.0, %v11174_v9  ;;  %v11331_v30 = vpop.eup %7963  ;;  %v5066_v51 = vadd.f32 0.2548296, %v5002_v35  ;;  %v11336_v50 = vand.u32 2147483647, %v11319_v49  ;;  %6314 = vmatpush2.bf16.msra.mxu0 %v7654_v63 }
 0x9b3   : > { %v7966_v14 = vpop.eup %7965  ;;  %v4748_v23 = vmul.f32 %v11275_v61, %v4684_v0  ;;  %7971 = vrcp.f32 %v4495_v55  ;;  %v11341_v38 = vmul.f32 0.70710677, %v11322_v22  ;;  %v5511_v46 = vsub.f32 1.0, %v5447_v52 }
 0x9b4   : > { %v4875_v2 = vmul.f32 %v11253_v25, %v4811_v44  ;;  %7973 = vpow2.f32 %v5350_v36  ;;  %v4432_v45 = vmul.f32 0.3275911, %v11325_v12  ;;  %v11346_v20 = vmul.f32 %v5638_v59, %v11117_v62 }
 0x9b5   : > { %v11351_v35 = vsel %vm4236_vm12, 1.0, %v12854_v27  ;;  %v4622_v13 = vmul.f32 1.0614054, %v11331_v30  ;;  %v11355_v55 = vadd.f32 %v4043_v5, %v10418_v32  ;;  %v5448_v3 = vmul.f32 %v7962_v1, %v5128_v29  ;;  %v3932_v1 = vpop.f32.mrf.mxu1 }
 0x9b6   : > { %12919 = vst [vmem:[#allocation91_spill] sm:$0xff] %v11346_v20  ;;  %v11357_v0 = vpop.eup %7967  ;;  %v5130_v63 = vmul.f32 %v11193_v10, %v5066_v51  ;;  %v5065_v34 = vadd.f32 0.2548296, %v5001_v57  ;;  %v4434_v52 = vmul.f32 0.3275911, %v11336_v50  ;;  %v5637_v62 = vadd.f32 1.0, %v5573_v39 }
 0x9b7   : > { %v4812_v44 = vadd.f32 1.4214138, %v4748_v23  ;;  %v5260_v36 = vmul.f32 %v5196_v16, %v11174_v9  ;;  %v11363_v19 = vand.u32 2147483647, %v11341_v38  ;;  %v5575_v59 = vmul.f32 %v5511_v46, %v11168_v53 }
 0x9b8   : > { %v4939_v28 = vadd.f32 -0.28449672, %v4875_v2  ;;  %v11367_v5 = vmul.f32 0.5, %v11183_v47  ;;  %v4496_v17 = vadd.f32 1.0, %v4432_v45  ;;  %v4686_v29 = vadd.f32 -1.4531521, %v4622_v13 }
 0x9b9   : > { %v4621_v51 = vmul.f32 1.0614054, %v11357_v0  ;;  %v11373_v57 = vmul.f32 0.70710677, %v11355_v55  ;;  %v5512_v9 = vsub.f32 1.0, %v5448_v3  ;;  %v5450_v16 = vmul.f32 %v7966_v14, %v5130_v63 }
 0x9ba   : > { %v5129_v39 = vmul.f32 %v11207_v8, %v5065_v34  ;;  %v4498_v53 = vadd.f32 1.0, %v4434_v52  ;;  %v4876_v23 = vmul.f32 %v11275_v61, %v4812_v44  ;;  %v5352_v47 = vmul.f32 1.442695, %v5260_v36  ;;  %v12920_v44 = vld [vmem:[#allocation67_spill] sm:$0xff] }
 0x9bb   : > { %v4433_v46 = vmul.f32 0.3275911, %v11363_v19  ;;  %v11379_v2 = vadd.f32 %v3932_v1, %v10401_v42  ;;  %v5639_v13 = vadd.f32 1.0, %v5575_v59  ;;  %v5003_v10 = vmul.f32 %v11253_v25, %v4939_v28 }
 0x9bc   : > { %v7970_v45 = vpop.eup %7969  ;;  %v5198_v24 = vsub.f32 0.0, %v11223_v37  ;;  %7975 = vrcp.f32 %v4496_v17  ;;  %vm4238_vm13 = vcmp.ge.f32.partialorder %v11202_v33, 0.0  ;;  %v4750_v8 = vmul.f32 %v11331_v30, %v4686_v29 }
 0x9bd   : > { %v4685_v14 = vadd.f32 -1.4531521, %v4621_v51  ;;  %v11386_v3 = vand.u32 2147483647, %v11373_v57  ;;  %v5576_v63 = vmul.f32 %v5512_v9, %v11216_v4  ;;  %v5514_v34 = vsub.f32 1.0, %v5450_v16 }
 0x9be   : > { %v5449_v52 = vmul.f32 %v7970_v45, %v5129_v39  ;;  %7977 = vrcp.f32 %v4498_v53  ;;  %v11390_v36 = vmul.f32 %v5637_v62, %v12920_v44  ;;  %v4940_v28 = vadd.f32 -0.28449672, %v4876_v23  ;;  %v12922_v53 = vld [vmem:[#allocation72_spill] sm:$0xff] }
 0x9bf   : > { %v4497_v59 = vadd.f32 1.0, %v4433_v46  ;;  %v11393_v17 = vmul.f32 0.70710677, %v11379_v2  ;;  %v5067_v29 = vadd.f32 0.2548296, %v5003_v10  ;;  %7979 = vpow2.f32 %v5352_v47 }
 0x9c0   : > { %12921 = vst [vmem:[#allocation67_spill] sm:$0xff] %v11390_v36  ;;  %v11395_v1 = vpop.eup %7971  ;;  %v5262_v51 = vmul.f32 %v5198_v24, %v11223_v37  ;;  %v5197_v20 = vsub.f32 0.0, %v11241_v48  ;;  %v11402_v9 = vsel %vm4238_vm13, 1.0, %v12854_v27  ;;  %v4814_v62 = vadd.f32 1.4214138, %v4750_v8 }
 0x9c1   : > { %v7974_v4 = vpop.eup %7973  ;;  %v4749_v16 = vmul.f32 %v11357_v0, %v4685_v14  ;;  %v4435_v39 = vmul.f32 0.3275911, %v11386_v3  ;;  %v11407_v23 = vmul.f32 %v5639_v13, %v12922_v53  ;;  %v5640_v10 = vadd.f32 1.0, %v5576_v63 }
 0x9c2   : > { %v5578_v47 = vmul.f32 %v5514_v34, %v11262_v15  ;;  %v5513_v24 = vsub.f32 1.0, %v5449_v52  ;;  %v5004_v37 = vmul.f32 %v11275_v61, %v4940_v28  ;;  %v4623_v46 = vmul.f32 1.0614054, %v11395_v1  ;;  %v12924_v52 = vld [vmem:[#allocation69_spill] sm:$0xff] }
 0x9c3   : > { %12923 = vst [vmem:[#allocation72_spill] sm:$0xff] %v11407_v23  ;;  %7981 = vrcp.f32 %v4497_v59  ;;  %v11413_v33 = vand.u32 2147483647, %v11393_v17  ;;  %v5131_v45 = vmul.f32 %v11253_v25, %v5067_v29  ;;  %v5356_v8 = vmul.f32 1.442695, %v5262_v51 }
 0x9c4   : > { %v11417_v14 = vmul.f32 0.5, %v11205_v11  ;;  %v5261_v13 = vmul.f32 %v5197_v20, %v11241_v48  ;;  %v4878_v63 = vmul.f32 %v11331_v30, %v4814_v62  ;;  %vm4237_vm14 = vcmp.ge.f32.partialorder %v11226_v56, 0.0 }
 0x9c5   : > { %v4813_v15 = vadd.f32 1.4214138, %v4749_v16  ;;  %v4499_v34 = vadd.f32 1.0, %v4435_v39  ;;  %v11423_v44 = vmul.f32 %v5640_v10, %v12924_v52  ;;  %v5642_v28 = vadd.f32 1.0, %v5578_v47  ;;  %v7657_v10 = vld [vmem:[#allocation14 + $0x80] ss:$8 sps:$4 sm:$0xff]  }
 0x9c6   : > { %vm4239_vm15 = vcmp.ge.f32.partialorder %v11265_v54, 0.0  ;;  %v5199_v25 = vsub.f32 0.0, %v11280_v26  ;;  %v5577_v59 = vmul.f32 %v5513_v24, %v11271_v41  ;;  %v5068_v11 = vadd.f32 0.2548296, %v5004_v37  ;;  %v4045_v41 = vpop.f32.mrf.mxu0 }
 0x9c7   : > { %12925 = vst [vmem:[#allocation69_spill] sm:$0xff] %v11423_v44  ;;  %v4687_v29 = vadd.f32 -1.4531521, %v4623_v46  ;;  %v4436_v48 = vmul.f32 0.3275911, %v11413_v33  ;;  %v5451_v20 = vmul.f32 %v7974_v4, %v5131_v45  ;;  %7983 = vpow2.f32 %v5356_v8  ;;  %v3934_v46 = vpop.f32.mrf.mxu1 }
 0x9c8   : > { %v11430_v56 = vsel %vm4237_vm14, 1.0, %v12854_v27  ;;  %v5354_v51 = vmul.f32 1.442695, %v5261_v13  ;;  %v4942_v16 = vadd.f32 -0.28449672, %v4878_v63  ;;  %v4877_v39 = vmul.f32 %v11357_v0, %v4813_v15 }
 0x9c9   : > { %v11432_v62 = vpop.eup %7975  ;;  %v11436_v53 = vmul.f32 0.5, %v11248_v31  ;;  %7985 = vrcp.f32 %v4499_v34  ;;  %v11439_v47 = vmul.f32 %v5642_v28, %v11230_v60  ;;  %v11444_v4 = vsel %vm4239_vm15, 1.0, %v12854_v27  ;;  %v7659_v45 = vld [vmem:[#allocation14 + $0x84] ss:$8 sps:$4 sm:$0xff]   ;;  %v7660_v8 = vld [vmem:[#allocation14 + $0x180] ss:$8 sps:$4 sm:$0xff]  }
 0x9ca   : > { %v5263_v24 = vmul.f32 %v5199_v25, %v11280_v26  ;;  %v5200_v37 = vsub.f32 0.0, %v11325_v12  ;;  %v5641_v13 = vadd.f32 1.0, %v5577_v59  ;;  %v5132_v63 = vmul.f32 %v11275_v61, %v5068_v11  ;;  %v7662_v34 = vld [vmem:[#allocation14 + $0x184] ss:$8 sps:$4 sm:$0xff]   ;;  %6202 = vmatprep.subr.bf16.mxu1 %v7659_v45 }
 0x9cb   : > { %12926 = vst [vmem:[#allocation92_spill] sm:$0xff] %v11439_v47  ;;  %v11448_v31 = vpop.eup %7977  ;;  %v4751_v60 = vmul.f32 %v11395_v1, %v4687_v29  ;;  %v4500_v15 = vadd.f32 1.0, %v4436_v48  ;;  %v5515_v52 = vsub.f32 1.0, %v5451_v20  ;;  %7987 = vpow2.f32 %v5354_v51  ;;  %6315 = vmatprep.subr.bf16.mxu0 %v7662_v34  ;;  %6203 = vmatpush2.bf16.msra.mxu1 %v7657_v10  ;;  %v8143_v20 = vld [vmem:[#allocation14 + $0x174] ss:$8 sps:$4 sm:$0xff]   ;;  %v12927_v51 = vld [vmem:[#allocation86_spill] sm:$0xff] }
 0x9cc   : > { %v4624_v54 = vmul.f32 1.0614054, %v11432_v62  ;;  %v11454_v26 = vadd.f32 %v4045_v41, %v10405_v18  ;;  %v7980_v28 = vpop.eup %7979  ;;  %v5006_v25 = vmul.f32 %v11331_v30, %v4942_v16  ;;  %v4941_v7 = vadd.f32 -0.28449672, %v4877_v39  ;;  %6316 = vmatpush2.bf16.msra.mxu0 %v7660_v8  ;;  %7126 = vmatprep.subr.bf16.mxu1 %v8143_v20  ;;  %v12929_v10 = vld [vmem:[#allocation88_spill] sm:$0xff] }
 0x9cd   : > { %vm4240_vm0 = vcmp.ge.f32.partialorder %v11308_v40, 0.0  ;;  %v11459_v61 = vadd.f32 %v3934_v46, %v10408_v21  ;;  %v5358_v59 = vmul.f32 1.442695, %v5263_v24  ;;  %v11462_v11 = vmul.f32 0.5, %v11284_v43 }
 0x9ce   : > { %v5264_v29 = vmul.f32 %v5200_v37, %v11325_v12  ;;  %v4626_v48 = vmul.f32 1.0614054, %v11448_v31  ;;  %v11467_v16 = vmul.f32 %v5641_v13, %v12927_v51  ;;  %v5452_v39 = vmul.f32 %v7980_v28, %v5132_v63  ;;  %v4047_v28 = vpop.f32.mrf.mxu0 }
 0x9cf   : > { %v4815_v41 = vadd.f32 1.4214138, %v4751_v60  ;;  %7989 = vrcp.f32 %v4500_v15  ;;  %v5579_v24 = vmul.f32 %v5515_v52, %v12929_v10  ;;  %v11475_v43 = vsel %vm4240_vm0, 1.0, %v12854_v27 }
 0x9d0   : > { %12928 = vst [vmem:[#allocation86_spill] sm:$0xff] %v11467_v16  ;;  %v11469_v46 = vpop.eup %7981  ;;  %v4688_v12 = vadd.f32 -1.4531521, %v4624_v54  ;;  %v11478_v37 = vmul.f32 0.70710677, %v11454_v26  ;;  %v5005_v8 = vmul.f32 %v11357_v0, %v4941_v7  ;;  %v11482_v13 = vmul.f32 0.5, %v11293_v6 }
 0x9d1   : > { %v5070_v45 = vadd.f32 0.2548296, %v5006_v25  ;;  %v11485_v63 = vmul.f32 0.70710677, %v11459_v61  ;;  %7991 = vpow2.f32 %v5358_v59  ;;  %v5360_v60 = vmul.f32 1.442695, %v5264_v29 }
 0x9d2   : > { %12930 = vst [vmem:[#allocation88_spill] sm:$0xff] %v11482_v13  ;;  %vm4242_vm1 = vcmp.ge.f32.partialorder %v11319_v49, 0.0  ;;  %v4690_v40 = vadd.f32 -1.4531521, %v4626_v48  ;;  %v5516_v15 = vsub.f32 1.0, %v5452_v39  ;;  %v4879_v34 = vmul.f32 %v11395_v1, %v4815_v41 }
 0x9d3   : > { %v5202_v52 = vsub.f32 0.0, %v11336_v50  ;;  %v4625_v54 = vmul.f32 1.0614054, %v11469_v46  ;;  %v5643_v7 = vadd.f32 1.0, %v5579_v24  ;;  %v4752_v6 = vmul.f32 %v11432_v62, %v4688_v12 }
 0x9d4   : > { %v11493_v25 = vmul.f32 0.5, %v11322_v22  ;;  %v11496_v59 = vand.u32 2147483647, %v11478_v37  ;;  %v7984_v29 = vpop.eup %7983  ;;  %v5134_v49 = vmul.f32 %v11331_v30, %v5070_v45  ;;  %v5069_v48 = vadd.f32 0.2548296, %v5005_v8  ;;  %v3938_v45 = vpop.f32.mrf.mxu1  ;;  %v12932_v8 = vld [vmem:[#allocation80_spill] sm:$0xff] }
 0x9d5   : > { %v11500_v20 = vsel %vm4242_vm1, 1.0, %v12854_v27  ;;  %v11503_v51 = vand.u32 2147483647, %v11485_v63  ;;  %7993 = vpow2.f32 %v5360_v60  ;;  %v4754_v41 = vmul.f32 %v11448_v31, %v4690_v40 }
 0x9d6   : > { %12931 = vst [vmem:[#allocation93_spill] sm:$0xff] %v11493_v25  ;;  %v11505_v39 = vpop.eup %7985  ;;  %vm4241_vm2 = vcmp.ge.f32.partialorder %v11341_v38, 0.0  ;;  %v11510_v22 = vadd.f32 %v4047_v28, %v10418_v32  ;;  %v5580_v10 = vmul.f32 %v5516_v15, %v11351_v35  ;;  %v4943_v30 = vadd.f32 -0.28449672, %v4879_v34 }
 0x9d7   : > { %v5266_v24 = vmul.f32 %v5202_v52, %v11336_v50  ;;  %v4689_v12 = vadd.f32 -1.4531521, %v4625_v54  ;;  %v11515_v16 = vmul.f32 %v5643_v7, %v12932_v8  ;;  %v4816_v23 = vadd.f32 1.4214138, %v4752_v6 }
 0x9d8   : > { %v5201_v60 = vsub.f32 0.0, %v11363_v19  ;;  %v4438_v40 = vmul.f32 0.3275911, %v11496_v59  ;;  %v7988_v58 = vpop.eup %7987  ;;  %v5454_v36 = vmul.f32 %v7984_v29, %v5134_v49  ;;  %v5133_v28 = vmul.f32 %v11357_v0, %v5069_v48 }
 0x9d9   : > { %12933 = vst [vmem:[#allocation80_spill] sm:$0xff] %v11515_v16  ;;  %v4627_v25 = vmul.f32 1.0614054, %v11505_v39  ;;  %v4437_v35 = vmul.f32 0.3275911, %v11503_v51  ;;  %v11525_v50 = vsel %vm4241_vm2, 1.0, %v12854_v27  ;;  %v11531_v52 = vadd.f32 %v3938_v45, %v10401_v42 }
 0x9da   : > { %v4818_v15 = vadd.f32 1.4214138, %v4754_v41  ;;  %v11528_v34 = vmul.f32 0.70710677, %v11510_v22  ;;  %v5644_v54 = vadd.f32 1.0, %v5580_v10  ;;  %v5007_v7 = vmul.f32 %v11395_v1, %v4943_v30 }
 0x9db   : > { %v5364_v0 = vmul.f32 1.442695, %v5266_v24  ;;  %v4753_v6 = vmul.f32 %v11469_v46, %v4689_v12  ;;  %v4880_v49 = vmul.f32 %v11432_v62, %v4816_v23  ;;  %v5265_v38 = vmul.f32 %v5201_v60, %v11363_v19  ;;  %v12936_v12 = vld [vmem:[#allocation89_spill] sm:$0xff] }
 0x9dc   : > { %v11535_v29 = vpop.eup %7989  ;;  %v11540_v48 = vmul.f32 0.5, %v11355_v55  ;;  %v4502_v41 = vadd.f32 1.0, %v4438_v40  ;;  %v5518_v8 = vsub.f32 1.0, %v5454_v36  ;;  %v5453_v16 = vmul.f32 %v7988_v58, %v5133_v28 }
 0x9dd   : > { %v4691_v45 = vadd.f32 -1.4531521, %v4627_v25  ;;  %v4501_v13 = vadd.f32 1.0, %v4437_v35  ;;  %v4882_v10 = vmul.f32 %v11448_v31, %v4818_v15  ;;  %v11544_v30 = vmul.f32 0.5, %v11379_v2 }
 0x9de   : > { %12934 = vst [vmem:[#allocation94_spill] sm:$0xff] %v11540_v48  ;;  %v11547_v24 = vand.u32 2147483647, %v11528_v34  ;;  %v11550_v23 = vmul.f32 0.70710677, %v11531_v52  ;;  %v7992_v19 = vpop.eup %7991  ;;  %v11553_v55 = vmul.f32 %v5644_v54, %v12936_v12  ;;  %vm4243_vm3 = vcmp.ge.f32.partialorder %v11373_v57, 0.0 }
 0x9df   : > { %12935 = vst [vmem:[#allocation95_spill] sm:$0xff] %v11544_v30  ;;  %v5071_v60 = vadd.f32 0.2548296, %v5007_v7  ;;  %v4817_v36 = vadd.f32 1.4214138, %v4753_v6  ;;  %v5203_v2 = vsub.f32 0.0, %v11386_v3  ;;  %7995 = vrcp.f32 %v4502_v41  ;;  %v4051_v6 = vpop.f32.mrf.mxu0 }
 0x9e0   : > { %12937 = vst [vmem:[#allocation89_spill] sm:$0xff] %v11553_v55  ;;  %v4628_v58 = vmul.f32 1.0614054, %v11535_v29  ;;  %v4944_v25 = vadd.f32 -0.28449672, %v4880_v49  ;;  %v5582_v40 = vmul.f32 %v5518_v8, %v11402_v9  ;;  %v5517_v28 = vsub.f32 1.0, %v5453_v16  ;;  %v3940_v8 = vpop.f32.mrf.mxu1 }
 0x9e1   : > { %v4755_v35 = vmul.f32 %v11505_v39, %v4691_v45  ;;  %7997 = vrcp.f32 %v4501_v13  ;;  %v4946_v15 = vadd.f32 -0.28449672, %v4882_v10  ;;  %v4439_v54 = vmul.f32 0.3275911, %v11547_v24 }
 0x9e2   : > { %7999 = vpow2.f32 %v5364_v0  ;;  %v11562_v7 = vand.u32 2147483647, %v11550_v23  ;;  %v7994_v49 = vpop.eup %7993  ;;  %v5135_v12 = vmul.f32 %v11395_v1, %v5071_v60  ;;  %v4881_v30 = vmul.f32 %v11469_v46, %v4817_v36 }
 0x9e3   : > { %v5362_v41 = vmul.f32 1.442695, %v5265_v38  ;;  %v4692_v48 = vadd.f32 -1.4531521, %v4628_v58  ;;  %v5008_v16 = vmul.f32 %v11432_v62, %v4944_v25  ;;  %v11572_v13 = vsel %vm4243_vm3, 1.0, %v12854_v27 }
 0x9e4   : > { %v5267_v0 = vmul.f32 %v5203_v2, %v11386_v3  ;;  %v5646_v45 = vadd.f32 1.0, %v5582_v40  ;;  %v4819_v10 = vadd.f32 1.4214138, %v4755_v35  ;;  %v5204_v1 = vsub.f32 0.0, %v11413_v33 }
 0x9e5   : > { %v11577_v38 = vadd.f32 %v4051_v6, %v10405_v18  ;;  %v5581_v60 = vmul.f32 %v5517_v28, %v11430_v56  ;;  %v5010_v36 = vmul.f32 %v11448_v31, %v4946_v15  ;;  %v4503_v58 = vadd.f32 1.0, %v4439_v54 }
 0x9e6   : > { %v4440_v25 = vmul.f32 0.3275911, %v11562_v7  ;;  %v5455_v57 = vmul.f32 %v7992_v19, %v5135_v12  ;;  %v4945_v9 = vadd.f32 -0.28449672, %v4881_v30  ;;  %v4756_v44 = vmul.f32 %v11535_v29, %v4692_v48  ;;  %v3942_v30 = vpop.f32.mrf.mxu1 }
 0x9e7   : > { %v11584_v3 = vadd.f32 %v3940_v8, %v10408_v21  ;;  %v5072_v2 = vadd.f32 0.2548296, %v5008_v16  ;;  %8001 = vpow2.f32 %v5362_v41  ;;  %v5366_v40 = vmul.f32 1.442695, %v5267_v0 }
 0x9e8   : > { %vm4244_vm4 = vcmp.ge.f32.partialorder %v11393_v17, 0.0  ;;  %v11588_v35 = vmul.f32 %v5646_v45, %v11367_v5  ;;  %v4883_v56 = vmul.f32 %v11505_v39, %v4819_v10  ;;  %v5268_v28 = vmul.f32 %v5204_v1, %v11413_v33 }
 0x9e9   : > { %v11593_v19 = vmul.f32 0.70710677, %v11577_v38  ;;  %v5645_v48 = vadd.f32 1.0, %v5581_v60  ;;  %v5074_v15 = vadd.f32 0.2548296, %v5010_v36  ;;  %8003 = vrcp.f32 %v4503_v58 }
 0x9ea   : > { %12938 = vst [vmem:[#allocation96_spill] sm:$0xff] %v11588_v35  ;;  %v4504_v54 = vadd.f32 1.0, %v4440_v25  ;;  %v5519_v6 = vsub.f32 1.0, %v5455_v57  ;;  %v5009_v12 = vmul.f32 %v11469_v46, %v4945_v9  ;;  %v4820_v41 = vadd.f32 1.4214138, %v4756_v44 }
 0x9eb   : > { %v11597_v16 = vmul.f32 0.70710677, %v11584_v3  ;;  %v5136_v5 = vmul.f32 %v11432_v62, %v5072_v2  ;;  %8005 = vpow2.f32 %v5366_v40  ;;  %v11603_v33 = vsel %vm4244_vm4, 1.0, %v12854_v27  ;;  %v4053_v2 = vpop.f32.mrf.mxu0 }
 0x9ec   : > { %v11606_v0 = vadd.f32 %v3942_v30, %v10401_v42  ;;  %v11608_v8 = vpop.eup %7995  ;;  %v4947_v44 = vadd.f32 -0.28449672, %v4883_v56  ;;  %v11613_v45 = vmul.f32 0.5, %v11454_v26  ;;  %v11616_v62 = vand.u32 2147483647, %v11593_v19 }
 0x9ed   : > { %v11621_v17 = vmul.f32 %v5645_v48, %v11417_v14  ;;  %v5138_v1 = vmul.f32 %v11448_v31, %v5074_v15  ;;  %v5368_v60 = vmul.f32 1.442695, %v5268_v28  ;;  %8007 = vrcp.f32 %v4504_v54 }
 0x9ee   : > { %v11618_v10 = vpop.eup %7997  ;;  %v5583_v58 = vmul.f32 %v5519_v6, %v11444_v4  ;;  %v5073_v25 = vadd.f32 0.2548296, %v5009_v12  ;;  %v4884_v57 = vmul.f32 %v11535_v29, %v4820_v41  ;;  %v11627_v26 = vand.u32 2147483647, %v11597_v16 }
 0x9ef   : > { %v8000_v36 = vpop.eup %7999  ;;  %v5456_v40 = vmul.f32 %v7994_v49, %v5136_v5  ;;  %vm4246_vm5 = vcmp.ge.f32.partialorder %v11478_v37, 0.0  ;;  %v4630_v14 = vmul.f32 1.0614054, %v11608_v8  ;;  %v11632_v56 = vmul.f32 0.70710677, %v11606_v0 }
 0x9f0   : > { %v5011_v31 = vmul.f32 %v11505_v39, %v4947_v44  ;;  %v5206_v28 = vsub.f32 0.0, %v11496_v59  ;;  %v4629_v4 = vmul.f32 1.0614054, %v11618_v10  ;;  %v4442_v30 = vmul.f32 0.3275911, %v11616_v62 }
 0x9f1   : > { %v5458_v48 = vmul.f32 %v8000_v36, %v5138_v1  ;;  %8009 = vpow2.f32 %v5368_v60  ;;  %v11639_v15 = vmul.f32 0.5, %v11459_v61  ;;  %v11642_v49 = vadd.f32 %v4053_v2, %v10418_v32 }
 0x9f2   : > { %v5647_v54 = vadd.f32 1.0, %v5583_v58  ;;  %v5137_v6 = vmul.f32 %v11469_v46, %v5073_v25  ;;  %v4948_v12 = vadd.f32 -0.28449672, %v4884_v57  ;;  %v4441_v41 = vmul.f32 0.3275911, %v11627_v26 }
 0x9f3   : > { %v5520_v5 = vsub.f32 1.0, %v5456_v40  ;;  %v11649_v44 = vsel %vm4246_vm5, 1.0, %v12854_v27  ;;  %v4694_v1 = vadd.f32 -1.4531521, %v4630_v14  ;;  %v11652_v60 = vand.u32 2147483647, %v11632_v56 }
 0x9f4   : > { %v8002_v61 = vpop.eup %8001  ;;  %v5075_v36 = vadd.f32 0.2548296, %v5011_v31  ;;  %v5270_v2 = vmul.f32 %v5206_v28, %v11496_v59  ;;  %v4693_v58 = vadd.f32 -1.4531521, %v4629_v4  ;;  %v4506_v9 = vadd.f32 1.0, %v4442_v30 }
 0x9f5   : > { %v5522_v46 = vsub.f32 1.0, %v5458_v48  ;;  %vm4245_vm6 = vcmp.ge.f32.partialorder %v11485_v63, 0.0  ;;  %v11657_v25 = vmul.f32 0.5, %v11510_v22  ;;  %v11660_v37 = vmul.f32 0.70710677, %v11642_v49 }
 0x9f6   : > { %v11662_v57 = vpop.eup %8003  ;;  %v11665_v40 = vmul.f32 %v5647_v54, %v11436_v53  ;;  %v5457_v14 = vmul.f32 %v8002_v61, %v5137_v6  ;;  %v5012_v31 = vmul.f32 %v11535_v29, %v4948_v12  ;;  %v4505_v59 = vadd.f32 1.0, %v4441_v41  ;;  %v3944_v12 = vpop.f32.mrf.mxu1 }
 0x9f7   : > { %v5584_v28 = vmul.f32 %v5520_v5, %v11475_v43  ;;  %v4758_v4 = vmul.f32 %v11608_v8, %v4694_v1  ;;  %v5205_v30 = vsub.f32 0.0, %v11503_v51  ;;  %v4444_v22 = vmul.f32 0.3275911, %v11652_v60 }
 0x9f8   : > { %12939 = vst [vmem:[#allocation97_spill] sm:$0xff] %v11665_v40  ;;  %v8006_v48 = vpop.eup %8005  ;;  %v5139_v47 = vmul.f32 %v11505_v39, %v5075_v36  ;;  %v5372_v35 = vmul.f32 1.442695, %v5270_v2  ;;  %v4757_v55 = vmul.f32 %v11618_v10, %v4693_v58  ;;  %8011 = vrcp.f32 %v4506_v9  ;;  %v4055_v58 = vpop.f32.mrf.mxu0 }
 0x9f9   : > { %v5586_v53 = vmul.f32 %v5522_v46, %v11500_v20  ;;  %v11678_v54 = vsel %vm4245_vm6, 1.0, %v12854_v27  ;;  %v4631_v43 = vmul.f32 1.0614054, %v11662_v57  ;;  %v11682_v6 = vand.u32 2147483647, %v11660_v37 }
 0x9fa   : > { %v11684_v41 = vpop.eup %8007  ;;  %v5521_v39 = vsub.f32 1.0, %v5457_v14  ;;  %v5076_v5 = vadd.f32 0.2548296, %v5012_v31  ;;  %v5207_v1 = vsub.f32 0.0, %v11547_v24  ;;  %8013 = vrcp.f32 %v4505_v59 }
 0x9fb   : > { %v5648_v9 = vadd.f32 1.0, %v5584_v28  ;;  %v4822_v20 = vadd.f32 1.4214138, %v4758_v4  ;;  %v5269_v61 = vmul.f32 %v5205_v30, %v11503_v51  ;;  %v4508_v63 = vadd.f32 1.0, %v4444_v22 }
 0x9fc   : > { %v5459_v36 = vmul.f32 %v8006_v48, %v5139_v47  ;;  %v4821_v2 = vadd.f32 1.4214138, %v4757_v55  ;;  %vm4247_vm7 = vcmp.ge.f32.partialorder %v11528_v34, 0.0  ;;  %v11690_v46 = vadd.f32 %v3944_v12, %v10408_v21 }
 0x9fd   : > { %8015 = vpow2.f32 %v5372_v35  ;;  %v4695_v40 = vadd.f32 -1.4531521, %v4631_v43  ;;  %v4632_v14 = vmul.f32 1.0614054, %v11684_v41  ;;  %v4443_v31 = vmul.f32 0.3275911, %v11682_v6 }
 0x9fe   : > { %v8010_v59 = vpop.eup %8009  ;;  %v5650_v28 = vadd.f32 1.0, %v5586_v53  ;;  %v5585_v4 = vmul.f32 %v5521_v39, %v11525_v50  ;;  %v5140_v51 = vmul.f32 %v11535_v29, %v5076_v5  ;;  %v5271_v47 = vmul.f32 %v5207_v1, %v11547_v24 }
 0x9ff   : > { %v4886_v55 = vmul.f32 %v11608_v8, %v4822_v20  ;;  %v5370_v30 = vmul.f32 1.442695, %v5269_v61  ;;  %8017 = vrcp.f32 %v4508_v63  ;;  %v11699_v22 = vadd.f32 %v4055_v58, %v10405_v18 }
 0xa00   : > { %v11702_v35 = vmul.f32 %v5648_v9, %v11462_v11  ;;  %v5523_v48 = vsub.f32 1.0, %v5459_v36  ;;  %v4885_v43 = vmul.f32 %v11618_v10, %v4821_v2  ;;  %v11706_v53 = vmul.f32 0.70710677, %v11690_v46  ;;  %v12942_v9 = vld [vmem:[#allocation88_spill] sm:$0xff] }
 0xa01   : > { %12940 = vst [vmem:[#allocation98_spill] sm:$0xff] %v11699_v22  ;;  %v11711_v50 = vsel %vm4247_vm7, 1.0, %v12854_v27  ;;  %v4759_v29 = vmul.f32 %v11662_v57, %v4695_v40  ;;  %v4696_v24 = vadd.f32 -1.4531521, %v4632_v14  ;;  %v4507_v12 = vadd.f32 1.0, %v4443_v31 }
 0xa02   : > { %12941 = vst [vmem:[#allocation99_spill] sm:$0xff] %v11702_v35  ;;  %v5649_v39 = vadd.f32 1.0, %v5585_v4  ;;  %v5460_v5 = vmul.f32 %v8010_v59, %v5140_v51  ;;  %v5374_v1 = vmul.f32 1.442695, %v5271_v47  ;;  %v5208_v11 = vsub.f32 0.0, %v11562_v7  ;;  %v12944_v59 = vld [vmem:[#allocation93_spill] sm:$0xff] }
 0xa03   : > { %v11716_v20 = vmul.f32 %v5650_v28, %v12942_v9  ;;  %v4950_v61 = vadd.f32 -0.28449672, %v4886_v55  ;;  %8019 = vpow2.f32 %v5370_v30  ;;  %v11719_v63 = vmul.f32 0.70710677, %v11699_v22  ;;  %v4057_v55 = vpop.f32.mrf.mxu0 }
 0xa04   : > { %v5587_v34 = vmul.f32 %v5523_v48, %v11572_v13  ;;  %v4949_v36 = vadd.f32 -0.28449672, %v4885_v43  ;;  %vm4248_vm8 = vcmp.ge.f32.partialorder %v11550_v23, 0.0  ;;  %v11724_v40 = vand.u32 2147483647, %v11706_v53 }
 0xa05   : > { %12943 = vst [vmem:[#allocation88_spill] sm:$0xff] %v11716_v20  ;;  %v11726_v2 = vpop.eup %8011  ;;  %v4823_v58 = vadd.f32 1.4214138, %v4759_v29  ;;  %v11729_v14 = vmul.f32 0.5, %v11531_v52  ;;  %v4760_v31 = vmul.f32 %v11684_v41, %v4696_v24  ;;  %8021 = vrcp.f32 %v4507_v12 }
 0xa06   : > { %v11733_v28 = vmul.f32 %v5649_v39, %v12944_v59  ;;  %v5524_v4 = vsub.f32 1.0, %v5460_v5  ;;  %8023 = vpow2.f32 %v5374_v1  ;;  %v5272_v13 = vmul.f32 %v5208_v11, %v11562_v7 }
 0xa07   : > { %v11736_v23 = vpop.eup %8013  ;;  %v5014_v51 = vmul.f32 %v11608_v8, %v4950_v61  ;;  %v11740_v47 = vsel %vm4248_vm8, 1.0, %v12854_v27  ;;  %vm4250_vm9 = vcmp.ge.f32.partialorder %v11593_v19, 0.0  ;;  %v11744_v52 = vand.u32 2147483647, %v11719_v63 }
 0xa08   : > { %12945 = vst [vmem:[#allocation93_spill] sm:$0xff] %v11733_v28  ;;  %v5651_v30 = vadd.f32 1.0, %v5587_v34  ;;  %v5013_v48 = vmul.f32 %v11618_v10, %v4949_v36  ;;  %v4634_v43 = vmul.f32 1.0614054, %v11726_v2  ;;  %v4445_v7 = vmul.f32 0.3275911, %v11724_v40  ;;  %v3948_v34 = vpop.f32.mrf.mxu1 }
 0xa09   : > { %v4887_v29 = vmul.f32 %v11662_v57, %v4823_v58  ;;  %v4824_v24 = vadd.f32 1.4214138, %v4760_v31  ;;  %v11751_v12 = vmul.f32 0.5, %v11577_v38  ;;  %v5210_v39 = vsub.f32 0.0, %v11616_v62 }
 0xa0a   : > { %v8016_v5 = vpop.eup %8015  ;;  %v5588_v1 = vmul.f32 %v5524_v4, %v11603_v33  ;;  %v5376_v11 = vmul.f32 1.442695, %v5272_v13  ;;  %v4633_v9 = vmul.f32 1.0614054, %v11736_v23  ;;  %v11757_v61 = vadd.f32 %v4057_v55, %v10418_v32  ;;  %v12949_v33 = vld [vmem:[#allocation94_spill] sm:$0xff] }
 0xa0b   : > { %12946 = vst [vmem:[#allocation100_spill] sm:$0xff] %v11751_v12  ;;  %v5078_v36 = vadd.f32 0.2548296, %v5014_v51  ;;  %v11762_v58 = vsel %vm4250_vm9, 1.0, %v12854_v27  ;;  %v11765_v38 = vmul.f32 0.5, %v11584_v3  ;;  %v11771_v4 = vmul.f32 %v5651_v30, %v12949_v33 }
 0xa0c   : > { %12947 = vst [vmem:[#allocation101_spill] sm:$0xff] %v11757_v61  ;;  %12948 = vst [vmem:[#allocation102_spill] sm:$0xff] %v11762_v58  ;;  %v4446_v31 = vmul.f32 0.3275911, %v11744_v52  ;;  %v11768_v59 = vpop.eup %8017  ;;  %v5077_v13 = vadd.f32 0.2548296, %v5013_v48  ;;  %v4888_v51 = vmul.f32 %v11684_v41, %v4824_v24  ;;  %v5274_v19 = vmul.f32 %v5210_v39, %v11616_v62 }
 0xa0d   : > { %12950 = vst [vmem:[#allocation94_spill] sm:$0xff] %v11771_v4  ;;  %v4698_v55 = vadd.f32 -1.4531521, %v4634_v43  ;;  %v4509_v12 = vadd.f32 1.0, %v4445_v7  ;;  %v4951_v20 = vadd.f32 -0.28449672, %v4887_v29  ;;  %v11776_v22 = vadd.f32 %v3948_v34, %v10401_v42 }
 0xa0e   : > { %v5652_v3 = vadd.f32 1.0, %v5588_v1  ;;  %8025 = vpow2.f32 %v5376_v11  ;;  %v4697_v58 = vadd.f32 -1.4531521, %v4633_v9  ;;  %v11779_v28 = vmul.f32 0.70710677, %v11757_v61 }
 0xa0f   : > { %v5142_v30 = vmul.f32 %v11608_v8, %v5078_v36  ;;  %vm4249_vm10 = vcmp.ge.f32.partialorder %v11597_v16, 0.0  ;;  %v4636_v48 = vmul.f32 1.0614054, %v11768_v59  ;;  %v4510_v43 = vadd.f32 1.0, %v4446_v31  ;;  %v12951_v16 = vld [vmem:[#allocation95_spill] sm:$0xff] }
 0xa10   : > { %v8020_v7 = vpop.eup %8019  ;;  %v5141_v29 = vmul.f32 %v11618_v10, %v5077_v13  ;;  %v4762_v62 = vmul.f32 %v11726_v2, %v4698_v55  ;;  %v5209_v24 = vsub.f32 0.0, %v11627_v26  ;;  %8027 = vrcp.f32 %v4509_v12 }
 0xa11   : > { %v5015_v39 = vmul.f32 %v11662_v57, %v4951_v20  ;;  %v4952_v1 = vadd.f32 -0.28449672, %v4888_v51  ;;  %v5380_v11 = vmul.f32 1.442695, %v5274_v19  ;;  %v11789_v9 = vmul.f32 0.70710677, %v11776_v22 }
 0xa12   : > { %v11791_v8 = vpop.eup %8021  ;;  %v11794_v34 = vmul.f32 %v5652_v3, %v12951_v16  ;;  %v11797_v36 = vsel %vm4249_vm10, 1.0, %v12854_v27  ;;  %v4761_v10 = vmul.f32 %v11736_v23, %v4697_v58  ;;  %v11801_v31 = vand.u32 2147483647, %v11779_v28 }
 0xa13   : > { %v8024_v12 = vpop.eup %8023  ;;  %v5462_v20 = vmul.f32 %v8016_v5, %v5142_v30  ;;  %v5211_v33 = vsub.f32 0.0, %v11682_v6  ;;  %v4700_v13 = vadd.f32 -1.4531521, %v4636_v48  ;;  %8029 = vrcp.f32 %v4510_v43 }
 0xa14   : > { %v5461_v55 = vmul.f32 %v8020_v7, %v5141_v29  ;;  %v4826_v51 = vadd.f32 1.4214138, %v4762_v62  ;;  %v5273_v19 = vmul.f32 %v5209_v24, %v11627_v26  ;;  %v11806_v3 = vmul.f32 0.5, %v11642_v49 }
 0xa15   : > { %v5079_v16 = vadd.f32 0.2548296, %v5015_v39  ;;  %v5016_v61 = vmul.f32 %v11684_v41, %v4952_v1  ;;  %v4635_v58 = vmul.f32 1.0614054, %v11791_v8  ;;  %v11811_v4 = vand.u32 2147483647, %v11789_v9  ;;  %v3950_v39 = vpop.f32.mrf.mxu1 }
 0xa16   : > { %12952 = vst [vmem:[#allocation95_spill] sm:$0xff] %v11806_v3  ;;  %8031 = vpow2.f32 %v5380_v11  ;;  %v4825_v30 = vadd.f32 1.4214138, %v4761_v10  ;;  %v4447_v48 = vmul.f32 0.3275911, %v11801_v31  ;;  %v5526_v43 = vsub.f32 1.0, %v5462_v20 }
 0xa17   : > { %vm4251_vm11 = vcmp.ge.f32.partialorder %v11660_v37, 0.0  ;;  %v5275_v26 = vmul.f32 %v5211_v33, %v11682_v6  ;;  %v4764_v49 = vmul.f32 %v11768_v59, %v4700_v13  ;;  %v5525_v7 = vsub.f32 1.0, %v5461_v55 }
 0xa18   : > { %v4890_v29 = vmul.f32 %v11726_v2, %v4826_v51  ;;  %v5378_v62 = vmul.f32 1.442695, %v5273_v19  ;;  %v5212_v24 = vsub.f32 0.0, %v11652_v60  ;;  %v5143_v1 = vmul.f32 %v11662_v57, %v5079_v16 }
 0xa19   : > { %v5080_v11 = vadd.f32 0.2548296, %v5016_v61  ;;  %v4699_v10 = vadd.f32 -1.4531521, %v4635_v58  ;;  %v4448_v5 = vmul.f32 0.3275911, %v11811_v4  ;;  %v4889_v20 = vmul.f32 %v11736_v23, %v4825_v30  ;;  %v4061_v58 = vpop.f32.mrf.mxu0 }
 0xa1a   : > { %v11825_v37 = vsel %vm4251_vm11, 1.0, %v12854_v27  ;;  %vm4252_vm12 = vcmp.ge.f32.partialorder %v11632_v56, 0.0  ;;  %v4511_v6 = vadd.f32 1.0, %v4447_v48  ;;  %v5590_v13 = vmul.f32 %v5526_v43, %v11649_v44 }
 0xa1b   : > { %v8026_v33 = vpop.eup %8025  ;;  %v5382_v55 = vmul.f32 1.442695, %v5275_v26  ;;  %v4828_v51 = vadd.f32 1.4214138, %v4764_v49  ;;  %v11830_v19 = vadd.f32 %v3950_v39, %v10408_v21  ;;  %v5589_v57 = vmul.f32 %v5525_v7, %v11678_v54 }
 0xa1c   : > { %v4954_v61 = vadd.f32 -0.28449672, %v4890_v29  ;;  %8033 = vpow2.f32 %v5378_v62  ;;  %v5276_v16 = vmul.f32 %v5212_v24, %v11652_v60  ;;  %v5463_v3 = vmul.f32 %v8024_v12, %v5143_v1  ;;  %v4063_v62 = vpop.f32.mrf.mxu0  ;;  %v3952_v1 = vpop.f32.mrf.mxu1 }
 0xa1d   : > { %v11834_v30 = vpop.eup %8027  ;;  %v5144_v48 = vmul.f32 %v11684_v41, %v5080_v11  ;;  %v4763_v35 = vmul.f32 %v11791_v8, %v4699_v10  ;;  %v4512_v44 = vadd.f32 1.0, %v4448_v5  ;;  %v4953_v43 = vadd.f32 -0.28449672, %v4889_v20 }
 0xa1e   : > { %v11839_v26 = vmul.f32 0.5, %v11606_v0  ;;  %v11844_v54 = vsel %vm4252_vm12, 1.0, %v12854_v27  ;;  %8035 = vrcp.f32 %v4511_v6  ;;  %v5654_v60 = vadd.f32 1.0, %v5590_v13 }
 0xa1f   : > { %8037 = vpow2.f32 %v5382_v55  ;;  %v4892_v49 = vmul.f32 %v11768_v59, %v4828_v51  ;;  %v11848_v12 = vmul.f32 0.70710677, %v11830_v19  ;;  %v5653_v5 = vadd.f32 1.0, %v5589_v57 }
 0xa20   : > { %v11850_v41 = vpop.eup %8029  ;;  %v5018_v7 = vmul.f32 %v11726_v2, %v4954_v61  ;;  %v5384_v0 = vmul.f32 1.442695, %v5276_v16  ;;  %v4637_v29 = vmul.f32 1.0614054, %v11834_v30  ;;  %v5527_v56 = vsub.f32 1.0, %v5463_v3 }
 0xa21   : > { %v5464_v24 = vmul.f32 %v8026_v33, %v5144_v48  ;;  %v4827_v39 = vadd.f32 1.4214138, %v4763_v35  ;;  %8039 = vrcp.f32 %v4512_v44  ;;  %v5017_v11 = vmul.f32 %v11736_v23, %v4953_v43  ;;  %v3954_v44 = vpop.f32.mrf.mxu1 }
 0xa22   : > { %vm4254_vm13 = vcmp.ge.f32.partialorder %v11719_v63, 0.0  ;;  %v5214_v10 = vsub.f32 0.0, %v11744_v52  ;;  %v11858_v20 = vadd.f32 %v4061_v58, %v10405_v18  ;;  %v4956_v13 = vadd.f32 -0.28449672, %v4892_v49 }
 0xa23   : > { %v8032_v6 = vpop.eup %8031  ;;  %v4638_v55 = vmul.f32 1.0614054, %v11850_v41  ;;  %v11862_v51 = vand.u32 2147483647, %v11848_v12  ;;  %v11865_v35 = vadd.f32 %v4063_v62, %v10418_v32  ;;  %v11868_v3 = vmul.f32 %v5654_v60, %v11613_v45 }
 0xa24   : > { %12953 = vst [vmem:[#allocation103_spill] sm:$0xff] %v11858_v20  ;;  %v5082_v33 = vadd.f32 0.2548296, %v5018_v7  ;;  %8041 = vpow2.f32 %v5384_v0  ;;  %v4701_v57 = vadd.f32 -1.4531521, %v4637_v29  ;;  %v11871_v61 = vmul.f32 %v5653_v5, %v11639_v15 }
 0xa25   : > { %12954 = vst [vmem:[#allocation104_spill] sm:$0xff] %v11865_v35  ;;  %12955 = vst [vmem:[#allocation105_spill] sm:$0xff] %v11868_v3  ;;  %v5591_v16 = vmul.f32 %v5527_v56, %v11711_v50  ;;  %v5528_v58 = vsub.f32 1.0, %v5464_v24  ;;  %v4891_v48 = vmul.f32 %v11791_v8, %v4827_v39  ;;  %v5081_v43 = vadd.f32 0.2548296, %v5017_v11 }
 0xa26   : > { %v11878_v49 = vsel %vm4254_vm13, 1.0, %v12854_v27  ;;  %v5278_v45 = vmul.f32 %v5214_v10, %v11744_v52  ;;  %v11882_v60 = vmul.f32 0.70710677, %v11858_v20  ;;  %v5020_v15 = vmul.f32 %v11768_v59, %v4956_v13 }
 0xa27   : > { %12956 = vst [vmem:[#allocation106_spill] sm:$0xff] %v11878_v49  ;;  %v4702_v5 = vadd.f32 -1.4531521, %v4638_v55  ;;  %v4449_v50 = vmul.f32 0.3275911, %v11862_v51  ;;  %v5146_v0 = vmul.f32 %v11726_v2, %v5082_v33  ;;  %v11891_v29 = vmul.f32 0.5, %v11690_v46 }
 0xa28   : > { %12957 = vst [vmem:[#allocation107_spill] sm:$0xff] %v11882_v60  ;;  %v11887_v7 = vmul.f32 0.70710677, %v11865_v35  ;;  %v4765_v63 = vmul.f32 %v11834_v30, %v4701_v57  ;;  %v11895_v52 = vadd.f32 %v3954_v44, %v10408_v21  ;;  %v5655_v56 = vadd.f32 1.0, %v5591_v16 }
 0xa29   : > { %v8034_v62 = vpop.eup %8033  ;;  %v5592_v24 = vmul.f32 %v5528_v58, %v11740_v47  ;;  %v4955_v39 = vadd.f32 -0.28449672, %v4891_v48  ;;  %v5213_v11 = vsub.f32 0.0, %v11724_v40  ;;  %v5145_v10 = vmul.f32 %v11736_v23, %v5081_v43 }
 0xa2a   : > { %12958 = vst [vmem:[#allocation108_spill] sm:$0xff] %v11887_v7  ;;  %v5388_v13 = vmul.f32 1.442695, %v5278_v45  ;;  %vm4253_vm14 = vcmp.ge.f32.partialorder %v11706_v53, 0.0  ;;  %v11902_v46 = vand.u32 2147483647, %v11882_v60  ;;  %v4766_v33 = vmul.f32 %v11850_v41, %v4702_v5 }
 0xa2b   : > { %v11904_v2 = vpop.eup %8035  ;;  %v5084_v55 = vadd.f32 0.2548296, %v5020_v15  ;;  %v4513_v57 = vadd.f32 1.0, %v4449_v50  ;;  %v11908_v16 = vand.u32 2147483647, %v11887_v7  ;;  %v11910_v58 = vmul.f32 %v8032_v6, %v5146_v0 }
 0xa2c   : > { %v8038_v47 = vpop.eup %8037  ;;  %v4829_v48 = vadd.f32 1.4214138, %v4765_v63  ;;  %v11913_v23 = vadd.f32 %v3952_v1, %v10401_v42  ;;  %v11916_v53 = vmul.f32 0.70710677, %v11895_v52  ;;  %v5656_v44 = vadd.f32 1.0, %v5592_v24 }
 0xa2d   : > { %12959 = vst [vmem:[#allocation109_spill] sm:$0xff] %v11910_v58  ;;  %v5019_v43 = vmul.f32 %v11791_v8, %v4955_v39  ;;  %v11920_v45 = vsel %vm4253_vm14, 1.0, %v12854_v27  ;;  %v5277_v15 = vmul.f32 %v5213_v11, %v11724_v40  ;;  %v5465_v50 = vmul.f32 %v8034_v62, %v5145_v10 }
 0xa2e   : > { %v11923_v5 = vpop.eup %8039  ;;  %v4639_v6 = vmul.f32 1.0614054, %v11904_v2  ;;  %v5215_v0 = vsub.f32 0.0, %v11801_v31  ;;  %v4450_v1 = vmul.f32 0.3275911, %v11902_v46  ;;  %v5148_v63 = vmul.f32 %v11768_v59, %v5084_v55 }
 0xa2f   : > { %v4830_v20 = vadd.f32 1.4214138, %v4766_v33  ;;  %8043 = vrcp.f32 %v4513_v57  ;;  %v4451_v24 = vmul.f32 0.3275911, %v11908_v16  ;;  %v4893_v35 = vmul.f32 %v11834_v30, %v4829_v48 }
 0xa30   : > { %v11933_v40 = vmul.f32 0.70710677, %v11913_v23  ;;  %v11936_v62 = vand.u32 2147483647, %v11916_v53  ;;  %v11939_v10 = vmul.f32 %v5655_v56, %v11657_v25  ;;  %v5083_v60 = vadd.f32 0.2548296, %v5019_v43 }
 0xa31   : > { %v8042_v11 = vpop.eup %8041  ;;  %v5386_v59 = vmul.f32 1.442695, %v5277_v15  ;;  %v4640_v55 = vmul.f32 1.0614054, %v11923_v5  ;;  %v5529_v33 = vsub.f32 1.0, %v5465_v50  ;;  %vm4255_vm15 = vcmp.ge.f32.partialorder %v11779_v28, 0.0 }
 0xa32   : > { %12960 = vst [vmem:[#allocation110_spill] sm:$0xff] %v11939_v10  ;;  %v4703_v57 = vadd.f32 -1.4531521, %v4639_v6  ;;  %v4514_v39 = vadd.f32 1.0, %v4450_v1  ;;  %v5468_v48 = vmul.f32 %v8042_v11, %v5148_v63  ;;  %v4894_v3 = vmul.f32 %v11850_v41, %v4830_v20 }
 0xa33   : > { %v5279_v49 = vmul.f32 %v5215_v0, %v11801_v31  ;;  %v4515_v7 = vadd.f32 1.0, %v4451_v24  ;;  %8045 = vpow2.f32 %v5388_v13  ;;  %v4957_v58 = vadd.f32 -0.28449672, %v4893_v35  ;;  %v3958_v35 = vpop.f32.mrf.mxu1 }
 0xa34   : > { %v11946_v25 = vand.u32 2147483647, %v11933_v40  ;;  %v4453_v56 = vmul.f32 0.3275911, %v11936_v62  ;;  %v11950_v43 = vmul.f32 %v5656_v44, %v11729_v14  ;;  %v5147_v15 = vmul.f32 %v11791_v8, %v5083_v60 }
 0xa35   : > { %8047 = vpow2.f32 %v5386_v59  ;;  %v4704_v50 = vadd.f32 -1.4531521, %v4640_v55  ;;  %v5593_v6 = vmul.f32 %v5529_v33, %v11797_v36  ;;  %v4767_v20 = vmul.f32 %v11904_v2, %v4703_v57 }
 0xa36   : > { %v5216_v31 = vsub.f32 0.0, %v11811_v4  ;;  %8049 = vrcp.f32 %v4514_v39  ;;  %v5532_v13 = vsub.f32 1.0, %v5468_v48  ;;  %v4958_v0 = vadd.f32 -0.28449672, %v4894_v3 }
 0xa37   : > { %v5390_v1 = vmul.f32 1.442695, %v5279_v49  ;;  %8051 = vrcp.f32 %v4515_v7  ;;  %v5021_v63 = vmul.f32 %v11834_v30, %v4957_v58  ;;  %v11960_v14 = vsel %vm4255_vm15, 1.0, %v12854_v27  ;;  %v4065_v58 = vpop.f32.mrf.mxu0 }
 0xa38   : > { %v4452_v8 = vmul.f32 0.3275911, %v11946_v25  ;;  %v4517_v36 = vadd.f32 1.0, %v4453_v56  ;;  %v5467_v60 = vmul.f32 %v8038_v47, %v5147_v15  ;;  %vm4256_vm0 = vcmp.ge.f32.partialorder %v11789_v9, 0.0  ;;  %v3960_v9 = vpop.f32.mrf.mxu1 }
 0xa39   : > { %v4768_v44 = vmul.f32 %v11923_v5, %v4704_v50  ;;  %v11966_v24 = vadd.f32 %v3958_v35, %v10401_v42  ;;  %v4831_v3 = vadd.f32 1.4214138, %v4767_v20  ;;  %v11969_v49 = vmul.f32 0.5, %v11776_v22 }
 0xa3a   : > { %v5280_v7 = vmul.f32 %v5216_v31, %v11811_v4  ;;  %v5218_v28 = vsub.f32 0.0, %v11902_v46  ;;  %v5657_v39 = vadd.f32 1.0, %v5593_v6  ;;  %v5596_v11 = vmul.f32 %v5532_v13, %v11844_v54 }
 0xa3b   : > { %v5022_v47 = vmul.f32 %v11850_v41, %v4958_v0  ;;  %8053 = vpow2.f32 %v5390_v1  ;;  %v5085_v55 = vadd.f32 0.2548296, %v5021_v63  ;;  %v11978_v33 = vsel %vm4256_vm0, 1.0, %v12854_v27 }
 0xa3c   : > { %v11975_v59 = vpop.eup %8043  ;;  %v4516_v22 = vadd.f32 1.0, %v4452_v8  ;;  %8055 = vrcp.f32 %v4517_v36  ;;  %v5531_v57 = vsub.f32 1.0, %v5467_v60  ;;  %v4832_v4 = vadd.f32 1.4214138, %v4768_v44 }
 0xa3d   : > { %v11981_v48 = vadd.f32 %v4065_v58, %v10405_v18  ;;  %v11984_v56 = vmul.f32 0.70710677, %v11966_v24  ;;  %v4895_v54 = vmul.f32 %v11904_v2, %v4831_v3  ;;  %v5392_v15 = vmul.f32 1.442695, %v5280_v7 }
 0xa3e   : > { %v5282_v50 = vmul.f32 %v5218_v28, %v11902_v46  ;;  %v11989_v6 = vadd.f32 %v3960_v9, %v10408_v21  ;;  %v11992_v20 = vmul.f32 %v5657_v39, %v11765_v38  ;;  %v5660_v31 = vadd.f32 1.0, %v5596_v11 }
 0xa3f   : > { %12961 = vst [vmem:[#allocation111_spill] sm:$0xff] %v11981_v48  ;;  %v5086_v35 = vadd.f32 0.2548296, %v5022_v47  ;;  %v4641_v13 = vmul.f32 1.0614054, %v11975_v59  ;;  %v5149_v0 = vmul.f32 %v11834_v30, %v5085_v55  ;;  %vm4257_vm1 = vcmp.ge.f32.partialorder %v11848_v12, 0.0 }
 0xa40   : > { %12962 = vst [vmem:[#allocation112_spill] sm:$0xff] %v11989_v6  ;;  %v5217_v1 = vsub.f32 0.0, %v11862_v51  ;;  %8057 = vrcp.f32 %v4516_v22  ;;  %v8046_v63 = vpop.eup %8045  ;;  %v4896_v46 = vmul.f32 %v11923_v5, %v4832_v4  ;;  %v12000_v8 = vmul.f32 0.5, %v11830_v19 }
 0xa41   : > { %v12003_v38 = vmul.f32 0.70710677, %v11981_v48  ;;  %v12006_v36 = vand.u32 2147483647, %v11984_v56  ;;  %v12009_v30 = vmul.f32 %v5531_v57, %v11825_v37  ;;  %v4959_v44 = vadd.f32 -0.28449672, %v4895_v54  ;;  %v4067_v57 = vpop.f32.mrf.mxu0 }
 0xa42   : > { %v8048_v60 = vpop.eup %8047  ;;  %v5396_v3 = vmul.f32 1.442695, %v5282_v50  ;;  %v12012_v7 = vmul.f32 0.70710677, %v11989_v6  ;;  %v12017_v19 = vmul.f32 %v5660_v31, %v11839_v26  ;;  %v5150_v58 = vmul.f32 %v11850_v41, %v5086_v35  ;;  %v13004_v6 = vld [vmem:[#allocation87_spill] sm:$0xff] }
 0xa43   : > { %12963 = vst [vmem:[#allocation113_spill] sm:$0xff] %v12003_v38  ;;  %12964 = vst [vmem:[#allocation114_spill] sm:$0xff] %v12009_v30  ;;  %v12014_v28 = vpop.eup %8049  ;;  %v12023_v39 = vsel %vm4257_vm1, 1.0, %v12854_v27  ;;  %v4705_v11 = vadd.f32 -1.4531521, %v4641_v13  ;;  %v5469_v47 = vmul.f32 %v8048_v60, %v5149_v0  ;;  %v5281_v9 = vmul.f32 %v5217_v1, %v11862_v51 }
 0xa44   : > { %12965 = vst [vmem:[#allocation115_spill] sm:$0xff] %v12014_v28  ;;  %v12025_v37 = vpop.eup %8051  ;;  %v5219_v55 = vsub.f32 0.0, %v11908_v16  ;;  %v12030_v22 = vand.u32 2147483647, %v12012_v7  ;;  %v4960_v26 = vadd.f32 -0.28449672, %v4896_v46  ;;  %8059 = vpow2.f32 %v5392_v15 }
 0xa45   : > { %v12033_v41 = vand.u32 2147483647, %v12003_v38  ;;  %v4456_v12 = vmul.f32 0.3275911, %v12006_v36  ;;  %v5023_v4 = vmul.f32 %v11904_v2, %v4959_v44  ;;  %v4642_v54 = vmul.f32 1.0614054, %v12014_v28 }
 0xa46   : > { %8061 = vpow2.f32 %v5396_v3  ;;  %v4457_v51 = vmul.f32 0.3275911, %v12030_v22  ;;  %v12041_v31 = vmul.f32 %v8046_v63, %v5150_v58  ;;  %v4769_v15 = vmul.f32 %v11975_v59, %v4705_v11 }
 0xa47   : > { %v4643_v35 = vmul.f32 1.0614054, %v12025_v37  ;;  %v5533_v0 = vsub.f32 1.0, %v5469_v47  ;;  %v5394_v1 = vmul.f32 1.442695, %v5281_v9  ;;  %v5283_v46 = vmul.f32 %v5219_v55, %v11908_v16 }
 0xa48   : > { %12966 = vst [vmem:[#allocation116_spill] sm:$0xff] %v12041_v31  ;;  %v8054_v13 = vpop.eup %8053  ;;  %v12047_v60 = vadd.f32 %v4067_v57, %v10418_v32  ;;  %v5024_v3 = vmul.f32 %v11923_v5, %v4960_v26  ;;  %v5220_v50 = vsub.f32 0.0, %v11946_v25  ;;  %v4454_v63 = vmul.f32 0.3275911, %v12033_v41  ;;  %v3962_v57 = vpop.f32.mrf.mxu1 }
 0xa49   : > { %v12049_v44 = vpop.eup %8055  ;;  %v4520_v58 = vadd.f32 1.0, %v4456_v12  ;;  %v5087_v11 = vadd.f32 0.2548296, %v5023_v4  ;;  %v4706_v48 = vadd.f32 -1.4531521, %v4642_v54  ;;  %v12055_v38 = vmul.f32 0.5, %v11913_v23  ;;  %v12064_v4 = vpop.f32.mrf.mxu0 }
 0xa4a   : > { %12967 = vst [vmem:[#allocation117_spill] sm:$0xff] %v12047_v60  ;;  %v4521_v47 = vadd.f32 1.0, %v4457_v51  ;;  %v4833_v9 = vadd.f32 1.4214138, %v4769_v15  ;;  %v4707_v55 = vadd.f32 -1.4531521, %v4643_v35  ;;  %v5597_v26 = vmul.f32 %v5533_v0, %v11920_v45 }
 0xa4b   : > { %vm4260_vm2 = vcmp.ge.f32.partialorder %v11933_v40, 0.0  ;;  %v5398_v30 = vmul.f32 1.442695, %v5283_v46  ;;  %v4645_v10 = vmul.f32 1.0614054, %v12049_v44  ;;  %v5284_v51 = vmul.f32 %v5220_v50, %v11946_v25  ;;  %v4073_v50 = vpop.f32.mrf.mxu0 }
 0xa4c   : > { %v12062_v12 = vmul.f32 0.70710677, %v12047_v60  ;;  %v5088_v54 = vadd.f32 0.2548296, %v5024_v3  ;;  %v4518_v15 = vadd.f32 1.0, %v4454_v63  ;;  %8063 = vrcp.f32 %v4520_v58 }
 0xa4d   : > { %v12066_v23 = vpop.eup %8057  ;;  %v5151_v35 = vmul.f32 %v11904_v2, %v5087_v11  ;;  %v4770_v16 = vmul.f32 %v12014_v28, %v4706_v48  ;;  %8065 = vrcp.f32 %v4521_v47  ;;  %v12072_v45 = vadd.f32 %v3962_v57, %v10401_v42 }
 0xa4e   : > { %12968 = vst [vmem:[#allocation118_spill] sm:$0xff] %v12062_v12  ;;  %v4897_v0 = vmul.f32 %v11975_v59, %v4833_v9  ;;  %8067 = vpow2.f32 %v5394_v1  ;;  %v4771_v46 = vmul.f32 %v12025_v37, %v4707_v55  ;;  %v12079_v3 = vsel %vm4260_vm2, 1.0, %v12854_v27 }
 0xa4f   : > { %12969 = vst [vmem:[#allocation119_spill] sm:$0xff] %v12072_v45  ;;  %8069 = vpow2.f32 %v5398_v30  ;;  %v4644_v25 = vmul.f32 1.0614054, %v12066_v23  ;;  %v4709_v2 = vadd.f32 -1.4531521, %v4645_v10  ;;  %v5661_v42 = vadd.f32 1.0, %v5597_v26 }
 0xa50   : > { %v12083_v48 = vand.u32 2147483647, %v12062_v12  ;;  %v5152_v63 = vmul.f32 %v11923_v5, %v5088_v54  ;;  %v5400_v58 = vmul.f32 1.442695, %v5284_v51  ;;  %8071 = vrcp.f32 %v4518_v15  ;;  %v12972_v54 = vld [vmem:[#allocation75_spill] sm:$0xff]  ;;  %v12973_v51 = vld [vmem:[#allocation29_spill] sm:$0xff] }
 0xa51   : > { %v8060_v1 = vpop.eup %8059  ;;  %v12086_v11 = vmul.f32 %v8054_v13, %v5151_v35  ;;  %v4834_v47 = vadd.f32 1.4214138, %v4770_v16  ;;  %v5222_v40 = vsub.f32 0.0, %v12033_v41  ;;  %v12090_v30 = vmul.f32 0.70710677, %v12072_v45 }
 0xa52   : > { %v4961_v10 = vadd.f32 -0.28449672, %v4897_v0  ;;  %v4835_v55 = vadd.f32 1.4214138, %v4771_v46  ;;  %v12095_v57 = vmul.f32 0.5, %v11895_v52  ;;  %v12098_v5 = vadd.f32 %v4073_v50, %v10418_v32  ;;  %v4075_v50 = vpop.f32.mrf.mxu0 }
 0xa53   : > { %v12092_v9 = vpop.eup %8061  ;;  %v4708_v26 = vadd.f32 -1.4531521, %v4644_v25  ;;  %v4773_v13 = vmul.f32 %v12049_v44, %v4709_v2  ;;  %v4455_v16 = vmul.f32 0.3275911, %v12083_v48  ;;  %v5745_v15 = vpack.c.bf16 %v12973_v51, %v12972_v54 }
 0xa54   : > { %12970 = vst [vmem:[#allocation120_spill] sm:$0xff] %v12092_v9  ;;  %12971 = vst [vmem:[#allocation121_spill] sm:$0xff] %v12098_v5  ;;  %v12105_v35 = vmul.f32 %v5661_v42, %v11891_v29  ;;  %v5472_v60 = vmul.f32 %v8060_v1, %v5152_v63  ;;  %8073 = vpow2.f32 %v5400_v58  ;;  %v5221_v0 = vsub.f32 0.0, %v11936_v62  ;;  %v12975_v42 = vld [vmem:[#allocation70_spill] sm:$0xff]  ;;  %v12977_v1 = vld [vmem:[#allocation76_spill] sm:$0xff]  ;;  %v3964_v9 = vpop.f32.mrf.mxu1 }
 0xa55   : > { %v5535_v52 = vsub.f32 1.0, %v12086_v11  ;;  %v4898_v46 = vmul.f32 %v12014_v28, %v4834_v47  ;;  %v5286_v25 = vmul.f32 %v5222_v40, %v12033_v41  ;;  %v12112_v2 = vand.u32 2147483647, %v12090_v30  ;;  %6204 = vmatprep.mubr.bf16.mxu1 %v5745_v15  ;;  %v12976_v63 = vld [vmem:[#allocation66_spill] sm:$0xff]  ;;  %v12978_v11 = vld [vmem:[#allocation73_spill] sm:$0xff] }
 0xa56   : > { %v5025_v54 = vmul.f32 %v11975_v59, %v4961_v10  ;;  %vm4261_vm3 = vcmp.ge.f32.partialorder %v11916_v53, 0.0  ;;  %v12117_v29 = vmul.f32 0.70710677, %v12098_v5  ;;  %v5747_v58 = vpack.c.bf16 %v12976_v63, %v12975_v42  ;;  %v8144_v10 = vld [vmem:[#allocation14 + $0x170] ss:$8 sps:$4 sm:$0xff]  }
 0xa57   : > { %v12979_v47 = vpack.c.bf16 %v12977_v1, %v12978_v11  ;;  %v4899_v41 = vmul.f32 %v12025_v37, %v4835_v55  ;;  %v4772_v40 = vmul.f32 %v12066_v23, %v4708_v26  ;;  %v4837_v51 = vadd.f32 1.4214138, %v4773_v13  ;;  %v8145_v63 = vld [vmem:[#allocation14 + $0x164] ss:$8 sps:$4 sm:$0xff]  }
 0xa58   : > { %12974 = vst [vmem:[#allocation75_spill] sm:$0xff] %v12117_v29  ;;  %v4519_v15 = vadd.f32 1.0, %v4455_v16  ;;  %v5536_v31 = vsub.f32 1.0, %v5472_v60  ;;  %v5285_v5 = vmul.f32 %v5221_v0, %v11936_v62  ;;  %v4460_v12 = vmul.f32 0.3275911, %v12112_v2  ;;  %6317 = vmatprep.mubr.bf16.mxu0 %v5747_v58  ;;  %v12982_v60 = vld [vmem:[#allocation77_spill] sm:$0xff] }
 0xa59   : > { %6205 = vmatmul.mubr.bf16.vlgmr.msra.gmra.mxu1 %v12979_v47  ;;  %v12129_v42 = vadd.f32 %v4075_v50, %v10405_v18  ;;  %v12131_v1 = vpop.eup %8063  ;;  %v4962_v55 = vadd.f32 -0.28449672, %v4898_v46  ;;  %v5404_v26 = vmul.f32 1.442695, %v5286_v25  ;;  %v12136_v13 = vsel %vm4261_vm3, 1.0, %v12854_v27  ;;  %v12983_v16 = vld [vmem:[#allocation74_spill] sm:$0xff] }
 0xa5a   : > { %7142 = vmatpush1.bf16.msra.mxu1 %v8144_v10  ;;  %v12140_v62 = vadd.f32 %v12064_v4, %v10405_v18  ;;  %v12984_v0 = vpack.c.bf16 %v12982_v60, %v12983_v16  ;;  %v12145_v50 = vpop.eup %8065  ;;  %v5089_v58 = vadd.f32 0.2548296, %v5025_v54  ;;  %v12148_v11 = vand.u32 2147483647, %v12117_v29  ;;  %v8146_v4 = vld [vmem:[#allocation14 + $0x160] ss:$8 sps:$4 sm:$0xff]  }
 0xa5b   : > { %12980 = vst [vmem:[#allocation29_spill] sm:$0xff] %v12129_v42  ;;  %7127 = vmatprep.subr.bf16.mxu1 %v8145_v63  ;;  %v4524_v46 = vadd.f32 1.0, %v4460_v12  ;;  %v12151_v25 = vadd.f32 %v3964_v9, %v10408_v21  ;;  %v8068_v53 = vpop.eup %8067  ;;  %v4963_v47 = vadd.f32 -0.28449672, %v4899_v41  ;;  %v4836_v10 = vadd.f32 1.4214138, %v4772_v40 }
 0xa5c   : > { %12981 = vst [vmem:[#allocation70_spill] sm:$0xff] %v12140_v62  ;;  %6318 = vmatmul.mubr.bf16.vlgmr.msra.gmra.mxu0 %v12984_v0  ;;  %v4901_v18 = vmul.f32 %v12049_v44, %v4837_v51  ;;  %8075 = vrcp.f32 %v4519_v15  ;;  %v12154_v63 = vpop.eup %8069  ;;  %v5600_v60 = vmul.f32 %v5536_v31, %v11978_v33  ;;  %v5402_v54 = vmul.f32 1.442695, %v5285_v5  ;;  %v8147_v12 = vld [vmem:[#allocation14 + $0x154] ss:$8 sps:$4 sm:$0xff]  }
 0xa5d   : > { %12985 = vst [vmem:[#allocation66_spill] sm:$0xff] %v12151_v25  ;;  %12986 = vst [vmem:[#allocation76_spill] sm:$0xff] %v12154_v63  ;;  %8077 = vrcp.f32 %v4524_v46  ;;  %v12158_v16 = vmul.f32 0.70710677, %v12129_v42  ;;  %v12160_v21 = vpop.eup %8071  ;;  %v12163_v9 = vmul.f32 %v5535_v52, %v11960_v14  ;;  %v4648_v41 = vmul.f32 1.0614054, %v12131_v1  ;;  %v4077_v46 = vpop.f32.mrf.mxu0 }
 0xa5e   : > { %7143 = vmatpush1.bf16.msra.mxu1 %v8146_v4  ;;  %v12167_v40 = vmul.f32 0.70710677, %v12140_v62  ;;  %v4649_v51 = vmul.f32 1.0614054, %v12145_v50  ;;  %v12171_v33 = vmul.f32 %v12014_v28, %v4962_v55  ;;  %v5153_v31 = vmul.f32 %v11975_v59, %v5089_v58  ;;  %v8148_v4 = vld [vmem:[#allocation14 + $0x150] ss:$8 sps:$4 sm:$0xff]  }
 0xa5f   : > { %12987 = vst [vmem:[#allocation73_spill] sm:$0xff] %v12158_v16  ;;  %7128 = vmatprep.subr.bf16.mxu1 %v8147_v12  ;;  %12988 = vst [vmem:[#allocation77_spill] sm:$0xff] %v12163_v9  ;;  %v4459_v5 = vmul.f32 0.3275911, %v12148_v11  ;;  %v12176_v15 = vmul.f32 0.70710677, %v12151_v25  ;;  %v5027_v14 = vmul.f32 %v12025_v37, %v4963_v47  ;;  %v4900_v52 = vmul.f32 %v12066_v23, %v4836_v10 }
 0xa60   : > { %12989 = vst [vmem:[#allocation74_spill] sm:$0xff] %v12167_v40  ;;  %12990 = vst [vmem:[#allocation122_spill] sm:$0xff] %v12171_v33  ;;  %8079 = vpow2.f32 %v5404_v26  ;;  %v4965_v0 = vadd.f32 -0.28449672, %v4901_v18  ;;  %v5664_v12 = vadd.f32 1.0, %v5600_v60  ;;  %v12190_v18 = vmul.f32 %v8068_v53, %v5153_v31  ;;  %v12999_v63 = vld [vmem:[#allocation64_spill] sm:$0xff] }
 0xa61   : > { %v4646_v55 = vmul.f32 1.0614054, %v12160_v21  ;;  %v12183_v59 = vand.u32 2147483647, %v12158_v16  ;;  %v8149_v58 = vld [vmem:[#allocation14 + $0x144] ss:$8 sps:$4 sm:$0xff]   ;;  %v12185_v42 = vpop.eup %8073  ;;  %8081 = vpow2.f32 %v5402_v54  ;;  %v12196_v62 = vadd.f32 %v4077_v46, %v10418_v32 }
 0xa62   : > { %7144 = vmatpush1.bf16.msra.mxu1 %v8148_v4  ;;  %v4712_v47 = vadd.f32 -1.4531521, %v4648_v41  ;;  %v12188_v26 = vand.u32 2147483647, %v12167_v40  ;;  %v4713_v10 = vadd.f32 -1.4531521, %v4649_v51  ;;  %v5029_v29 = vmul.f32 %v12049_v44, %v4965_v0 }
 0xa63   : > { %7129 = vmatprep.subr.bf16.mxu1 %v8149_v58  ;;  %v4523_v60 = vadd.f32 1.0, %v4459_v5  ;;  %v12193_v4 = vand.u32 2147483647, %v12176_v15  ;;  %12991 = vst [vmem:[#allocation123_spill] sm:$0xff] %v12196_v62  ;;  %v12198_v16 = vadd.f32 0.2548296, %v5027_v14  ;;  %v12204_v53 = vmul.f32 %v5664_v12, %v11969_v49 }
 0xa64   : > { %v4964_v58 = vadd.f32 -0.28449672, %v4900_v52  ;;  %v12992_v54 = vld [vmem:[#allocation83_spill] sm:$0xff]  ;;  %v12993_v41 = vld [vmem:[#allocation65_spill] sm:$0xff]  ;;  %v4710_v51 = vadd.f32 -1.4531521, %v4646_v55  ;;  %v4776_v14 = vmul.f32 %v12131_v1, %v4712_v47  ;;  %v4777_v0 = vmul.f32 %v12145_v50, %v4713_v10 }
 0xa65   : > { %v5749_v28 = vpack.c.bf16 %v12993_v41, %v12992_v54  ;;  %v8150_v40 = vld [vmem:[#allocation14 + $0x140] ss:$8 sps:$4 sm:$0xff]   ;;  %12994 = vst [vmem:[#allocation83_spill] sm:$0xff] %v12204_v53  ;;  %v4462_v31 = vmul.f32 0.3275911, %v12183_v59  ;;  %8083 = vrcp.f32 %v4523_v60  ;;  %v5228_v49 = vsub.f32 0.0, %v12112_v2 }
 0xa66   : > { %7145 = vmatpush1.bf16.msra.mxu1 %v8150_v40  ;;  %v4461_v5 = vmul.f32 0.3275911, %v12193_v4  ;;  %v8151_v32 = vld [vmem:[#allocation14 + $0x134] ss:$8 sps:$4 sm:$0xff]   ;;  %v4458_v52 = vmul.f32 0.3275911, %v12188_v26  ;;  %v5028_v60 = vmul.f32 %v12066_v23, %v4964_v58 }
 0xa67   : > { %7130 = vmatprep.subr.bf16.mxu1 %v8151_v32  ;;  %v12212_v46 = vmul.f32 0.70710677, %v12196_v62  ;;  %6214 = vmatprep.mubr.bf16.mxu1 %v5749_v28  ;;  %v12996_v12 = vld [vmem:[#allocation84_spill] sm:$0xff]  ;;  %v12998_v41 = vld [vmem:[#allocation81_spill] sm:$0xff]  ;;  %v5537_v47 = vsub.f32 1.0, %v12190_v18  ;;  %v5224_v10 = vsub.f32 0.0, %v12006_v36 }
 0xa68   : > { %v4525_v40 = vadd.f32 1.0, %v4461_v5  ;;  %v12997_v55 = vld [vmem:[#allocation68_spill] sm:$0xff]  ;;  %v13000_v32 = vpack.c.bf16 %v12998_v41, %v12999_v63  ;;  %v5093_v9 = vadd.f32 0.2548296, %v5029_v29  ;;  %v5225_v62 = vsub.f32 0.0, %v12030_v22  ;;  %v13005_v58 = vld [vmem:[#allocation67_spill] sm:$0xff] }
 0xa69   : > { %12995 = vst [vmem:[#allocation65_spill] sm:$0xff] %v12212_v46  ;;  %v5751_v54 = vpack.c.bf16 %v12997_v55, %v12996_v12  ;;  %v8152_v33 = vld [vmem:[#allocation14 + $0x130] ss:$8 sps:$4 sm:$0xff]   ;;  %v12223_v28 = vpop.eup %8075  ;;  %v4774_v5 = vmul.f32 %v12160_v21, %v4710_v51  ;;  %v4526_v12 = vadd.f32 1.0, %v4462_v31  ;;  %v8153_v63 = vld [vmem:[#allocation14 + $0x124] ss:$8 sps:$4 sm:$0xff]   ;;  %v5753_v45 = vpack.c.bf16 %v13005_v58, %v13004_v6 }
 0xa6a   : > { %6215 = vmatmul.mubr.bf16.gmra.mxu1 %v13000_v32  ;;  %8085 = vrcp.f32 %v4525_v40  ;;  %v12227_v55 = vpop.eup %8077  ;;  %v4522_v29 = vadd.f32 1.0, %v4458_v52  ;;  %v4841_v18 = vadd.f32 1.4214138, %v4777_v0  ;;  %v12230_v41 = vand.u32 2147483647, %v12212_v46  ;;  %v13001_v32 = vld [vmem:[#allocation85_spill] sm:$0xff] }
 0xa6b   : > { %7146 = vmatpush1.bf16.msra.mxu1 %v8152_v33  ;;  %6327 = vmatprep.mubr.bf16.mxu0 %v5751_v54  ;;  %v13002_v33 = vld [vmem:[#allocation82_spill] sm:$0xff]  ;;  %v4840_v51 = vadd.f32 1.4214138, %v4776_v14  ;;  %v4652_v31 = vmul.f32 1.0614054, %v12227_v55  ;;  %v5292_v40 = vmul.f32 %v5228_v49, %v12112_v2  ;;  %v13006_v54 = vld [vmem:[#allocation79_spill] sm:$0xff]  ;;  %v5157_v52 = vmul.f32 %v12049_v44, %v5093_v9 }
 0xa6c   : > { %7131 = vmatprep.subr.bf16.mxu1 %v8153_v63  ;;  %v13003_v25 = vpack.c.bf16 %v13001_v32, %v13002_v33  ;;  %v13007_v63 = vld [vmem:[#allocation72_spill] sm:$0xff]  ;;  %v5288_v0 = vmul.f32 %v5224_v10, %v12006_v36  ;;  %v5289_v46 = vmul.f32 %v5225_v62, %v12030_v22  ;;  %v4463_v32 = vmul.f32 0.3275911, %v12230_v41  ;;  %6224 = vmatprep.mubr.bf16.mxu1 %v5753_v45  ;;  %v13008_v2 = vld [vmem:[#allocation86_spill] sm:$0xff] }
 0xa6d   : > { %v5755_v53 = vpack.c.bf16 %v13007_v63, %v13006_v54  ;;  %v12245_v6 = vpop.eup %8079  ;;  %v4647_v14 = vmul.f32 1.0614054, %v12223_v28  ;;  %v4716_v33 = vadd.f32 -1.4531521, %v4652_v31  ;;  %8087 = vrcp.f32 %v4526_v12  ;;  %v8155_v44 = vld [vmem:[#allocation14 + $0x114] ss:$8 sps:$4 sm:$0xff]  }
 0xa6e   : > { %6328 = vmatmul.mubr.bf16.gmra.mxu0 %v13003_v25  ;;  %v8154_v25 = vld [vmem:[#allocation14 + $0x120] ss:$8 sps:$4 sm:$0xff]   ;;  %v5757_v49 = vpack.c.bf16 %v11621_v17, %v13008_v2  ;;  %v5092_v36 = vadd.f32 0.2548296, %v5028_v60  ;;  %8089 = vrcp.f32 %v4522_v29  ;;  %v4905_v22 = vmul.f32 %v12145_v50, %v4841_v18  ;;  %v8082_v45 = vpop.eup %8081  ;;  %v13010_v31 = vld [vmem:[#allocation71_spill] sm:$0xff] }
 0xa6f   : > { %7147 = vmatpush1.bf16.msra.mxu1 %v8154_v25  ;;  %6337 = vmatprep.mubr.bf16.mxu0 %v5755_v53  ;;  %v4527_v62 = vadd.f32 1.0, %v4463_v32  ;;  %v4904_v9 = vmul.f32 %v12131_v1, %v4840_v51  ;;  %v4780_v10 = vmul.f32 %v12227_v55, %v4716_v33  ;;  %v5416_v58 = vmul.f32 1.442695, %v5292_v40  ;;  %v13009_v54 = vld [vmem:[#allocation90_spill] sm:$0xff]  ;;  %v13012_v53 = vld [vmem:[#allocation80_spill] sm:$0xff]  ;;  %v13013_v63 = vld [vmem:[#allocation97_spill] sm:$0xff] }
 0xa70   : > { %7132 = vmatprep.subr.bf16.mxu1 %v8155_v44  ;;  %v13011_v12 = vpack.c.bf16 %v13009_v54, %v13010_v31  ;;  %v5759_v17 = vpack.c.bf16 %v13013_v63, %v13012_v53  ;;  %v5477_v25 = vmul.f32 %v8082_v45, %v5157_v52  ;;  %v5410_v2 = vmul.f32 1.442695, %v5289_v46  ;;  %v8156_v29 = vld [vmem:[#allocation14 + $0x110] ss:$8 sps:$4 sm:$0xff]   ;;  %v8157_v44 = vld [vmem:[#allocation14 + $0x104] ss:$8 sps:$4 sm:$0xff]  }
 0xa71   : > { %v5229_v60 = vsub.f32 0.0, %v12193_v4  ;;  %8091 = vrcp.f32 %v4527_v62  ;;  %v4711_v18 = vadd.f32 -1.4531521, %v4647_v14  ;;  %v13014_v51 = vsub.f32 0.0, %v12083_v48  ;;  %v13015_v31 = vld [vmem:[#allocation91_spill] sm:$0xff]  ;;  %v13016_v62 = vld [vmem:[#allocation78_spill] sm:$0xff] }
 0xa72   : > { %6225 = vmatmul.mubr.bf16.gmra.mxu1 %v13011_v12  ;;  %v5408_v32 = vmul.f32 1.442695, %v5288_v0  ;;  %v4844_v33 = vadd.f32 1.4214138, %v4780_v10  ;;  %v5601_v54 = vmul.f32 %v5537_v47, %v12023_v39  ;;  %v5156_v52 = vmul.f32 %v12066_v23, %v5092_v36  ;;  %v8158_v23 = vld [vmem:[#allocation14 + $0x100] ss:$8 sps:$4 sm:$0xff]  }
 0xa73   : > { %6234 = vmatprep.mubr.bf16.mxu1 %v5757_v49  ;;  %7148 = vmatpush1.bf16.msra.mxu1 %v8156_v29  ;;  %v5287_v40 = vmul.f32 %v13014_v51, %v12083_v48  ;;  %v4838_v46 = vadd.f32 1.4214138, %v4774_v5  ;;  %v4969_v45 = vadd.f32 -0.28449672, %v4905_v22  ;;  %v13017_v49 = vpack.c.bf16 %v13015_v31, %v13016_v62  ;;  %v12269_v48 = vpop.eup %8083  ;;  %v13018_v47 = vld [vmem:[#allocation93_spill] sm:$0xff]  ;;  %v13022_v62 = vld [vmem:[#allocation96_spill] sm:$0xff] }
 0xa74   : > { %7133 = vmatprep.subr.bf16.mxu1 %v8157_v44  ;;  %vm4264_vm4 = vcmp.ge.f32.partialorder %v11984_v56, 0.0  ;;  %v4968_v14 = vadd.f32 -0.28449672, %v4904_v9  ;;  %v4908_v12 = vmul.f32 %v12227_v55, %v4844_v33  ;;  %8093 = vpow2.f32 %v5416_v58  ;;  %v8159_v10 = vld [vmem:[#allocation14 + $0x1f4] ss:$8 sps:$4 sm:$0xff]   ;;  %v13019_v29 = vld [vmem:[#allocation89_spill] sm:$0xff] }
 0xa75   : > { %v5541_v0 = vsub.f32 1.0, %v5477_v25  ;;  %8095 = vpow2.f32 %v5410_v2  ;;  %v5293_v39 = vmul.f32 %v5229_v60, %v12193_v4  ;;  %v5761_v5 = vpack.c.bf16 %v11871_v61, %v13018_v47  ;;  %v8160_v44 = vld [vmem:[#allocation14 + $0x1f0] ss:$8 sps:$4 sm:$0xff]  }
 0xa76   : > { %6338 = vmatmul.mubr.bf16.gmra.mxu0 %v13017_v49  ;;  %v4775_v36 = vmul.f32 %v12223_v28, %v4711_v18  ;;  %v5406_v22 = vmul.f32 1.442695, %v5287_v40  ;;  %8097 = vpow2.f32 %v5408_v32  ;;  %v4972_v9 = vadd.f32 -0.28449672, %v4908_v12  ;;  %v13020_v18 = vld [vmem:[#allocation69_spill] sm:$0xff]  ;;  %v13023_v49 = vld [vmem:[#allocation92_spill] sm:$0xff] }
 0xa77   : > { %6347 = vmatprep.mubr.bf16.mxu0 %v5759_v17  ;;  %7149 = vmatpush1.bf16.msra.mxu1 %v8158_v23  ;;  %v12275_v58 = vpop.eup %8085  ;;  %v5665_v53 = vadd.f32 1.0, %v5601_v54  ;;  %v5476_v63 = vmul.f32 %v12185_v42, %v5156_v52  ;;  %v4902_v17 = vmul.f32 %v12160_v21, %v4838_v46  ;;  %v5033_v4 = vmul.f32 %v12145_v50, %v4969_v45 }
 0xa78   : > { %7134 = vmatprep.subr.bf16.mxu1 %v8159_v10  ;;  %v5032_v25 = vmul.f32 %v12131_v1, %v4968_v14  ;;  %v4651_v61 = vmul.f32 1.0614054, %v12269_v48  ;;  %v5036_v2 = vmul.f32 %v12227_v55, %v4972_v9  ;;  %v4653_v60 = vmul.f32 1.0614054, %v12275_v58 }
 0xa79   : > { %v13021_v51 = vpack.c.bf16 %v13019_v29, %v13020_v18  ;;  %v12289_v40 = vmul.f32 %v12025_v37, %v12198_v16  ;;  %v5605_v42 = vmul.f32 %v5541_v0, %v12136_v13  ;;  %v12293_v32 = vmul.f32 0.5, %v11966_v24  ;;  %v8161_v37 = vld [vmem:[#allocation14 + $0x1e4] ss:$8 sps:$4 sm:$0xff]  }
 0xa7a   : > { %v5418_v33 = vmul.f32 1.442695, %v5293_v39  ;;  %v4839_v54 = vadd.f32 1.4214138, %v4775_v36  ;;  %v12298_v52 = vsel %vm4264_vm4, 1.0, %v12854_v27  ;;  %v5226_v46 = vsub.f32 0.0, %v12188_v26  ;;  %v12301_v16 = vpop.eup %8087 }
 0xa7b   : > { %6235 = vmatmul.mubr.bf16.gmra.mxu1 %v13021_v51  ;;  %v5100_v45 = vadd.f32 0.2548296, %v5036_v2  ;;  %v5540_v13 = vsub.f32 1.0, %v5476_v63  ;;  %8099 = vpow2.f32 %v5406_v22  ;;  %v5097_v24 = vadd.f32 0.2548296, %v5033_v4  ;;  %v12306_v12 = vpop.eup %8089 }
 0xa7c   : > { %6244 = vmatprep.mubr.bf16.mxu1 %v5761_v5  ;;  %7150 = vmatpush2.bf16.msra.mxu1 %v8160_v44  ;;  %v4717_v31 = vadd.f32 -1.4531521, %v4653_v60  ;;  %v13024_v14 = vpack.c.bf16 %v13022_v62, %v13023_v49  ;;  %v12309_v56 = vmul.f32 %v5665_v53, %v12000_v8  ;;  %v12311_v0 = vadd.f32 -0.28449672, %v4902_v17  ;;  %v8162_v36 = vld [vmem:[#allocation14 + $0x1e0] ss:$8 sps:$4 sm:$0xff]  }
 0xa7d   : > { %7135 = vmatprep.subr.bf16.mxu1 %v8161_v37  ;;  %v5096_v39 = vadd.f32 0.2548296, %v5032_v25  ;;  %v4715_v23 = vadd.f32 -1.4531521, %v4651_v61  ;;  %v5669_v47 = vadd.f32 1.0, %v5605_v42  ;;  %8101 = vpow2.f32 %v5418_v33 }
 0xa7e   : > { %6348 = vmatmul.mubr.bf16.gmra.mxu0 %v13024_v14  ;;  %v4781_v5 = vmul.f32 %v12275_v58, %v4717_v31  ;;  %v5765_v22 = vpack.c.bf16 %v12105_v35, %v11992_v20  ;;  %v12316_v9 = vpop.eup %8091  ;;  %v4903_v10 = vmul.f32 %v12223_v28, %v4839_v54  ;;  %v12320_v8 = vmul.f32 %v5226_v46, %v12188_v26  ;;  %v8163_v17 = vld [vmem:[#allocation14 + $0x1d4] ss:$8 sps:$4 sm:$0xff]  }
 0xa7f   : > { %v5164_v53 = vmul.f32 %v12227_v55, %v5100_v45  ;;  %v4654_v63 = vmul.f32 1.0614054, %v12301_v16  ;;  %v5604_v4 = vmul.f32 %v5540_v13, %v12079_v3  ;;  %v5161_v25 = vmul.f32 %v12145_v50, %v5097_v24  ;;  %v13025_v55 = vld [vmem:[#allocation99_spill] sm:$0xff]  ;;  %v8165_v45 = vld [vmem:[#allocation14 + $0x1c4] ss:$8 sps:$4 sm:$0xff]  }
 0xa80   : > { %7151 = vmatpush2.bf16.msra.mxu1 %v8162_v36  ;;  %v4845_v61 = vadd.f32 1.4214138, %v4781_v5  ;;  %v4655_v20 = vmul.f32 1.0614054, %v12316_v9  ;;  %v5160_v35 = vmul.f32 %v12131_v1, %v5096_v39  ;;  %v4650_v2 = vmul.f32 1.0614054, %v12306_v12 }
 0xa81   : > { %7136 = vmatprep.subr.bf16.mxu1 %v8163_v17  ;;  %v4779_v26 = vmul.f32 %v12269_v48, %v4715_v23  ;;  %v5227_v60 = vsub.f32 0.0, %v12148_v11  ;;  %v13026_v29 = vpack.c.bf16 %v11794_v34, %v13025_v55  ;;  %v8094_v18 = vpop.eup %8093  ;;  %v5733_v3 = vmul.f32 %v5669_v47, %v12095_v57  ;;  %v8164_v1 = vld [vmem:[#allocation14 + $0x1d0] ss:$8 sps:$4 sm:$0xff]   ;;  %v8166_v5 = vld [vmem:[#allocation14 + $0x1c0] ss:$8 sps:$4 sm:$0xff]  }
 0xa82   : > { %v4909_v50 = vmul.f32 %v12275_v58, %v4845_v61  ;;  %v4719_v51 = vadd.f32 -1.4531521, %v4655_v20  ;;  %v5231_v42 = vsub.f32 0.0, %v12230_v41  ;;  %v8096_v33 = vpop.eup %8095  ;;  %v4967_v44 = vadd.f32 -0.28449672, %v4903_v10 }
 0xa83   : > { %6245 = vmatmul.mubr.bf16.gmra.mxu1 %v13026_v29  ;;  %vm4265_vm5 = vcmp.ge.f32.partialorder %v12012_v7, 0.0  ;;  %v5484_v54 = vmul.f32 %v8094_v18, %v5164_v53  ;;  %v4718_v46 = vadd.f32 -1.4531521, %v4654_v63  ;;  %v8098_v34 = vpop.eup %8097  ;;  %v5668_v37 = vadd.f32 1.0, %v5604_v4  ;;  %v8167_v63 = vld [vmem:[#allocation14 + $0x1b4] ss:$8 sps:$4 sm:$0xff]  }
 0xa84   : > { %6254 = vmatprep.mubr.bf16.mxu1 %v5765_v22  ;;  %7152 = vmatpush2.bf16.msra.mxu1 %v8164_v1  ;;  %v5481_v13 = vmul.f32 %v8096_v33, %v5161_v25  ;;  %v4973_v57 = vadd.f32 -0.28449672, %v4909_v50  ;;  %v4783_v24 = vmul.f32 %v12316_v9, %v4719_v51  ;;  %v5480_v31 = vmul.f32 %v8098_v34, %v5160_v35 }
 0xa85   : > { %7137 = vmatprep.subr.bf16.mxu1 %v8165_v45  ;;  %v4714_v62 = vadd.f32 -1.4531521, %v4650_v2  ;;  %v4843_v49 = vadd.f32 1.4214138, %v4779_v26  ;;  %v5291_v14 = vmul.f32 %v5227_v60, %v12148_v11  ;;  %v5295_v47 = vmul.f32 %v5231_v42, %v12230_v41  ;;  %v8169_v42 = vld [vmem:[#allocation14 + $0x1a4] ss:$8 sps:$4 sm:$0xff]  }
 0xa86   : > { %v5037_v39 = vmul.f32 %v12275_v58, %v4973_v57  ;;  %v4847_v23 = vadd.f32 1.4214138, %v4783_v24  ;;  %v5769_v36 = vpack.c.bf16 %v5733_v3, %v12309_v56  ;;  %v5031_v22 = vmul.f32 %v12223_v28, %v4967_v44  ;;  %v8171_v24 = vld [vmem:[#allocation14 + $0x194] ss:$8 sps:$4 sm:$0xff]  }
 0xa87   : > { %vm4268_vm6 = vcmp.ge.f32.partialorder %v12090_v30, 0.0  ;;  %v5548_v10 = vsub.f32 1.0, %v5484_v54  ;;  %v4782_v53 = vmul.f32 %v12301_v16, %v4718_v46  ;;  %v4329_v11 = vsel %vm4265_vm5, 1.0, %v12854_v27  ;;  %v13028_v54 = vld [vmem:[#allocation83_spill] sm:$0xff] }
 0xa88   : > { %7153 = vmatpush2.bf16.msra.mxu1 %v8166_v5  ;;  %v5545_v17 = vsub.f32 1.0, %v5481_v13  ;;  %v5101_v4 = vadd.f32 0.2548296, %v5037_v39  ;;  %v4911_v41 = vmul.f32 %v12316_v9, %v4847_v23  ;;  %v8100_v25 = vpop.eup %8099  ;;  %v5732_v56 = vmul.f32 %v5668_v37, %v12055_v38  ;;  %v8168_v38 = vld [vmem:[#allocation14 + $0x1b0] ss:$8 sps:$4 sm:$0xff]  }
 0xa89   : > { %7138 = vmatprep.subr.bf16.mxu1 %v8167_v63  ;;  %v5544_v61 = vsub.f32 1.0, %v5480_v31  ;;  %v4778_v20 = vmul.f32 %v12306_v12, %v4714_v62  ;;  %v5230_v35 = vsub.f32 0.0, %v12183_v59  ;;  %v13027_v2 = vpack.c.bf16 %v12017_v19, %v11950_v43  ;;  %v8170_v37 = vld [vmem:[#allocation14 + $0x1a0] ss:$8 sps:$4 sm:$0xff]   ;;  %v13029_v39 = vld [vmem:[#allocation119_spill] sm:$0xff]  ;;  %v13030_v5 = vld [vmem:[#allocation112_spill] sm:$0xff] }
 0xa8a   : > { %v4907_v26 = vmul.f32 %v12269_v48, %v4843_v49  ;;  %v4332_v7 = vsel %vm4268_vm6, 1.0, %v12854_v27  ;;  %v5165_v60 = vmul.f32 %v12275_v58, %v5101_v4  ;;  %v5422_v55 = vmul.f32 1.442695, %v5295_v47  ;;  %v8102_v29 = vpop.eup %8101  ;;  %v8172_v63 = vld [vmem:[#allocation14 + $0x190] ss:$8 sps:$4 sm:$0xff]  }
 0xa8b   : > { %6255 = vmatmul.mubr.bf16.gmra.mxu1 %v13027_v2  ;;  %v5095_v18 = vadd.f32 0.2548296, %v5031_v22  ;;  %v5414_v3 = vmul.f32 1.442695, %v5291_v14  ;;  %v5612_v50 = vmul.f32 %v5548_v10, %v4332_v7  ;;  %v4846_v51 = vadd.f32 1.4214138, %v4782_v53 }
 0xa8c   : > { %6264 = vmatprep.mubr.bf16.mxu1 %v5769_v36  ;;  %7154 = vmatpush2.bf16.msra.mxu1 %v8168_v38  ;;  %v5609_v43 = vmul.f32 %v5545_v17, %v4329_v11  ;;  %vm4269_vm7 = vcmp.ge.f32.partialorder %v12176_v15, 0.0  ;;  %v5485_v19 = vmul.f32 %v8102_v29, %v5165_v60  ;;  %v4975_v1 = vadd.f32 -0.28449672, %v4911_v41  ;;  %v13031_v22 = vld [vmem:[#allocation66_spill] sm:$0xff]  ;;  %v13034_v29 = vld [vmem:[#allocation76_spill] sm:$0xff] }
 0xa8d   : > { %7139 = vmatprep.subr.bf16.mxu1 %v8169_v42  ;;  %v5030_v30 = vmul.f32 %v12160_v21, %v12311_v0  ;;  %v5608_v58 = vmul.f32 %v5544_v61, %v12298_v52  ;;  %v4842_v33 = vadd.f32 1.4214138, %v4778_v20  ;;  %v5294_v44 = vmul.f32 %v5230_v35, %v12183_v59  ;;  %v8173_v41 = vld [vmem:[#allocation14 + $0x184] ss:$8 sps:$4 sm:$0xff]  }
 0xa8e   : > { %v5768_v46 = vpack.c.bf16 %v5732_v56, %v13028_v54  ;;  %v4971_v45 = vadd.f32 -0.28449672, %v4907_v26  ;;  %v5549_v34 = vsub.f32 1.0, %v5485_v19  ;;  %8103 = vpow2.f32 %v5422_v55  ;;  %v13032_v2 = vld [vmem:[#allocation122_spill] sm:$0xff]  ;;  %v13033_v55 = vld [vmem:[#allocation77_spill] sm:$0xff] }
 0xa8f   : > { %8105 = vpow2.f32 %v5414_v3  ;;  %v5676_v13 = vadd.f32 1.0, %v5612_v50  ;;  %v4910_v57 = vmul.f32 %v12301_v16, %v4846_v51  ;;  %v4333_v0 = vsel %vm4269_vm7, 1.0, %v12854_v27  ;;  %v8174_v50 = vld [vmem:[#allocation14 + $0x180] ss:$8 sps:$4 sm:$0xff]  }
 0xa90   : > { %7155 = vmatpush2.bf16.msra.mxu1 %v8170_v37  ;;  %v5159_v52 = vmul.f32 %v12223_v28, %v5095_v18  ;;  %v5673_v59 = vadd.f32 1.0, %v5609_v43  ;;  %v5613_v31 = vmul.f32 %v5549_v34, %v4333_v0  ;;  %v5039_v62 = vmul.f32 %v12316_v9, %v4975_v1  ;;  %v13035_v43 = vld [vmem:[#allocation118_spill] sm:$0xff]  ;;  %v13044_v0 = vld [vmem:[#allocation108_spill] sm:$0xff] }
 0xa91   : > { %7140 = vmatprep.subr.bf16.mxu1 %v8171_v24  ;;  %v5672_v49 = vadd.f32 1.0, %v5608_v58  ;;  %v4906_v14 = vmul.f32 %v12306_v12, %v4842_v33  ;;  %v4140_v23 = vmul.f32 0.5, %v13029_v39  ;;  %v5420_v47 = vmul.f32 1.442695, %v5294_v44  ;;  %v13036_v1 = vld [vmem:[#allocation94_spill] sm:$0xff]  ;;  %v13039_v33 = vld [vmem:[#allocation109_spill] sm:$0xff] }
 0xa92   : > { %v4137_v36 = vmul.f32 0.5, %v13030_v5  ;;  %v5035_v15 = vmul.f32 %v12269_v48, %v4971_v45  ;;  %v4141_v10 = vmul.f32 0.5, %v13031_v22  ;;  %v5677_v53 = vadd.f32 1.0, %v5613_v31  ;;  %v13046_v31 = vld [vmem:[#allocation116_spill] sm:$0xff]  ;;  %v13048_v5 = vld [vmem:[#allocation98_spill] sm:$0xff] }
 0xa93   : > { %6265 = vmatmul.mubr.bf16.gmra.mxu1 %v5768_v46  ;;  %v5094_v28 = vadd.f32 0.2548296, %v5030_v30  ;;  %v5412_v11 = vmul.f32 1.442695, %v12320_v8  ;;  %v5740_v17 = vmul.f32 %v5676_v13, %v4140_v23  ;;  %v4974_v4 = vadd.f32 -0.28449672, %v4910_v57 }
 0xa94   : > { %7156 = vmatpush2.bf16.msra.mxu1 %v8172_v63  ;;  %v5479_v56 = vmul.f32 %v8100_v25, %v5159_v52  ;;  %v5737_v61 = vmul.f32 %v5673_v59, %v4137_v36  ;;  %v5741_v20 = vmul.f32 %v5677_v53, %v4141_v10  ;;  %v5103_v35 = vadd.f32 0.2548296, %v5039_v62  ;;  %v13037_v30 = vld [vmem:[#allocation110_spill] sm:$0xff]  ;;  %v13041_v46 = vld [vmem:[#allocation101_spill] sm:$0xff] }
 0xa95   : > { %7141 = vmatprep.subr.bf16.mxu1 %v8173_v41  ;;  %v5090_v26 = vadd.f32 0.2548296, %v13032_v2  ;;  %v5736_v7 = vmul.f32 %v5672_v49, %v12293_v32  ;;  %v4970_v60 = vadd.f32 -0.28449672, %v4906_v14  ;;  %8107 = vpow2.f32 %v5420_v47  ;;  %v13043_v13 = vld [vmem:[#allocation114_spill] sm:$0xff]  ;;  %v13050_v53 = vld [vmem:[#allocation105_spill] sm:$0xff] }
 0xa96   : > { %v5663_v38 = vadd.f32 1.0, %v13033_v55  ;;  %v5475_v18 = vmul.f32 %v13034_v29, %v12289_v40  ;;  %v5099_v8 = vadd.f32 0.2548296, %v5035_v15  ;;  %v5773_v3 = vpack.c.bf16 %v5741_v20, %v5737_v61  ;;  %v13038_v40 = vld [vmem:[#allocation102_spill] sm:$0xff]  ;;  %v13053_v61 = vld [vmem:[#allocation113_spill] sm:$0xff] }
 0xa97   : > { %v5158_v25 = vmul.f32 %v12160_v21, %v5094_v28  ;;  %8109 = vpow2.f32 %v5412_v11  ;;  %v5772_v51 = vpack.c.bf16 %v5740_v17, %v5736_v7  ;;  %v5038_v42 = vmul.f32 %v12301_v16, %v4974_v4  ;;  %v13042_v21 = vld [vmem:[#allocation115_spill] sm:$0xff]  ;;  %v13045_v59 = vld [vmem:[#allocation106_spill] sm:$0xff]  ;;  %v13051_v28 = vld [vmem:[#allocation120_spill] sm:$0xff] }
 0xa98   : > { %7157 = vmatpush2.bf16.msra.mxu1 %v8174_v50  ;;  %vm4263_vm8 = vcmp.ge.f32.partialorder %v13035_v43, 0.0  ;;  %v5543_v32 = vsub.f32 1.0, %v5479_v56  ;;  %v5167_v19 = vmul.f32 %v12316_v9, %v5103_v35  ;;  %6274 = vmatprep.mubr.bf16.mxu1 %v5773_v3  ;;  %v5763_v58 = vpack.c.bf16 %v13037_v30, %v13036_v1  ;;  %v13052_v4 = vld [vmem:[#allocation95_spill] sm:$0xff]  ;;  %v13054_v55 = vld [vmem:[#allocation65_spill] sm:$0xff] }
 0xa99   : > { %v13040_v44 = vsub.f32 1.0, %v13039_v33  ;;  %v4127_v45 = vmul.f32 0.5, %v13041_v46  ;;  %v5154_v34 = vmul.f32 %v13042_v21, %v5090_v26  ;;  %v5034_v37 = vmul.f32 %v12306_v12, %v4970_v60  ;;  %v13058_v33 = vld [vmem:[#allocation104_spill] sm:$0xff] }
 0xa9a   : > { %v5659_v57 = vadd.f32 1.0, %v13043_v13  ;;  %vm4259_vm9 = vcmp.ge.f32.partialorder %v13044_v0, 0.0  ;;  %v5539_v9 = vsub.f32 1.0, %v5475_v18  ;;  %v5163_v24 = vmul.f32 %v12269_v48, %v5099_v8  ;;  %v13049_v48 = vld [vmem:[#allocation88_spill] sm:$0xff]  ;;  %v13055_v18 = vld [vmem:[#allocation107_spill] sm:$0xff] }
 0xa9b   : > { %v5594_v54 = vmul.f32 %v13040_v44, %v13038_v40  ;;  %6275 = vmatmul.mubr.bf16.gmra.mxu1 %v5772_v51  ;;  %v8104_v52 = vpop.eup %8103  ;;  %v13047_v62 = vsub.f32 1.0, %v13046_v31  ;;  %v5478_v14 = vmul.f32 %v12245_v6, %v5158_v25  ;;  %v4327_v39 = vsel %vm4263_vm8, 1.0, %v12854_v27 }
 0xa9c   : > { %6357 = vmatprep.mubr.bf16.mxu1 %v5763_v58  ;;  %v5102_v23 = vadd.f32 0.2548296, %v5038_v42  ;;  %v8106_v47 = vpop.eup %8105  ;;  %v4126_v36 = vmul.f32 0.5, %v13048_v5  ;;  %v5727_v15 = vmul.f32 %v5663_v38, %v4127_v45  ;;  %v5607_v22 = vmul.f32 %v5543_v32, %v4327_v39  ;;  %v13056_v42 = vld [vmem:[#allocation117_spill] sm:$0xff]  ;;  %v13057_v32 = vld [vmem:[#allocation75_spill] sm:$0xff]  ;;  %v13059_v45 = vld [vmem:[#allocation100_spill] sm:$0xff] }
 0xa9d   : > { %v5598_v49 = vmul.f32 %v13047_v62, %v13045_v59  ;;  %v5487_v10 = vmul.f32 %v8104_v52, %v5167_v19  ;;  %v5762_v63 = vpack.c.bf16 %v13050_v53, %v13049_v48  ;;  %v5474_v11 = vmul.f32 %v13051_v28, %v5154_v34  ;;  %v13060_v52 = vld [vmem:[#allocation73_spill] sm:$0xff] }
 0xa9e   : > { %v4323_v6 = vsel %vm4259_vm9, 1.0, %v12854_v27  ;;  %v5098_v17 = vadd.f32 0.2548296, %v5034_v37  ;;  %v5723_v41 = vmul.f32 %v5659_v57, %v13052_v4  ;;  %vm4262_vm10 = vcmp.ge.f32.partialorder %v13053_v61, 0.0 }
 0xa9f   : > { %v5603_v56 = vmul.f32 %v5539_v9, %v4323_v6  ;;  %v5483_v20 = vmul.f32 %v8106_v47, %v5163_v24  ;;  %v5658_v35 = vadd.f32 1.0, %v5594_v54  ;;  %v5662_v2 = vadd.f32 1.0, %v5598_v49 }
 0xaa0   : > { %v5542_v26 = vsub.f32 1.0, %v5478_v14  ;;  %v5166_v7 = vmul.f32 %v12301_v16, %v5102_v23  ;;  %v5671_v60 = vadd.f32 1.0, %v5607_v22  ;;  %vm4271_vm11 = vcmp.ge.f32.partialorder %v13054_v55, 0.0  ;;  %v13061_v14 = vld [vmem:[#allocation111_spill] sm:$0xff]  ;;  %v13062_v23 = vld [vmem:[#allocation74_spill] sm:$0xff] }
 0xaa1   : > { %v5551_v38 = vsub.f32 1.0, %v5487_v10  ;;  %v5767_v29 = vpack.c.bf16 %v5727_v15, %v5723_v41  ;;  %vm4258_vm12 = vcmp.ge.f32.partialorder %v13055_v18, 0.0  ;;  %v5538_v8 = vsub.f32 1.0, %v5474_v11  ;;  %v13063_v15 = vld [vmem:[#allocation123_spill] sm:$0xff]  ;;  %v13065_v11 = vld [vmem:[#allocation121_spill] sm:$0xff] }
 0xaa2   : > { %v4326_v3 = vsel %vm4262_vm10, 1.0, %v12854_v27  ;;  %v5162_v50 = vmul.f32 %v12306_v12, %v5098_v17  ;;  %v8108_v25 = vpop.eup %8107  ;;  %v5667_v51 = vadd.f32 1.0, %v5603_v56  ;;  %v4135_v43 = vmul.f32 0.5, %v13056_v42  ;;  %v13064_v10 = vld [vmem:[#allocation103_spill] sm:$0xff] }
 0xaa3   : > { %6358 = vmatmul.mubr.bf16.vlgmr.msra.gmra.mxu1 %v5762_v63  ;;  %vm4267_vm13 = vcmp.ge.f32.partialorder %v13057_v32, 0.0  ;;  %v5547_v16 = vsub.f32 1.0, %v5483_v20  ;;  %v5726_v19 = vmul.f32 %v5662_v2, %v4126_v36  ;;  %v5606_v1 = vmul.f32 %v5542_v26, %v4326_v3  ;;  %v13066_v26 = vld [vmem:[#allocation29_spill] sm:$0xff] }
 0xaa4   : > { %6367 = vmatprep.mubr.bf16.mxu1 %v5767_v29  ;;  %v5486_v30 = vmul.f32 %v8108_v25, %v5166_v7  ;;  %v4335_v58 = vsel %vm4271_vm11, 1.0, %v12854_v27  ;;  %v8110_v40 = vpop.eup %8109  ;;  %v4322_v12 = vsel %vm4258_vm12, 1.0, %v12854_v27  ;;  %v4131_v44 = vmul.f32 0.5, %v13058_v33 }
 0xaa5   : > { %v5735_v54 = vmul.f32 %v5671_v60, %v4135_v43  ;;  %v5615_v46 = vmul.f32 %v5551_v38, %v4335_v58  ;;  %v5722_v21 = vmul.f32 %v5658_v35, %v13059_v45  ;;  %v5602_v34 = vmul.f32 %v5538_v8, %v4322_v12  ;;  %v13067_v60 = vld [vmem:[#allocation70_spill] sm:$0xff]  ;;  %v13068_v8 = vld [vmem:[#allocation31_spill] sm:$0xff] }
 0xaa6   : > { %v5482_v37 = vmul.f32 %v8110_v40, %v5162_v50  ;;  %v4331_v13 = vsel %vm4267_vm13, 1.0, %v12854_v27  ;;  %v5731_v57 = vmul.f32 %v5667_v51, %v4131_v44  ;;  %v5670_v24 = vadd.f32 1.0, %v5606_v1  ;;  %v13069_v50 = vld [vmem:[#allocation30_spill] sm:$0xff]  ;;  %v13070_v40 = vld [vmem:[#allocation32_spill] sm:$0xff]  ;;  %v13071_v45 = vld [vmem:[#allocation35_spill] sm:$0xff] }
 0xaa7   : > { %v5611_v0 = vmul.f32 %v5547_v16, %v4331_v13  ;;  %v5766_v9 = vpack.c.bf16 %v5726_v19, %v5722_v21  ;;  %vm4270_vm14 = vcmp.ge.f32.partialorder %v13060_v52, 0.0  ;;  %v5550_v59 = vsub.f32 1.0, %v5486_v30  ;;  %v13072_v13 = vld [vmem:[#allocation33_spill] sm:$0xff] }
 0xaa8   : > { %v5679_v31 = vadd.f32 1.0, %v5615_v46  ;;  %v5771_v62 = vpack.c.bf16 %v5735_v54, %v5731_v57  ;;  %v5666_v49 = vadd.f32 1.0, %v5602_v34  ;;  %v4134_v39 = vmul.f32 0.5, %v13061_v14 }
 0xaa9   : > { %vm4266_vm15 = vcmp.ge.f32.partialorder %v13062_v23, 0.0  ;;  %v5546_v47 = vsub.f32 1.0, %v5482_v37  ;;  %v5675_v5 = vadd.f32 1.0, %v5611_v0  ;;  %v4334_v36 = vsel %vm4270_vm14, 1.0, %v12854_v27 }
 0xaaa   : > { %v4143_v22 = vmul.f32 0.5, %v13063_v15  ;;  %v4130_v48 = vmul.f32 0.5, %v13064_v10  ;;  %v5734_v53 = vmul.f32 %v5670_v24, %v4134_v39  ;;  %v5614_v63 = vmul.f32 %v5550_v59, %v4334_v36 }
 0xaab   : > { %6368 = vmatmul.mubr.bf16.gmra.mxu1 %v5766_v9  ;;  %v4330_v28 = vsel %vm4266_vm15, 1.0, %v12854_v27  ;;  %v4139_v6 = vmul.f32 0.5, %v13065_v11  ;;  %v4142_v7 = vmul.f32 0.5, %v13066_v26  ;;  %v4138_v55 = vmul.f32 0.5, %v13067_v60  ;;  %v5840_v27 = vld [vmem:[%s12618_s13] sm:$0x3] }
 0xaac   : > { %6377 = vmatprep.mubr.bf16.mxu1 %v5771_v62  ;;  %v5743_v17 = vmul.f32 %v5679_v31, %v4143_v22  ;;  %v5730_v4 = vmul.f32 %v5666_v49, %v4130_v48  ;;  %v5610_v41 = vmul.f32 %v5546_v47, %v4330_v28  ;;  %v5678_v20 = vadd.f32 1.0, %v5614_v63  ;;  %v13073_v9 = vld [vmem:[#allocation39_spill] sm:$0xff] }
 0xaad   : > { %v5739_v56 = vmul.f32 %v5675_v5, %v4139_v6  ;;  %v12445_v3 = vrot.slane %v5840_v27, %v13068_v8  ;;  %v12448_v25 = vrot.slane %v5840_v27, %v13069_v50  ;;  %v13074_v5 = vld [vmem:[#allocation37_spill] sm:$0xff] }
 0xaae   : > { %v5770_v61 = vpack.c.bf16 %v5734_v53, %v5730_v4  ;;  %v5674_v2 = vadd.f32 1.0, %v5610_v41  ;;  %v5742_v38 = vmul.f32 %v5678_v20, %v4142_v7  ;;  %v13075_v53 = vld [vmem:[#allocation36_spill] sm:$0xff]  ;;  %v13076_v4 = vld [vmem:[#allocation34_spill] sm:$0xff] }
 0xaaf   : > { %v5775_v35 = vpack.c.bf16 %v5743_v17, %v5739_v56 }
 0xab0   : > { %v5738_v29 = vmul.f32 %v5674_v2, %v4138_v55  ;;  %v13077_v2 = vld [vmem:[#allocation40_spill] sm:$0xff] }
 0xab2   : > { %v5774_v18 = vpack.c.bf16 %v5742_v38, %v5738_v29  ;;  %v13078_v29 = vld [vmem:[#allocation38_spill] sm:$0xff] }
 0xab3   : > { %6378 = vmatmul.mubr.bf16.gmra.mxu1 %v5770_v61 }
 0xab4   : > { %6387 = vmatprep.mubr.bf16.mxu1 %v5775_v35 }
 0xabb   : > { %6388 = vmatmul.mubr.bf16.gmra.mxu1 %v5774_v18 }
 0xb19   : > { %v6206_v51 = vpop.f32.mrf.mxu1 }
 0xb1a   : > { %v6207_v42 = vadd.f32 %v6206_v51, %v12445_v3 }
 0xb1b   : > { %v6208_v43 = vpop.f32.mrf.mxu1 }
 0xb1c   : > { %v6319_v32 = vpop.f32.mrf.mxu0  ;;  %v6209_v16 = vadd.f32 %v6208_v43, %v12448_v25 }
 0xb1d   : > { %v6320_v19 = vadd.f32 %v6319_v32, %v6207_v42  ;;  %v6210_v1 = vpop.f32.mrf.mxu1  ;;  %v13079_v42 = vld [vmem:[#allocation41_spill] sm:$0xff] }
 0xb1e   : > { %v6321_v30 = vpop.f32.mrf.mxu0  ;;  %v6211_v58 = vadd.f32 %v6210_v1, %v12445_v3 }
 0xb1f   : > { %v6398_v12 = vadd.f32 %v6320_v19, %v13070_v40  ;;  %v6322_v33 = vadd.f32 %v6321_v30, %v6209_v16  ;;  %v6212_v44 = vpop.f32.mrf.mxu1  ;;  %v13080_v30 = vld [vmem:[#allocation42_spill] sm:$0xff] }
 0xb20   : > { %v6323_v54 = vpop.f32.mrf.mxu0  ;;  %v6213_v46 = vadd.f32 %v6212_v44, %v12448_v25 }
 0xb21   : > { %6430 = vst [vmem:[%s12456_s25] sm:$0xff] %v6398_v12  ;;  %v6399_v21 = vadd.f32 %v6322_v33, %v13071_v45  ;;  %v6324_v34 = vadd.f32 %v6323_v54, %v6211_v58  ;;  %v13081_v54 = vld [vmem:[#allocation43_spill] sm:$0xff] }
 0xb22   : > { %v6325_v37 = vpop.f32.mrf.mxu0 }
 0xb23   : > { %6431 = vst [vmem:[%s12456_s25 + $0x8] sm:$0xff] %v6399_v21  ;;  %v6400_v57 = vadd.f32 %v6324_v34, %v13072_v13  ;;  %v6326_v0 = vadd.f32 %v6325_v37, %v6213_v46  ;;  %v13082_v13 = vld [vmem:[#allocation44_spill] sm:$0xff] }
 0xb25   : > { %6432 = vst [vmem:[%s12456_s25 + $0x10] sm:$0xff] %v6400_v57  ;;  %v6401_v24 = vadd.f32 %v6326_v0, %v13073_v9 }
 0xb27   : > { %6433 = vst [vmem:[%s12456_s25 + $0x18] sm:$0xff] %v6401_v24 }
 0xb2a   : > { %v6216_v52 = vpop.f32.mrf.mxu1 }
 0xb2b   : > { %v6217_v59 = vadd.f32 %v6216_v52, %v12445_v3 }
 0xb2c   : > { %v6218_v31 = vpop.f32.mrf.mxu1 }
 0xb2d   : > { %v6219_v49 = vadd.f32 %v6218_v31, %v12448_v25 }
 0xb2e   : > { %v6329_v62 = vpop.f32.mrf.mxu0  ;;  %v6220_v39 = vpop.f32.mrf.mxu1 }
 0xb2f   : > { %v6330_v14 = vadd.f32 %v6329_v62, %v6217_v59  ;;  %v6221_v47 = vadd.f32 %v6220_v39, %v12445_v3  ;;  %v13083_v59 = vld [vmem:[#allocation45_spill] sm:$0xff]  ;;  %v13084_v39 = vld [vmem:[#allocation46_spill] sm:$0xff] }
 0xb30   : > { %v6331_v23 = vpop.f32.mrf.mxu0  ;;  %v6222_v22 = vpop.f32.mrf.mxu1 }
 0xb31   : > { %v6402_v36 = vadd.f32 %v6330_v14, %v13074_v5  ;;  %v6332_v15 = vadd.f32 %v6331_v23, %v6219_v49  ;;  %v6223_v48 = vadd.f32 %v6222_v22, %v12448_v25 }
 0xb32   : > { %v6333_v10 = vpop.f32.mrf.mxu0  ;;  %v6226_v11 = vpop.f32.mrf.mxu1 }
 0xb33   : > { %6434 = vst [vmem:[%s12456_s25 + $0x20] sm:$0xff] %v6402_v36  ;;  %v6403_v63 = vadd.f32 %v6332_v15, %v13075_v53  ;;  %v6334_v28 = vadd.f32 %v6333_v10, %v6221_v47  ;;  %v6227_v17 = vadd.f32 %v6226_v11, %v12445_v3  ;;  %v13085_v36 = vld [vmem:[#allocation47_spill] sm:$0xff] }
 0xb34   : > { %v6335_v6 = vpop.f32.mrf.mxu0  ;;  %v6228_v61 = vpop.f32.mrf.mxu1 }
 0xb35   : > { %6435 = vst [vmem:[%s12456_s25 + $0x28] sm:$0xff] %v6403_v63  ;;  %v6404_v41 = vadd.f32 %v6334_v28, %v13076_v4  ;;  %v6336_v56 = vadd.f32 %v6335_v6, %v6223_v48  ;;  %v6229_v35 = vadd.f32 %v6228_v61, %v12448_v25 }
 0xb36   : > { %v6339_v20 = vpop.f32.mrf.mxu0  ;;  %v6230_v60 = vpop.f32.mrf.mxu1 }
 0xb37   : > { %6436 = vst [vmem:[%s12456_s25 + $0x30] sm:$0xff] %v6404_v41  ;;  %v6405_v26 = vadd.f32 %v6336_v56, %v13077_v2  ;;  %v6340_v7 = vadd.f32 %v6339_v20, %v6227_v17  ;;  %v6231_v38 = vadd.f32 %v6230_v60, %v12445_v3 }
 0xb38   : > { %v6341_v55 = vpop.f32.mrf.mxu0  ;;  %v6232_v8 = vpop.f32.mrf.mxu1 }
 0xb39   : > { %6437 = vst [vmem:[%s12456_s25 + $0x38] sm:$0xff] %v6405_v26  ;;  %v6406_v18 = vadd.f32 %v6340_v7, %v13078_v29  ;;  %v6342_v27 = vadd.f32 %v6341_v55, %v6229_v35  ;;  %v6233_v51 = vadd.f32 %v6232_v8, %v12448_v25 }
 0xb3a   : > { %v6343_v50 = vpop.f32.mrf.mxu0 }
 0xb3b   : > { %6438 = vst [vmem:[%s12456_s25 + $0x40] sm:$0xff] %v6406_v18  ;;  %v6407_v43 = vadd.f32 %v6342_v27, %v13079_v42  ;;  %v6344_v32 = vadd.f32 %v6343_v50, %v6231_v38  ;;  %v6236_v16 = vpop.f32.mrf.mxu1  ;;  %v13086_v38 = vld [vmem:[#allocation48_spill] sm:$0xff]  ;;  %v13087_v50 = vld [vmem:[#allocation49_spill] sm:$0xff] }
 0xb3c   : > { %v6345_v19 = vpop.f32.mrf.mxu0  ;;  %v6237_v1 = vadd.f32 %v6236_v16, %v12445_v3  ;;  %v13088_v16 = vld [vmem:[#allocation50_spill] sm:$0xff] }
 0xb3d   : > { %6439 = vst [vmem:[%s12456_s25 + $0x48] sm:$0xff] %v6407_v43  ;;  %v6408_v58 = vadd.f32 %v6344_v32, %v13080_v30  ;;  %v6346_v40 = vadd.f32 %v6345_v19, %v6233_v51  ;;  %v6238_v12 = vpop.f32.mrf.mxu1 }
 0xb3e   : > { %v6349_v33 = vpop.f32.mrf.mxu0  ;;  %v6239_v44 = vadd.f32 %v6238_v12, %v12448_v25 }
 0xb3f   : > { %6440 = vst [vmem:[%s12456_s25 + $0x50] sm:$0xff] %v6408_v58  ;;  %v6409_v46 = vadd.f32 %v6346_v40, %v13081_v54  ;;  %v6350_v45 = vadd.f32 %v6349_v33, %v6237_v1  ;;  %v6240_v21 = vpop.f32.mrf.mxu1  ;;  %v13089_v40 = vld [vmem:[#allocation51_spill] sm:$0xff] }
 0xb40   : > { %v6351_v34 = vpop.f32.mrf.mxu0  ;;  %v6241_v37 = vadd.f32 %v6240_v21, %v12445_v3 }
 0xb41   : > { %6441 = vst [vmem:[%s12456_s25 + $0x58] sm:$0xff] %v6409_v46  ;;  %v6410_v57 = vadd.f32 %v6350_v45, %v13082_v13  ;;  %v6352_v0 = vadd.f32 %v6351_v34, %v6239_v44  ;;  %v6242_v9 = vpop.f32.mrf.mxu1  ;;  %v13090_v46 = vld [vmem:[#allocation52_spill] sm:$0xff]  ;;  %v13091_v13 = vld [vmem:[#allocation53_spill] sm:$0xff] }
 0xb42   : > { %v6353_v24 = vpop.f32.mrf.mxu0  ;;  %v6243_v52 = vadd.f32 %v6242_v9, %v12448_v25 }
 0xb43   : > { %6442 = vst [vmem:[%s12456_s25 + $0x60] sm:$0xff] %v6410_v57  ;;  %v6411_v31 = vadd.f32 %v6352_v0, %v13083_v59  ;;  %v6354_v62 = vadd.f32 %v6353_v24, %v6241_v37  ;;  %v6246_v49 = vpop.f32.mrf.mxu1 }
 0xb44   : > { %v6355_v14 = vpop.f32.mrf.mxu0  ;;  %v6247_v35 = vadd.f32 %v6246_v49, %v12445_v3 }
 0xb45   : > { %6443 = vst [vmem:[%s12456_s25 + $0x68] sm:$0xff] %v6411_v31  ;;  %v6412_v23 = vadd.f32 %v6354_v62, %v13084_v39  ;;  %v6356_v47 = vadd.f32 %v6355_v14, %v6243_v52  ;;  %v6248_v5 = vpop.f32.mrf.mxu1  ;;  %v13092_v52 = vld [vmem:[#allocation54_spill] sm:$0xff]  ;;  %v13093_v14 = vld [vmem:[#allocation55_spill] sm:$0xff] }
 0xb46   : > { %v6249_v26 = vadd.f32 %v6248_v5, %v12448_v25 }
 0xb47   : > { %6444 = vst [vmem:[%s12456_s25 + $0x70] sm:$0xff] %v6412_v23  ;;  %v6413_v15 = vadd.f32 %v6356_v47, %v13085_v36  ;;  %v6250_v22 = vpop.f32.mrf.mxu1  ;;  %v13094_v36 = vld [vmem:[#allocation56_spill] sm:$0xff] }
 0xb48   : > { %v6251_v55 = vadd.f32 %v6250_v22, %v12445_v3 }
 0xb49   : > { %6445 = vst [vmem:[%s12456_s25 + $0x78] sm:$0xff] %v6413_v15  ;;  %v6252_v10 = vpop.f32.mrf.mxu1 }
 0xb4a   : > { %v6253_v8 = vadd.f32 %v6252_v10, %v12448_v25 }
 0xb4b   : > { %v6256_v48 = vpop.f32.mrf.mxu1 }
 0xb4c   : > { %v6257_v32 = vadd.f32 %v6256_v48, %v12445_v3 }
 0xb4d   : > { %v6258_v53 = vpop.f32.mrf.mxu1 }
 0xb4e   : > { %v6259_v58 = vadd.f32 %v6258_v53, %v12448_v25  ;;  %v13095_v53 = vld [vmem:[#allocation57_spill] sm:$0xff] }
 0xb4f   : > { %v6260_v63 = vpop.f32.mrf.mxu1 }
 0xb50   : > { %v6261_v54 = vadd.f32 %v6260_v63, %v12445_v3 }
 0xb51   : > { %v6262_v28 = vpop.f32.mrf.mxu1 }
 0xb52   : > { %v6263_v37 = vadd.f32 %v6262_v28, %v12448_v25 }
 0xb53   : > { %v6266_v11 = vpop.f32.mrf.mxu1 }
 0xb54   : > { %v6267_v24 = vadd.f32 %v6266_v11, %v12445_v3 }
 0xb55   : > { %v6268_v6 = vpop.f32.mrf.mxu1 }
 0xb56   : > { %v6269_v49 = vadd.f32 %v6268_v6, %v12448_v25 }
 0xb57   : > { %v6270_v17 = vpop.f32.mrf.mxu1 }
 0xb58   : > { %v6271_v5 = vadd.f32 %v6270_v17, %v12445_v3 }
 0xb59   : > { %v6272_v4 = vpop.f32.mrf.mxu1 }
 0xb5a   : > { %v6273_v48 = vadd.f32 %v6272_v4, %v12448_v25  ;;  %v13097_v4 = vld [vmem:[#allocation59_spill] sm:$0xff] }
 0xb5b   : > { %v6276_v41 = vpop.f32.mrf.mxu1 }
 0xb5c   : > { %v6277_v6 = vadd.f32 %v6276_v41, %v12445_v3  ;;  %v13098_v41 = vld [vmem:[#allocation60_spill] sm:$0xff] }
 0xb5d   : > { %v6278_v56 = vpop.f32.mrf.mxu1 }
 0xb5f   : > { %v12501_v61 = vpop.f32.mrf.mxu1 }
 0xb61   : > { %v12503_v20 = vpop.f32.mrf.mxu1 }
 0xb63   : > { %v6359_v2 = vpop.f32.mrf.mxu1 }
 0xb64   : > { %v6360_v7 = vadd.f32 %v6359_v2, %v6247_v35  ;;  %v13096_v35 = vld [vmem:[#allocation58_spill] sm:$0xff] }
 0xb65   : > { %v6361_v60 = vpop.f32.mrf.mxu1 }
 0xb66   : > { %v6414_v29 = vadd.f32 %v6360_v7, %v13086_v38  ;;  %v6362_v18 = vadd.f32 %v6361_v60, %v6249_v26  ;;  %v6279_v7 = vadd.f32 %v6278_v56, %v12448_v25  ;;  %v6283_v56 = vadd.f32 %v12503_v20, %v12448_v25  ;;  %v13102_v25 = vld [vmem:[#allocation63_spill] sm:$0xff] }
 0xb67   : > { %v6363_v27 = vpop.f32.mrf.mxu1 }
 0xb68   : > { %6446 = vst [vmem:[%s12456_s25 + $0x80] sm:$0xff] %v6414_v29  ;;  %v6415_v51 = vadd.f32 %v6362_v18, %v13087_v50  ;;  %v6364_v42 = vadd.f32 %v6363_v27, %v6251_v55  ;;  %v6281_v29 = vadd.f32 %v12501_v61, %v12445_v3  ;;  %v13099_v50 = vld [vmem:[#allocation61_spill] sm:$0xff]  ;;  %v13100_v3 = vld [vmem:[#allocation62_spill] sm:$0xff] }
 0xb69   : > { %v6365_v43 = vpop.f32.mrf.mxu1 }
 0xb6a   : > { %6447 = vst [vmem:[%s12456_s25 + $0x88] sm:$0xff] %v6415_v51  ;;  %v6416_v19 = vadd.f32 %v6364_v42, %v13088_v16  ;;  %v6366_v1 = vadd.f32 %v6365_v43, %v6253_v8 }
 0xb6b   : > { %v6369_v30 = vpop.f32.mrf.mxu1 }
 0xb6c   : > { %6448 = vst [vmem:[%s12456_s25 + $0x90] sm:$0xff] %v6416_v19  ;;  %v6417_v12 = vadd.f32 %v6366_v1, %v13089_v40  ;;  %v6370_v33 = vadd.f32 %v6369_v30, %v6257_v32 }
 0xb6d   : > { %v6371_v44 = vpop.f32.mrf.mxu1 }
 0xb6e   : > { %6449 = vst [vmem:[%s12456_s25 + $0x98] sm:$0xff] %v6417_v12  ;;  %v6418_v45 = vadd.f32 %v6370_v33, %v13090_v46  ;;  %v6372_v21 = vadd.f32 %v6371_v44, %v6259_v58 }
 0xb6f   : > { %v6373_v34 = vpop.f32.mrf.mxu1 }
 0xb70   : > { %6450 = vst [vmem:[%s12456_s25 + $0xa0] sm:$0xff] %v6418_v45  ;;  %v6419_v57 = vadd.f32 %v6372_v21, %v13091_v13  ;;  %v6374_v0 = vadd.f32 %v6373_v34, %v6261_v54 }
 0xb71   : > { %v6375_v9 = vpop.f32.mrf.mxu1 }
 0xb72   : > { %6451 = vst [vmem:[%s12456_s25 + $0xa8] sm:$0xff] %v6419_v57  ;;  %v6420_v59 = vadd.f32 %v6374_v0, %v13092_v52  ;;  %v6376_v31 = vadd.f32 %v6375_v9, %v6263_v37 }
 0xb73   : > { %v6379_v62 = vpop.f32.mrf.mxu1 }
 0xb74   : > { %6452 = vst [vmem:[%s12456_s25 + $0xb0] sm:$0xff] %v6420_v59  ;;  %v6421_v39 = vadd.f32 %v6376_v31, %v13093_v14  ;;  %v6380_v23 = vadd.f32 %v6379_v62, %v6267_v24 }
 0xb75   : > { %v6381_v47 = vpop.f32.mrf.mxu1 }
 0xb76   : > { %6453 = vst [vmem:[%s12456_s25 + $0xb8] sm:$0xff] %v6421_v39  ;;  %v6422_v15 = vadd.f32 %v6380_v23, %v13094_v36  ;;  %v6382_v22 = vadd.f32 %v6381_v47, %v6269_v49 }
 0xb77   : > { %v6383_v10 = vpop.f32.mrf.mxu1 }
 0xb78   : > { %6454 = vst [vmem:[%s12456_s25 + $0xc0] sm:$0xff] %v6422_v15  ;;  %v6423_v63 = vadd.f32 %v6382_v22, %v13095_v53  ;;  %v6384_v28 = vadd.f32 %v6383_v10, %v6271_v5 }
 0xb79   : > { %v6385_v11 = vpop.f32.mrf.mxu1 }
 0xb7a   : > { %6455 = vst [vmem:[%s12456_s25 + $0xc8] sm:$0xff] %v6423_v63  ;;  %v6424_v17 = vadd.f32 %v6384_v28, %v13096_v35  ;;  %v6386_v2 = vadd.f32 %v6385_v11, %v6273_v48 }
 0xb7b   : > { %v6389_v26 = vpop.f32.mrf.mxu1 }
 0xb7c   : > { %6456 = vst [vmem:[%s12456_s25 + $0xd0] sm:$0xff] %v6424_v17  ;;  %v6425_v60 = vadd.f32 %v6386_v2, %v13097_v4  ;;  %v6390_v55 = vadd.f32 %v6389_v26, %v6277_v6 }
 0xb7d   : > { %v6391_v38 = vpop.f32.mrf.mxu1 }
 0xb7e   : > { %6457 = vst [vmem:[%s12456_s25 + $0xd8] sm:$0xff] %v6425_v60  ;;  %v6426_v18 = vadd.f32 %v6390_v55, %v13098_v41  ;;  %v6392_v27 = vadd.f32 %v6391_v38, %v6279_v7 }
 0xb7f   : > { %v6393_v8 = vpop.f32.mrf.mxu1 }
 0xb80   : > { %6458 = vst [vmem:[%s12456_s25 + $0xe0] sm:$0xff] %v6426_v18  ;;  %v6427_v51 = vadd.f32 %v6392_v27, %v13099_v50  ;;  %v6394_v42 = vadd.f32 %v6393_v8, %v6281_v29 }
 0xb81   : > { %v6395_v43 = vpop.f32.mrf.mxu1 }
 0xb82   : > { %6459 = vst [vmem:[%s12456_s25 + $0xe8] sm:$0xff] %v6427_v51  ;;  %v6428_v61 = vadd.f32 %v6394_v42, %v13100_v3  ;;  %v6396_v32 = vadd.f32 %v6395_v43, %v6283_v56 }
 0xb84   : > { %6460 = vst [vmem:[%s12456_s25 + $0xf0] sm:$0xff] %v6428_v61  ;;  %v6429_v20 = vadd.f32 %v6396_v32, %v13102_v25 }
 0xb86   : > { %6461 = vst [vmem:[%s12456_s25 + $0xf8] sm:$0xff] %v6429_v20 }
 0xb87   : > { %8400 = shalt.err (!%p8397_p4)
}
 0xb88   : > { %s8401_s17 = scalar_lea.hbm %s12557_s21, 4096  ;;  %s8405_s23 = scalar_lea.hbm %s13101_s28, 8192 }
 0xb89   : > { %p8402_p2 = scmp.ne.s32.totalorder %s12557_s21, %s8401_s17  ;;  %p8406_p9 = scmp.lt.s32.totalorder %s12557_s21, %s13101_s28 }
 0xb8a   : > { %p8407_p6 = scmp.lt.s32.totalorder %s8405_s23, %s8401_s17 }
 0xb8b   : > { %p8403_p5 = pnand %p8402_p2, %p13103_p3 }
 0xb8c   : > { %p8408_p13 = por %p8407_p6, %p8406_p9 }
 0xb8d   : > { %p8404_p8 = pneg %p8403_p5 }
 0xb8f   : > { %p8409_p1 = pnand %p8408_p13, %p8404_p8 }
 0xb91   : > { %8412 = shalt.err (!%p8409_p1)
}
 0xb92   : > { %s8489_s12 = smov 256   ;;  %s8490_s29 = smov 16  }
 0xb93   : > { %7186 = dma.vmem_to_hbm [thread:$0]  (%p13103_p3), %s12559_s15, 4096, %s12557_s21, %s6463_s19, %s8489_s12, %s8489_s12, %s8490_s29  }
 0xb94 PF: > { %s13104_s25 = sld [smem:[#allocation24_spill]]  ;;  %p13107_p11 = scmp.ge.s32.totalorder %s8471_s16, 2 }
 0xb95   : > { %s13105_s2 = sld [smem:[#allocation28_spill]] }
 0xb9a   : > { %s6491_s24 = sand.u32 1, %s13104_s25  }
 0xb9b   : > { %p13106_p10 = scmp.ne.s32.totalorder %s13105_s2, 0  ;;  %s6492_s20 = scalar_lea.sflag [#allocation4], %s6491_s24 }
 0xb9d   : > { %p7215_p0 = pnand %p13107_p11, %p13106_p10 }
 0xb9f   : > { %p7216_p7 = pneg %p7215_p0 }
 0xba1   : > { %8454 = dma.done.wait (%p7216_p7), %s6492_s20, 4096  }
 0xba2   : > { %8456 = vsyncadd (%p7216_p7), %s6492_s20, 4294963200  ;;  %s13108_s16 = sld [smem:[#allocation26_spill]]  ;;  %s13111_s29 = smov %s8463_s30 }
 0xba3   : > { %s13109_s22 = sld [smem:[#allocation25_spill]] }
 0xba4   : > { %s13110_s15 = sld [smem:[#allocation27_spill]] }
 0xba8   : > { %p33_p12 = scmp.ge.s32.totalorder %s13108_s16, 4  }
 0xba9   : > { %s13112_s30 = smov %s13109_s22 }
 0xbaa   :  { %35 = sbr.rel (!%p33_p12) target bundleno = 19 (0x13), region = 159 }
 0xbaf   :  { %6497 = vsyncpa [#allocation3], 1 }
 0xbb0   :  { %6499 = vsyncpa [#allocation3 + $0x1], 1 }
 0xbb1   :  { %6500 = vsyncpa [#allocation6], 1 }
 0xbb2   :  { %6502 = vsyncpa [#allocation6 + $0x1], 1 }
 0xbb3   :  { %6503 = vsyncpa [#allocation9], 1 }
 0xbb4   :  { %6504 = vsyncpa [#allocation12], 1 }
 0xbb5   :  { %6505 = vsyncpa [#allocation15], 1 }
 0xbb6   :  { %6506 = vsyncpa [#allocation4], 1 }
 0xbb7   :  { %6508 = vsyncpa [#allocation4 + $0x1], 1 }

</bundles_post_ra>
